<compile_context>
chip_gen: v6e
topology: v6e:2x2x1
jax: 0.10.0
libtpu: 0.0.40
codegen_flags: <defaults>
</compile_context>

<pallas_src>
import math
import functools

import jax
import jax.numpy as jnp
from jax.experimental import pallas as pl
from jax.experimental.pallas import tpu as pltpu

LANE = 128


def _round_up(v, m):
    return (v + m - 1) // m * m


# -----------------------------------------------------------------------------
# Fused kernel: IDWT 2x upsample -> StyledConv2d#1 -> StyledConv2d#2 -> to_img.
# Per grid step (one batch element), everything stays in VMEM:
#   x_ref  : (1, h, w, 4*Cinp)     bf16 wavelet bands [ll | lh | hl | hh]
#   wX_ref : (1, k*k*Cinp, Coutp)  bf16 per-sample weights (style+demod folded)
#   bX_ref : (1, 1, Coutp)         f32 bias
#   nzX_ref: (1, h, w, 4)          f32 phase-decomposed noise (pre-scaled)
#   hid_ref: (1, h, 2, w, 2*C2p) f32, img_ref: (1, h, 2, w, 2*C3p) f32
# -----------------------------------------------------------------------------
def _fused_block_kernel(*refs, k, cp_in, has_n1, has_n2):
    x_ref, w1_ref, w2_ref, w3_ref, b1_ref, b2_ref, b3_ref = refs[:7]
    idx = 7
    nz1_ref = refs[idx] if has_n1 else None
    idx += int(has_n1)
    nz2_ref = refs[idx] if has_n2 else None
    idx += int(has_n2)
    hid_ref, img_ref = refs[idx], refs[idx + 1]

    _, h, w, _ = x_ref.shape
    c2p = w1_ref.shape[-1]
    c3p = w3_ref.shape[-1]
    cdt = x_ref.dtype                    # MXU / activation stream dtype (bf16)
    pad = k // 2
    sqrt2 = math.sqrt(2.0)

    # ---- IDWT (inverse Haar): bands -> the four phase planes of the 2x image ----
    bands = x_ref[0].astype(jnp.float32)                       # (h, w, 4*cp_in)
    ll = bands[:, :, 0 * cp_in:1 * cp_in]
    lh = bands[:, :, 1 * cp_in:2 * cp_in]
    hl = bands[:, :, 2 * cp_in:3 * cp_in]
    hh = bands[:, :, 3 * cp_in:4 * cp_in]
    # TODO(synk): band order / sign convention of pytorch_wavelets DWTInverse
    # (wave="db1", mode="zero") may differ by a fixed permutation / sign flip.
    planes0 = [0.5 * (ll + lh + hl + hh),        # fine pixel (2i,   2j)
               0.5 * (ll - lh + hl - hh),        # fine pixel (2i,   2j+1)
               0.5 * (ll + lh - hl - hh),        # fine pixel (2i+1, 2j)
               0.5 * (ll - lh - hl + hh)]        # fine pixel (2i+1, 2j+1)

    def pad_stack(planes):
        """[p0,p1,p2,p3] each (h, w, c) -> (4, h+2p, w+2p, c) bf16 zero halo."""
        c = planes[0].shape[-1]
        p4 = jnp.stack([p.astype(cdt) for p in planes], axis=0)
        zr = jnp.zeros((4, pad, w, c), cdt)
        p4 = jnp.concatenate([zr, p4, zr], axis=1)
        zc = jnp.zeros((4, h + 2 * pad, pad, c), cdt)
        p4 = jnp.concatenate([zc, p4, zc], axis=2)
        return p4

    def phase_conv(p4, w_mat):
        """Fine-grid kxk conv (stride 1, zero pad) on the phase-decomposed 2x
        image.  p4: (4, h+2p, w+2p, cin) bf16; w_mat: (k*k*cin, cout) bf16.
        Returns (4, h, w, cout) f32 where plane p = 2*r + s holds fine output
        pixels (2i+r, 2j+s).  Single im2col matmul on the MXU."""
        cin = p4.shape[-1]
        cols_all = []
        for r in (0, 1):
            for s in (0, 1):
                taps = []
                for kh in range(k):
                    a = r + kh - pad
                    pr, sr = a % 2, a // 2          # input row-phase / coarse shift
                    for kw in range(k):
                        bcol = s + kw - pad
                        pc, sc = bcol % 2, bcol // 2
                        taps.append(
                            p4[2 * pr + pc,
                               pad + sr:pad + sr + h,
                               pad + sc:pad + sc + w, :])
                cols_all.append(jnp.concatenate(taps, axis=-1))   # (h, w, k*k*cin)
        cols = jnp.stack(cols_all, axis=0).reshape(4 * h * w, k * k * cin)
        out = jnp.dot(cols, w_mat, preferred_element_type=jnp.float32)
        return out.reshape(4, h, w, -1)

    def noise_bias_act(y4, b_ref, nz):
        """NoiseInjection + FusedLeakyReLU (sqrt(2)*leaky_relu(v+bias, 0.2)),
        all in f32.  y4: (4, h, w, c); nz: (h, w, 4) or None."""
        outs = []
        for p in range(4):
            v = y4[p]
            if nz is not None:
                v = v + nz[:, :, p:p + 1]                 # (h, w, 1) broadcast
            v = v + b_ref[...]                            # (1, 1, c) broadcast
            outs.append(jnp.where(v >= 0.0, v, 0.2 * v) * sqrt2)
        return outs

    nz1 = nz1_ref[0] if has_n1 else None
    nz2 = nz2_ref[0] if has_n2 else None

    # ---- StyledConv2d #1: modconv(3x3, demod) + noise + FusedLeakyReLU ----
    y1 = phase_conv(pad_stack(planes0), w1_ref[0])
    planes1 = noise_bias_act(y1, b1_ref, nz1)

    # ---- StyledConv2d #2 ----
    y2 = phase_conv(pad_stack(planes1), w2_ref[0])
    planes2 = noise_bias_act(y2, b2_ref, nz2)

    # ---- hidden output in (h, 2, w, 2*c2p) channel-concat phase layout ----
    hdt = hid_ref.dtype
    hid_ref[0, :, 0, :, :] = jnp.concatenate(
        [planes2[0], planes2[1]], axis=-1).astype(hdt)
    hid_ref[0, :, 1, :, :] = jnp.concatenate(
        [planes2[2], planes2[3]], axis=-1).astype(hdt)

    # ---- MultichannelImage: 1x1 modconv (no demod) + bias, no activation ----
    y2s = jnp.stack(planes2, axis=0).astype(cdt).reshape(4 * h * w, c2p)
    img = jnp.dot(y2s, w3_ref[0], preferred_element_type=jnp.float32)
    img = img.reshape(4, h, w, c3p) + b3_ref[...]
    idt = img_ref.dtype
    img_ref[0, :, 0, :, :] = jnp.concatenate([img[0], img[1]], axis=-1).astype(idt)
    img_ref[0, :, 1, :, :] = jnp.concatenate([img[2], img[3]], axis=-1).astype(idt)


# -----------------------------------------------------------------------------
# Wrapper-side (f32) folding of EqualLinear style + demodulation into weights.
# -----------------------------------------------------------------------------
def _equal_linear(style, weight, bias):
    # EqualLinear (lr_mul=1): y = style @ (W / sqrt(in_features)).T + bias
    return style @ (weight / math.sqrt(weight.shape[1])).T + bias


def _per_sample_weight_mat(wgt, s, *, demodulate, cin_p, cout_p, dtype):
    """wgt: (Cout, Cin, K, K) f32, s: (N, Cin) f32 ->
    (N, K*K*Cin_p, Cout_p) matmul weight; row index = (kh*K + kw)*Cin_p + ci."""
    cout, cin, k, _ = wgt.shape
    scale = 1.0 / math.sqrt(cin * k * k)
    w = scale * wgt[None] * s[:, None, :, None, None]             # (N,Cout,Cin,K,K)
    if demodulate:
        d = jax.lax.rsqrt(jnp.sum(w * w, axis=(2, 3, 4)) + 1e-8)  # (N, Cout) f32
        w = w * d[:, :, None, None, None]
    w = jnp.transpose(w, (0, 3, 4, 2, 1))                         # (N,K,K,Cin,Cout)
    w = jnp.pad(w, ((0, 0), (0, 0), (0, 0),
                    (0, cin_p - cin), (0, cout_p - cout)))
    return w.reshape(w.shape[0], k * k * cin_p, cout_p).astype(dtype)


def _pad_bias(b, cp):
    return jnp.pad(b, (0, cp - b.shape[0])).reshape(1, 1, cp).astype(jnp.float32)


def _phase_noise(nz, weight):
    # nz: (N, 2h, 2w, 1) f32 -> (N, h, w, 4), channel index = 2*r + s,
    # pre-scaled by the NoiseInjection scalar weight.
    ph = jnp.stack([nz[:, r::2, s::2, 0] for r in (0, 1) for s in (0, 1)],
                   axis=-1)
    return (ph * weight).astype(jnp.float32)


# -----------------------------------------------------------------------------
# MobileSynthesisBlock forward.
# -----------------------------------------------------------------------------
def mobile_synthesis_block(hidden_nchw, style, params, noise=(None, None)):
    """hidden: (N, Cin, H, W) NCHW; style: (N, style_dim);
    noise: optional pair of (N, 2H, 2W, 1) maps.
    Returns (hidden_out (N, Cout, 2H, 2W), img (N, 12, 2H, 2W)) in NCHW."""
    n, c4, h, w = hidden_nchw.shape
    c = c4 // 4

    p1, p2, p3 = params["conv1"], params["conv2"], params["to_img"]
    cout = p1["weight"].shape[0]
    cimg = p3["weight"].shape[0]
    k = p1["weight"].shape[-1]

    c1p = _round_up(c, LANE)
    c2p = _round_up(cout, LANE)
    c3p = _round_up(cimg, LANE)
    cdt = jnp.bfloat16                 # MXU / activation-stream dtype

    # ---- NCHW -> band-major lane layout (N, h, w, 4*c1p), zero-padded channels ----
    low = hidden_nchw[:, :c]                                    # (N, C, H, W)
    high = hidden_nchw[:, c:].reshape(n, c, 3, h, w)            # (N, C, 3, H, W)
    bands = jnp.stack([low, high[:, :, 0], high[:, :, 1], high[:, :, 2]],
                      axis=1)                                   # (N, 4, C, H, W)
    bands = jnp.pad(bands, ((0, 0), (0, 0), (0, c1p - c), (0, 0), (0, 0)))
    bands = bands.transpose(0, 3, 4, 1, 2).reshape(n, h, w, 4 * c1p).astype(cdt)

    # ---- fold style + demod into per-sample weights (f32 math, bf16 store) ----
    s1 = _equal_linear(style, p1["mod_weight"], p1["mod_bias"])
    s2 = _equal_linear(style, p2["mod_weight"], p2["mod_bias"])
    s3 = _equal_linear(style, p3["mod_weight"], p3["mod_bias"])
    w1 = _per_sample_weight_mat(p1["weight"], s1, demodulate=True,
                                cin_p=c1p, cout_p=c2p, dtype=cdt)
    w2 = _per_sample_weight_mat(p2["weight"], s2, demodulate=True,
                                cin_p=c2p, cout_p=c2p, dtype=cdt)
    w3 = _per_sample_weight_mat(p3["weight"], s3, demodulate=False,
                                cin_p=c2p, cout_p=c3p, dtype=cdt)
    b1 = _pad_bias(p1["bias"], c2p)
    b2 = _pad_bias(p2["bias"], c2p)
    b3 = _pad_bias(p3["bias"], c3p)

    n1, n2 = noise
    has_n1, has_n2 = n1 is not None, n2 is not None
    # TODO(synk): PyTorch NoiseInjection draws fresh randn noise when noise is
    # None; here None simply skips the noise add (weight is 0 at init anyway).

    inputs = [bands, w1, w2, w3, b1, b2, b3]
    in_specs = [
        pl.BlockSpec((1, h, w, 4 * c1p), lambda b: (b, 0, 0, 0)),
        pl.BlockSpec((1, k * k * c1p, c2p), lambda b: (b, 0, 0)),
        pl.BlockSpec((1, k * k * c2p, c2p), lambda b: (b, 0, 0)),
        pl.BlockSpec((1, c2p, c3p), lambda b: (b, 0, 0)),
        pl.BlockSpec((1, 1, c2p), lambda b: (0, 0, 0)),
        pl.BlockSpec((1, 1, c2p), lambda b: (0, 0, 0)),
        pl.BlockSpec((1, 1, c3p), lambda b: (0, 0, 0)),
    ]
    if has_n1:   # NoiseInjection weight pre-folded into the phase-noise map
        inputs.append(_phase_noise(n1, params["noise_weight1"]))
        in_specs.append(pl.BlockSpec((1, h, w, 4), lambda b: (b, 0, 0, 0)))
    if has_n2:
        inputs.append(_phase_noise(n2, params["noise_weight2"]))
        in_specs.append(pl.BlockSpec((1, h, w, 4), lambda b: (b, 0, 0, 0)))

    kern = functools.partial(_fused_block_kernel, k=k, cp_in=c1p,
                             has_n1=has_n1, has_n2=has_n2)

    # TODO(synk): at production resolutions, add a spatial (row) grid axis with
    # a k-1 halo (recomputed border rows) so per-step VMEM stays bounded.
    hid, img = pl.pallas_call(
        kern,
        out_shape=(jax.ShapeDtypeStruct((n, h, 2, w, 2 * c2p), jnp.float32),
                   jax.ShapeDtypeStruct((n, h, 2, w, 2 * c3p), jnp.float32)),
        grid=(n,),
        in_specs=in_specs,
        out_specs=(pl.BlockSpec((1, h, 2, w, 2 * c2p),
                                lambda b: (b, 0, 0, 0, 0)),
                   pl.BlockSpec((1, h, 2, w, 2 * c3p),
                                lambda b: (b, 0, 0, 0, 0))),
        compiler_params=pltpu.CompilerParams(
            dimension_semantics=("parallel",),
            vmem_limit_bytes=64 * 1024 * 1024),
    )(*inputs)

    # (N, h, 2, w, 2*Cp) is row-major identical to (N, 2h, 2w, Cp): free reshape.
    hid = hid.reshape(n, 2 * h, 2 * w, c2p)[..., :cout]
    img = img.reshape(n, 2 * h, 2 * w, c3p)[..., :cimg]
    return hid.transpose(0, 3, 1, 2), img.transpose(0, 3, 1, 2)


def init_params(key, channels_in, channels_out, style_dim, kernel_size=3):
    cin4 = channels_in // 4
    ks = jax.random.split(key, 9)

    def conv_p(kw, km, kb, co, ci, ksz):
        return {
            "weight": jax.random.normal(kw, (co, ci, ksz, ksz), jnp.float32),
            "mod_weight": jax.random.normal(km, (ci, style_dim), jnp.float32),
            "mod_bias": jnp.ones((ci,), jnp.float32),      # EqualLinear bias_init=1
            "bias": 0.01 * jax.random.normal(kb, (co,), jnp.float32),
        }

    return {
        "conv1": conv_p(ks[0], ks[1], ks[2], channels_out, cin4, kernel_size),
        "conv2": conv_p(ks[3], ks[4], ks[5], channels_out, channels_out, kernel_size),
        "to_img": conv_p(ks[6], ks[7], ks[8], 12, channels_out, 1),
        # NoiseInjection scalar weights (PyTorch inits to 0; non-zero to exercise path)
        "noise_weight1": 0.1,
        "noise_weight2": 0.1,
    }


if __name__ == "__main__":
    N, CIN, COUT, SDIM, H, W = 2, 16, 8, 16, 8, 8

    key = jax.random.PRNGKey(0)
    k_in, k_style, k_par, k_n1, k_n2 = jax.random.split(key, 5)

    hidden = jax.random.normal(k_in, (N, CIN, H, W), jnp.float32)   # NCHW
    style = jax.random.normal(k_style, (N, SDIM), jnp.float32)
    params = init_params(k_par, CIN, COUT, SDIM, kernel_size=3)

    # Deterministic stand-ins for NoiseInjection's noise=None random maps (NHWC).
    noise1 = jax.random.normal(k_n1, (N, 2 * H, 2 * W, 1), jnp.float32)
    noise2 = jax.random.normal(k_n2, (N, 2 * H, 2 * W, 1), jnp.float32)

    fwd = jax.jit(mobile_synthesis_block)
    hidden_out, img = fwd(hidden, style, params, (noise1, noise2))
    jax.block_until_ready((hidden_out, img))

    assert hidden_out.shape == (N, COUT, 2 * H, 2 * W), hidden_out.shape
    assert img.shape == (N, 12, 2 * H, 2 * W), img.shape
    assert bool(jnp.all(jnp.isfinite(hidden_out))) and bool(jnp.all(jnp.isfinite(img)))
    print("KERNEL_OK")
</pallas_src>

<mosaic_0001>
module attributes {stable_mosaic.version = 11 : i64} {
  func.func @_fused_block_kernel(%arg0: i32, %arg1: memref<1x8x8x512xbf16, #tpu.memory_space<vmem>>, %arg2: memref<1x1152x128xbf16, #tpu.memory_space<vmem>>, %arg3: memref<1x1152x128xbf16, #tpu.memory_space<vmem>>, %arg4: memref<1x128x128xbf16, #tpu.memory_space<vmem>>, %arg5: memref<1x1x128xf32, #tpu.memory_space<vmem>>, %arg6: memref<1x1x128xf32, #tpu.memory_space<vmem>>, %arg7: memref<1x1x128xf32, #tpu.memory_space<vmem>>, %arg8: memref<1x8x8x4xf32, #tpu.memory_space<vmem>>, %arg9: memref<1x8x8x4xf32, #tpu.memory_space<vmem>>, %arg10: memref<1x8x2x8x256xf32, #tpu.memory_space<vmem>>, %arg11: memref<1x8x2x8x256xf32, #tpu.memory_space<vmem>>) attributes {dimension_semantics = [#tpu.dimension_semantics<parallel>], iteration_bounds = array<i64: 2>, scalar_prefetch = 0 : i64, scratch_operands = 0 : i64, tpu.core_type = #tpu.core_type<tc>, window_params = [{transform_indices = @transform_0, window_bounds = array<i64: 1, 8, 8, 512>}, {transform_indices = @transform_1, window_bounds = array<i64: 1, 1152, 128>}, {transform_indices = @transform_2, window_bounds = array<i64: 1, 1152, 128>}, {transform_indices = @transform_3, window_bounds = array<i64: 1, 128, 128>}, {pipeline_mode = #tpu.pipeline_mode<synchronous>, transform_indices = @transform_4, window_bounds = array<i64: 1, 1, 128>}, {pipeline_mode = #tpu.pipeline_mode<synchronous>, transform_indices = @transform_5, window_bounds = array<i64: 1, 1, 128>}, {pipeline_mode = #tpu.pipeline_mode<synchronous>, transform_indices = @transform_6, window_bounds = array<i64: 1, 1, 128>}, {transform_indices = @transform_7, window_bounds = array<i64: 1, 8, 8, 4>}, {transform_indices = @transform_8, window_bounds = array<i64: 1, 8, 8, 4>}, {transform_indices = @transform_9, window_bounds = array<i64: 1, 8, 2, 8, 256>}, {transform_indices = @transform_10, window_bounds = array<i64: 1, 8, 2, 8, 256>}]} {
    %c0 = arith.constant 0 : index
    %c0_0 = arith.constant 0 : index
    %c0_1 = arith.constant 0 : index
    %c0_2 = arith.constant 0 : index
    %0 = vector.load %arg1[%c0, %c0_0, %c0_1, %c0_2] : memref<1x8x8x512xbf16, #tpu.memory_space<vmem>>, vector<1x8x8x512xbf16>
    %1 = vector.shape_cast %0 : vector<1x8x8x512xbf16> to vector<8x8x512xbf16>
    %2 = arith.extf %1 : vector<8x8x512xbf16> to vector<8x8x512xf32>
    %3 = vector.extract_strided_slice %2 {offsets = [0, 0, 0], sizes = [8, 8, 128], strides = [1, 1, 1]} : vector<8x8x512xf32> to vector<8x8x128xf32>
    %4 = vector.extract_strided_slice %2 {offsets = [0, 0, 128], sizes = [8, 8, 128], strides = [1, 1, 1]} : vector<8x8x512xf32> to vector<8x8x128xf32>
    %5 = vector.extract_strided_slice %2 {offsets = [0, 0, 256], sizes = [8, 8, 128], strides = [1, 1, 1]} : vector<8x8x512xf32> to vector<8x8x128xf32>
    %6 = vector.extract_strided_slice %2 {offsets = [0, 0, 384], sizes = [8, 8, 128], strides = [1, 1, 1]} : vector<8x8x512xf32> to vector<8x8x128xf32>
    %7 = arith.addf %3, %4 : vector<8x8x128xf32>
    %8 = arith.addf %7, %5 : vector<8x8x128xf32>
    %9 = arith.addf %8, %6 : vector<8x8x128xf32>
    %cst = arith.constant 5.000000e-01 : f32
    %10 = vector.broadcast %cst : f32 to vector<8x8x128xf32>
    %11 = arith.mulf %10, %9 : vector<8x8x128xf32>
    %12 = arith.subf %3, %4 : vector<8x8x128xf32>
    %13 = arith.addf %12, %5 : vector<8x8x128xf32>
    %14 = arith.subf %13, %6 : vector<8x8x128xf32>
    %cst_3 = arith.constant 5.000000e-01 : f32
    %15 = vector.broadcast %cst_3 : f32 to vector<8x8x128xf32>
    %16 = arith.mulf %15, %14 : vector<8x8x128xf32>
    %17 = arith.addf %3, %4 : vector<8x8x128xf32>
    %18 = arith.subf %17, %5 : vector<8x8x128xf32>
    %19 = arith.subf %18, %6 : vector<8x8x128xf32>
    %cst_4 = arith.constant 5.000000e-01 : f32
    %20 = vector.broadcast %cst_4 : f32 to vector<8x8x128xf32>
    %21 = arith.mulf %20, %19 : vector<8x8x128xf32>
    %22 = arith.subf %3, %4 : vector<8x8x128xf32>
    %23 = arith.subf %22, %5 : vector<8x8x128xf32>
    %24 = arith.addf %23, %6 : vector<8x8x128xf32>
    %cst_5 = arith.constant 5.000000e-01 : f32
    %25 = vector.broadcast %cst_5 : f32 to vector<8x8x128xf32>
    %26 = arith.mulf %25, %24 : vector<8x8x128xf32>
    %c0_6 = arith.constant 0 : index
    %c0_7 = arith.constant 0 : index
    %c0_8 = arith.constant 0 : index
    %c0_9 = arith.constant 0 : index
    %27 = vector.load %arg8[%c0_6, %c0_7, %c0_8, %c0_9] : memref<1x8x8x4xf32, #tpu.memory_space<vmem>>, vector<1x8x8x4xf32>
    %28 = vector.shape_cast %27 : vector<1x8x8x4xf32> to vector<8x8x4xf32>
    %c0_10 = arith.constant 0 : index
    %c0_11 = arith.constant 0 : index
    %c0_12 = arith.constant 0 : index
    %c0_13 = arith.constant 0 : index
    %29 = vector.load %arg9[%c0_10, %c0_11, %c0_12, %c0_13] : memref<1x8x8x4xf32, #tpu.memory_space<vmem>>, vector<1x8x8x4xf32>
    %30 = vector.shape_cast %29 : vector<1x8x8x4xf32> to vector<8x8x4xf32>
    %31 = arith.truncf %11 : vector<8x8x128xf32> to vector<8x8x128xbf16>
    %32 = arith.truncf %16 : vector<8x8x128xf32> to vector<8x8x128xbf16>
    %33 = arith.truncf %21 : vector<8x8x128xf32> to vector<8x8x128xbf16>
    %34 = arith.truncf %26 : vector<8x8x128xf32> to vector<8x8x128xbf16>
    %35 = vector.shape_cast %31 : vector<8x8x128xbf16> to vector<1x8x8x128xbf16>
    %36 = vector.shape_cast %32 : vector<8x8x128xbf16> to vector<1x8x8x128xbf16>
    %37 = vector.shape_cast %33 : vector<8x8x128xbf16> to vector<1x8x8x128xbf16>
    %38 = vector.shape_cast %34 : vector<8x8x128xbf16> to vector<1x8x8x128xbf16>
    %39 = tpu.concatenate %35, %36, %37, %38 in 0 : vector<1x8x8x128xbf16>, vector<1x8x8x128xbf16>, vector<1x8x8x128xbf16>, vector<1x8x8x128xbf16> -> vector<4x8x8x128xbf16>
    %cst_14 = arith.constant 0.000000e+00 : bf16
    %40 = vector.broadcast %cst_14 : bf16 to vector<4x1x8x128xbf16>
    %41 = tpu.concatenate %40, %39, %40 in 1 : vector<4x1x8x128xbf16>, vector<4x8x8x128xbf16>, vector<4x1x8x128xbf16> -> vector<4x10x8x128xbf16>
    %cst_15 = arith.constant 0.000000e+00 : bf16
    %42 = vector.broadcast %cst_15 : bf16 to vector<4x10x1x128xbf16>
    %43 = tpu.concatenate %42, %41, %42 in 2 : vector<4x10x1x128xbf16>, vector<4x10x8x128xbf16>, vector<4x10x1x128xbf16> -> vector<4x10x10x128xbf16>
    %c0_16 = arith.constant 0 : index
    %c0_17 = arith.constant 0 : index
    %c0_18 = arith.constant 0 : index
    %44 = vector.load %arg2[%c0_16, %c0_17, %c0_18] : memref<1x1152x128xbf16, #tpu.memory_space<vmem>>, vector<1x1152x128xbf16>
    %45 = vector.shape_cast %44 : vector<1x1152x128xbf16> to vector<1152x128xbf16>
    %46 = vector.extract_strided_slice %43 {offsets = [3, 0, 0, 0], sizes = [1, 8, 8, 128], strides = [1, 1, 1, 1]} : vector<4x10x10x128xbf16> to vector<1x8x8x128xbf16>
    %47 = vector.shape_cast %46 : vector<1x8x8x128xbf16> to vector<8x8x128xbf16>
    %48 = vector.extract_strided_slice %43 {offsets = [2, 0, 1, 0], sizes = [1, 8, 8, 128], strides = [1, 1, 1, 1]} : vector<4x10x10x128xbf16> to vector<1x8x8x128xbf16>
    %49 = vector.shape_cast %48 : vector<1x8x8x128xbf16> to vector<8x8x128xbf16>
    %50 = vector.extract_strided_slice %43 {offsets = [3, 0, 1, 0], sizes = [1, 8, 8, 128], strides = [1, 1, 1, 1]} : vector<4x10x10x128xbf16> to vector<1x8x8x128xbf16>
    %51 = vector.shape_cast %50 : vector<1x8x8x128xbf16> to vector<8x8x128xbf16>
    %52 = vector.extract_strided_slice %43 {offsets = [1, 1, 0, 0], sizes = [1, 8, 8, 128], strides = [1, 1, 1, 1]} : vector<4x10x10x128xbf16> to vector<1x8x8x128xbf16>
    %53 = vector.shape_cast %52 : vector<1x8x8x128xbf16> to vector<8x8x128xbf16>
    %54 = vector.extract_strided_slice %43 {offsets = [0, 1, 1, 0], sizes = [1, 8, 8, 128], strides = [1, 1, 1, 1]} : vector<4x10x10x128xbf16> to vector<1x8x8x128xbf16>
    %55 = vector.shape_cast %54 : vector<1x8x8x128xbf16> to vector<8x8x128xbf16>
    %56 = vector.extract_strided_slice %43 {offsets = [1, 1, 1, 0], sizes = [1, 8, 8, 128], strides = [1, 1, 1, 1]} : vector<4x10x10x128xbf16> to vector<1x8x8x128xbf16>
    %57 = vector.shape_cast %56 : vector<1x8x8x128xbf16> to vector<8x8x128xbf16>
    %58 = vector.extract_strided_slice %43 {offsets = [3, 1, 0, 0], sizes = [1, 8, 8, 128], strides = [1, 1, 1, 1]} : vector<4x10x10x128xbf16> to vector<1x8x8x128xbf16>
    %59 = vector.shape_cast %58 : vector<1x8x8x128xbf16> to vector<8x8x128xbf16>
    %60 = vector.extract_strided_slice %43 {offsets = [2, 1, 1, 0], sizes = [1, 8, 8, 128], strides = [1, 1, 1, 1]} : vector<4x10x10x128xbf16> to vector<1x8x8x128xbf16>
    %61 = vector.shape_cast %60 : vector<1x8x8x128xbf16> to vector<8x8x128xbf16>
    %62 = vector.extract_strided_slice %43 {offsets = [3, 1, 1, 0], sizes = [1, 8, 8, 128], strides = [1, 1, 1, 1]} : vector<4x10x10x128xbf16> to vector<1x8x8x128xbf16>
    %63 = vector.shape_cast %62 : vector<1x8x8x128xbf16> to vector<8x8x128xbf16>
    %64 = tpu.concatenate %47, %49, %51, %53, %55, %57, %59, %61, %63 in 2 : vector<8x8x128xbf16>, vector<8x8x128xbf16>, vector<8x8x128xbf16>, vector<8x8x128xbf16>, vector<8x8x128xbf16>, vector<8x8x128xbf16>, vector<8x8x128xbf16>, vector<8x8x128xbf16>, vector<8x8x128xbf16> -> vector<8x8x1152xbf16>
    %65 = vector.extract_strided_slice %43 {offsets = [2, 0, 1, 0], sizes = [1, 8, 8, 128], strides = [1, 1, 1, 1]} : vector<4x10x10x128xbf16> to vector<1x8x8x128xbf16>
    %66 = vector.shape_cast %65 : vector<1x8x8x128xbf16> to vector<8x8x128xbf16>
    %67 = vector.extract_strided_slice %43 {offsets = [3, 0, 1, 0], sizes = [1, 8, 8, 128], strides = [1, 1, 1, 1]} : vector<4x10x10x128xbf16> to vector<1x8x8x128xbf16>
    %68 = vector.shape_cast %67 : vector<1x8x8x128xbf16> to vector<8x8x128xbf16>
    %69 = vector.extract_strided_slice %43 {offsets = [2, 0, 2, 0], sizes = [1, 8, 8, 128], strides = [1, 1, 1, 1]} : vector<4x10x10x128xbf16> to vector<1x8x8x128xbf16>
    %70 = vector.shape_cast %69 : vector<1x8x8x128xbf16> to vector<8x8x128xbf16>
    %71 = vector.extract_strided_slice %43 {offsets = [0, 1, 1, 0], sizes = [1, 8, 8, 128], strides = [1, 1, 1, 1]} : vector<4x10x10x128xbf16> to vector<1x8x8x128xbf16>
    %72 = vector.shape_cast %71 : vector<1x8x8x128xbf16> to vector<8x8x128xbf16>
    %73 = vector.extract_strided_slice %43 {offsets = [1, 1, 1, 0], sizes = [1, 8, 8, 128], strides = [1, 1, 1, 1]} : vector<4x10x10x128xbf16> to vector<1x8x8x128xbf16>
    %74 = vector.shape_cast %73 : vector<1x8x8x128xbf16> to vector<8x8x128xbf16>
    %75 = vector.extract_strided_slice %43 {offsets = [0, 1, 2, 0], sizes = [1, 8, 8, 128], strides = [1, 1, 1, 1]} : vector<4x10x10x128xbf16> to vector<1x8x8x128xbf16>
    %76 = vector.shape_cast %75 : vector<1x8x8x128xbf16> to vector<8x8x128xbf16>
    %77 = vector.extract_strided_slice %43 {offsets = [2, 1, 1, 0], sizes = [1, 8, 8, 128], strides = [1, 1, 1, 1]} : vector<4x10x10x128xbf16> to vector<1x8x8x128xbf16>
    %78 = vector.shape_cast %77 : vector<1x8x8x128xbf16> to vector<8x8x128xbf16>
    %79 = vector.extract_strided_slice %43 {offsets = [3, 1, 1, 0], sizes = [1, 8, 8, 128], strides = [1, 1, 1, 1]} : vector<4x10x10x128xbf16> to vector<1x8x8x128xbf16>
    %80 = vector.shape_cast %79 : vector<1x8x8x128xbf16> to vector<8x8x128xbf16>
    %81 = vector.extract_strided_slice %43 {offsets = [2, 1, 2, 0], sizes = [1, 8, 8, 128], strides = [1, 1, 1, 1]} : vector<4x10x10x128xbf16> to vector<1x8x8x128xbf16>
    %82 = vector.shape_cast %81 : vector<1x8x8x128xbf16> to vector<8x8x128xbf16>
    %83 = tpu.concatenate %66, %68, %70, %72, %74, %76, %78, %80, %82 in 2 : vector<8x8x128xbf16>, vector<8x8x128xbf16>, vector<8x8x128xbf16>, vector<8x8x128xbf16>, vector<8x8x128xbf16>, vector<8x8x128xbf16>, vector<8x8x128xbf16>, vector<8x8x128xbf16>, vector<8x8x128xbf16> -> vector<8x8x1152xbf16>
    %84 = vector.extract_strided_slice %43 {offsets = [1, 1, 0, 0], sizes = [1, 8, 8, 128], strides = [1, 1, 1, 1]} : vector<4x10x10x128xbf16> to vector<1x8x8x128xbf16>
    %85 = vector.shape_cast %84 : vector<1x8x8x128xbf16> to vector<8x8x128xbf16>
    %86 = vector.extract_strided_slice %43 {offsets = [0, 1, 1, 0], sizes = [1, 8, 8, 128], strides = [1, 1, 1, 1]} : vector<4x10x10x128xbf16> to vector<1x8x8x128xbf16>
    %87 = vector.shape_cast %86 : vector<1x8x8x128xbf16> to vector<8x8x128xbf16>
    %88 = vector.extract_strided_slice %43 {offsets = [1, 1, 1, 0], sizes = [1, 8, 8, 128], strides = [1, 1, 1, 1]} : vector<4x10x10x128xbf16> to vector<1x8x8x128xbf16>
    %89 = vector.shape_cast %88 : vector<1x8x8x128xbf16> to vector<8x8x128xbf16>
    %90 = vector.extract_strided_slice %43 {offsets = [3, 1, 0, 0], sizes = [1, 8, 8, 128], strides = [1, 1, 1, 1]} : vector<4x10x10x128xbf16> to vector<1x8x8x128xbf16>
    %91 = vector.shape_cast %90 : vector<1x8x8x128xbf16> to vector<8x8x128xbf16>
    %92 = vector.extract_strided_slice %43 {offsets = [2, 1, 1, 0], sizes = [1, 8, 8, 128], strides = [1, 1, 1, 1]} : vector<4x10x10x128xbf16> to vector<1x8x8x128xbf16>
    %93 = vector.shape_cast %92 : vector<1x8x8x128xbf16> to vector<8x8x128xbf16>
    %94 = vector.extract_strided_slice %43 {offsets = [3, 1, 1, 0], sizes = [1, 8, 8, 128], strides = [1, 1, 1, 1]} : vector<4x10x10x128xbf16> to vector<1x8x8x128xbf16>
    %95 = vector.shape_cast %94 : vector<1x8x8x128xbf16> to vector<8x8x128xbf16>
    %96 = vector.extract_strided_slice %43 {offsets = [1, 2, 0, 0], sizes = [1, 8, 8, 128], strides = [1, 1, 1, 1]} : vector<4x10x10x128xbf16> to vector<1x8x8x128xbf16>
    %97 = vector.shape_cast %96 : vector<1x8x8x128xbf16> to vector<8x8x128xbf16>
    %98 = vector.extract_strided_slice %43 {offsets = [0, 2, 1, 0], sizes = [1, 8, 8, 128], strides = [1, 1, 1, 1]} : vector<4x10x10x128xbf16> to vector<1x8x8x128xbf16>
    %99 = vector.shape_cast %98 : vector<1x8x8x128xbf16> to vector<8x8x128xbf16>
    %100 = vector.extract_strided_slice %43 {offsets = [1, 2, 1, 0], sizes = [1, 8, 8, 128], strides = [1, 1, 1, 1]} : vector<4x10x10x128xbf16> to vector<1x8x8x128xbf16>
    %101 = vector.shape_cast %100 : vector<1x8x8x128xbf16> to vector<8x8x128xbf16>
    %102 = tpu.concatenate %85, %87, %89, %91, %93, %95, %97, %99, %101 in 2 : vector<8x8x128xbf16>, vector<8x8x128xbf16>, vector<8x8x128xbf16>, vector<8x8x128xbf16>, vector<8x8x128xbf16>, vector<8x8x128xbf16>, vector<8x8x128xbf16>, vector<8x8x128xbf16>, vector<8x8x128xbf16> -> vector<8x8x1152xbf16>
    %103 = vector.extract_strided_slice %43 {offsets = [0, 1, 1, 0], sizes = [1, 8, 8, 128], strides = [1, 1, 1, 1]} : vector<4x10x10x128xbf16> to vector<1x8x8x128xbf16>
    %104 = vector.shape_cast %103 : vector<1x8x8x128xbf16> to vector<8x8x128xbf16>
    %105 = vector.extract_strided_slice %43 {offsets = [1, 1, 1, 0], sizes = [1, 8, 8, 128], strides = [1, 1, 1, 1]} : vector<4x10x10x128xbf16> to vector<1x8x8x128xbf16>
    %106 = vector.shape_cast %105 : vector<1x8x8x128xbf16> to vector<8x8x128xbf16>
    %107 = vector.extract_strided_slice %43 {offsets = [0, 1, 2, 0], sizes = [1, 8, 8, 128], strides = [1, 1, 1, 1]} : vector<4x10x10x128xbf16> to vector<1x8x8x128xbf16>
    %108 = vector.shape_cast %107 : vector<1x8x8x128xbf16> to vector<8x8x128xbf16>
    %109 = vector.extract_strided_slice %43 {offsets = [2, 1, 1, 0], sizes = [1, 8, 8, 128], strides = [1, 1, 1, 1]} : vector<4x10x10x128xbf16> to vector<1x8x8x128xbf16>
    %110 = vector.shape_cast %109 : vector<1x8x8x128xbf16> to vector<8x8x128xbf16>
    %111 = vector.extract_strided_slice %43 {offsets = [3, 1, 1, 0], sizes = [1, 8, 8, 128], strides = [1, 1, 1, 1]} : vector<4x10x10x128xbf16> to vector<1x8x8x128xbf16>
    %112 = vector.shape_cast %111 : vector<1x8x8x128xbf16> to vector<8x8x128xbf16>
    %113 = vector.extract_strided_slice %43 {offsets = [2, 1, 2, 0], sizes = [1, 8, 8, 128], strides = [1, 1, 1, 1]} : vector<4x10x10x128xbf16> to vector<1x8x8x128xbf16>
    %114 = vector.shape_cast %113 : vector<1x8x8x128xbf16> to vector<8x8x128xbf16>
    %115 = vector.extract_strided_slice %43 {offsets = [0, 2, 1, 0], sizes = [1, 8, 8, 128], strides = [1, 1, 1, 1]} : vector<4x10x10x128xbf16> to vector<1x8x8x128xbf16>
    %116 = vector.shape_cast %115 : vector<1x8x8x128xbf16> to vector<8x8x128xbf16>
    %117 = vector.extract_strided_slice %43 {offsets = [1, 2, 1, 0], sizes = [1, 8, 8, 128], strides = [1, 1, 1, 1]} : vector<4x10x10x128xbf16> to vector<1x8x8x128xbf16>
    %118 = vector.shape_cast %117 : vector<1x8x8x128xbf16> to vector<8x8x128xbf16>
    %119 = vector.extract_strided_slice %43 {offsets = [0, 2, 2, 0], sizes = [1, 8, 8, 128], strides = [1, 1, 1, 1]} : vector<4x10x10x128xbf16> to vector<1x8x8x128xbf16>
    %120 = vector.shape_cast %119 : vector<1x8x8x128xbf16> to vector<8x8x128xbf16>
    %121 = tpu.concatenate %104, %106, %108, %110, %112, %114, %116, %118, %120 in 2 : vector<8x8x128xbf16>, vector<8x8x128xbf16>, vector<8x8x128xbf16>, vector<8x8x128xbf16>, vector<8x8x128xbf16>, vector<8x8x128xbf16>, vector<8x8x128xbf16>, vector<8x8x128xbf16>, vector<8x8x128xbf16> -> vector<8x8x1152xbf16>
    %122 = vector.shape_cast %64 : vector<8x8x1152xbf16> to vector<1x8x8x1152xbf16>
    %123 = vector.shape_cast %83 : vector<8x8x1152xbf16> to vector<1x8x8x1152xbf16>
    %124 = vector.shape_cast %102 : vector<8x8x1152xbf16> to vector<1x8x8x1152xbf16>
    %125 = vector.shape_cast %121 : vector<8x8x1152xbf16> to vector<1x8x8x1152xbf16>
    %126 = tpu.concatenate %122, %123, %124, %125 in 0 : vector<1x8x8x1152xbf16>, vector<1x8x8x1152xbf16>, vector<1x8x8x1152xbf16>, vector<1x8x8x1152xbf16> -> vector<4x8x8x1152xbf16>
    %127 = vector.shape_cast %126 : vector<4x8x8x1152xbf16> to vector<256x1152xbf16>
    %cst_19 = arith.constant dense<0.000000e+00> : vector<256x128xf32>
    %128 = tpu.matmul %127, %45, %cst_19 {dimension_numbers = #tpu.dot_dimension_numbers<[1], [0], [0], [1], [0, 0, 1, 1], [], []>} : vector<256x1152xbf16>, vector<1152x128xbf16>, vector<256x128xf32> -> vector<256x128xf32>
    %129 = vector.shape_cast %128 : vector<256x128xf32> to vector<4x8x8x128xf32>
    %130 = vector.extract_strided_slice %129 {offsets = [0, 0, 0, 0], sizes = [1, 8, 8, 128], strides = [1, 1, 1, 1]} : vector<4x8x8x128xf32> to vector<1x8x8x128xf32>
    %131 = vector.shape_cast %130 : vector<1x8x8x128xf32> to vector<8x8x128xf32>
    %132 = vector.extract_strided_slice %28 {offsets = [0, 0, 0], sizes = [8, 8, 1], strides = [1, 1, 1]} : vector<8x8x4xf32> to vector<8x8x1xf32>
    %133 = vector.broadcast %132 : vector<8x8x1xf32> to vector<8x8x128xf32>
    %134 = arith.addf %131, %133 : vector<8x8x128xf32>
    %c0_20 = arith.constant 0 : index
    %c0_21 = arith.constant 0 : index
    %c0_22 = arith.constant 0 : index
    %135 = vector.load %arg5[%c0_20, %c0_21, %c0_22] : memref<1x1x128xf32, #tpu.memory_space<vmem>>, vector<1x1x128xf32>
    %136 = vector.broadcast %135 : vector<1x1x128xf32> to vector<8x8x128xf32>
    %137 = arith.addf %134, %136 : vector<8x8x128xf32>
    %cst_23 = arith.constant 0.000000e+00 : f32
    %138 = vector.broadcast %cst_23 : f32 to vector<8x8x128xf32>
    %139 = arith.cmpf oge, %137, %138 : vector<8x8x128xf32>
    %cst_24 = arith.constant 2.000000e-01 : f32
    %140 = vector.broadcast %cst_24 : f32 to vector<8x8x128xf32>
    %141 = arith.mulf %140, %137 : vector<8x8x128xf32>
    %142 = arith.select %139, %137, %141 : vector<8x8x128xi1>, vector<8x8x128xf32>
    %cst_25 = arith.constant 1.41421354 : f32
    %143 = vector.broadcast %cst_25 : f32 to vector<8x8x128xf32>
    %144 = arith.mulf %142, %143 : vector<8x8x128xf32>
    %145 = vector.extract_strided_slice %129 {offsets = [1, 0, 0, 0], sizes = [1, 8, 8, 128], strides = [1, 1, 1, 1]} : vector<4x8x8x128xf32> to vector<1x8x8x128xf32>
    %146 = vector.shape_cast %145 : vector<1x8x8x128xf32> to vector<8x8x128xf32>
    %147 = vector.extract_strided_slice %28 {offsets = [0, 0, 1], sizes = [8, 8, 1], strides = [1, 1, 1]} : vector<8x8x4xf32> to vector<8x8x1xf32>
    %148 = vector.broadcast %147 : vector<8x8x1xf32> to vector<8x8x128xf32>
    %149 = arith.addf %146, %148 : vector<8x8x128xf32>
    %c0_26 = arith.constant 0 : index
    %c0_27 = arith.constant 0 : index
    %c0_28 = arith.constant 0 : index
    %150 = vector.load %arg5[%c0_26, %c0_27, %c0_28] : memref<1x1x128xf32, #tpu.memory_space<vmem>>, vector<1x1x128xf32>
    %151 = vector.broadcast %150 : vector<1x1x128xf32> to vector<8x8x128xf32>
    %152 = arith.addf %149, %151 : vector<8x8x128xf32>
    %cst_29 = arith.constant 0.000000e+00 : f32
    %153 = vector.broadcast %cst_29 : f32 to vector<8x8x128xf32>
    %154 = arith.cmpf oge, %152, %153 : vector<8x8x128xf32>
    %cst_30 = arith.constant 2.000000e-01 : f32
    %155 = vector.broadcast %cst_30 : f32 to vector<8x8x128xf32>
    %156 = arith.mulf %155, %152 : vector<8x8x128xf32>
    %157 = arith.select %154, %152, %156 : vector<8x8x128xi1>, vector<8x8x128xf32>
    %cst_31 = arith.constant 1.41421354 : f32
    %158 = vector.broadcast %cst_31 : f32 to vector<8x8x128xf32>
    %159 = arith.mulf %157, %158 : vector<8x8x128xf32>
    %160 = vector.extract_strided_slice %129 {offsets = [2, 0, 0, 0], sizes = [1, 8, 8, 128], strides = [1, 1, 1, 1]} : vector<4x8x8x128xf32> to vector<1x8x8x128xf32>
    %161 = vector.shape_cast %160 : vector<1x8x8x128xf32> to vector<8x8x128xf32>
    %162 = vector.extract_strided_slice %28 {offsets = [0, 0, 2], sizes = [8, 8, 1], strides = [1, 1, 1]} : vector<8x8x4xf32> to vector<8x8x1xf32>
    %163 = vector.broadcast %162 : vector<8x8x1xf32> to vector<8x8x128xf32>
    %164 = arith.addf %161, %163 : vector<8x8x128xf32>
    %c0_32 = arith.constant 0 : index
    %c0_33 = arith.constant 0 : index
    %c0_34 = arith.constant 0 : index
    %165 = vector.load %arg5[%c0_32, %c0_33, %c0_34] : memref<1x1x128xf32, #tpu.memory_space<vmem>>, vector<1x1x128xf32>
    %166 = vector.broadcast %165 : vector<1x1x128xf32> to vector<8x8x128xf32>
    %167 = arith.addf %164, %166 : vector<8x8x128xf32>
    %cst_35 = arith.constant 0.000000e+00 : f32
    %168 = vector.broadcast %cst_35 : f32 to vector<8x8x128xf32>
    %169 = arith.cmpf oge, %167, %168 : vector<8x8x128xf32>
    %cst_36 = arith.constant 2.000000e-01 : f32
    %170 = vector.broadcast %cst_36 : f32 to vector<8x8x128xf32>
    %171 = arith.mulf %170, %167 : vector<8x8x128xf32>
    %172 = arith.select %169, %167, %171 : vector<8x8x128xi1>, vector<8x8x128xf32>
    %cst_37 = arith.constant 1.41421354 : f32
    %173 = vector.broadcast %cst_37 : f32 to vector<8x8x128xf32>
    %174 = arith.mulf %172, %173 : vector<8x8x128xf32>
    %175 = vector.extract_strided_slice %129 {offsets = [3, 0, 0, 0], sizes = [1, 8, 8, 128], strides = [1, 1, 1, 1]} : vector<4x8x8x128xf32> to vector<1x8x8x128xf32>
    %176 = vector.shape_cast %175 : vector<1x8x8x128xf32> to vector<8x8x128xf32>
    %177 = vector.extract_strided_slice %28 {offsets = [0, 0, 3], sizes = [8, 8, 1], strides = [1, 1, 1]} : vector<8x8x4xf32> to vector<8x8x1xf32>
    %178 = vector.broadcast %177 : vector<8x8x1xf32> to vector<8x8x128xf32>
    %179 = arith.addf %176, %178 : vector<8x8x128xf32>
    %c0_38 = arith.constant 0 : index
    %c0_39 = arith.constant 0 : index
    %c0_40 = arith.constant 0 : index
    %180 = vector.load %arg5[%c0_38, %c0_39, %c0_40] : memref<1x1x128xf32, #tpu.memory_space<vmem>>, vector<1x1x128xf32>
    %181 = vector.broadcast %180 : vector<1x1x128xf32> to vector<8x8x128xf32>
    %182 = arith.addf %179, %181 : vector<8x8x128xf32>
    %cst_41 = arith.constant 0.000000e+00 : f32
    %183 = vector.broadcast %cst_41 : f32 to vector<8x8x128xf32>
    %184 = arith.cmpf oge, %182, %183 : vector<8x8x128xf32>
    %cst_42 = arith.constant 2.000000e-01 : f32
    %185 = vector.broadcast %cst_42 : f32 to vector<8x8x128xf32>
    %186 = arith.mulf %185, %182 : vector<8x8x128xf32>
    %187 = arith.select %184, %182, %186 : vector<8x8x128xi1>, vector<8x8x128xf32>
    %cst_43 = arith.constant 1.41421354 : f32
    %188 = vector.broadcast %cst_43 : f32 to vector<8x8x128xf32>
    %189 = arith.mulf %187, %188 : vector<8x8x128xf32>
    %190 = arith.truncf %144 : vector<8x8x128xf32> to vector<8x8x128xbf16>
    %191 = arith.truncf %159 : vector<8x8x128xf32> to vector<8x8x128xbf16>
    %192 = arith.truncf %174 : vector<8x8x128xf32> to vector<8x8x128xbf16>
    %193 = arith.truncf %189 : vector<8x8x128xf32> to vector<8x8x128xbf16>
    %194 = vector.shape_cast %190 : vector<8x8x128xbf16> to vector<1x8x8x128xbf16>
    %195 = vector.shape_cast %191 : vector<8x8x128xbf16> to vector<1x8x8x128xbf16>
    %196 = vector.shape_cast %192 : vector<8x8x128xbf16> to vector<1x8x8x128xbf16>
    %197 = vector.shape_cast %193 : vector<8x8x128xbf16> to vector<1x8x8x128xbf16>
    %198 = tpu.concatenate %194, %195, %196, %197 in 0 : vector<1x8x8x128xbf16>, vector<1x8x8x128xbf16>, vector<1x8x8x128xbf16>, vector<1x8x8x128xbf16> -> vector<4x8x8x128xbf16>
    %cst_44 = arith.constant 0.000000e+00 : bf16
    %199 = vector.broadcast %cst_44 : bf16 to vector<4x1x8x128xbf16>
    %200 = tpu.concatenate %199, %198, %199 in 1 : vector<4x1x8x128xbf16>, vector<4x8x8x128xbf16>, vector<4x1x8x128xbf16> -> vector<4x10x8x128xbf16>
    %cst_45 = arith.constant 0.000000e+00 : bf16
    %201 = vector.broadcast %cst_45 : bf16 to vector<4x10x1x128xbf16>
    %202 = tpu.concatenate %201, %200, %201 in 2 : vector<4x10x1x128xbf16>, vector<4x10x8x128xbf16>, vector<4x10x1x128xbf16> -> vector<4x10x10x128xbf16>
    %c0_46 = arith.constant 0 : index
    %c0_47 = arith.constant 0 : index
    %c0_48 = arith.constant 0 : index
    %203 = vector.load %arg3[%c0_46, %c0_47, %c0_48] : memref<1x1152x128xbf16, #tpu.memory_space<vmem>>, vector<1x1152x128xbf16>
    %204 = vector.shape_cast %203 : vector<1x1152x128xbf16> to vector<1152x128xbf16>
    %205 = vector.extract_strided_slice %202 {offsets = [3, 0, 0, 0], sizes = [1, 8, 8, 128], strides = [1, 1, 1, 1]} : vector<4x10x10x128xbf16> to vector<1x8x8x128xbf16>
    %206 = vector.shape_cast %205 : vector<1x8x8x128xbf16> to vector<8x8x128xbf16>
    %207 = vector.extract_strided_slice %202 {offsets = [2, 0, 1, 0], sizes = [1, 8, 8, 128], strides = [1, 1, 1, 1]} : vector<4x10x10x128xbf16> to vector<1x8x8x128xbf16>
    %208 = vector.shape_cast %207 : vector<1x8x8x128xbf16> to vector<8x8x128xbf16>
    %209 = vector.extract_strided_slice %202 {offsets = [3, 0, 1, 0], sizes = [1, 8, 8, 128], strides = [1, 1, 1, 1]} : vector<4x10x10x128xbf16> to vector<1x8x8x128xbf16>
    %210 = vector.shape_cast %209 : vector<1x8x8x128xbf16> to vector<8x8x128xbf16>
    %211 = vector.extract_strided_slice %202 {offsets = [1, 1, 0, 0], sizes = [1, 8, 8, 128], strides = [1, 1, 1, 1]} : vector<4x10x10x128xbf16> to vector<1x8x8x128xbf16>
    %212 = vector.shape_cast %211 : vector<1x8x8x128xbf16> to vector<8x8x128xbf16>
    %213 = vector.extract_strided_slice %202 {offsets = [0, 1, 1, 0], sizes = [1, 8, 8, 128], strides = [1, 1, 1, 1]} : vector<4x10x10x128xbf16> to vector<1x8x8x128xbf16>
    %214 = vector.shape_cast %213 : vector<1x8x8x128xbf16> to vector<8x8x128xbf16>
    %215 = vector.extract_strided_slice %202 {offsets = [1, 1, 1, 0], sizes = [1, 8, 8, 128], strides = [1, 1, 1, 1]} : vector<4x10x10x128xbf16> to vector<1x8x8x128xbf16>
    %216 = vector.shape_cast %215 : vector<1x8x8x128xbf16> to vector<8x8x128xbf16>
    %217 = vector.extract_strided_slice %202 {offsets = [3, 1, 0, 0], sizes = [1, 8, 8, 128], strides = [1, 1, 1, 1]} : vector<4x10x10x128xbf16> to vector<1x8x8x128xbf16>
    %218 = vector.shape_cast %217 : vector<1x8x8x128xbf16> to vector<8x8x128xbf16>
    %219 = vector.extract_strided_slice %202 {offsets = [2, 1, 1, 0], sizes = [1, 8, 8, 128], strides = [1, 1, 1, 1]} : vector<4x10x10x128xbf16> to vector<1x8x8x128xbf16>
    %220 = vector.shape_cast %219 : vector<1x8x8x128xbf16> to vector<8x8x128xbf16>
    %221 = vector.extract_strided_slice %202 {offsets = [3, 1, 1, 0], sizes = [1, 8, 8, 128], strides = [1, 1, 1, 1]} : vector<4x10x10x128xbf16> to vector<1x8x8x128xbf16>
    %222 = vector.shape_cast %221 : vector<1x8x8x128xbf16> to vector<8x8x128xbf16>
    %223 = tpu.concatenate %206, %208, %210, %212, %214, %216, %218, %220, %222 in 2 : vector<8x8x128xbf16>, vector<8x8x128xbf16>, vector<8x8x128xbf16>, vector<8x8x128xbf16>, vector<8x8x128xbf16>, vector<8x8x128xbf16>, vector<8x8x128xbf16>, vector<8x8x128xbf16>, vector<8x8x128xbf16> -> vector<8x8x1152xbf16>
    %224 = vector.extract_strided_slice %202 {offsets = [2, 0, 1, 0], sizes = [1, 8, 8, 128], strides = [1, 1, 1, 1]} : vector<4x10x10x128xbf16> to vector<1x8x8x128xbf16>
    %225 = vector.shape_cast %224 : vector<1x8x8x128xbf16> to vector<8x8x128xbf16>
    %226 = vector.extract_strided_slice %202 {offsets = [3, 0, 1, 0], sizes = [1, 8, 8, 128], strides = [1, 1, 1, 1]} : vector<4x10x10x128xbf16> to vector<1x8x8x128xbf16>
    %227 = vector.shape_cast %226 : vector<1x8x8x128xbf16> to vector<8x8x128xbf16>
    %228 = vector.extract_strided_slice %202 {offsets = [2, 0, 2, 0], sizes = [1, 8, 8, 128], strides = [1, 1, 1, 1]} : vector<4x10x10x128xbf16> to vector<1x8x8x128xbf16>
    %229 = vector.shape_cast %228 : vector<1x8x8x128xbf16> to vector<8x8x128xbf16>
    %230 = vector.extract_strided_slice %202 {offsets = [0, 1, 1, 0], sizes = [1, 8, 8, 128], strides = [1, 1, 1, 1]} : vector<4x10x10x128xbf16> to vector<1x8x8x128xbf16>
    %231 = vector.shape_cast %230 : vector<1x8x8x128xbf16> to vector<8x8x128xbf16>
    %232 = vector.extract_strided_slice %202 {offsets = [1, 1, 1, 0], sizes = [1, 8, 8, 128], strides = [1, 1, 1, 1]} : vector<4x10x10x128xbf16> to vector<1x8x8x128xbf16>
    %233 = vector.shape_cast %232 : vector<1x8x8x128xbf16> to vector<8x8x128xbf16>
    %234 = vector.extract_strided_slice %202 {offsets = [0, 1, 2, 0], sizes = [1, 8, 8, 128], strides = [1, 1, 1, 1]} : vector<4x10x10x128xbf16> to vector<1x8x8x128xbf16>
    %235 = vector.shape_cast %234 : vector<1x8x8x128xbf16> to vector<8x8x128xbf16>
    %236 = vector.extract_strided_slice %202 {offsets = [2, 1, 1, 0], sizes = [1, 8, 8, 128], strides = [1, 1, 1, 1]} : vector<4x10x10x128xbf16> to vector<1x8x8x128xbf16>
    %237 = vector.shape_cast %236 : vector<1x8x8x128xbf16> to vector<8x8x128xbf16>
    %238 = vector.extract_strided_slice %202 {offsets = [3, 1, 1, 0], sizes = [1, 8, 8, 128], strides = [1, 1, 1, 1]} : vector<4x10x10x128xbf16> to vector<1x8x8x128xbf16>
    %239 = vector.shape_cast %238 : vector<1x8x8x128xbf16> to vector<8x8x128xbf16>
    %240 = vector.extract_strided_slice %202 {offsets = [2, 1, 2, 0], sizes = [1, 8, 8, 128], strides = [1, 1, 1, 1]} : vector<4x10x10x128xbf16> to vector<1x8x8x128xbf16>
    %241 = vector.shape_cast %240 : vector<1x8x8x128xbf16> to vector<8x8x128xbf16>
    %242 = tpu.concatenate %225, %227, %229, %231, %233, %235, %237, %239, %241 in 2 : vector<8x8x128xbf16>, vector<8x8x128xbf16>, vector<8x8x128xbf16>, vector<8x8x128xbf16>, vector<8x8x128xbf16>, vector<8x8x128xbf16>, vector<8x8x128xbf16>, vector<8x8x128xbf16>, vector<8x8x128xbf16> -> vector<8x8x1152xbf16>
    %243 = vector.extract_strided_slice %202 {offsets = [1, 1, 0, 0], sizes = [1, 8, 8, 128], strides = [1, 1, 1, 1]} : vector<4x10x10x128xbf16> to vector<1x8x8x128xbf16>
    %244 = vector.shape_cast %243 : vector<1x8x8x128xbf16> to vector<8x8x128xbf16>
    %245 = vector.extract_strided_slice %202 {offsets = [0, 1, 1, 0], sizes = [1, 8, 8, 128], strides = [1, 1, 1, 1]} : vector<4x10x10x128xbf16> to vector<1x8x8x128xbf16>
    %246 = vector.shape_cast %245 : vector<1x8x8x128xbf16> to vector<8x8x128xbf16>
    %247 = vector.extract_strided_slice %202 {offsets = [1, 1, 1, 0], sizes = [1, 8, 8, 128], strides = [1, 1, 1, 1]} : vector<4x10x10x128xbf16> to vector<1x8x8x128xbf16>
    %248 = vector.shape_cast %247 : vector<1x8x8x128xbf16> to vector<8x8x128xbf16>
    %249 = vector.extract_strided_slice %202 {offsets = [3, 1, 0, 0], sizes = [1, 8, 8, 128], strides = [1, 1, 1, 1]} : vector<4x10x10x128xbf16> to vector<1x8x8x128xbf16>
    %250 = vector.shape_cast %249 : vector<1x8x8x128xbf16> to vector<8x8x128xbf16>
    %251 = vector.extract_strided_slice %202 {offsets = [2, 1, 1, 0], sizes = [1, 8, 8, 128], strides = [1, 1, 1, 1]} : vector<4x10x10x128xbf16> to vector<1x8x8x128xbf16>
    %252 = vector.shape_cast %251 : vector<1x8x8x128xbf16> to vector<8x8x128xbf16>
    %253 = vector.extract_strided_slice %202 {offsets = [3, 1, 1, 0], sizes = [1, 8, 8, 128], strides = [1, 1, 1, 1]} : vector<4x10x10x128xbf16> to vector<1x8x8x128xbf16>
    %254 = vector.shape_cast %253 : vector<1x8x8x128xbf16> to vector<8x8x128xbf16>
    %255 = vector.extract_strided_slice %202 {offsets = [1, 2, 0, 0], sizes = [1, 8, 8, 128], strides = [1, 1, 1, 1]} : vector<4x10x10x128xbf16> to vector<1x8x8x128xbf16>
    %256 = vector.shape_cast %255 : vector<1x8x8x128xbf16> to vector<8x8x128xbf16>
    %257 = vector.extract_strided_slice %202 {offsets = [0, 2, 1, 0], sizes = [1, 8, 8, 128], strides = [1, 1, 1, 1]} : vector<4x10x10x128xbf16> to vector<1x8x8x128xbf16>
    %258 = vector.shape_cast %257 : vector<1x8x8x128xbf16> to vector<8x8x128xbf16>
    %259 = vector.extract_strided_slice %202 {offsets = [1, 2, 1, 0], sizes = [1, 8, 8, 128], strides = [1, 1, 1, 1]} : vector<4x10x10x128xbf16> to vector<1x8x8x128xbf16>
    %260 = vector.shape_cast %259 : vector<1x8x8x128xbf16> to vector<8x8x128xbf16>
    %261 = tpu.concatenate %244, %246, %248, %250, %252, %254, %256, %258, %260 in 2 : vector<8x8x128xbf16>, vector<8x8x128xbf16>, vector<8x8x128xbf16>, vector<8x8x128xbf16>, vector<8x8x128xbf16>, vector<8x8x128xbf16>, vector<8x8x128xbf16>, vector<8x8x128xbf16>, vector<8x8x128xbf16> -> vector<8x8x1152xbf16>
    %262 = vector.extract_strided_slice %202 {offsets = [0, 1, 1, 0], sizes = [1, 8, 8, 128], strides = [1, 1, 1, 1]} : vector<4x10x10x128xbf16> to vector<1x8x8x128xbf16>
    %263 = vector.shape_cast %262 : vector<1x8x8x128xbf16> to vector<8x8x128xbf16>
    %264 = vector.extract_strided_slice %202 {offsets = [1, 1, 1, 0], sizes = [1, 8, 8, 128], strides = [1, 1, 1, 1]} : vector<4x10x10x128xbf16> to vector<1x8x8x128xbf16>
    %265 = vector.shape_cast %264 : vector<1x8x8x128xbf16> to vector<8x8x128xbf16>
    %266 = vector.extract_strided_slice %202 {offsets = [0, 1, 2, 0], sizes = [1, 8, 8, 128], strides = [1, 1, 1, 1]} : vector<4x10x10x128xbf16> to vector<1x8x8x128xbf16>
    %267 = vector.shape_cast %266 : vector<1x8x8x128xbf16> to vector<8x8x128xbf16>
    %268 = vector.extract_strided_slice %202 {offsets = [2, 1, 1, 0], sizes = [1, 8, 8, 128], strides = [1, 1, 1, 1]} : vector<4x10x10x128xbf16> to vector<1x8x8x128xbf16>
    %269 = vector.shape_cast %268 : vector<1x8x8x128xbf16> to vector<8x8x128xbf16>
    %270 = vector.extract_strided_slice %202 {offsets = [3, 1, 1, 0], sizes = [1, 8, 8, 128], strides = [1, 1, 1, 1]} : vector<4x10x10x128xbf16> to vector<1x8x8x128xbf16>
    %271 = vector.shape_cast %270 : vector<1x8x8x128xbf16> to vector<8x8x128xbf16>
    %272 = vector.extract_strided_slice %202 {offsets = [2, 1, 2, 0], sizes = [1, 8, 8, 128], strides = [1, 1, 1, 1]} : vector<4x10x10x128xbf16> to vector<1x8x8x128xbf16>
    %273 = vector.shape_cast %272 : vector<1x8x8x128xbf16> to vector<8x8x128xbf16>
    %274 = vector.extract_strided_slice %202 {offsets = [0, 2, 1, 0], sizes = [1, 8, 8, 128], strides = [1, 1, 1, 1]} : vector<4x10x10x128xbf16> to vector<1x8x8x128xbf16>
    %275 = vector.shape_cast %274 : vector<1x8x8x128xbf16> to vector<8x8x128xbf16>
    %276 = vector.extract_strided_slice %202 {offsets = [1, 2, 1, 0], sizes = [1, 8, 8, 128], strides = [1, 1, 1, 1]} : vector<4x10x10x128xbf16> to vector<1x8x8x128xbf16>
    %277 = vector.shape_cast %276 : vector<1x8x8x128xbf16> to vector<8x8x128xbf16>
    %278 = vector.extract_strided_slice %202 {offsets = [0, 2, 2, 0], sizes = [1, 8, 8, 128], strides = [1, 1, 1, 1]} : vector<4x10x10x128xbf16> to vector<1x8x8x128xbf16>
    %279 = vector.shape_cast %278 : vector<1x8x8x128xbf16> to vector<8x8x128xbf16>
    %280 = tpu.concatenate %263, %265, %267, %269, %271, %273, %275, %277, %279 in 2 : vector<8x8x128xbf16>, vector<8x8x128xbf16>, vector<8x8x128xbf16>, vector<8x8x128xbf16>, vector<8x8x128xbf16>, vector<8x8x128xbf16>, vector<8x8x128xbf16>, vector<8x8x128xbf16>, vector<8x8x128xbf16> -> vector<8x8x1152xbf16>
    %281 = vector.shape_cast %223 : vector<8x8x1152xbf16> to vector<1x8x8x1152xbf16>
    %282 = vector.shape_cast %242 : vector<8x8x1152xbf16> to vector<1x8x8x1152xbf16>
    %283 = vector.shape_cast %261 : vector<8x8x1152xbf16> to vector<1x8x8x1152xbf16>
    %284 = vector.shape_cast %280 : vector<8x8x1152xbf16> to vector<1x8x8x1152xbf16>
    %285 = tpu.concatenate %281, %282, %283, %284 in 0 : vector<1x8x8x1152xbf16>, vector<1x8x8x1152xbf16>, vector<1x8x8x1152xbf16>, vector<1x8x8x1152xbf16> -> vector<4x8x8x1152xbf16>
    %286 = vector.shape_cast %285 : vector<4x8x8x1152xbf16> to vector<256x1152xbf16>
    %cst_49 = arith.constant dense<0.000000e+00> : vector<256x128xf32>
    %287 = tpu.matmul %286, %204, %cst_49 {dimension_numbers = #tpu.dot_dimension_numbers<[1], [0], [0], [1], [0, 0, 1, 1], [], []>} : vector<256x1152xbf16>, vector<1152x128xbf16>, vector<256x128xf32> -> vector<256x128xf32>
    %288 = vector.shape_cast %287 : vector<256x128xf32> to vector<4x8x8x128xf32>
    %289 = vector.extract_strided_slice %288 {offsets = [0, 0, 0, 0], sizes = [1, 8, 8, 128], strides = [1, 1, 1, 1]} : vector<4x8x8x128xf32> to vector<1x8x8x128xf32>
    %290 = vector.shape_cast %289 : vector<1x8x8x128xf32> to vector<8x8x128xf32>
    %291 = vector.extract_strided_slice %30 {offsets = [0, 0, 0], sizes = [8, 8, 1], strides = [1, 1, 1]} : vector<8x8x4xf32> to vector<8x8x1xf32>
    %292 = vector.broadcast %291 : vector<8x8x1xf32> to vector<8x8x128xf32>
    %293 = arith.addf %290, %292 : vector<8x8x128xf32>
    %c0_50 = arith.constant 0 : index
    %c0_51 = arith.constant 0 : index
    %c0_52 = arith.constant 0 : index
    %294 = vector.load %arg6[%c0_50, %c0_51, %c0_52] : memref<1x1x128xf32, #tpu.memory_space<vmem>>, vector<1x1x128xf32>
    %295 = vector.broadcast %294 : vector<1x1x128xf32> to vector<8x8x128xf32>
    %296 = arith.addf %293, %295 : vector<8x8x128xf32>
    %cst_53 = arith.constant 0.000000e+00 : f32
    %297 = vector.broadcast %cst_53 : f32 to vector<8x8x128xf32>
    %298 = arith.cmpf oge, %296, %297 : vector<8x8x128xf32>
    %cst_54 = arith.constant 2.000000e-01 : f32
    %299 = vector.broadcast %cst_54 : f32 to vector<8x8x128xf32>
    %300 = arith.mulf %299, %296 : vector<8x8x128xf32>
    %301 = arith.select %298, %296, %300 : vector<8x8x128xi1>, vector<8x8x128xf32>
    %cst_55 = arith.constant 1.41421354 : f32
    %302 = vector.broadcast %cst_55 : f32 to vector<8x8x128xf32>
    %303 = arith.mulf %301, %302 : vector<8x8x128xf32>
    %304 = vector.extract_strided_slice %288 {offsets = [1, 0, 0, 0], sizes = [1, 8, 8, 128], strides = [1, 1, 1, 1]} : vector<4x8x8x128xf32> to vector<1x8x8x128xf32>
    %305 = vector.shape_cast %304 : vector<1x8x8x128xf32> to vector<8x8x128xf32>
    %306 = vector.extract_strided_slice %30 {offsets = [0, 0, 1], sizes = [8, 8, 1], strides = [1, 1, 1]} : vector<8x8x4xf32> to vector<8x8x1xf32>
    %307 = vector.broadcast %306 : vector<8x8x1xf32> to vector<8x8x128xf32>
    %308 = arith.addf %305, %307 : vector<8x8x128xf32>
    %c0_56 = arith.constant 0 : index
    %c0_57 = arith.constant 0 : index
    %c0_58 = arith.constant 0 : index
    %309 = vector.load %arg6[%c0_56, %c0_57, %c0_58] : memref<1x1x128xf32, #tpu.memory_space<vmem>>, vector<1x1x128xf32>
    %310 = vector.broadcast %309 : vector<1x1x128xf32> to vector<8x8x128xf32>
    %311 = arith.addf %308, %310 : vector<8x8x128xf32>
    %cst_59 = arith.constant 0.000000e+00 : f32
    %312 = vector.broadcast %cst_59 : f32 to vector<8x8x128xf32>
    %313 = arith.cmpf oge, %311, %312 : vector<8x8x128xf32>
    %cst_60 = arith.constant 2.000000e-01 : f32
    %314 = vector.broadcast %cst_60 : f32 to vector<8x8x128xf32>
    %315 = arith.mulf %314, %311 : vector<8x8x128xf32>
    %316 = arith.select %313, %311, %315 : vector<8x8x128xi1>, vector<8x8x128xf32>
    %cst_61 = arith.constant 1.41421354 : f32
    %317 = vector.broadcast %cst_61 : f32 to vector<8x8x128xf32>
    %318 = arith.mulf %316, %317 : vector<8x8x128xf32>
    %319 = vector.extract_strided_slice %288 {offsets = [2, 0, 0, 0], sizes = [1, 8, 8, 128], strides = [1, 1, 1, 1]} : vector<4x8x8x128xf32> to vector<1x8x8x128xf32>
    %320 = vector.shape_cast %319 : vector<1x8x8x128xf32> to vector<8x8x128xf32>
    %321 = vector.extract_strided_slice %30 {offsets = [0, 0, 2], sizes = [8, 8, 1], strides = [1, 1, 1]} : vector<8x8x4xf32> to vector<8x8x1xf32>
    %322 = vector.broadcast %321 : vector<8x8x1xf32> to vector<8x8x128xf32>
    %323 = arith.addf %320, %322 : vector<8x8x128xf32>
    %c0_62 = arith.constant 0 : index
    %c0_63 = arith.constant 0 : index
    %c0_64 = arith.constant 0 : index
    %324 = vector.load %arg6[%c0_62, %c0_63, %c0_64] : memref<1x1x128xf32, #tpu.memory_space<vmem>>, vector<1x1x128xf32>
    %325 = vector.broadcast %324 : vector<1x1x128xf32> to vector<8x8x128xf32>
    %326 = arith.addf %323, %325 : vector<8x8x128xf32>
    %cst_65 = arith.constant 0.000000e+00 : f32
    %327 = vector.broadcast %cst_65 : f32 to vector<8x8x128xf32>
    %328 = arith.cmpf oge, %326, %327 : vector<8x8x128xf32>
    %cst_66 = arith.constant 2.000000e-01 : f32
    %329 = vector.broadcast %cst_66 : f32 to vector<8x8x128xf32>
    %330 = arith.mulf %329, %326 : vector<8x8x128xf32>
    %331 = arith.select %328, %326, %330 : vector<8x8x128xi1>, vector<8x8x128xf32>
    %cst_67 = arith.constant 1.41421354 : f32
    %332 = vector.broadcast %cst_67 : f32 to vector<8x8x128xf32>
    %333 = arith.mulf %331, %332 : vector<8x8x128xf32>
    %334 = vector.extract_strided_slice %288 {offsets = [3, 0, 0, 0], sizes = [1, 8, 8, 128], strides = [1, 1, 1, 1]} : vector<4x8x8x128xf32> to vector<1x8x8x128xf32>
    %335 = vector.shape_cast %334 : vector<1x8x8x128xf32> to vector<8x8x128xf32>
    %336 = vector.extract_strided_slice %30 {offsets = [0, 0, 3], sizes = [8, 8, 1], strides = [1, 1, 1]} : vector<8x8x4xf32> to vector<8x8x1xf32>
    %337 = vector.broadcast %336 : vector<8x8x1xf32> to vector<8x8x128xf32>
    %338 = arith.addf %335, %337 : vector<8x8x128xf32>
    %c0_68 = arith.constant 0 : index
    %c0_69 = arith.constant 0 : index
    %c0_70 = arith.constant 0 : index
    %339 = vector.load %arg6[%c0_68, %c0_69, %c0_70] : memref<1x1x128xf32, #tpu.memory_space<vmem>>, vector<1x1x128xf32>
    %340 = vector.broadcast %339 : vector<1x1x128xf32> to vector<8x8x128xf32>
    %341 = arith.addf %338, %340 : vector<8x8x128xf32>
    %cst_71 = arith.constant 0.000000e+00 : f32
    %342 = vector.broadcast %cst_71 : f32 to vector<8x8x128xf32>
    %343 = arith.cmpf oge, %341, %342 : vector<8x8x128xf32>
    %cst_72 = arith.constant 2.000000e-01 : f32
    %344 = vector.broadcast %cst_72 : f32 to vector<8x8x128xf32>
    %345 = arith.mulf %344, %341 : vector<8x8x128xf32>
    %346 = arith.select %343, %341, %345 : vector<8x8x128xi1>, vector<8x8x128xf32>
    %cst_73 = arith.constant 1.41421354 : f32
    %347 = vector.broadcast %cst_73 : f32 to vector<8x8x128xf32>
    %348 = arith.mulf %346, %347 : vector<8x8x128xf32>
    %349 = tpu.concatenate %303, %318 in 2 : vector<8x8x128xf32>, vector<8x8x128xf32> -> vector<8x8x256xf32>
    %c0_74 = arith.constant 0 : index
    %c0_75 = arith.constant 0 : index
    %c0_76 = arith.constant 0 : index
    %c0_77 = arith.constant 0 : index
    %c0_78 = arith.constant 0 : index
    %350 = vector.load %arg10[%c0_74, %c0_75, %c0_76, %c0_77, %c0_78] : memref<1x8x2x8x256xf32, #tpu.memory_space<vmem>>, vector<1x8x1x8x256xf32>
    %351 = vector.shape_cast %350 : vector<1x8x1x8x256xf32> to vector<8x8x256xf32>
    %352 = vector.shape_cast %349 : vector<8x8x256xf32> to vector<1x8x1x8x256xf32>
    tpu.vector_store %arg10[%c0_74, %c0_75, %c0_76, %c0_77, %c0_78], %352 {strides = array<i32>} : memref<1x8x2x8x256xf32, #tpu.memory_space<vmem>>, vector<1x8x1x8x256xf32>,
    %353 = tpu.concatenate %333, %348 in 2 : vector<8x8x128xf32>, vector<8x8x128xf32> -> vector<8x8x256xf32>
    %c0_79 = arith.constant 0 : index
    %c0_80 = arith.constant 0 : index
    %c1 = arith.constant 1 : index
    %c0_81 = arith.constant 0 : index
    %c0_82 = arith.constant 0 : index
    %354 = vector.load %arg10[%c0_79, %c0_80, %c1, %c0_81, %c0_82] : memref<1x8x2x8x256xf32, #tpu.memory_space<vmem>>, vector<1x8x1x8x256xf32>
    %355 = vector.shape_cast %354 : vector<1x8x1x8x256xf32> to vector<8x8x256xf32>
    %356 = vector.shape_cast %353 : vector<8x8x256xf32> to vector<1x8x1x8x256xf32>
    tpu.vector_store %arg10[%c0_79, %c0_80, %c1, %c0_81, %c0_82], %356 {strides = array<i32>} : memref<1x8x2x8x256xf32, #tpu.memory_space<vmem>>, vector<1x8x1x8x256xf32>,
    %357 = vector.shape_cast %303 : vector<8x8x128xf32> to vector<1x8x8x128xf32>
    %358 = vector.shape_cast %318 : vector<8x8x128xf32> to vector<1x8x8x128xf32>
    %359 = vector.shape_cast %333 : vector<8x8x128xf32> to vector<1x8x8x128xf32>
    %360 = vector.shape_cast %348 : vector<8x8x128xf32> to vector<1x8x8x128xf32>
    %361 = tpu.concatenate %357, %358, %359, %360 in 0 : vector<1x8x8x128xf32>, vector<1x8x8x128xf32>, vector<1x8x8x128xf32>, vector<1x8x8x128xf32> -> vector<4x8x8x128xf32>
    %362 = arith.truncf %361 : vector<4x8x8x128xf32> to vector<4x8x8x128xbf16>
    %363 = vector.shape_cast %362 : vector<4x8x8x128xbf16> to vector<256x128xbf16>
    %c0_83 = arith.constant 0 : index
    %c0_84 = arith.constant 0 : index
    %c0_85 = arith.constant 0 : index
    %364 = vector.load %arg4[%c0_83, %c0_84, %c0_85] : memref<1x128x128xbf16, #tpu.memory_space<vmem>>, vector<1x128x128xbf16>
    %365 = vector.shape_cast %364 : vector<1x128x128xbf16> to vector<128x128xbf16>
    %cst_86 = arith.constant dense<0.000000e+00> : vector<256x128xf32>
    %366 = tpu.matmul %363, %365, %cst_86 {dimension_numbers = #tpu.dot_dimension_numbers<[1], [0], [0], [1], [0, 0, 1, 1], [], []>} : vector<256x128xbf16>, vector<128x128xbf16>, vector<256x128xf32> -> vector<256x128xf32>
    %367 = vector.shape_cast %366 : vector<256x128xf32> to vector<4x8x8x128xf32>
    %c0_87 = arith.constant 0 : index
    %c0_88 = arith.constant 0 : index
    %c0_89 = arith.constant 0 : index
    %368 = vector.load %arg7[%c0_87, %c0_88, %c0_89] : memref<1x1x128xf32, #tpu.memory_space<vmem>>, vector<1x1x128xf32>
    %369 = vector.shape_cast %368 : vector<1x1x128xf32> to vector<1x1x1x128xf32>
    %370 = vector.broadcast %369 : vector<1x1x1x128xf32> to vector<4x8x8x128xf32>
    %371 = arith.addf %367, %370 : vector<4x8x8x128xf32>
    %372 = vector.extract_strided_slice %371 {offsets = [0, 0, 0, 0], sizes = [1, 8, 8, 128], strides = [1, 1, 1, 1]} : vector<4x8x8x128xf32> to vector<1x8x8x128xf32>
    %373 = vector.shape_cast %372 : vector<1x8x8x128xf32> to vector<8x8x128xf32>
    %374 = vector.extract_strided_slice %371 {offsets = [1, 0, 0, 0], sizes = [1, 8, 8, 128], strides = [1, 1, 1, 1]} : vector<4x8x8x128xf32> to vector<1x8x8x128xf32>
    %375 = vector.shape_cast %374 : vector<1x8x8x128xf32> to vector<8x8x128xf32>
    %376 = tpu.concatenate %373, %375 in 2 : vector<8x8x128xf32>, vector<8x8x128xf32> -> vector<8x8x256xf32>
    %c0_90 = arith.constant 0 : index
    %c0_91 = arith.constant 0 : index
    %c0_92 = arith.constant 0 : index
    %c0_93 = arith.constant 0 : index
    %c0_94 = arith.constant 0 : index
    %377 = vector.load %arg11[%c0_90, %c0_91, %c0_92, %c0_93, %c0_94] : memref<1x8x2x8x256xf32, #tpu.memory_space<vmem>>, vector<1x8x1x8x256xf32>
    %378 = vector.shape_cast %377 : vector<1x8x1x8x256xf32> to vector<8x8x256xf32>
    %379 = vector.shape_cast %376 : vector<8x8x256xf32> to vector<1x8x1x8x256xf32>
    tpu.vector_store %arg11[%c0_90, %c0_91, %c0_92, %c0_93, %c0_94], %379 {strides = array<i32>} : memref<1x8x2x8x256xf32, #tpu.memory_space<vmem>>, vector<1x8x1x8x256xf32>,
    %380 = vector.extract_strided_slice %371 {offsets = [2, 0, 0, 0], sizes = [1, 8, 8, 128], strides = [1, 1, 1, 1]} : vector<4x8x8x128xf32> to vector<1x8x8x128xf32>
    %381 = vector.shape_cast %380 : vector<1x8x8x128xf32> to vector<8x8x128xf32>
    %382 = vector.extract_strided_slice %371 {offsets = [3, 0, 0, 0], sizes = [1, 8, 8, 128], strides = [1, 1, 1, 1]} : vector<4x8x8x128xf32> to vector<1x8x8x128xf32>
    %383 = vector.shape_cast %382 : vector<1x8x8x128xf32> to vector<8x8x128xf32>
    %384 = tpu.concatenate %381, %383 in 2 : vector<8x8x128xf32>, vector<8x8x128xf32> -> vector<8x8x256xf32>
    %c0_95 = arith.constant 0 : index
    %c0_96 = arith.constant 0 : index
    %c1_97 = arith.constant 1 : index
    %c0_98 = arith.constant 0 : index
    %c0_99 = arith.constant 0 : index
    %385 = vector.load %arg11[%c0_95, %c0_96, %c1_97, %c0_98, %c0_99] : memref<1x8x2x8x256xf32, #tpu.memory_space<vmem>>, vector<1x8x1x8x256xf32>
    %386 = vector.shape_cast %385 : vector<1x8x1x8x256xf32> to vector<8x8x256xf32>
    %387 = vector.shape_cast %384 : vector<8x8x256xf32> to vector<1x8x1x8x256xf32>
    tpu.vector_store %arg11[%c0_95, %c0_96, %c1_97, %c0_98, %c0_99], %387 {strides = array<i32>} : memref<1x8x2x8x256xf32, #tpu.memory_space<vmem>>, vector<1x8x1x8x256xf32>,
    return
  }
  func.func @transform_0(%arg0: i32) -> (i32, i32, i32, i32) {
    %c0_i32 = arith.constant 0 : i32
    %c0_i32_0 = arith.constant 0 : i32
    %c0_i32_1 = arith.constant 0 : i32
    %c0_i32_2 = arith.constant 0 : i32
    return %arg0, %c0_i32, %c0_i32_0, %c0_i32_1 : i32, i32, i32, i32
  }
  func.func @transform_1(%arg0: i32) -> (i32, i32, i32) {
    %c0_i32 = arith.constant 0 : i32
    %c0_i32_0 = arith.constant 0 : i32
    %c0_i32_1 = arith.constant 0 : i32
    return %arg0, %c0_i32, %c0_i32_0 : i32, i32, i32
  }
  func.func @transform_2(%arg0: i32) -> (i32, i32, i32) {
    %c0_i32 = arith.constant 0 : i32
    %c0_i32_0 = arith.constant 0 : i32
    %c0_i32_1 = arith.constant 0 : i32
    return %arg0, %c0_i32, %c0_i32_0 : i32, i32, i32
  }
  func.func @transform_3(%arg0: i32) -> (i32, i32, i32) {
    %c0_i32 = arith.constant 0 : i32
    %c0_i32_0 = arith.constant 0 : i32
    %c0_i32_1 = arith.constant 0 : i32
    return %arg0, %c0_i32, %c0_i32_0 : i32, i32, i32
  }
  func.func @transform_4(%arg0: i32) -> (i32, i32, i32) {
    %c0_i32 = arith.constant 0 : i32
    %c0_i32_0 = arith.constant 0 : i32
    %c0_i32_1 = arith.constant 0 : i32
    %c0_i32_2 = arith.constant 0 : i32
    return %c0_i32, %c0_i32_0, %c0_i32_1 : i32, i32, i32
  }
  func.func @transform_5(%arg0: i32) -> (i32, i32, i32) {
    %c0_i32 = arith.constant 0 : i32
    %c0_i32_0 = arith.constant 0 : i32
    %c0_i32_1 = arith.constant 0 : i32
    %c0_i32_2 = arith.constant 0 : i32
    return %c0_i32, %c0_i32_0, %c0_i32_1 : i32, i32, i32
  }
  func.func @transform_6(%arg0: i32) -> (i32, i32, i32) {
    %c0_i32 = arith.constant 0 : i32
    %c0_i32_0 = arith.constant 0 : i32
    %c0_i32_1 = arith.constant 0 : i32
    %c0_i32_2 = arith.constant 0 : i32
    return %c0_i32, %c0_i32_0, %c0_i32_1 : i32, i32, i32
  }
  func.func @transform_7(%arg0: i32) -> (i32, i32, i32, i32) {
    %c0_i32 = arith.constant 0 : i32
    %c0_i32_0 = arith.constant 0 : i32
    %c0_i32_1 = arith.constant 0 : i32
    %c0_i32_2 = arith.constant 0 : i32
    return %arg0, %c0_i32, %c0_i32_0, %c0_i32_1 : i32, i32, i32, i32
  }
  func.func @transform_8(%arg0: i32) -> (i32, i32, i32, i32) {
    %c0_i32 = arith.constant 0 : i32
    %c0_i32_0 = arith.constant 0 : i32
    %c0_i32_1 = arith.constant 0 : i32
    %c0_i32_2 = arith.constant 0 : i32
    return %arg0, %c0_i32, %c0_i32_0, %c0_i32_1 : i32, i32, i32, i32
  }
  func.func @transform_9(%arg0: i32) -> (i32, i32, i32, i32, i32) {
    %c0_i32 = arith.constant 0 : i32
    %c0_i32_0 = arith.constant 0 : i32
    %c0_i32_1 = arith.constant 0 : i32
    %c0_i32_2 = arith.constant 0 : i32
    %c0_i32_3 = arith.constant 0 : i32
    return %arg0, %c0_i32, %c0_i32_0, %c0_i32_1, %c0_i32_2 : i32, i32, i32, i32, i32
  }
  func.func @transform_10(%arg0: i32) -> (i32, i32, i32, i32, i32) {
    %c0_i32 = arith.constant 0 : i32
    %c0_i32_0 = arith.constant 0 : i32
    %c0_i32_1 = arith.constant 0 : i32
    %c0_i32_2 = arith.constant 0 : i32
    %c0_i32_3 = arith.constant 0 : i32
    return %arg0, %c0_i32, %c0_i32_0, %c0_i32_1, %c0_i32_2 : i32, i32, i32, i32, i32
  }
}

</mosaic_0001>

<bundles_post_ra>
// kernel: mobile_synthesis_block.1
= control target key start
LH: loop header
LB: loop body
LE: loop exit
PB: predicated region body
PF: predicated region fallthrough
CT: control target
= control target key end

     0   :  { %s8281_s13 = smov 0   ;;  %s11558_s0 = inlined_call_operand.vmem [shape: bf16[2,8,8,512], index: 0, kind: input, shape index: {}]   ;;  %s11559_s1 = inlined_call_operand.vmem [shape: bf16[2,1152,128], index: 1, kind: input, shape index: {}]   ;;  %s11560_s2 = inlined_call_operand.vmem [shape: bf16[2,1152,128], index: 2, kind: input, shape index: {}]   ;;  %s11561_s3 = inlined_call_operand.vmem [shape: bf16[2,128,128], index: 3, kind: input, shape index: {}]   ;;  %s11562_s4 = inlined_call_operand.vmem [shape: f32[1,1,128], index: 4, kind: input, shape index: {}]   ;;  %s11563_s5 = inlined_call_operand.vmem [shape: f32[1,1,128], index: 5, kind: input, shape index: {}]   ;;  %s11564_s6 = inlined_call_operand.vmem [shape: f32[1,1,128], index: 6, kind: input, shape index: {}]   ;;  %s11565_s7 = inlined_call_operand.vmem [shape: f32[2,8,8,4], index: 7, kind: input, shape index: {}]   ;;  %s11566_s8 = inlined_call_operand.vmem [shape: f32[2,8,8,4], index: 8, kind: input, shape index: {}]   ;;  %s11567_s9 = inlined_call_operand.vmem [shape: f32[2,8,2,8,256], index: 9, kind: output, shape index: {0}]   ;;  %s11568_s10 = inlined_call_operand.vmem [shape: f32[2,8,2,8,256], index: 10, kind: output, shape index: {1}]  }
   0x1 LB: > { %s6514_s14 = sadd.s32 4294967295, %s8220_s13   ;;  %p6518_p0 = scmp.ge.s32.totalorder %s8220_s13, 1  ;;  %s8220_s13 = sphi %s8281_s13, %s21_s13  }
   0x2   : > { %p365_p1 = scmp.lt.s32.totalorder %s8220_s13, 3 }
   0x4   : > { %p366_p2 = pnand %p6518_p0, %p365_p1 }
   0x6   : > { %369 = sbr.rel (%p366_p2) target bundleno = 1375 (0x55f), region = 56 }
   0xb   : > { %p433_p3 = scmp.lt.s32.totalorder %s6514_s14, 1  ;;  %vm946_vm0 = vcmask 1040384   ;;  %vm947_vm1 = vsmask.f32 256  ;;  %vm982_vm2 = vcmask 1044480   ;;  %v11569_v3 = vmov 0  }
   0xc   : > { %vm983_vm3 = vsmask.f32 4352  ;;  %vm8298_vm4 = vmand %vm946_vm0, %vm947_vm1  ;;  %v741_v4 = vrot.slane %v11569_v3, 7 }
   0xd   : > { %s11859_s14 = smov (!%p433_p3, %s6514_s14), 1  ;;  %vm8312_vm5 = vmand %vm982_vm2, %vm983_vm3 }
   0xe   : > { %s8016_s15 = smul.u32 576, %s11859_s14  ;;  %s6866_s16 = sshll.u32 %s11859_s14, 7  ;;  %v957_v16 = vsel %vm8298_vm4, 0, %v741_v4 }
   0xf   : > { %s8296_s19 = scalar_lea.vmem %s11558_s0, %s6866_s16  ;;  %v8325_v23 = vsel %vm8312_vm5, %v957_v16, 0  ;;  %s9058_s23 = sshll.u32 %s11859_s14, 6 }
  0x10   : > { %s8307_s22 = scalar_lea.vmem %s11559_s1, %s8016_s15  ;;  %v474_v1 = vld [vmem:[%s8296_s19] sm:$0xff]  ;;  %v475_v2 = vld [vmem:[%s8296_s19 + $0x8] sm:$0xff]  ;;  %11634 = vst [vmem:[#allocation2_spill] sm:$0xff] %v8325_v23  ;;  %v476_v24 = vld [vmem:[%s8296_s19 + $0x10] sm:$0xff]  ;;  %v1165_v31 = vshll.u32 %v8325_v23, 16  ;;  %v1163_v34 = vshrl.u32 %v8325_v23, 16  ;;  %s9067_s26 = scalar_lea.vmem %s11565_s7, %s9058_s23 }
  0x11   : > { %v8061_v6 = vld [vmem:[%s8307_s22 + $0x78] sm:$0xff]   ;;  %v490_v7 = vunpack.c.l.bf16 %v474_v1  ;;  %v491_v8 = vunpack.c.h.bf16 %v474_v1  ;;  %v492_v9 = vunpack.c.l.bf16 %v475_v2  ;;  %v8063_v11 = vld [vmem:[%s8307_s22 + $0x70] sm:$0xff]   ;;  %v493_v12 = vunpack.c.h.bf16 %v475_v2  ;;  %v8065_v17 = vld [vmem:[%s8307_s22 + $0x68] sm:$0xff]   ;;  %s9087_s29 = scalar_lea.vmem %s11561_s3, %s9058_s23  ;;  %s9324_s12 = scalar_lea.vmem %s11560_s2, %s8016_s15 }
  0x12   : > { %v8062_v10 = vld [vmem:[%s8307_s22 + $0x38] sm:$0xff]   ;;  %6888 = vmatprep.subr.bf16.mxu0 %v8061_v6  ;;  %8000 = vmatprep.subr.bf16.mxu1 %v8061_v6  ;;  %v8064_v15 = vld [vmem:[%s8307_s22 + $0x30] sm:$0xff]   ;;  %v8066_v27 = vld [vmem:[%s8307_s22 + $0x28] sm:$0xff]   ;;  %v494_v37 = vunpack.c.l.bf16 %v476_v24  ;;  %v495_v38 = vunpack.c.h.bf16 %v476_v24  ;;  %v1167_v45 = vrot.slane %v1165_v31, 1  ;;  %s10731_s21 = scalar_lea.vmem %s11566_s8, %s9058_s23  ;;  %s6870_s24 = sshll.u32 %s11859_s14, 8 }
  0x13   : > { %v522_v13 = vadd.f32 %v491_v8, %v490_v7  ;;  %v554_v14 = vsub.f32 %v490_v7, %v491_v8  ;;  %6889 = vmatpush3.bf16.msra.mxu0 %v8062_v10  ;;  %8008 = vmatpush3.bf16.msra.mxu1 %v8062_v10  ;;  %v8067_v29 = vld [vmem:[%s8307_s22 + $0x60] sm:$0xff]   ;;  %v8069_v41 = vld [vmem:[%s8307_s22 + $0x58] sm:$0xff]   ;;  %v8071_v49 = vld [vmem:[%s8307_s22 + $0x50] sm:$0xff]   ;;  %s11293_s27 = scalar_lea.vmem %s11567_s9, %s6870_s24 }
  0x14   : > { %6890 = vmatprep.subr.bf16.mxu0 %v8063_v11  ;;  %8001 = vmatprep.subr.bf16.mxu1 %v8063_v11  ;;  %v8068_v36 = vld [vmem:[%s8307_s22 + $0x20] sm:$0xff]   ;;  %v8070_v47 = vld [vmem:[%s8307_s22 + $0x18] sm:$0xff]   ;;  %v8336_v50 = vsub.f32 %v494_v37, %v495_v38  ;;  %v8338_v52 = vadd.f32 %v495_v38, %v494_v37  ;;  %v8347_v63 = vor.u32 %v1167_v45, %v1163_v34  ;;  %v8072_v4 = vld [vmem:[%s8307_s22 + $0x10] sm:$0xff]  }
  0x15   : > { %v586_v18 = vsub.f32 %v522_v13, %v492_v9  ;;  %v562_v19 = vadd.f32 %v554_v14, %v492_v9  ;;  %v610_v20 = vsub.f32 %v554_v14, %v492_v9  ;;  %v530_v21 = vadd.f32 %v522_v13, %v492_v9  ;;  %v477_v54 = vld [vmem:[%s8296_s19 + $0x18] sm:$0xff]  ;;  %v8073_v10 = vld [vmem:[%s8307_s22 + $0x48] sm:$0xff]  }
  0x16   : > { %v8341_v58 = vunpack.c.l.bf16 %v477_v54  ;;  %v8343_v59 = vunpack.c.h.bf16 %v477_v54  ;;  %11635 = vst [vmem:[#allocation3_spill] sm:$0xff] %v8347_v63  ;;  %v8077_v45 = vld [vmem:[%s8307_s22 + $0xf8] sm:$0xff]  }
  0x17   : > { %v594_v22 = vsub.f32 %v586_v18, %v493_v12  ;;  %v570_v25 = vsub.f32 %v562_v19, %v493_v12  ;;  %v618_v26 = vadd.f32 %v610_v20, %v493_v12  ;;  %6891 = vmatpush3.bf16.msra.mxu0 %v8064_v15  ;;  %8009 = vmatpush3.bf16.msra.mxu1 %v8064_v15  ;;  %v8074_v15 = vld [vmem:[%s8307_s22 + $0x8] sm:$0xff]   ;;  %v8075_v20 = vld [vmem:[%s8307_s22 + $0x40] sm:$0xff]  }
  0x18   : > { %v538_v28 = vadd.f32 %v530_v21, %v493_v12  ;;  %6892 = vmatprep.subr.bf16.mxu0 %v8065_v17  ;;  %8002 = vmatprep.subr.bf16.mxu1 %v8065_v17  ;;  %v563_v7 = vadd.f32 %v8336_v50, %v8341_v58  ;;  %v531_v9 = vadd.f32 %v8338_v52, %v8341_v58 }
  0x19   : > { %v602_v30 = vmul.f32 0.5, %v594_v22  ;;  %v578_v32 = vmul.f32 0.5, %v570_v25  ;;  %v626_v35 = vmul.f32 0.5, %v618_v26  ;;  %v587_v19 = vsub.f32 %v8338_v52, %v8341_v58  ;;  %v478_v26 = vld [vmem:[%s8296_s19 + $0x20] sm:$0xff]  ;;  %v8397_v52 = vld [vmem:[%s8296_s19 + $0x30] sm:$0xff] }
  0x1a   : > { %v546_v40 = vmul.f32 0.5, %v538_v28  ;;  %v571_v16 = vsub.f32 %v563_v7, %v8343_v59  ;;  %v539_v18 = vadd.f32 %v531_v9, %v8343_v59  ;;  %v503_v7 = vunpack.c.h.bf16 %v8397_v52  ;;  %v8080_v9 = vld [vmem:[%s8307_s22 + $0x138] sm:$0xff]  }
  0x1b   : > { %v666_v33 = vpack.c.bf16 %v602_v30, %v602_v30  ;;  %6893 = vmatpush3.bf16.msra.mxu0 %v8066_v27  ;;  %8010 = vmatpush3.bf16.msra.mxu1 %v8066_v27  ;;  %v658_v39 = vpack.c.bf16 %v578_v32, %v578_v32  ;;  %v674_v43 = vpack.c.bf16 %v626_v35, %v626_v35  ;;  %v8076_v35 = vld [vmem:[%s8307_s22] sm:$0xff]  }
  0x1c   : > { %6894 = vmatprep.subr.bf16.mxu0 %v8067_v29  ;;  %8003 = vmatprep.subr.bf16.mxu1 %v8067_v29  ;;  %v650_v46 = vpack.c.bf16 %v546_v40, %v546_v40  ;;  %v579_v27 = vmul.f32 0.5, %v571_v16  ;;  %v498_v40 = vunpack.c.l.bf16 %v478_v26 }
  0x1d   : > { %v802_v42 = vshrl.u32 %v666_v33, 16  ;;  %v805_v44 = vshll.u32 %v666_v33, 16  ;;  %v746_v51 = vshrl.u32 %v658_v39, 16  ;;  %v749_v55 = vshll.u32 %v658_v39, 16  ;;  %v479_v39 = vld [vmem:[%s8296_s19 + $0x28] sm:$0xff] }
  0x1e   : > { %v858_v56 = vshrl.u32 %v674_v43, 16  ;;  %v861_v57 = vshll.u32 %v674_v43, 16  ;;  %v683_v61 = vshrl.u32 %v650_v46, 16  ;;  %v686_v2 = vshll.u32 %v650_v46, 16 }
  0x1f   : > { %v804_v48 = vrot.slane %v802_v42, 7  ;;  %6895 = vmatpush3.bf16.msra.mxu0 %v8068_v36  ;;  %8011 = vmatpush3.bf16.msra.mxu1 %v8068_v36  ;;  %v748_v60 = vrot.slane %v746_v51, 7  ;;  %v547_v33 = vmul.f32 0.5, %v539_v18  ;;  %v659_v36 = vpack.c.bf16 %v579_v27, %v579_v27 }
  0x20   : > { %6896 = vmatprep.subr.bf16.mxu0 %v8069_v41  ;;  %8004 = vmatprep.subr.bf16.mxu1 %v8069_v41  ;;  %v860_v1 = vrot.slane %v858_v56, 7  ;;  %v685_v14 = vrot.slane %v683_v61, 7  ;;  %v499_v51 = vunpack.c.h.bf16 %v478_v26  ;;  %v8399_v56 = vunpack.c.l.bf16 %v479_v39 }
  0x21   : > { %v807_v53 = vor.u32 %v805_v44, %v804_v48  ;;  %v751_v8 = vor.u32 %v749_v55, %v748_v60  ;;  %v651_v42 = vpack.c.bf16 %v547_v33, %v547_v33  ;;  %v753_v46 = vshrl.u32 %v659_v36, 16  ;;  %v8088_v33 = vld [vmem:[%s8307_s22 + $0x130] sm:$0xff]  }
  0x22   : > { %v863_v13 = vor.u32 %v861_v57, %v860_v1  ;;  %v688_v25 = vor.u32 %v686_v2, %v685_v14  ;;  %v481_v57 = vld [vmem:[%s8296_s19 + $0x38] sm:$0xff]  ;;  %v8403_v61 = vunpack.c.h.bf16 %v479_v39  ;;  %v595_v1 = vsub.f32 %v587_v19, %v8343_v59 }
  0x23   : > { %v966_v62 = vsel %vm8298_vm4, 0, %v807_v53  ;;  %6897 = vmatpush3.bf16.msra.mxu0 %v8070_v47  ;;  %8012 = vmatpush3.bf16.msra.mxu1 %v8070_v47  ;;  %v958_v17 = vsel %vm8298_vm4, 0, %v751_v8  ;;  %v756_v47 = vshll.u32 %v659_v36, 16  ;;  %v690_v53 = vshrl.u32 %v651_v42, 16 }
  0x24   : > { %v1002_v6 = vsel %vm8312_vm5, %v966_v62, 0  ;;  %6898 = vmatprep.subr.bf16.mxu0 %v8071_v49  ;;  %8005 = vmatprep.subr.bf16.mxu1 %v8071_v49  ;;  %v8367_v22 = vsel %vm8312_vm5, %v958_v17, 0  ;;  %v974_v24 = vsel %vm8298_vm4, 0, %v863_v13  ;;  %v949_v34 = vsel %vm8298_vm4, 0, %v688_v25  ;;  %v8078_v49 = vld [vmem:[%s8307_s22 + $0x178] sm:$0xff]   ;;  %v8086_v17 = vld [vmem:[%s8307_s22 + $0x170] sm:$0xff]  }
  0x25   : > { %v1170_v11 = vshrl.u32 %v1002_v6, 16  ;;  %v1172_v12 = vshll.u32 %v1002_v6, 16  ;;  %v1324_v28 = vshrl.u32 %v8367_v22, 16  ;;  %v1326_v29 = vshll.u32 %v8367_v22, 16 }
  0x26   : > { %v8376_v30 = vsel %vm8312_vm5, %v974_v24, 0  ;;  %v985_v38 = vsel %vm8312_vm5, %v949_v34, 0  ;;  %v693_v54 = vshll.u32 %v651_v42, 16  ;;  %v755_v60 = vrot.slane %v753_v46, 7 }
  0x27   : > { %v1174_v21 = vrot.slane %v1172_v12, 1  ;;  %6899 = vmatpush3.bf16.msra.mxu0 %v8072_v4  ;;  %8013 = vmatpush3.bf16.msra.mxu1 %v8072_v4  ;;  %v6533_v32 = vcombine.low %v8325_v23, %v8376_v30  ;;  %v1328_v37 = vrot.slane %v1326_v29, 1  ;;  %v1268_v43 = vshrl.u32 %v985_v38, 16 }
  0x28   : > { %6900 = vmatprep.subr.bf16.mxu0 %v8073_v10  ;;  %8006 = vmatprep.subr.bf16.mxu1 %v8073_v10  ;;  %v1270_v44 = vshll.u32 %v985_v38, 16  ;;  %v8405_v62 = vadd.f32 %v499_v51, %v498_v40  ;;  %v692_v2 = vrot.slane %v690_v53, 7  ;;  %v502_v6 = vunpack.c.l.bf16 %v8397_v52 }
  0x29   : > { %v8378_v31 = vor.u32 %v1174_v21, %v1170_v11  ;;  %v8393_v48 = vor.u32 %v1328_v37, %v1324_v28  ;;  %v758_v8 = vor.u32 %v756_v47, %v755_v60  ;;  %v603_v11 = vmul.f32 0.5, %v595_v1  ;;  %v8079_v1 = vld [vmem:[%s8307_s22 + $0xb8] sm:$0xff]  }
  0x2a   : > { %v1272_v55 = vrot.slane %v1270_v44, 1  ;;  %v588_v10 = vsub.f32 %v8405_v62, %v8399_v56  ;;  %v8415_v12 = vunpack.c.l.bf16 %v481_v57  ;;  %v695_v13 = vor.u32 %v693_v54, %v692_v2  ;;  %v8081_v2 = vld [vmem:[%s8307_s22 + $0xf0] sm:$0xff]  }
  0x2b   : > { %v8390_v41 = vcombine.low %v8347_v63, %v8378_v31  ;;  %6901 = vmatpush3.bf16.msra.mxu0 %v8074_v15  ;;  %8014 = vmatpush3.bf16.msra.mxu1 %v8074_v15  ;;  %v8417_v14 = vunpack.c.h.bf16 %v481_v57  ;;  %v556_v15 = vsub.f32 %v498_v40, %v499_v51  ;;  %v8423_v16 = vsub.f32 %v502_v6, %v503_v7 }
  0x2c   : > { %6902 = vmatprep.subr.bf16.mxu0 %v8075_v20  ;;  %8007 = vmatprep.subr.bf16.mxu1 %v8075_v20  ;;  %v8408_v4 = vor.u32 %v1272_v55, %v1268_v43  ;;  %v959_v18 = vsel %vm8298_vm4, 0, %v758_v8  ;;  %v596_v19 = vsub.f32 %v588_v10, %v8403_v61  ;;  %v667_v20 = vpack.c.bf16 %v603_v11, %v603_v11 }
  0x2d   : > { %2188 = vmatprep.mubr.bf16.mxu0 %v8390_v41  ;;  %v611_v21 = vsub.f32 %v8336_v50, %v8341_v58  ;;  %v8433_v24 = vsel %vm8312_vm5, %v959_v18, 0  ;;  %v950_v25 = vsel %vm8298_vm4, 0, %v695_v13  ;;  %v564_v26 = vadd.f32 %v556_v15, %v8399_v56 }
  0x2e   : > { %11636 = vst [vmem:[#allocation4_spill] sm:$0xff] %v8433_v24  ;;  %v565_v27 = vadd.f32 %v8423_v16, %v8415_v12  ;;  %v1331_v28 = vshrl.u32 %v8433_v24, 16  ;;  %v1333_v29 = vshll.u32 %v8433_v24, 16  ;;  %v986_v50 = vsel %vm8312_vm5, %v950_v25, 0 }
  0x2f   : > { %6903 = vmatpush3.bf16.msra.mxu0 %v8076_v35  ;;  %8015 = vmatpush3.bf16.msra.mxu1 %v8076_v35  ;;  %v604_v58 = vmul.f32 0.5, %v596_v19  ;;  %v1275_v34 = vshrl.u32 %v986_v50, 16  ;;  %v809_v35 = vshrl.u32 %v667_v20, 16  ;;  %v812_v36 = vshll.u32 %v667_v20, 16  ;;  %v8094_v20 = vld [vmem:[%s8307_s22 + $0x168] sm:$0xff]  }
  0x30   : > { %7000 = vmatprep.subr.bf16.mxu1 %v8077_v45  ;;  %7112 = vmatprep.subr.bf16.mxu0 %v8078_v49  ;;  %v1335_v37 = vrot.slane %v1333_v29, 1  ;;  %v572_v39 = vsub.f32 %v564_v26, %v8403_v61  ;;  %v573_v40 = vsub.f32 %v565_v27, %v8417_v14  ;;  %v612_v44 = vsub.f32 %v556_v15, %v8399_v56 }
  0x31   : > { %v668_v38 = vpack.c.bf16 %v604_v58, %v604_v58  ;;  %v811_v43 = vrot.slane %v809_v35, 7  ;;  %v619_v45 = vadd.f32 %v611_v21, %v8343_v59 }
  0x32   : > { %2189 = vmatmul.mubr.bf16.vlgmr.msra.gmra.mxu0 %v6533_v32  ;;  %v1277_v32 = vshll.u32 %v986_v50, 16  ;;  %v8449_v46 = vor.u32 %v1335_v37, %v1331_v28  ;;  %v580_v51 = vmul.f32 0.5, %v572_v39  ;;  %v581_v55 = vmul.f32 0.5, %v573_v40  ;;  %v8082_v28 = vld [vmem:[%s8307_s22 + $0xb0] sm:$0xff]  }
  0x33   : > { %7113 = vmatpush3.bf16.msra.mxu0 %v8080_v9  ;;  %v816_v47 = vshrl.u32 %v668_v38, 16  ;;  %v819_v49 = vshll.u32 %v668_v38, 16  ;;  %v814_v54 = vor.u32 %v812_v36, %v811_v43  ;;  %v620_v57 = vadd.f32 %v612_v44, %v8403_v61  ;;  %v8083_v38 = vld [vmem:[%s8307_s22 + $0xe8] sm:$0xff]  }
  0x34   : > { %7114 = vmatprep.subr.bf16.mxu0 %v8086_v17  ;;  %v1279_v42 = vrot.slane %v1277_v32, 1  ;;  %11637 = vst [vmem:[#allocation5_spill] sm:$0xff] %v8449_v46  ;;  %v8456_v60 = vcombine.low %v8393_v48, %v8449_v46  ;;  %v660_v8 = vpack.c.bf16 %v580_v51, %v580_v51  ;;  %v627_v9 = vmul.f32 0.5, %v619_v45  ;;  %v8084_v44 = vld [vmem:[%s8307_s22 + $0xa8] sm:$0xff]  }
  0x35   : > { %v818_v59 = vrot.slane %v816_v47, 7  ;;  %v967_v11 = vsel %vm8298_vm4, 0, %v814_v54  ;;  %v661_v13 = vpack.c.bf16 %v581_v55, %v581_v55  ;;  %v628_v15 = vmul.f32 0.5, %v620_v57  ;;  %v8085_v54 = vld [vmem:[%s8307_s22 + $0xe0] sm:$0xff]  }
  0x36   : > { %v8451_v53 = vor.u32 %v1279_v42, %v1275_v34  ;;  %2284 = vmatprep.mubr.bf16.mxu1 %v8456_v60  ;;  %v1003_v48 = vsel %vm8312_vm5, %v967_v11, 0  ;;  %v760_v18 = vshrl.u32 %v660_v8, 16  ;;  %v763_v19 = vshll.u32 %v660_v8, 16  ;;  %v8096_v34 = vld [vmem:[%s8307_s22 + $0x128] sm:$0xff]   ;;  %v8491_v57 = vld [vmem:[%s8296_s19 + $0x40] sm:$0xff] }
  0x37   : > { %7115 = vmatpush3.bf16.msra.mxu0 %v8088_v33  ;;  %v821_v17 = vor.u32 %v819_v49, %v818_v59  ;;  %v1177_v21 = vshrl.u32 %v1003_v48, 16  ;;  %v1179_v25 = vshll.u32 %v1003_v48, 16  ;;  %v767_v26 = vshrl.u32 %v661_v13, 16  ;;  %v8087_v48 = vld [vmem:[%s8307_s22 + $0xa0] sm:$0xff]  }
  0x38   : > { %11638 = vst [vmem:[#allocation6_spill] sm:$0xff] %v8451_v53  ;;  %v8462_v10 = vcombine.low %v8408_v4, %v8451_v53  ;;  %v770_v27 = vshll.u32 %v661_v13, 16  ;;  %v762_v50 = vrot.slane %v760_v18, 7  ;;  %v675_v58 = vpack.c.bf16 %v627_v9, %v627_v9  ;;  %7116 = vmatprep.subr.bf16.mxu0 %v8094_v20  ;;  %v8099_v9 = vld [vmem:[%s8307_s22 + $0x160] sm:$0xff]  }
  0x39   : > { %v968_v29 = vsel %vm8298_vm4, 0, %v821_v17  ;;  %v676_v33 = vpack.c.bf16 %v628_v15, %v628_v15  ;;  %v1181_v35 = vrot.slane %v1179_v25, 1  ;;  %v769_v36 = vrot.slane %v767_v26, 7  ;;  %v8100_v18 = vld [vmem:[%s8307_s22 + $0x120] sm:$0xff]  }
  0x3a   : > { %2285 = vmatmul.mubr.bf16.vlgmr.msra.gmra.mxu1 %v8462_v10  ;;  %v1004_v32 = vsel %vm8312_vm5, %v968_v29, 0  ;;  %v8481_v37 = vadd.f32 %v503_v7, %v502_v6  ;;  %v765_v42 = vor.u32 %v763_v19, %v762_v50  ;;  %v865_v43 = vshrl.u32 %v675_v58, 16  ;;  %v8523_v29 = vld [vmem:[%s8296_s19 + $0x50] sm:$0xff] }
  0x3b   : > { %7001 = vmatpush3.bf16.msra.mxu1 %v8079_v1  ;;  %v1184_v39 = vshrl.u32 %v1004_v32, 16  ;;  %v1186_v40 = vshll.u32 %v1004_v32, 16  ;;  %7117 = vmatpush3.bf16.msra.mxu0 %v8096_v34  ;;  %v8485_v45 = vor.u32 %v1181_v35, %v1177_v21  ;;  %v772_v47 = vor.u32 %v770_v27, %v769_v36  ;;  %v483_v21 = vld [vmem:[%s8296_s19 + $0x48] sm:$0xff]  ;;  %v485_v32 = vld [vmem:[%s8296_s19 + $0x58] sm:$0xff] }
  0x3c   : > { %7002 = vmatprep.subr.bf16.mxu1 %v8081_v2  ;;  %v868_v49 = vshll.u32 %v675_v58, 16  ;;  %v872_v51 = vshrl.u32 %v676_v33, 16  ;;  %v960_v6 = vsel %vm8298_vm4, 0, %v765_v42  ;;  %v867_v7 = vrot.slane %v865_v43, 7  ;;  %7118 = vmatprep.subr.bf16.mxu0 %v8099_v9  ;;  %v8089_v35 = vld [vmem:[%s8307_s22 + $0xd8] sm:$0xff]   ;;  %v8105_v9 = vld [vmem:[%s8307_s22 + $0x150] sm:$0xff]  }
  0x3d   : > { %v1188_v52 = vrot.slane %v1186_v40, 1  ;;  %v875_v55 = vshll.u32 %v676_v33, 16  ;;  %v961_v1 = vsel %vm8298_vm4, 0, %v772_v47  ;;  %v8497_v2 = vsel %vm8312_vm5, %v960_v6, 0  ;;  %v8090_v40 = vld [vmem:[%s8307_s22 + $0x98] sm:$0xff]  }
  0x3e   : > { %v874_v59 = vrot.slane %v872_v51, 7  ;;  %v532_v8 = vadd.f32 %v8405_v62, %v8399_v56  ;;  %v8506_v13 = vsel %vm8312_vm5, %v961_v1, 0  ;;  %v1338_v15 = vshrl.u32 %v8497_v2, 16  ;;  %v8103_v51 = vld [vmem:[%s8307_s22 + $0x158] sm:$0xff]  }
  0x3f   : > { %7003 = vmatpush3.bf16.msra.mxu1 %v8082_v28  ;;  %v8502_v11 = vor.u32 %v1188_v52, %v1184_v39  ;;  %v1340_v17 = vshll.u32 %v8497_v2, 16  ;;  %v1345_v19 = vshrl.u32 %v8506_v13, 16  ;;  %v1347_v20 = vshll.u32 %v8506_v13, 16  ;;  %7119 = vmatpush3.bf16.msra.mxu0 %v8100_v18  ;;  %v8092_v18 = vld [vmem:[%s8307_s22 + $0x90] sm:$0xff]  }
  0x40   : > { %7004 = vmatprep.subr.bf16.mxu1 %v8083_v38  ;;  %v870_v56 = vor.u32 %v868_v49, %v867_v7  ;;  %v877_v62 = vor.u32 %v875_v55, %v874_v59  ;;  %v533_v27 = vadd.f32 %v8481_v37, %v8415_v12  ;;  %v540_v28 = vadd.f32 %v532_v8, %v8403_v61  ;;  %v8091_v49 = vld [vmem:[%s8307_s22 + $0xd0] sm:$0xff]   ;;  %v8104_v55 = vld [vmem:[%s8307_s22 + $0x118] sm:$0xff]  }
  0x41   : > { %v8517_v25 = vcombine.low %v8485_v45, %v8502_v11  ;;  %v1342_v26 = vrot.slane %v1340_v17, 1  ;;  %v1349_v50 = vrot.slane %v1347_v20, 1  ;;  %v506_v34 = vunpack.c.l.bf16 %v8491_v57  ;;  %7120 = vmatprep.subr.bf16.mxu0 %v8103_v51 }
  0x42   : > { %v975_v58 = vsel %vm8298_vm4, 0, %v870_v56  ;;  %v976_v33 = vsel %vm8298_vm4, 0, %v877_v62  ;;  %v541_v39 = vadd.f32 %v533_v27, %v8417_v14  ;;  %v507_v47 = vunpack.c.h.bf16 %v8491_v57 }
  0x43   : > { %7005 = vmatpush3.bf16.msra.mxu1 %v8084_v44  ;;  %2196 = vmatprep.mubr.bf16.mxu0 %v8517_v25  ;;  %v8533_v61 = vor.u32 %v1342_v26, %v1338_v15  ;;  %v8537_v36 = vsel %vm8312_vm5, %v975_v58, 0  ;;  %v8541_v38 = vsel %vm8312_vm5, %v976_v33, 0  ;;  %v8545_v42 = vor.u32 %v1349_v50, %v1345_v19  ;;  %v8107_v50 = vld [vmem:[%s8307_s22 + $0x110] sm:$0xff]  }
  0x44   : > { %7006 = vmatprep.subr.bf16.mxu1 %v8085_v54  ;;  %v6542_v43 = vcombine.low %v8537_v36, %v8541_v38  ;;  %v548_v44 = vmul.f32 0.5, %v540_v28  ;;  %v549_v54 = vmul.f32 0.5, %v541_v39  ;;  %v8552_v52 = vunpack.c.l.bf16 %v483_v21  ;;  %7121 = vmatpush3.bf16.msra.mxu0 %v8104_v55  ;;  %v8093_v39 = vld [vmem:[%s8307_s22 + $0xc8] sm:$0xff]  }
  0x45   : > { %11639 = vst [vmem:[#allocation7_spill] sm:$0xff] %v8533_v61  ;;  %11640 = vst [vmem:[#allocation8_spill] sm:$0xff] %v8545_v42  ;;  %v8554_v6 = vunpack.c.h.bf16 %v483_v21  ;;  %v589_v7 = vsub.f32 %v8481_v37, %v8415_v12  ;;  %v8561_v1 = vcombine.low %v8533_v61, %v8545_v42  ;;  %v8563_v57 = vadd.f32 %v507_v47, %v506_v34 }
  0x46   : > { %2197 = vmatmul.mubr.bf16.gmra.mxu0 %v6542_v43  ;;  %v652_v59 = vpack.c.bf16 %v548_v44, %v548_v44  ;;  %v510_v8 = vunpack.c.l.bf16 %v8523_v29  ;;  %v653_v15 = vpack.c.bf16 %v549_v54, %v549_v54  ;;  %v8569_v37 = vunpack.c.l.bf16 %v485_v32  ;;  %7122 = vmatprep.subr.bf16.mxu0 %v8105_v9 }
  0x47   : > { %7007 = vmatpush3.bf16.msra.mxu1 %v8087_v48  ;;  %v597_v17 = vsub.f32 %v589_v7, %v8417_v14  ;;  %v511_v48 = vunpack.c.h.bf16 %v8523_v29  ;;  %2292 = vmatprep.mubr.bf16.mxu1 %v8561_v1  ;;  %v590_v56 = vsub.f32 %v8563_v57, %v8552_v52  ;;  %v8575_v62 = vunpack.c.h.bf16 %v485_v32 }
  0x48   : > { %7008 = vmatprep.subr.bf16.mxu1 %v8089_v35  ;;  %v697_v19 = vshrl.u32 %v652_v59, 16  ;;  %v700_v20 = vshll.u32 %v652_v59, 16  ;;  %v704_v21 = vshrl.u32 %v653_v15, 16  ;;  %v707_v26 = vshll.u32 %v653_v15, 16  ;;  %7123 = vmatpush3.bf16.msra.mxu0 %v8107_v50  ;;  %v8095_v15 = vld [vmem:[%s8307_s22 + $0x88] sm:$0xff]   ;;  %v8098_v50 = vld [vmem:[%s8307_s22 + $0x80] sm:$0xff]  }
  0x49   : > { %v605_v27 = vmul.f32 0.5, %v597_v17  ;;  %v558_v28 = vsub.f32 %v506_v34, %v507_v47  ;;  %v598_v33 = vsub.f32 %v590_v56, %v8554_v6  ;;  %v8583_v35 = vsub.f32 %v510_v8, %v511_v48  ;;  %v8109_v47 = vld [vmem:[%s8307_s22 + $0x148] sm:$0xff]   ;;  %v8097_v17 = vld [vmem:[%s8307_s22 + $0xc0] sm:$0xff]  }
  0x4a   : > { %v699_v58 = vrot.slane %v697_v19, 7  ;;  %v613_v32 = vsub.f32 %v8423_v16, %v8415_v12  ;;  %v706_v43 = vrot.slane %v704_v21, 7  ;;  %v8110_v12 = vld [vmem:[%s8307_s22 + $0x108] sm:$0xff]   ;;  %7124 = vmatprep.subr.bf16.mxu0 %v8109_v47  ;;  %v8113_v21 = vld [vmem:[%s8307_s22 + $0x140] sm:$0xff]  }
  0x4b   : > { %7009 = vmatpush3.bf16.msra.mxu1 %v8090_v40  ;;  %v669_v34 = vpack.c.bf16 %v605_v27, %v605_v27  ;;  %v566_v40 = vadd.f32 %v558_v28, %v8552_v52  ;;  %v614_v44 = vsub.f32 %v558_v28, %v8552_v52  ;;  %v606_v54 = vmul.f32 0.5, %v598_v33  ;;  %v8114_v47 = vld [vmem:[%s8307_s22 + $0x100] sm:$0xff]  }
  0x4c   : > { %7010 = vmatprep.subr.bf16.mxu1 %v8091_v49  ;;  %v702_v51 = vor.u32 %v700_v20, %v699_v58  ;;  %v567_v7 = vadd.f32 %v8583_v35, %v8569_v37  ;;  %v621_v55 = vadd.f32 %v613_v32, %v8417_v14  ;;  %v709_v16 = vor.u32 %v707_v26, %v706_v43 }
  0x4d   : > { %v823_v49 = vshrl.u32 %v669_v34, 16  ;;  %v826_v59 = vshll.u32 %v669_v34, 16  ;;  %v574_v9 = vsub.f32 %v566_v40, %v8554_v6  ;;  %v670_v20 = vpack.c.bf16 %v606_v54, %v606_v54  ;;  %7125 = vmatpush3.bf16.msra.mxu0 %v8110_v12 }
  0x4e   : > { %v951_v19 = vsel %vm8298_vm4, 0, %v702_v51  ;;  %v575_v56 = vsub.f32 %v567_v7, %v8575_v62  ;;  %v622_v14 = vadd.f32 %v614_v44, %v8554_v6  ;;  %v952_v26 = vsel %vm8298_vm4, 0, %v709_v16  ;;  %7126 = vmatprep.subr.bf16.mxu0 %v8113_v21 }
  0x4f   : > { %7011 = vmatpush3.bf16.msra.mxu1 %v8092_v18  ;;  %v987_v18 = vsel %vm8312_vm5, %v951_v19, 0  ;;  %v825_v27 = vrot.slane %v823_v49, 7  ;;  %v582_v28 = vmul.f32 0.5, %v574_v9  ;;  %v988_v58 = vsel %vm8312_vm5, %v952_v26, 0  ;;  %v8101_v49 = vld [vmem:[%s8307_s22 + $0x1f8] sm:$0xff]  }
  0x50   : > { %7012 = vmatprep.subr.bf16.mxu1 %v8093_v39  ;;  %v1282_v33 = vshrl.u32 %v987_v18, 16  ;;  %v1284_v32 = vshll.u32 %v987_v18, 16  ;;  %v830_v43 = vshrl.u32 %v670_v20, 16  ;;  %v1289_v39 = vshrl.u32 %v988_v58, 16 }
  0x51   : > { %v1291_v34 = vshll.u32 %v988_v58, 16  ;;  %v828_v40 = vor.u32 %v826_v59, %v825_v27  ;;  %v833_v44 = vshll.u32 %v670_v20, 16  ;;  %v583_v7 = vmul.f32 0.5, %v575_v56  ;;  %7127 = vmatpush3.bf16.msra.mxu0 %v8114_v47 }
  0x52   : > { %v1286_v51 = vrot.slane %v1284_v32, 1  ;;  %v832_v54 = vrot.slane %v830_v43, 7  ;;  %v662_v16 = vpack.c.bf16 %v582_v28, %v582_v28  ;;  %v629_v26 = vmul.f32 0.5, %v621_v55 }
  0x53   : > { %7013 = vmatpush3.bf16.msra.mxu1 %v8095_v15  ;;  %v1293_v9 = vrot.slane %v1291_v34, 1  ;;  %v969_v19 = vsel %vm8298_vm4, 0, %v828_v40  ;;  %v630_v18 = vmul.f32 0.5, %v622_v14  ;;  %v663_v15 = vpack.c.bf16 %v583_v7, %v583_v7 }
  0x54   : > { %7014 = vmatprep.subr.bf16.mxu1 %v8097_v17  ;;  %v8614_v12 = vor.u32 %v1286_v51, %v1282_v33  ;;  %v835_v58 = vor.u32 %v833_v44, %v832_v54  ;;  %v1005_v59 = vsel %vm8312_vm5, %v969_v19, 0  ;;  %v774_v17 = vshrl.u32 %v662_v16, 16 }
  0x55   : > { %v8618_v20 = vor.u32 %v1293_v9, %v1289_v39  ;;  %v1191_v56 = vshrl.u32 %v1005_v59, 16  ;;  %v1193_v21 = vshll.u32 %v1005_v59, 16  ;;  %v777_v28 = vshll.u32 %v662_v16, 16 }
  0x56   : > { %11641 = vst [vmem:[#allocation9_spill] sm:$0xff] %v8614_v12  ;;  %v970_v27 = vsel %vm8298_vm4, 0, %v835_v58  ;;  %v781_v55 = vshrl.u32 %v663_v15, 16  ;;  %v784_v14 = vshll.u32 %v663_v15, 16  ;;  %v776_v39 = vrot.slane %v774_v17, 7 }
  0x57   : > { %11642 = vst [vmem:[#allocation10_spill] sm:$0xff] %v8618_v20  ;;  %7015 = vmatpush3.bf16.msra.mxu1 %v8098_v50  ;;  %v8624_v33 = vcombine.low %v8614_v12, %v8618_v20  ;;  %v1006_v32 = vsel %vm8312_vm5, %v970_v27, 0  ;;  %v1195_v43 = vrot.slane %v1193_v21, 1  ;;  %v677_v50 = vpack.c.bf16 %v629_v26, %v629_v26  ;;  %v487_v27 = vld [vmem:[%s8296_s19 + $0x68] sm:$0xff] }
  0x58   : > { %7224 = vmatprep.subr.bf16.mxu1 %v8101_v49  ;;  %v1198_v34 = vshrl.u32 %v1006_v32, 16  ;;  %v1200_v40 = vshll.u32 %v1006_v32, 16  ;;  %v783_v44 = vrot.slane %v781_v55, 7  ;;  %v779_v51 = vor.u32 %v777_v28, %v776_v39  ;;  %v8656_v28 = vld [vmem:[%s8307_s22 + $0x238] sm:$0xff]  }
  0x59   : > { %2293 = vmatmul.mubr.bf16.gmra.mxu1 %v8624_v33  ;;  %v8629_v47 = vor.u32 %v1195_v43, %v1191_v56  ;;  %v678_v54 = vpack.c.bf16 %v630_v18, %v630_v18  ;;  %v527_v7 = vadd.f32 %v511_v48, %v510_v8  ;;  %v879_v9 = vshrl.u32 %v677_v50, 16  ;;  %v486_v56 = vld [vmem:[%s8296_s19 + $0x60] sm:$0xff]  ;;  %7856 = vmatprep.subr.bf16.mxu0 %v8656_v28 }
  0x5a   : > { %v1202_v16 = vrot.slane %v1200_v40, 1  ;;  %v786_v49 = vor.u32 %v784_v14, %v783_v44  ;;  %v882_v19 = vshll.u32 %v677_v50, 16  ;;  %v962_v26 = vsel %vm8298_vm4, 0, %v779_v51  ;;  %v8667_v50 = vld [vmem:[%s8296_s19 + $0x70] sm:$0xff] }
  0x5b   : > { %11643 = vst [vmem:[#allocation11_spill] sm:$0xff] %v8629_v47  ;;  %v886_v58 = vshrl.u32 %v678_v54, 16  ;;  %v889_v59 = vshll.u32 %v678_v54, 16  ;;  %v534_v15 = vadd.f32 %v8563_v57, %v8552_v52  ;;  %v8645_v8 = vsel %vm8312_vm5, %v962_v26, 0 }
  0x5c   : > { %v8639_v18 = vor.u32 %v1202_v16, %v1198_v34  ;;  %v963_v29 = vsel %vm8298_vm4, 0, %v786_v49  ;;  %v881_v48 = vrot.slane %v879_v9, 7  ;;  %v1352_v17 = vshrl.u32 %v8645_v8, 16  ;;  %v489_v9 = vld [vmem:[%s8296_s19 + $0x78] sm:$0xff] }
  0x5d   : > { %v8650_v21 = vsel %vm8312_vm5, %v963_v29, 0  ;;  %v1354_v52 = vshll.u32 %v8645_v8, 16  ;;  %v888_v57 = vrot.slane %v886_v58, 7  ;;  %v535_v40 = vadd.f32 %v527_v7, %v8569_v37 }
  0x5e   : > { %v8660_v55 = vcombine.low %v8629_v47, %v8639_v18  ;;  %v1359_v14 = vshrl.u32 %v8650_v21, 16  ;;  %v1361_v32 = vshll.u32 %v8650_v21, 16  ;;  %v884_v43 = vor.u32 %v882_v19, %v881_v48 }
  0x5f   : > { %v1356_v39 = vrot.slane %v1354_v52, 1  ;;  %v891_v34 = vor.u32 %v889_v59, %v888_v57  ;;  %v542_v44 = vadd.f32 %v534_v15, %v8554_v6  ;;  %v514_v16 = vunpack.c.l.bf16 %v486_v56 }
  0x60   : > { %2204 = vmatprep.mubr.bf16.mxu0 %v8660_v55  ;;  %v1363_v51 = vrot.slane %v1361_v32, 1  ;;  %v977_v54 = vsel %vm8298_vm4, 0, %v884_v43  ;;  %v515_v49 = vunpack.c.h.bf16 %v486_v56  ;;  %v543_v58 = vadd.f32 %v535_v40, %v8575_v62 }
  0x61   : > { %v8674_v19 = vor.u32 %v1356_v39, %v1352_v17  ;;  %v978_v26 = vsel %vm8298_vm4, 0, %v891_v34  ;;  %v8680_v6 = vsel %vm8312_vm5, %v977_v54, 0  ;;  %v550_v29 = vmul.f32 0.5, %v542_v44 }
  0x62   : > { %v8683_v59 = vor.u32 %v1363_v51, %v1359_v14  ;;  %v8687_v15 = vsel %vm8312_vm5, %v978_v26, 0  ;;  %v8689_v48 = vunpack.c.l.bf16 %v487_v27  ;;  %v551_v17 = vmul.f32 0.5, %v543_v58 }
  0x63   : > { %11644 = vst [vmem:[#allocation12_spill] sm:$0xff] %v8674_v19  ;;  %v6551_v56 = vcombine.low %v8680_v6, %v8687_v15  ;;  %v8693_v52 = vunpack.c.h.bf16 %v487_v27  ;;  %v8695_v57 = vadd.f32 %v515_v49, %v514_v16  ;;  %v654_v14 = vpack.c.bf16 %v550_v29, %v550_v29 }
  0x64   : > { %11645 = vst [vmem:[#allocation13_spill] sm:$0xff] %v8683_v59  ;;  %v8699_v32 = vcombine.low %v8674_v19, %v8683_v59  ;;  %v591_v43 = vsub.f32 %v527_v7, %v8569_v37  ;;  %v655_v34 = vpack.c.bf16 %v551_v17, %v551_v17  ;;  %v11576_v44 = vunpack.c.h.bf16 %v8667_v50 }
  0x65   : > { %2205 = vmatmul.mubr.bf16.gmra.mxu0 %v6551_v56  ;;  %v592_v40 = vsub.f32 %v8695_v57, %v8689_v48  ;;  %v8706_v27 = vunpack.c.l.bf16 %v489_v9  ;;  %v711_v51 = vshrl.u32 %v654_v14, 16  ;;  %v714_v54 = vshll.u32 %v654_v14, 16 }
  0x66   : > { %2300 = vmatprep.mubr.bf16.mxu1 %v8699_v32  ;;  %v599_v26 = vsub.f32 %v591_v43, %v8575_v62  ;;  %v8710_v58 = vunpack.c.h.bf16 %v489_v9  ;;  %v718_v7 = vshrl.u32 %v655_v34, 16  ;;  %v721_v29 = vshll.u32 %v655_v34, 16 }
  0x67   : > { %v600_v56 = vsub.f32 %v592_v40, %v8693_v52  ;;  %v560_v17 = vsub.f32 %v514_v16, %v515_v49  ;;  %v713_v3 = vrot.slane %v711_v51, 7  ;;  %v11646_v23 = vunpack.c.l.bf16 %v8667_v50 }
  0x68   : > { %v607_v39 = vmul.f32 0.5, %v599_v26  ;;  %v615_v14 = vsub.f32 %v8583_v35, %v8569_v37  ;;  %v720_v42 = vrot.slane %v718_v7, 7 }
  0x69   : > { %v8717_v59 = vsub.f32 %v11646_v23, %v11576_v44  ;;  %v608_v43 = vmul.f32 0.5, %v600_v56  ;;  %v568_v9 = vadd.f32 %v560_v17, %v8689_v48  ;;  %v616_v34 = vsub.f32 %v560_v17, %v8689_v48 }
  0x6a   : > { %v716_v19 = vor.u32 %v714_v54, %v713_v3  ;;  %v671_v40 = vpack.c.bf16 %v607_v39, %v607_v39  ;;  %v623_v49 = vadd.f32 %v615_v14, %v8575_v62  ;;  %v723_v51 = vor.u32 %v721_v29, %v720_v42 }
  0x6b   : > { %v569_v16 = vadd.f32 %v8717_v59, %v8706_v27  ;;  %v672_v26 = vpack.c.bf16 %v608_v43, %v608_v43  ;;  %v576_v23 = vsub.f32 %v568_v9, %v8693_v52  ;;  %v624_v44 = vadd.f32 %v616_v34, %v8693_v52 }
  0x6c   : > { %v953_v37 = vsel %vm8298_vm4, 0, %v716_v19  ;;  %v837_v35 = vshrl.u32 %v671_v40, 16  ;;  %v840_v7 = vshll.u32 %v671_v40, 16  ;;  %v954_v3 = vsel %vm8298_vm4, 0, %v723_v51 }
  0x6d   : > { %v577_v56 = vsub.f32 %v569_v16, %v8710_v58  ;;  %v989_v39 = vsel %vm8312_vm5, %v953_v37, 0  ;;  %v844_v62 = vshrl.u32 %v672_v26, 16  ;;  %v847_v42 = vshll.u32 %v672_v26, 16 }
  0x6e   : > { %v990_v54 = vsel %vm8312_vm5, %v954_v3, 0  ;;  %v1296_v29 = vshrl.u32 %v989_v39, 16  ;;  %v1298_v17 = vshll.u32 %v989_v39, 16  ;;  %v839_v14 = vrot.slane %v837_v35, 7 }
  0x6f   : > { %v1303_v43 = vshrl.u32 %v990_v54, 16  ;;  %v1305_v19 = vshll.u32 %v990_v54, 16  ;;  %v846_v9 = vrot.slane %v844_v62, 7  ;;  %v584_v34 = vmul.f32 0.5, %v576_v23 }
  0x70   : > { %v1300_v40 = vrot.slane %v1298_v17, 1  ;;  %v842_v16 = vor.u32 %v840_v7, %v839_v14  ;;  %v585_v46 = vmul.f32 0.5, %v577_v56  ;;  %v631_v61 = vmul.f32 0.5, %v623_v49 }
  0x71   : > { %v1307_v51 = vrot.slane %v1305_v19, 1  ;;  %v849_v20 = vor.u32 %v847_v42, %v846_v9  ;;  %v664_v12 = vpack.c.bf16 %v584_v34, %v584_v34  ;;  %v632_v37 = vmul.f32 0.5, %v624_v44 }
  0x72   : > { %v8737_v53 = vor.u32 %v1300_v40, %v1296_v29  ;;  %v971_v26 = vsel %vm8298_vm4, 0, %v842_v16  ;;  %v665_v3 = vpack.c.bf16 %v585_v46, %v585_v46  ;;  %v679_v39 = vpack.c.bf16 %v631_v61, %v631_v61 }
  0x73   : > { %v8741_v35 = vor.u32 %v1307_v51, %v1303_v43  ;;  %v972_v23 = vsel %vm8298_vm4, 0, %v849_v20  ;;  %v1007_v7 = vsel %vm8312_vm5, %v971_v26, 0  ;;  %v788_v49 = vshrl.u32 %v664_v12, 16 }
  0x74   : > { %11647 = vst [vmem:[#allocation14_spill] sm:$0xff] %v8737_v53  ;;  %v1008_v56 = vsel %vm8312_vm5, %v972_v23, 0  ;;  %v1205_v44 = vshrl.u32 %v1007_v7, 16  ;;  %v1207_v62 = vshll.u32 %v1007_v7, 16  ;;  %v791_v42 = vshll.u32 %v664_v12, 16 }
  0x75   : > { %11648 = vst [vmem:[#allocation15_spill] sm:$0xff] %v8741_v35  ;;  %v8751_v54 = vcombine.low %v8737_v53, %v8741_v35  ;;  %v1212_v46 = vshrl.u32 %v1008_v56, 16  ;;  %v1214_v61 = vshll.u32 %v1008_v56, 16  ;;  %v790_v29 = vrot.slane %v788_v49, 7 }
  0x76   : > { %v1209_v17 = vrot.slane %v1207_v62, 1  ;;  %v795_v14 = vshrl.u32 %v665_v3, 16  ;;  %v798_v20 = vshll.u32 %v665_v3, 16  ;;  %v680_v43 = vpack.c.bf16 %v632_v37, %v632_v37 }
  0x77   : > { %2301 = vmatmul.mubr.bf16.gmra.mxu1 %v8751_v54  ;;  %v1216_v19 = vrot.slane %v1214_v61, 1  ;;  %v793_v9 = vor.u32 %v791_v42, %v790_v29  ;;  %v893_v34 = vshrl.u32 %v679_v39, 16  ;;  %v896_v40 = vshll.u32 %v679_v39, 16 }
  0x78   : > { %v8754_v16 = vor.u32 %v1209_v17, %v1205_v44  ;;  %v797_v12 = vrot.slane %v795_v14, 7  ;;  %v900_v51 = vshrl.u32 %v680_v43, 16  ;;  %v903_v26 = vshll.u32 %v680_v43, 16 }
  0x79   : > { %v8756_v23 = vor.u32 %v1216_v19, %v1212_v46  ;;  %v964_v7 = vsel %vm8298_vm4, 0, %v793_v9  ;;  %v895_v49 = vrot.slane %v893_v34, 7  ;;  %v11649_v3 = vunpack.c.l.bf16 %v8667_v50 }
  0x7a   : > { %v11650_v37 = vunpack.c.h.bf16 %v8667_v50  ;;  %v800_v62 = vor.u32 %v798_v20, %v797_v12  ;;  %v8768_v39 = vsel %vm8312_vm5, %v964_v7, 0  ;;  %v902_v44 = vrot.slane %v900_v51, 7 }
  0x7b   : > { %v536_v42 = vadd.f32 %v8695_v57, %v8689_v48  ;;  %v8774_v46 = vcombine.low %v8754_v16, %v8756_v23  ;;  %v1366_v61 = vshrl.u32 %v8768_v39, 16  ;;  %v1368_v29 = vshll.u32 %v8768_v39, 16 }
  0x7c   : > { %v8764_v56 = vadd.f32 %v11650_v37, %v11649_v3  ;;  %v898_v50 = vor.u32 %v896_v40, %v895_v49  ;;  %v965_v17 = vsel %vm8298_vm4, 0, %v800_v62  ;;  %v905_v14 = vor.u32 %v903_v26, %v902_v44 }
  0x7d   : > { %v544_v43 = vadd.f32 %v536_v42, %v8693_v52  ;;  %2212 = vmatprep.mubr.bf16.mxu0 %v8774_v46  ;;  %v8786_v48 = vsel %vm8312_vm5, %v965_v17, 0  ;;  %v1370_v57 = vrot.slane %v1368_v29, 1  ;;  %v1219_v7 = vshrl.u32 %v8376_v30, 16 }
  0x7e   : > { %v537_v20 = vadd.f32 %v8764_v56, %v8706_v27  ;;  %v979_v19 = vsel %vm8298_vm4, 0, %v898_v50  ;;  %v1373_v9 = vshrl.u32 %v8786_v48, 16  ;;  %v1375_v34 = vshll.u32 %v8786_v48, 16 }
  0x7f   : > { %v980_v40 = vsel %vm8298_vm4, 0, %v905_v14  ;;  %v8796_v52 = vsel %vm8312_vm5, %v979_v19, 0  ;;  %v552_v26 = vmul.f32 0.5, %v544_v43  ;;  %v8804_v49 = vor.u32 %v1370_v57, %v1366_v61 }
  0x80   : > { %v8800_v12 = vsel %vm8312_vm5, %v980_v40, 0  ;;  %v545_v51 = vadd.f32 %v537_v20, %v8710_v58  ;;  %v1377_v3 = vrot.slane %v1375_v34, 1  ;;  %v1221_v62 = vshll.u32 %v8376_v30, 16 }
  0x81   : > { %11651 = vst [vmem:[#allocation16_spill] sm:$0xff] %v8804_v49  ;;  %v6560_v37 = vcombine.low %v8796_v52, %v8800_v12  ;;  %v656_v42 = vpack.c.bf16 %v552_v26, %v552_v26  ;;  %v1226_v29 = vshrl.u32 %v8537_v36, 16  ;;  %v1228_v50 = vshll.u32 %v8537_v36, 16 }
  0x82   : > { %v553_v44 = vmul.f32 0.5, %v545_v51  ;;  %v8811_v17 = vor.u32 %v1377_v3, %v1373_v9  ;;  %v1223_v14 = vrot.slane %v1221_v62, 1  ;;  %v1233_v20 = vshrl.u32 %v8541_v38, 16 }
  0x83   : > { %2213 = vmatmul.mubr.bf16.gmra.mxu0 %v6560_v37  ;;  %v1235_v61 = vshll.u32 %v8541_v38, 16  ;;  %v725_v57 = vshrl.u32 %v656_v42, 16  ;;  %v728_v19 = vshll.u32 %v656_v42, 16  ;;  %v1230_v34 = vrot.slane %v1228_v50, 1 }
  0x84   : > { %11652 = vst [vmem:[#allocation17_spill] sm:$0xff] %v8811_v17  ;;  %v657_v43 = vpack.c.bf16 %v553_v44, %v553_v44  ;;  %v8817_v40 = vcombine.low %v8804_v49, %v8811_v17  ;;  %v8819_v51 = vor.u32 %v1223_v14, %v1219_v7  ;;  %v1240_v42 = vshrl.u32 %v8680_v6, 16 }
  0x85   : > { %v1237_v26 = vrot.slane %v1235_v61, 1  ;;  %v727_v35 = vrot.slane %v725_v57, 7  ;;  %v8821_v37 = vor.u32 %v1230_v34, %v1226_v29  ;;  %v1242_v50 = vshll.u32 %v8680_v6, 16 }
  0x86   : > { %11653 = vst [vmem:[#allocation18_spill] sm:$0xff] %v8817_v40  ;;  %v732_v9 = vshrl.u32 %v657_v43, 16  ;;  %v735_v3 = vshll.u32 %v657_v43, 16  ;;  %2308 = vmatprep.mubr.bf16.mxu1 %v8817_v40  ;;  %v8826_v62 = vcombine.low %v8347_v63, %v8819_v51  ;;  %v1247_v61 = vshrl.u32 %v8687_v15, 16 }
  0x87   : > { %v8828_v44 = vor.u32 %v1237_v26, %v1233_v20  ;;  %v730_v7 = vor.u32 %v728_v19, %v727_v35  ;;  %v1249_v43 = vshll.u32 %v8687_v15, 16  ;;  %v1244_v57 = vrot.slane %v1242_v50, 1 }
  0x88   : > { %v734_v14 = vrot.slane %v732_v9, 7  ;;  %2220 = vmatprep.mubr.bf16.mxu0 %v8826_v62  ;;  %v1256_v9 = vshll.u32 %v8796_v52, 16  ;;  %v1263_v17 = vshll.u32 %v8800_v12, 16  ;;  %v1261_v53 = vshrl.u32 %v8800_v12, 16 }
  0x89   : > { %v8837_v29 = vcombine.low %v8821_v37, %v8828_v44  ;;  %v955_v20 = vsel %vm8298_vm4, 0, %v730_v7  ;;  %v1251_v26 = vrot.slane %v1249_v43, 1  ;;  %v8844_v19 = vor.u32 %v1244_v57, %v1240_v42 }
  0x8a   : > { %v737_v34 = vor.u32 %v735_v3, %v734_v14  ;;  %v991_v35 = vsel %vm8312_vm5, %v955_v20, 0  ;;  %v1254_v57 = vshrl.u32 %v8796_v52, 16  ;;  %v1258_v20 = vrot.slane %v1256_v9, 1 }
  0x8b   : > { %2221 = vmatmul.mubr.bf16.gmra.mxu0 %v8390_v41  ;;  %v1310_v50 = vshrl.u32 %v991_v35, 16  ;;  %v1312_v3 = vshll.u32 %v991_v35, 16  ;;  %v8851_v7 = vor.u32 %v1251_v26, %v1247_v61  ;;  %v1265_v61 = vrot.slane %v1263_v17, 1 }
  0x8c   : > { %v956_v49 = vsel %vm8298_vm4, 0, %v737_v34  ;;  %2228 = vmatprep.mubr.bf16.mxu0 %v8837_v29  ;;  %v1450_v9 = vshrl.u32 %v8629_v47, 16 }
  0x8d   : > { %v992_v14 = vsel %vm8312_vm5, %v956_v49, 0  ;;  %v1314_v43 = vrot.slane %v1312_v3, 1  ;;  %v8861_v35 = vcombine.low %v8844_v19, %v8851_v7  ;;  %v8867_v49 = vcombine.low %v8367_v22, %v8433_v24 }
  0x8e   : > { %v1317_v41 = vshrl.u32 %v992_v14, 16  ;;  %v1319_v42 = vshll.u32 %v992_v14, 16  ;;  %v1452_v3 = vshll.u32 %v8629_v47, 16  ;;  %v1259_v14 = vor.u32 %v1258_v20, %v1254_v57 }
  0x8f   : > { %v8857_v40 = vor.u32 %v1314_v43, %v1310_v50  ;;  %v8877_v17 = vor.u32 %v1265_v61, %v1261_v53  ;;  %v1466_v22 = vshll.u32 %v8639_v18, 16  ;;  %v1492_v53 = vshrl.u32 %v8756_v23, 16 }
  0x90   : > { %v1321_v34 = vrot.slane %v1319_v42, 1  ;;  %v1454_v43 = vrot.slane %v1452_v3, 1  ;;  %v1480_v42 = vshll.u32 %v8754_v16, 16  ;;  %v1494_v57 = vshll.u32 %v8756_v23, 16 }
  0x91   : > { %11654 = vst [vmem:[#allocation19_spill] sm:$0xff] %v8857_v40  ;;  %v1468_v24 = vrot.slane %v1466_v22, 1  ;;  %v8890_v20 = vcombine.low %v1259_v14, %v8877_v17  ;;  %v8894_v3 = vcombine.low %v8687_v15, %v8796_v52  ;;  %v8904_v22 = vcombine.low %v8497_v2, %v8506_v13 }
  0x92   : > { %v8863_v26 = vor.u32 %v1321_v34, %v1317_v41  ;;  %v1464_v41 = vshrl.u32 %v8639_v18, 16  ;;  %v8885_v34 = vor.u32 %v1454_v43, %v1450_v9  ;;  %v1482_v61 = vrot.slane %v1480_v42, 1 }
  0x93   : > { %2229 = vmatmul.mubr.bf16.gmra.mxu0 %v8517_v25  ;;  %v1478_v25 = vshrl.u32 %v8754_v16, 16  ;;  %v617_v9 = vsub.f32 %v8717_v59, %v8706_v27  ;;  %v8106_v59 = vld [vmem:[%s8307_s22 + $0x1f0] sm:$0xff]  }
  0x94   : > { %11655 = vst [vmem:[#allocation20_spill] sm:$0xff] %v8863_v26  ;;  %v8874_v50 = vcombine.low %v8857_v40, %v8863_v26  ;;  %2236 = vmatprep.mubr.bf16.mxu0 %v8861_v35  ;;  %v8896_v47 = vor.u32 %v1468_v24, %v1464_v41  ;;  %v1496_v26 = vrot.slane %v1494_v57, 1  ;;  %v8102_v40 = vld [vmem:[%s8307_s22 + $0x1b8] sm:$0xff]  }
  0x95   : > { %v8900_v43 = vor.u32 %v1482_v61, %v1478_v25  ;;  %v625_v52 = vadd.f32 %v617_v9, %v8710_v58  ;;  %v593_v9 = vsub.f32 %v8764_v56, %v8706_v27  ;;  %v8938_v27 = vcombine.low %v8819_v51, %v8821_v37  ;;  %v8118_v51 = vld [vmem:[%s8307_s22 + $0x1d8] sm:$0xff]  }
  0x96   : > { %2309 = vmatmul.mubr.bf16.gmra.mxu1 %v8874_v50  ;;  %v6575_v15 = vcombine.low %v8885_v34, %v8896_v47  ;;  %v8910_v24 = vor.u32 %v1496_v26, %v1492_v53  ;;  %v8108_v26 = vld [vmem:[%s8307_s22 + $0x1b0] sm:$0xff]   ;;  %v8111_v53 = vld [vmem:[%s8307_s22 + $0x1e8] sm:$0xff]   ;;  %v8942_v56 = vcombine.low %v8828_v44, %v8844_v19 }
  0x97   : > { %2349 = vmatprep.mubr.bf16.mxu1 %v8867_v49  ;;  %v633_v25 = vmul.f32 0.5, %v625_v52  ;;  %v601_v52 = vsub.f32 %v593_v9, %v8710_v58  ;;  %v8116_v58 = vld [vmem:[%s8307_s22 + $0x1a0] sm:$0xff]   ;;  %v1410_v9 = vshll.u32 %v8378_v31, 16 }
  0x98   : > { %v6578_v41 = vcombine.low %v8900_v43, %v8910_v24 }
  0x99   : > { %v681_v42 = vpack.c.bf16 %v633_v25, %v633_v25  ;;  %v8946_v25 = vcombine.low %v8851_v7, %v1259_v14 }
  0x9b   : > { %2237 = vmatmul.mubr.bf16.gmra.mxu0 %v8660_v55  ;;  %v8920_v55 = vcombine.low %v8639_v18, %v8754_v16  ;;  %v907_v57 = vshrl.u32 %v681_v42, 16  ;;  %v910_v61 = vshll.u32 %v681_v42, 16  ;;  %v8112_v18 = vld [vmem:[%s8307_s22 + $0x1a8] sm:$0xff]  }
  0x9c   : > { %2244 = vmatprep.mubr.bf16.mxu0 %v8890_v20 }
  0x9d   : > { %v909_v16 = vrot.slane %v907_v57, 7  ;;  %v8119_v57 = vld [vmem:[%s8307_s22 + $0x198] sm:$0xff]  }
  0x9e   : > { %2350 = vmatmul.mubr.bf16.vlgmr.msra.gmra.mxu1 %v8826_v62  ;;  %v8929_v62 = vcombine.low %v8645_v8, %v8650_v21 }
  0x9f   : > { %2357 = vmatprep.mubr.bf16.mxu1 %v8904_v22  ;;  %7225 = vmatpush3.bf16.msra.mxu1 %v8102_v40  ;;  %v8115_v40 = vld [vmem:[%s8307_s22 + $0x1e0] sm:$0xff]  }
  0xa0   : > { %7226 = vmatprep.subr.bf16.mxu1 %v8106_v59  ;;  %v912_v59 = vor.u32 %v910_v61, %v909_v16 }
  0xa3   : > { %2245 = vmatmul.mubr.bf16.gmra.mxu0 %v8774_v46  ;;  %7227 = vmatpush3.bf16.msra.mxu1 %v8108_v26  ;;  %v609_v46 = vmul.f32 0.5, %v601_v52  ;;  %v981_v26 = vsel %vm8298_vm4, 0, %v912_v59  ;;  %v1408_v59 = vshrl.u32 %v8378_v31, 16 }
  0xa4   : > { %2252 = vmatprep.mubr.bf16.mxu0 %v8462_v10  ;;  %7228 = vmatprep.subr.bf16.mxu1 %v8111_v53  ;;  %v1017_v37 = vsel %vm8312_vm5, %v981_v26, 0  ;;  %v6563_v53 = vcombine.low %v8768_v39, %v8786_v48  ;;  %v1412_v26 = vrot.slane %v1410_v9, 1 }
  0xa5   : > { %v673_v44 = vpack.c.bf16 %v609_v46, %v609_v46  ;;  %v8956_v19 = vcombine.low %v8800_v12, %v1017_v37  ;;  %v1387_v7 = vshrl.u32 %v1017_v37, 16  ;;  %v8121_v12 = vld [vmem:[%s8307_s22 + $0x1d0] sm:$0xff]   ;;  %v1422_v46 = vshrl.u32 %v8485_v45, 16 }
  0xa6   : > { %2358 = vmatmul.mubr.bf16.gmra.mxu1 %v8837_v29  ;;  %v1389_v29 = vshll.u32 %v1017_v37, 16  ;;  %v1413_v9 = vor.u32 %v1412_v26, %v1408_v59  ;;  %v1436_v59 = vshrl.u32 %v8502_v11, 16 }
  0xa7   : > { %2365 = vmatprep.mubr.bf16.mxu1 %v8929_v62  ;;  %7229 = vmatpush3.bf16.msra.mxu1 %v8112_v18  ;;  %v851_v14 = vshrl.u32 %v673_v44, 16  ;;  %v854_v42 = vshll.u32 %v673_v44, 16  ;;  %v1424_v18 = vshll.u32 %v8485_v45, 16 }
  0xa8   : > { %7230 = vmatprep.subr.bf16.mxu1 %v8115_v40  ;;  %v1391_v61 = vrot.slane %v1389_v29, 1  ;;  %v1396_v40 = vshll.u32 %v8347_v63, 16 }
  0xa9   : > { %v853_v16 = vrot.slane %v851_v14, 7  ;;  %v1426_v37 = vrot.slane %v1424_v18, 1 }
  0xaa   : > { %v1398_v14 = vrot.slane %v1396_v40, 1 }
  0xab   : > { %2253 = vmatmul.mubr.bf16.gmra.mxu0 %v8867_v49  ;;  %7231 = vmatpush3.bf16.msra.mxu1 %v8116_v58  ;;  %v856_v52 = vor.u32 %v854_v42, %v853_v16  ;;  %v1392_v49 = vor.u32 %v1391_v61, %v1387_v7  ;;  %v8122_v58 = vld [vmem:[%s8307_s22 + $0x190] sm:$0xff]   ;;  %v1394_v7 = vshrl.u32 %v8347_v63, 16  ;;  %v8125_v61 = vld [vmem:[%s8307_s22 + $0x188] sm:$0xff]   ;;  %v1427_v18 = vor.u32 %v1426_v37, %v1422_v46  ;;  %v8127_v16 = vld [vmem:[%s8307_s22 + $0x1c0] sm:$0xff]  }
  0xac   : > { %2260 = vmatprep.mubr.bf16.mxu0 %v8624_v33  ;;  %7232 = vmatprep.subr.bf16.mxu1 %v8118_v51  ;;  %v8124_v51 = vld [vmem:[%s8307_s22 + $0x1c8] sm:$0xff]  }
  0xad   : > { %v973_v44 = vsel %vm8298_vm4, 0, %v856_v52  ;;  %v8986_v52 = vor.u32 %v1398_v14, %v1394_v7  ;;  %v8126_v14 = vld [vmem:[%s8307_s22 + $0x220] sm:$0xff]  }
  0xae   : > { %2366 = vmatmul.mubr.bf16.gmra.mxu1 %v8861_v35  ;;  %v8975_v35 = vcombine.low %v8877_v17, %v1392_v49  ;;  %v1009_v29 = vsel %vm8312_vm5, %v973_v44, 0  ;;  %v8988_v49 = vcombine.low %v1413_v9, %v1427_v18  ;;  %v8123_v44 = vld [vmem:[%s8307_s22 + $0x228] sm:$0xff]  }
  0xaf   : > { %2373 = vmatprep.mubr.bf16.mxu1 %v6563_v53  ;;  %7233 = vmatpush3.bf16.msra.mxu1 %v8119_v57  ;;  %v1380_v42 = vshrl.u32 %v1009_v29, 16  ;;  %v1382_v57 = vshll.u32 %v1009_v29, 16  ;;  %11656 = vst [vmem:[#allocation21_spill] sm:$0xff] %v8986_v52  ;;  %v6569_v26 = vcombine.low %v8986_v52, %v1413_v9  ;;  %v8130_v9 = vld [vmem:[%s8307_s22 + $0x210] sm:$0xff]  }
  0xb0   : > { %7234 = vmatprep.subr.bf16.mxu1 %v8121_v12  ;;  %v1438_v12 = vshll.u32 %v8502_v11, 16 }
  0xb1   : > { %v1384_v17 = vrot.slane %v1382_v57, 1  ;;  %v8129_v57 = vld [vmem:[%s8307_s22 + $0x218] sm:$0xff]  }
  0xb2   : > { %v1440_v46 = vrot.slane %v1438_v12, 1 }
  0xb3   : > { %2261 = vmatmul.mubr.bf16.gmra.mxu0 %v8904_v22  ;;  %7235 = vmatpush3.bf16.msra.mxu1 %v8122_v58  ;;  %v1385_v40 = vor.u32 %v1384_v17, %v1380_v42  ;;  %v8128_v22 = vld [vmem:[%s8307_s22 + $0x180] sm:$0xff]  }
  0xb4   : > { %2268 = vmatprep.mubr.bf16.mxu0 %v8751_v54  ;;  %7236 = vmatprep.subr.bf16.mxu1 %v8124_v51  ;;  %v11660_v17 = vld [vmem:[#allocation10_spill] sm:$0xff] }
  0xb5   : > { %v8994_v58 = vcombine.low %v8756_v23, %v1385_v40  ;;  %v9006_v23 = vcombine.low %v8896_v47, %v8900_v43  ;;  %v1506_v29 = vshrl.u32 %v1385_v40, 16  ;;  %v1403_v47 = vshll.u32 %v8408_v4, 16  ;;  %v11658_v43 = vld [vmem:[#allocation18_spill] sm:$0xff] }
  0xb6   : > { %2374 = vmatmul.mubr.bf16.gmra.mxu1 %v8890_v20  ;;  %v1441_v20 = vor.u32 %v1440_v46, %v1436_v59  ;;  %v8132_v46 = vld [vmem:[%s8307_s22 + $0x200] sm:$0xff]  }
  0xb7   : > { %2381 = vmatprep.mubr.bf16.mxu1 %v8462_v10  ;;  %7237 = vmatpush3.bf16.msra.mxu1 %v8125_v61 }
  0xb8   : > { %7238 = vmatprep.subr.bf16.mxu1 %v8127_v16  ;;  %v9000_v37 = vcombine.low %v1441_v20, %v8885_v34  ;;  %v6572_v51 = vcombine.low %v1427_v18, %v1441_v20  ;;  %v11657_v34 = vld [vmem:[#allocation6_spill] sm:$0xff]  ;;  %v9040_v18 = vcombine.low %v8541_v38, %v8680_v6  ;;  %v1445_v16 = vshll.u32 %v11660_v17, 16 }
  0xba   : > { %v1447_v59 = vrot.slane %v1445_v16, 1 }
  0xbb   : > { %2269 = vmatmul.mubr.bf16.gmra.mxu0 %v8929_v62  ;;  %7239 = vmatpush3.bf16.msra.mxu1 %v8128_v22  ;;  %v8120_v62 = vld [vmem:[%s8307_s22 + $0x230] sm:$0xff]   ;;  %v1443_v22 = vshrl.u32 %v11660_v17, 16 }
  0xbc   : > { %2276 = vmatprep.mubr.bf16.mxu0 %v8874_v50 }
  0xbe   : > { %2382 = vmatmul.mubr.bf16.gmra.mxu1 %v6569_v26  ;;  %v11661_v26 = vld [vmem:[#allocation14_spill] sm:$0xff] }
  0xbf   : > { %2389 = vmatprep.mubr.bf16.mxu1 %v8624_v33  ;;  %v1459_v20 = vshll.u32 %v11661_v26, 16 }
  0xc3   : > { %2277 = vmatmul.mubr.bf16.gmra.mxu0 %v6563_v53  ;;  %v1508_v53 = vshll.u32 %v1385_v40, 16  ;;  %v8131_v40 = vld [vmem:[%s8307_s22 + $0x208] sm:$0xff]  }
  0xc4   : > { %2510 = vmatprep.mubr.bf16.mxu0 %v8456_v60 }
  0xc5   : > { %v1510_v7 = vrot.slane %v1508_v53, 1  ;;  %v9072_v53 = vor.u32 %v1447_v59, %v1443_v22 }
  0xc6   : > { %2390 = vmatmul.mubr.bf16.gmra.mxu1 %v6572_v51  ;;  %v11662_v51 = vld [vmem:[#allocation15_spill] sm:$0xff] }
  0xc7   : > { %2397 = vmatprep.mubr.bf16.mxu1 %v8751_v54 }
  0xcb   : > { %2511 = vmatmul.mubr.bf16.vlgmr.msra.gmra.mxu0 %v8462_v10  ;;  %v1511_v10 = vor.u32 %v1510_v7, %v1506_v29  ;;  %v9075_v29 = vld [vmem:[%s9067_s26 + $0x8] sm:$0xff]  ;;  %v1457_v7 = vshrl.u32 %v11661_v26, 16 }
  0xcc   : > { %7857 = vmatpush3.bf16.msra.mxu0 %v8656_v28  ;;  %2518 = vmatprep.mubr.bf16.mxu0 %v8561_v1  ;;  %v9021_v28 = vcombine.low %v8376_v30, %v8537_v36  ;;  %v1401_v30 = vshrl.u32 %v8408_v4, 16  ;;  %v1405_v36 = vrot.slane %v1403_v47, 1  ;;  %v11659_v4 = vld [vmem:[#allocation9_spill] sm:$0xff] }
  0xcd   : > { %7858 = vmatprep.subr.bf16.mxu0 %v8120_v62  ;;  %v9025_v42 = vcombine.low %v8910_v24, %v1511_v10  ;;  %v1431_v12 = vshll.u32 %v11659_v4, 16  ;;  %v1429_v38 = vshrl.u32 %v11659_v4, 16  ;;  %v1471_v10 = vshrl.u32 %v11662_v51, 16 }
  0xce   : > { %2398 = vmatmul.mubr.bf16.gmra.mxu1 %v6575_v15  ;;  %v1417_v15 = vshll.u32 %v11657_v34, 16  ;;  %v1406_v24 = vor.u32 %v1405_v36, %v1401_v30  ;;  %v9094_v36 = vld [vmem:[%s9067_s26 + $0x10] sm:$0xff] }
  0xcf   : > { %2405 = vmatprep.mubr.bf16.mxu1 %v8874_v50 }
  0xd0   : > { %7859 = vmatpush3.bf16.msra.mxu0 %v8120_v62  ;;  %v1419_v61 = vrot.slane %v1417_v15, 1  ;;  %v1473_v62 = vshll.u32 %v11662_v51, 16 }
  0xd1   : > { %7860 = vmatprep.subr.bf16.mxu0 %v8123_v44 }
  0xd2   : > { %v1475_v47 = vrot.slane %v1473_v62, 1  ;;  %v9118_v62 = vcombine.low %v8378_v31, %v8485_v45 }
  0xd3   : > { %2519 = vmatmul.mubr.bf16.gmra.mxu0 %v8624_v33  ;;  %v1415_v33 = vshrl.u32 %v11657_v34, 16 }
  0xd4   : > { %2526 = vmatprep.mubr.bf16.mxu0 %v8699_v32  ;;  %7861 = vmatpush3.bf16.msra.mxu0 %v8123_v44 }
  0xd5   : > { %7862 = vmatprep.subr.bf16.mxu0 %v8126_v14 }
  0xd6   : > { %2406 = vmatmul.mubr.bf16.gmra.mxu1 %v6578_v41  ;;  %v9044_v41 = vor.u32 %v1419_v61, %v1415_v33  ;;  %v9100_v61 = vor.u32 %v1475_v47, %v1471_v10 }
  0xd7   : > { %2413 = vmatprep.mubr.bf16.mxu1 %v9021_v28 }
  0xd8   : > { %7863 = vmatpush3.bf16.msra.mxu0 %v8126_v14  ;;  %v9053_v6 = vcombine.low %v1406_v24, %v9044_v41  ;;  %v1461_v14 = vrot.slane %v1459_v20, 1  ;;  %v9114_v20 = vld [vmem:[%s9067_s26 + $0x18] sm:$0xff] }
  0xd9   : > { %7864 = vmatprep.subr.bf16.mxu0 %v8129_v57 }
  0xda   : > { %v9098_v33 = vor.u32 %v1461_v14, %v1457_v7 }
  0xdb   : > { %2527 = vmatmul.mubr.bf16.gmra.mxu0 %v8751_v54  ;;  %v1433_v54 = vrot.slane %v1431_v12, 1  ;;  %v11599_v12 = vmov 3  }
  0xdc   : > { %2534 = vmatprep.mubr.bf16.mxu0 %v11658_v43  ;;  %7865 = vmatpush3.bf16.msra.mxu0 %v8129_v57  ;;  %v11663_v57 = vld [vmem:[#allocation19_spill] sm:$0xff] }
  0xdd   : > { %7866 = vmatprep.subr.bf16.mxu0 %v8130_v9  ;;  %v9070_v44 = vor.u32 %v1433_v54, %v1429_v38  ;;  %v1487_v30 = vshll.u32 %v11663_v57, 16  ;;  %v1485_v16 = vshrl.u32 %v11663_v57, 16 }
  0xde   : > { %2414 = vmatmul.mubr.bf16.gmra.mxu1 %v8456_v60 }
  0xdf   : > { %2421 = vmatprep.mubr.bf16.mxu1 %v9040_v18  ;;  %v6573_v15 = vcombine.low %v9070_v44, %v9072_v53  ;;  %v1489_v38 = vrot.slane %v1487_v30, 1  ;;  %v9139_v30 = vld [vmem:[%s9067_s26 + $0x20] sm:$0xff] }
  0xe0   : > { %7867 = vmatpush3.bf16.msra.mxu0 %v8130_v9  ;;  %v11664_v9 = vld [vmem:[#allocation20_spill] sm:$0xff] }
  0xe1   : > { %7868 = vmatprep.subr.bf16.mxu0 %v8131_v40  ;;  %v1501_v24 = vshll.u32 %v11664_v9, 16  ;;  %v1499_v54 = vshrl.u32 %v11664_v9, 16  ;;  %v9122_v7 = vor.u32 %v1489_v38, %v1485_v16  ;;  %v634_v16 = vld [vmem:[%s9067_s26] sm:$0xff] }
  0xe3   : > { %2535 = vmatmul.mubr.bf16.gmra.mxu0 %v8874_v50  ;;  %v11601_v50 = vmov 2   ;;  %v1503_v22 = vrot.slane %v1501_v24, 1 }
  0xe4   : > { %2542 = vmatprep.mubr.bf16.mxu0 %v9053_v6  ;;  %7869 = vmatpush3.bf16.msra.mxu0 %v8131_v40 }
  0xe5   : > { %7870 = vmatprep.subr.bf16.mxu0 %v8132_v46  ;;  %8031 = vset.pattern.permute.xlu1 %v11601_v50  ;;  %v9124_v14 = vor.u32 %v1503_v22, %v1499_v54  ;;  %v11666_v54 = vmov 0   ;;  %v639_v22 = vld [vmem:[%s9067_s26 + $0x28] sm:$0xff] }
  0xe6   : > { %2422 = vmatmul.mubr.bf16.gmra.mxu1 %v8561_v1  ;;  %3141 = vperm.xlu1 %8031, %v9075_v29  }
  0xe7   : > { %2429 = vmatprep.mubr.bf16.mxu1 %v8894_v3  ;;  %8029 = vset.pattern.permute.xlu0 %v11601_v50  ;;  %v6579_v31 = vcombine.low %v9122_v7, %v9124_v14 }
  0xe8   : > { %7871 = vmatpush3.bf16.msra.mxu0 %v8132_v46  ;;  %3137 = vperm.xlu0 %8029, %v634_v16  }
  0xea   : > { %3145 = vperm.xlu1 %8031, %v9094_v36  }
  0xeb   : > { %2543 = vmatmul.mubr.bf16.gmra.mxu0 %v8456_v60  ;;  %v6576_v60 = vcombine.low %v9098_v33, %v9100_v61 }
  0xec   : > { %2550 = vmatprep.mubr.bf16.mxu0 %v6573_v15  ;;  %8030 = vset.pattern.permute.xlu0 %v11599_v12 }
  0xed   : > { %3217 = vperm.xlu0 %8030, %v634_v16  }
  0xee   : > { %2430 = vmatmul.mubr.bf16.gmra.mxu1 %v8699_v32  ;;  %8032 = vset.pattern.permute.xlu1 %v11599_v12 }
  0xef   : > { %2437 = vmatprep.mubr.bf16.mxu1 %v8956_v19  ;;  %3221 = vperm.xlu1 %8032, %v9075_v29  }
  0xf1   : > { %3225 = vperm.xlu0 %8030, %v9094_v36  }
  0xf2   : > { %v6904_v40 = vpop.f32.mrf.mxu0 }
  0xf3   : > { %2551 = vmatmul.mubr.bf16.gmra.mxu0 %v8561_v1  ;;  %8033 = vset.pattern.permute.xlu1 %v11601_v50  ;;  %v11665_v1 = vld [vmem:[#allocation11_spill] sm:$0xff] }
  0xf4   : > { %v6905_v59 = vpop.f32.mrf.mxu0  ;;  %2558 = vmatprep.mubr.bf16.mxu0 %v6576_v60  ;;  %3149 = vperm.xlu1 %8033, %v9114_v20   ;;  %v9135_v10 = vcombine.low %v8502_v11, %v11665_v1  ;;  %v9150_v11 = vld [vmem:[%s9067_s26 + $0x30] sm:$0xff] }
  0xf5   : > { %v9111_v46 = vadd.f32 %v6905_v59, %v6904_v40  ;;  %8034 = vset.pattern.permute.xlu0 %v11601_v50 }
  0xf6   : > { %2438 = vmatmul.mubr.bf16.gmra.mxu1 %v11658_v43  ;;  %v9147_v40 = vpop.f32.mrf.mxu0  ;;  %3153 = vperm.xlu0 %8034, %v9139_v30  }
  0xf7   : > { %2445 = vmatprep.mubr.bf16.mxu1 %v9118_v62 }
  0xf8   : > { %8035 = vset.pattern.permute.xlu1 %v11599_v12 }
  0xf9   : > { %3229 = vperm.xlu1 %8035, %v9114_v20  }
  0xfa   : > { %v6976_v45 = vpop.f32.mrf.mxu1  ;;  %3157 = vperm.xlu0 %8034, %v639_v22  }
  0xfb   : > { %2559 = vmatmul.mubr.bf16.gmra.mxu0 %v8699_v32  ;;  %v9155_v32 = vpop.f32.mrf.mxu0 }
  0xfc   : > { %v6977_v47 = vpop.f32.mrf.mxu1  ;;  %2566 = vmatprep.mubr.bf16.mxu0 %v6579_v31 }
  0xfd   : > { %v9141_v24 = vadd.f32 %v6977_v47, %v6976_v45  ;;  %3233 = vperm.xlu1 %8035, %v9139_v30  }
  0xfe   : > { %2446 = vmatmul.mubr.bf16.gmra.mxu1 %v9053_v6  ;;  %v9173_v59 = vpop.f32.mrf.mxu1  ;;  %8037 = vset.pattern.permute.xlu0 %v11599_v12 }
  0xff   : > { %2453 = vmatprep.mubr.bf16.mxu1 %v9135_v10  ;;  %3237 = vperm.xlu0 %8037, %v639_v22  }
 0x101   : > { %8036 = vset.pattern.permute.xlu1 %v11601_v50 }
 0x102   : > { %3161 = vperm.xlu1 %8036, %v9150_v11  }
 0x103   : > { %2567 = vmatmul.mubr.bf16.gmra.mxu0 %v11658_v43  ;;  %8040 = vset.pattern.permute.xlu0 %v11666_v54 }
 0x104   : > { %2574 = vmatprep.mubr.bf16.mxu0 %v8938_v27  ;;  %2968 = vperm.xlu0 %8040, %v9075_v29  }
 0x106   : > { %2454 = vmatmul.mubr.bf16.gmra.mxu1 %v6573_v15  ;;  %8038 = vset.pattern.permute.xlu1 %v11599_v12  ;;  %v6910_v6 = vpop.f32.mrf.mxu0  ;;  %v11603_v15 = vmov 1  }
 0x107   : > { %2461 = vmatprep.mubr.bf16.mxu1 %v8920_v55  ;;  %3241 = vperm.xlu1 %8038, %v9150_v11  }
 0x108   : > { %v6911_v38 = vpop.f32.mrf.mxu0  ;;  %2973 = vperm.xlu0 %8040, %v9094_v36  }
 0x109   : > { %v9163_v43 = vadd.f32 %v6911_v38, %v6910_v6 }
 0x10a   : > { %v9191_v47 = vpop.f32.mrf.mxu0 }
 0x10b   : > { %2575 = vmatmul.mubr.bf16.gmra.mxu0 %v9118_v62  ;;  %8039 = vset.pattern.permute.xlu1 %v11666_v54 }
 0x10c   : > { %2582 = vmatprep.mubr.bf16.mxu0 %v8942_v56  ;;  %2963 = vperm.xlu1 %8039, %v634_v16  }
 0x10d   : > { %8043 = vset.pattern.permute.xlu0 %v11603_v15 }
 0x10e   : > { %2462 = vmatmul.mubr.bf16.gmra.mxu1 %v6576_v60  ;;  %v9178_v60 = vpop.f32.mrf.mxu1  ;;  %3065 = vperm.xlu0 %8043, %v9094_v36  }
 0x10f   : > { %2469 = vmatprep.mubr.bf16.mxu1 %v8994_v58 }
 0x110   : > { %8041 = vset.pattern.permute.xlu1 %v11603_v15 }
 0x111   : > { %3057 = vperm.xlu1 %8041, %v634_v16   ;;  %v9197_v16 = vpop.f32.mrf.mxu0 }
 0x112   : > { %8046 = vset.pattern.permute.xlu0 %v11666_v54 }
 0x113   : > { %2583 = vmatmul.mubr.bf16.gmra.mxu0 %v9135_v10  ;;  %2988 = vperm.xlu0 %8046, %v639_v22  }
 0x114   : > { %2590 = vmatprep.mubr.bf16.mxu0 %v8946_v25 }
 0x115   : > { %3061 = vperm.xlu1 %8041, %v9075_v29  }
 0x116   : > { %2470 = vmatmul.mubr.bf16.gmra.mxu1 %v6579_v31 }
 0x117   : > { %2671 = vmatprep.mubr.bf16.mxu1 %v9118_v62  ;;  %2993 = vperm.xlu0 %8046, %v9150_v11  }
 0x119   : > { %8042 = vset.pattern.permute.xlu1 %v11666_v54  ;;  %v6982_v45 = vpop.f32.mrf.mxu1 }
 0x11a   : > { %2978 = vperm.xlu1 %8042, %v9114_v20  }
 0x11b   : > { %2591 = vmatmul.mubr.bf16.gmra.mxu0 %v8920_v55  ;;  %v6983_v1 = vpop.f32.mrf.mxu1  ;;  %8049 = vset.pattern.permute.xlu0 %v11603_v15 }
 0x11c   : > { %2598 = vmatprep.mubr.bf16.mxu0 %v8975_v35  ;;  %v9188_v31 = vadd.f32 %v6983_v1, %v6982_v45  ;;  %3081 = vperm.xlu0 %8049, %v9150_v11  }
 0x11d   : > { %v9219_v38 = vpop.f32.mrf.mxu1 }
 0x11e   : > { %2672 = vmatmul.mubr.bf16.vlgmr.msra.gmra.mxu1 %v9021_v28  ;;  %8044 = vset.pattern.permute.xlu1 %v11603_v15 }
 0x11f   : > { %2679 = vmatprep.mubr.bf16.mxu1 %v9135_v10  ;;  %3069 = vperm.xlu1 %8044, %v9114_v20   ;;  %v9225_v45 = vpop.f32.mrf.mxu1 }
 0x120   : > { %8052 = vset.pattern.permute.xlu0 %v11601_v50 }
 0x123   : > { %2599 = vmatmul.mubr.bf16.gmra.mxu0 %v8994_v58  ;;  %8045 = vset.pattern.permute.xlu1 %v11666_v54 }
 0x124   : > { %2606 = vmatprep.mubr.bf16.mxu0 %v8988_v49  ;;  %2983 = vperm.xlu1 %8045, %v9139_v30  }
 0x125   : > { %v6916_v28 = vpop.f32.mrf.mxu0 }
 0x126   : > { %2680 = vmatmul.mubr.bf16.gmra.mxu1 %v9040_v18 }
 0x127   : > { %2687 = vmatprep.mubr.bf16.mxu1 %v8920_v55  ;;  %v6917_v29 = vpop.f32.mrf.mxu0 }
 0x128   : > { %8047 = vset.pattern.permute.xlu1 %v11603_v15  ;;  %v9208_v20 = vadd.f32 %v6917_v29, %v6916_v28 }
 0x129   : > { %3073 = vperm.xlu1 %8047, %v9139_v30   ;;  %v6919_v6 = vpop.f32.mrf.mxu0  ;;  %v641_v30 = vld [vmem:[%s9067_s26 + $0x38] sm:$0xff] }
 0x12a   : > { %3165 = vperm.xlu0 %8052, %v641_v30  }
 0x12b   : > { %2607 = vmatmul.mubr.bf16.gmra.mxu0 %v8938_v27  ;;  %v6920_v18 = vpop.f32.mrf.mxu0 }
 0x12c   : > { %2614 = vmatprep.mubr.bf16.mxu0 %v9000_v37  ;;  %v9214_v36 = vadd.f32 %v6920_v18, %v6919_v6 }
 0x12d   : > { %3077 = vperm.xlu1 %8047, %v639_v22  }
 0x12e   : > { %2688 = vmatmul.mubr.bf16.gmra.mxu1 %v8894_v3  ;;  %8054 = vset.pattern.permute.xlu0 %v11666_v54 }
 0x12f   : > { %2695 = vmatprep.mubr.bf16.mxu1 %v8994_v58 }
 0x131   : > { %8048 = vset.pattern.permute.xlu1 %v11666_v54 }
 0x132   : > { %2998 = vperm.xlu1 %8048, %v641_v30  }
 0x133   : > { %2615 = vmatmul.mubr.bf16.gmra.mxu0 %v8942_v56 }
 0x134   : > { %2622 = vmatprep.mubr.bf16.mxu0 %v9006_v23 }
 0x136   : > { %2696 = vmatmul.mubr.bf16.gmra.mxu1 %v8956_v19  ;;  %8050 = vset.pattern.permute.xlu1 %v11603_v15 }
 0x137   : > { %2703 = vmatprep.mubr.bf16.mxu1 %v8938_v27  ;;  %3085 = vperm.xlu1 %8050, %v641_v30   ;;  %v6988_v3 = vpop.f32.mrf.mxu1 }
 0x139   : > { %v6989_v22 = vpop.f32.mrf.mxu1 }
 0x13a   : > { %v9234_v1 = vadd.f32 %v6989_v22, %v6988_v3 }
 0x13b   : > { %2623 = vmatmul.mubr.bf16.gmra.mxu0 %v8946_v25  ;;  %8051 = vset.pattern.permute.xlu1 %v11599_v12  ;;  %v6991_v28 = vpop.f32.mrf.mxu1 }
 0x13c   : > { %2630 = vmatprep.mubr.bf16.mxu0 %v9025_v42  ;;  %3245 = vperm.xlu1 %8051, %v641_v30  }
 0x13d   : > { %v6992_v19 = vpop.f32.mrf.mxu1 }
 0x13e   : > { %2704 = vmatmul.mubr.bf16.gmra.mxu1 %v9118_v62  ;;  %v9241_v11 = vadd.f32 %v6992_v19, %v6991_v28 }
 0x13f   : > { %2711 = vmatprep.mubr.bf16.mxu1 %v8942_v56 }
 0x140   : > { %8053 = vset.pattern.permute.xlu1 %v11666_v54 }
 0x143   : > { %v6922_v29 = vpop.f32.mrf.mxu0  ;;  %2631 = vmatmul.mubr.bf16.gmra.mxu0 %v8975_v35 }
 0x144   : > { %7872 = vmatprep.mubr.bf16.mxu0 %v8938_v27 }
 0x145   : > { %v6923_v6 = vpop.f32.mrf.mxu0 }
 0x146   : > { %2712 = vmatmul.mubr.bf16.gmra.mxu1 %v9135_v10  ;;  %v9247_v18 = vadd.f32 %v6923_v6, %v6922_v29  ;;  %v9262_v29 = vcombine.low %v11657_v34, %v11659_v4  ;;  %v11667_v4 = vld [vmem:[#allocation4_spill] sm:$0xff] }
 0x147   : > { %2719 = vmatprep.mubr.bf16.mxu1 %v8946_v25  ;;  %v6925_v62 = vpop.f32.mrf.mxu0 }
 0x149   : > { %v6926_v30 = vpop.f32.mrf.mxu0 }
 0x14a   : > { %v9250_v3 = vadd.f32 %v6926_v30, %v6925_v62 }
 0x14b   : > { %v6928_v22 = vpop.f32.mrf.mxu0  ;;  %7873 = vmatmul.mubr.bf16.vlgmr.msra.gmra.mxu0 %v8942_v56 }
 0x14c   : > { %7876 = vmatprep.mubr.bf16.mxu0 %v8946_v25 }
 0x14d   : > { %v6929_v54 = vpop.f32.mrf.mxu0 }
 0x14e   : > { %2720 = vmatmul.mubr.bf16.gmra.mxu1 %v8920_v55  ;;  %v9255_v27 = vadd.f32 %v6929_v54, %v6928_v22 }
 0x14f   : > { %2727 = vmatprep.mubr.bf16.mxu1 %v8975_v35  ;;  %v6931_v10 = vpop.f32.mrf.mxu0 }
 0x151   : > { %v6932_v28 = vpop.f32.mrf.mxu0 }
 0x152   : > { %v9258_v19 = vadd.f32 %v6932_v28, %v6931_v10  ;;  %v6581_v10 = vcombine.low %v11667_v4, %v8497_v2 }
 0x153   : > { %v6934_v6 = vpop.f32.mrf.mxu0  ;;  %7877 = vmatmul.mubr.bf16.gmra.mxu0 %v8975_v35 }
 0x154   : > { %7880 = vmatprep.mubr.bf16.mxu0 %v8988_v49  ;;  %v9278_v49 = vcombine.low %v11660_v17, %v11661_v26  ;;  %v11669_v17 = vld [vmem:[#allocation5_spill] sm:$0xff] }
 0x155   : > { %v6935_v56 = vpop.f32.mrf.mxu0 }
 0x156   : > { %v6994_v25 = vpop.f32.mrf.mxu1  ;;  %2728 = vmatmul.mubr.bf16.gmra.mxu1 %v8994_v58  ;;  %v9267_v55 = vadd.f32 %v6935_v56, %v6934_v6 }
 0x157   : > { %2735 = vmatprep.mubr.bf16.mxu1 %v9262_v29  ;;  %v6937_v62 = vpop.f32.mrf.mxu0 }
 0x158   : > { %v6995_v30 = vpop.f32.mrf.mxu1 }
 0x159   : > { %v9270_v22 = vadd.f32 %v6995_v30, %v6994_v25  ;;  %v6938_v54 = vpop.f32.mrf.mxu0 }
 0x15a   : > { %v6997_v34 = vpop.f32.mrf.mxu1  ;;  %v9274_v35 = vadd.f32 %v6938_v54, %v6937_v62  ;;  %v11668_v54 = vld [vmem:[#allocation7_spill] sm:$0xff] }
 0x15b   : > { %v6940_v58 = vpop.f32.mrf.mxu0  ;;  %7881 = vmatmul.mubr.bf16.gmra.mxu0 %v9000_v37  ;;  %v9289_v26 = vcombine.low %v11669_v17, %v11668_v54 }
 0x15c   : > { %v6998_v28 = vpop.f32.mrf.mxu1  ;;  %7884 = vmatprep.mubr.bf16.mxu0 %v9006_v23  ;;  %v6584_v23 = vcombine.low %v8506_v13, %v8645_v8 }
 0x15d   : > { %v9282_v6 = vadd.f32 %v6998_v28, %v6997_v34  ;;  %v6941_v56 = vpop.f32.mrf.mxu0 }
 0x15e   : > { %v7016_v25 = vpop.f32.mrf.mxu1  ;;  %2736 = vmatmul.mubr.bf16.gmra.mxu1 %v6581_v10  ;;  %v9284_v30 = vadd.f32 %v6941_v56, %v6940_v58  ;;  %v9300_v58 = vcombine.low %v11662_v51, %v11663_v57  ;;  %v11670_v57 = vld [vmem:[#allocation12_spill] sm:$0xff] }
 0x15f   : > { %2743 = vmatprep.mubr.bf16.mxu1 %v9278_v49  ;;  %v6943_v2 = vpop.f32.mrf.mxu0 }
 0x160   : > { %v7017_v62 = vpop.f32.mrf.mxu1 }
 0x161   : > { %v7018_v4 = vadd.f32 %v7017_v62, %v7016_v25  ;;  %v6944_v37 = vpop.f32.mrf.mxu0  ;;  %v6909_v25 = vadd.f32 %v9155_v32, %v9147_v40 }
 0x162   : > { %v7019_v12 = vpop.f32.mrf.mxu1  ;;  %v9293_v34 = vadd.f32 %v6944_v37, %v6943_v2  ;;  %v11673_v37 = vld [vmem:[#allocation13_spill] sm:$0xff] }
 0x163   : > { %v9296_v10 = vadd.f32 %v7018_v4, %v9111_v46  ;;  %v6946_v28 = vpop.f32.mrf.mxu0  ;;  %7885 = vmatmul.mubr.bf16.gmra.mxu0 %v9025_v42  ;;  %v11671_v42 = vld [vmem:[#allocation8_spill] sm:$0xff] }
 0x164   : > { %v7020_v56 = vpop.f32.mrf.mxu1  ;;  %7888 = vmatprep.mubr.bf16.mxu0 %v9289_v26  ;;  %v9313_v54 = vcombine.low %v11671_v42, %v11670_v57  ;;  %v11672_v4 = vld [vmem:[#allocation16_spill] sm:$0xff] }
 0x165   : > { %v7021_v13 = vadd.f32 %v7020_v56, %v7019_v12  ;;  %v6947_v8 = vpop.f32.mrf.mxu0  ;;  %v9317_v50 = vcombine.low %v11673_v37, %v11672_v4  ;;  %v8133_v56 = vld [vmem:[%s9324_s12 + $0x78] sm:$0xff]  }
 0x166   : > { %v7022_v2 = vpop.f32.mrf.mxu1  ;;  %2744 = vmatmul.mubr.bf16.gmra.mxu1 %v6584_v23  ;;  %v9306_v46 = vadd.f32 %v6947_v8, %v6946_v28  ;;  %v6587_v23 = vcombine.low %v8650_v21, %v8768_v39  ;;  %7360 = vmatprep.subr.bf16.mxu1 %v8133_v56  ;;  %v6915_v21 = vadd.f32 %v9197_v16, %v9191_v47  ;;  %v11674_v4 = vld [vmem:[#allocation17_spill] sm:$0xff] }
 0x167   : > { %v9308_v62 = vadd.f32 %v7021_v13, %v6909_v25  ;;  %2751 = vmatprep.mubr.bf16.mxu1 %v9300_v58  ;;  %v6949_v51 = vpop.f32.mrf.mxu0  ;;  %v9336_v13 = vcombine.low %v11664_v9, %v8347_v63  ;;  %v9352_v37 = vcombine.low %v11674_v4, %v8347_v63  ;;  %v6593_v47 = vcombine.low %v9044_v41, %v9070_v44 }
 0x168   : > { %v7023_v17 = vpop.f32.mrf.mxu1  ;;  %v6595_v4 = vcombine.low %v9100_v61, %v9122_v7 }
 0x169   : > { %v7024_v12 = vadd.f32 %v7023_v17, %v7022_v2  ;;  %v6950_v40 = vpop.f32.mrf.mxu0  ;;  %v8134_v2 = vld [vmem:[%s9324_s12 + $0x38] sm:$0xff]  }
 0x16a   : > { %v7025_v32 = vpop.f32.mrf.mxu1  ;;  %v9328_v28 = vadd.f32 %v6950_v40, %v6949_v51  ;;  %7361 = vmatpush3.bf16.msra.mxu1 %v8134_v2 }
 0x16b   : > { %v9332_v25 = vadd.f32 %v7024_v12, %v9163_v43  ;;  %v6952_v8 = vpop.f32.mrf.mxu0  ;;  %7889 = vmatmul.mubr.bf16.gmra.mxu0 %v9313_v54 }
 0x16c   : > { %v7026_v57 = vpop.f32.mrf.mxu1  ;;  %7892 = vmatprep.mubr.bf16.mxu0 %v9317_v50 }
 0x16d   : > { %v7027_v39 = vadd.f32 %v7026_v57, %v7025_v32  ;;  %v6953_v51 = vpop.f32.mrf.mxu0 }
 0x16e   : > { %v7028_v43 = vpop.f32.mrf.mxu1  ;;  %2752 = vmatmul.mubr.bf16.gmra.mxu1 %v6587_v23  ;;  %v9343_v42 = vadd.f32 %v6953_v51, %v6952_v8  ;;  %v11675_v23 = vld [vmem:[#allocation2_spill] sm:$0xff] }
 0x16f   : > { %v9345_v9 = vadd.f32 %v7027_v39, %v6915_v21  ;;  %2759 = vmatprep.mubr.bf16.mxu1 %v9336_v13  ;;  %v9348_v17 = vpop.f32.mrf.mxu0  ;;  %v6590_v56 = vcombine.low %v8786_v48, %v11675_v23 }
 0x170   : > { %v7029_v12 = vpop.f32.mrf.mxu1 }
 0x171   : > { %v7030_v16 = vadd.f32 %v7029_v12, %v7028_v43  ;;  %v9356_v40 = vpop.f32.mrf.mxu0 }
 0x172   : > { %v7031_v32 = vpop.f32.mrf.mxu1 }
 0x173   : > { %v9361_v8 = vadd.f32 %v7030_v16, %v9208_v20  ;;  %v6958_v2 = vpop.f32.mrf.mxu0  ;;  %7893 = vmatmul.mubr.bf16.gmra.mxu0 %v9352_v37  ;;  %v6594_v20 = vcombine.low %v9072_v53, %v9098_v33  ;;  %v8135_v16 = vld [vmem:[%s9324_s12 + $0x70] sm:$0xff]  }
 0x174   : > { %v7032_v57 = vpop.f32.mrf.mxu1  ;;  %7896 = vmatprep.mubr.bf16.mxu0 %v6593_v47  ;;  %7362 = vmatprep.subr.bf16.mxu1 %v8135_v16 }
 0x175   : > { %v7033_v21 = vadd.f32 %v7032_v57, %v7031_v32  ;;  %v6959_v39 = vpop.f32.mrf.mxu0  ;;  %v8136_v32 = vld [vmem:[%s9324_s12 + $0x30] sm:$0xff]  }
 0x176   : > { %v7034_v41 = vpop.f32.mrf.mxu1  ;;  %2760 = vmatmul.mubr.bf16.gmra.mxu1 %v6590_v56  ;;  %v9364_v44 = vadd.f32 %v6959_v39, %v6958_v2 }
 0x177   : > { %v9367_v51 = vadd.f32 %v7033_v21, %v9214_v36  ;;  %2767 = vmatprep.mubr.bf16.mxu1 %v9289_v26  ;;  %v9370_v48 = vpop.f32.mrf.mxu0  ;;  %7363 = vmatpush3.bf16.msra.mxu1 %v8136_v32  ;;  %v6596_v21 = vcombine.low %v9124_v14, %v8986_v52 }
 0x178   : > { %v7035_v43 = vpop.f32.mrf.mxu1 }
 0x179   : > { %v7036_v12 = vadd.f32 %v7035_v43, %v7034_v41  ;;  %v9376_v47 = vpop.f32.mrf.mxu0 }
 0x17a   : > { %v7037_v56 = vpop.f32.mrf.mxu1 }
 0x17b   : > { %v9381_v36 = vadd.f32 %v7036_v12, %v9247_v18  ;;  %v6964_v2 = vpop.f32.mrf.mxu0  ;;  %7897 = vmatmul.mubr.bf16.gmra.mxu0 %v6594_v20 }
 0x17c   : > { %v7038_v26 = vpop.f32.mrf.mxu1  ;;  %7900 = vmatprep.mubr.bf16.mxu0 %v6595_v4 }
 0x17d   : > { %v7039_v53 = vadd.f32 %v7038_v26, %v7037_v56  ;;  %v6965_v33 = vpop.f32.mrf.mxu0 }
 0x17e   : > { %v7040_v57 = vpop.f32.mrf.mxu1  ;;  %2768 = vmatmul.mubr.bf16.gmra.mxu1 %v9262_v29  ;;  %v9384_v61 = vadd.f32 %v6965_v33, %v6964_v2  ;;  %v8138_v33 = vld [vmem:[%s9324_s12 + $0x28] sm:$0xff]  }
 0x17f   : > { %v9387_v7 = vadd.f32 %v7039_v53, %v9250_v3  ;;  %2775 = vmatprep.mubr.bf16.mxu1 %v9313_v54  ;;  %v9390_v18 = vpop.f32.mrf.mxu0  ;;  %v8137_v53 = vld [vmem:[%s9324_s12 + $0x68] sm:$0xff]  }
 0x180   : > { %v7041_v39 = vpop.f32.mrf.mxu1  ;;  %7364 = vmatprep.subr.bf16.mxu1 %v8137_v53 }
 0x181   : > { %v7042_v41 = vadd.f32 %v7041_v39, %v7040_v57  ;;  %v9394_v20 = vpop.f32.mrf.mxu0  ;;  %7365 = vmatpush3.bf16.msra.mxu1 %v8138_v33 }
 0x182   : > { %v7043_v43 = vpop.f32.mrf.mxu1 }
 0x183   : > { %v9397_v29 = vadd.f32 %v7042_v41, %v9255_v27  ;;  %v6970_v4 = vpop.f32.mrf.mxu0  ;;  %7901 = vmatmul.mubr.bf16.gmra.mxu0 %v6596_v21 }
 0x184   : > { %v7044_v3 = vpop.f32.mrf.mxu1 }
 0x185   : > { %v7045_v12 = vadd.f32 %v7044_v3, %v7043_v43  ;;  %v6971_v54 = vpop.f32.mrf.mxu0 }
 0x186   : > { %v7046_v16 = vpop.f32.mrf.mxu1  ;;  %2776 = vmatmul.mubr.bf16.gmra.mxu1 %v9278_v49  ;;  %v9400_v32 = vadd.f32 %v6971_v54, %v6970_v4 }
 0x187   : > { %v9403_v14 = vadd.f32 %v7045_v12, %v9258_v19  ;;  %2783 = vmatprep.mubr.bf16.mxu1 %v9317_v50  ;;  %v9406_v56 = vpop.f32.mrf.mxu0 }
 0x188   : > { %v7047_v27 = vpop.f32.mrf.mxu1 }
 0x189   : > { %v7048_v2 = vadd.f32 %v7047_v27, %v7046_v16  ;;  %v9408_v26 = vpop.f32.mrf.mxu0 }
 0x18a   : > { %v7049_v57 = vpop.f32.mrf.mxu1 }
 0x18b   : > { %v9413_v21 = vadd.f32 %v7048_v2, %v9267_v55  ;;  %v7128_v49 = vpop.f32.mrf.mxu0 }
 0x18c   : > { %v7050_v39 = vpop.f32.mrf.mxu1 }
 0x18d   : > { %v7051_v19 = vadd.f32 %v7050_v39, %v7049_v57  ;;  %v7129_v41 = vpop.f32.mrf.mxu0 }
 0x18e   : > { %v7052_v43 = vpop.f32.mrf.mxu1  ;;  %2784 = vmatmul.mubr.bf16.gmra.mxu1 %v9300_v58  ;;  %v7130_v50 = vadd.f32 %v7129_v41, %v7128_v49 }
 0x18f   : > { %v9417_v4 = vadd.f32 %v7051_v19, %v9274_v35  ;;  %2791 = vmatprep.mubr.bf16.mxu1 %v9352_v37  ;;  %v7131_v3 = vpop.f32.mrf.mxu0 }
 0x190   : > { %v7053_v12 = vpop.f32.mrf.mxu1  ;;  %v9421_v55 = vadd.f32 %v7130_v50, %v9296_v10 }
 0x191   : > { %v7054_v54 = vadd.f32 %v7053_v12, %v7052_v43  ;;  %v7132_v16 = vpop.f32.mrf.mxu0  ;;  %v8140_v12 = vld [vmem:[%s9324_s12 + $0x20] sm:$0xff]  }
 0x192   : > { %v7055_v27 = vpop.f32.mrf.mxu1  ;;  %v7133_v2 = vadd.f32 %v7132_v16, %v7131_v3  ;;  %v8139_v3 = vld [vmem:[%s9324_s12 + $0x60] sm:$0xff]  }
 0x193   : > { %v9424_v53 = vadd.f32 %v7054_v54, %v9284_v30  ;;  %v7134_v58 = vpop.f32.mrf.mxu0  ;;  %7366 = vmatprep.subr.bf16.mxu1 %v8139_v3 }
 0x194   : > { %v7056_v33 = vpop.f32.mrf.mxu1  ;;  %v9427_v35 = vadd.f32 %v7133_v2, %v9308_v62  ;;  %7367 = vmatpush3.bf16.msra.mxu1 %v8140_v12 }
 0x195   : > { %v7057_v37 = vadd.f32 %v7056_v33, %v7055_v27  ;;  %v7135_v57 = vpop.f32.mrf.mxu0 }
 0x196   : > { %v7058_v49 = vpop.f32.mrf.mxu1  ;;  %2792 = vmatmul.mubr.bf16.gmra.mxu1 %v9336_v13  ;;  %v7136_v10 = vadd.f32 %v7135_v57, %v7134_v58 }
 0x197   : > { %v9431_v39 = vadd.f32 %v7057_v37, %v9293_v34  ;;  %v7137_v19 = vpop.f32.mrf.mxu0 }
 0x198   : > { %v7059_v41 = vpop.f32.mrf.mxu1  ;;  %v9434_v30 = vadd.f32 %v7136_v10, %v9332_v25 }
 0x199   : > { %v7060_v43 = vadd.f32 %v7059_v41, %v7058_v49  ;;  %v7138_v50 = vpop.f32.mrf.mxu0 }
 0x19a   : > { %v7061_v62 = vpop.f32.mrf.mxu1  ;;  %v7139_v54 = vadd.f32 %v7138_v50, %v7137_v19 }
 0x19b   : > { %v9439_v16 = vadd.f32 %v7060_v43, %v9306_v46  ;;  %v7140_v27 = vpop.f32.mrf.mxu0 }
 0x19c   : > { %v7062_v13 = vpop.f32.mrf.mxu1  ;;  %v9442_v34 = vadd.f32 %v7139_v54, %v9345_v9 }
 0x19d   : > { %v7063_v2 = vadd.f32 %v7062_v13, %v7061_v62  ;;  %v7141_v58 = vpop.f32.mrf.mxu0 }
 0x19e   : > { %v7064_v25 = vpop.f32.mrf.mxu1  ;;  %v7142_v33 = vadd.f32 %v7141_v58, %v7140_v27 }
 0x19f   : > { %v9445_v37 = vadd.f32 %v7063_v2, %v9328_v28  ;;  %v7143_v57 = vpop.f32.mrf.mxu0  ;;  %v6957_v28 = vadd.f32 %v9356_v40, %v9348_v17 }
 0x1a0   : > { %v7065_v49 = vpop.f32.mrf.mxu1  ;;  %v9448_v10 = vadd.f32 %v7142_v33, %v9361_v8 }
 0x1a1   : > { %v7066_v46 = vadd.f32 %v7065_v49, %v7064_v25  ;;  %v7144_v19 = vpop.f32.mrf.mxu0 }
 0x1a2   : > { %v7067_v41 = vpop.f32.mrf.mxu1  ;;  %v7145_v43 = vadd.f32 %v7144_v19, %v7143_v57  ;;  %v6963_v19 = vadd.f32 %v9376_v47, %v9370_v48 }
 0x1a3   : > { %v9451_v9 = vadd.f32 %v7066_v46, %v9343_v42  ;;  %v7146_v50 = vpop.f32.mrf.mxu0 }
 0x1a4   : > { %v7068_v3 = vpop.f32.mrf.mxu1  ;;  %v9454_v12 = vadd.f32 %v7145_v43, %v9367_v51 }
 0x1a5   : > { %v7069_v62 = vadd.f32 %v7068_v3, %v7067_v41  ;;  %v7147_v54 = vpop.f32.mrf.mxu0 }
 0x1a6   : > { %v7070_v27 = vpop.f32.mrf.mxu1  ;;  %v7148_v8 = vadd.f32 %v7147_v54, %v7146_v50  ;;  %v8142_v54 = vld [vmem:[%s9324_s12 + $0x18] sm:$0xff]  }
 0x1a7   : > { %v9458_v13 = vadd.f32 %v7069_v62, %v6957_v28  ;;  %v7149_v2 = vpop.f32.mrf.mxu0  ;;  %v8141_v62 = vld [vmem:[%s9324_s12 + $0x58] sm:$0xff]  }
 0x1a8   : > { %v7071_v58 = vpop.f32.mrf.mxu1  ;;  %v9461_v25 = vadd.f32 %v7148_v8, %v9381_v36  ;;  %7368 = vmatprep.subr.bf16.mxu1 %v8141_v62 }
 0x1a9   : > { %v7072_v42 = vadd.f32 %v7071_v58, %v7070_v27  ;;  %v7150_v33 = vpop.f32.mrf.mxu0  ;;  %7369 = vmatpush3.bf16.msra.mxu1 %v8142_v54 }
 0x1aa   : > { %v7073_v51 = vpop.f32.mrf.mxu1  ;;  %v7151_v57 = vadd.f32 %v7150_v33, %v7149_v2 }
 0x1ab   : > { %v9464_v49 = vadd.f32 %v7072_v42, %v9364_v44  ;;  %v7152_v17 = vpop.f32.mrf.mxu0 }
 0x1ac   : > { %v7074_v40 = vpop.f32.mrf.mxu1  ;;  %v9467_v46 = vadd.f32 %v7151_v57, %v9387_v7 }
 0x1ad   : > { %v7075_v41 = vadd.f32 %v7074_v40, %v7073_v51  ;;  %v7153_v36 = vpop.f32.mrf.mxu0  ;;  %v6969_v51 = vadd.f32 %v9394_v20, %v9390_v18 }
 0x1ae   : > { %v7076_v43 = vpop.f32.mrf.mxu1  ;;  %v7154_v50 = vadd.f32 %v7153_v36, %v7152_v17 }
 0x1af   : > { %v9471_v3 = vadd.f32 %v7075_v41, %v6963_v19  ;;  %v7155_v28 = vpop.f32.mrf.mxu0 }
 0x1b0   : > { %v7077_v27 = vpop.f32.mrf.mxu1  ;;  %v9476_v44 = vadd.f32 %v7154_v50, %v9397_v29 }
 0x1b1   : > { %v7078_v8 = vadd.f32 %v7077_v27, %v7076_v43  ;;  %v7156_v2 = vpop.f32.mrf.mxu0  ;;  %v6975_v27 = vadd.f32 %v9408_v26, %v9406_v56 }
 0x1b2   : > { %v7079_v7 = vpop.f32.mrf.mxu1  ;;  %v7157_v58 = vadd.f32 %v7156_v2, %v7155_v28 }
 0x1b3   : > { %v9479_v48 = vadd.f32 %v7078_v8, %v9384_v61  ;;  %v7158_v47 = vpop.f32.mrf.mxu0 }
 0x1b4   : > { %v7080_v42 = vpop.f32.mrf.mxu1  ;;  %v9482_v33 = vadd.f32 %v7157_v58, %v9403_v14 }
 0x1b5   : > { %v7081_v57 = vadd.f32 %v7080_v42, %v7079_v7  ;;  %v7159_v29 = vpop.f32.mrf.mxu0  ;;  %v9499_v7 = vpop.permute.xlu1 %3141 }
 0x1b6   : > { %v7082_v17 = vpop.f32.mrf.mxu1  ;;  %v7160_v40 = vadd.f32 %v7159_v29, %v7158_v47 }
 0x1b7   : > { %v9486_v19 = vadd.f32 %v7081_v57, %v6969_v51  ;;  %v7161_v41 = vpop.f32.mrf.mxu0 }
 0x1b8   : > { %v7083_v36 = vpop.f32.mrf.mxu1  ;;  %v9489_v43 = vadd.f32 %v7160_v40, %v9413_v21 }
 0x1b9   : > { %v7084_v61 = vadd.f32 %v7083_v36, %v7082_v17  ;;  %v7162_v50 = vpop.f32.mrf.mxu0  ;;  %v9509_v26 = vpop.permute.xlu1 %3145 }
 0x1ba   : > { %v7085_v28 = vpop.f32.mrf.mxu1  ;;  %v7163_v62 = vadd.f32 %v7162_v50, %v7161_v41 }
 0x1bb   : > { %v9492_v14 = vadd.f32 %v7084_v61, %v9400_v32  ;;  %v7164_v54 = vpop.f32.mrf.mxu0 }
 0x1bc   : > { %v7086_v18 = vpop.f32.mrf.mxu1  ;;  %v9495_v20 = vadd.f32 %v7163_v62, %v9417_v4 }
 0x1bd   : > { %v7087_v8 = vadd.f32 %v7086_v18, %v7085_v28  ;;  %v7165_v2 = vpop.f32.mrf.mxu0 }
 0x1be   : > { %v7088_v21 = vpop.f32.mrf.mxu1  ;;  %v7166_v58 = vadd.f32 %v7165_v2, %v7164_v54 }
 0x1bf   : > { %v9501_v47 = vadd.f32 %v7087_v8, %v6975_v27  ;;  %v7167_v42 = vpop.f32.mrf.mxu0 }
 0x1c0   : > { %v7089_v51 = vpop.f32.mrf.mxu1  ;;  %v9504_v32 = vadd.f32 %v7166_v58, %v9424_v53  ;;  %v6981_v53 = vadd.f32 %v9178_v60, %v9173_v59  ;;  %v8144_v58 = vld [vmem:[%s9324_s12 + $0x10] sm:$0xff]  }
 0x1c1   : > { %v7090_v57 = vadd.f32 %v7089_v51, %v7088_v21  ;;  %v7168_v29 = vpop.f32.mrf.mxu0  ;;  %v9521_v21 = vpop.permute.xlu1 %3221 }
 0x1c2   : > { %v7091_v4 = vpop.f32.mrf.mxu1  ;;  %v7169_v17 = vadd.f32 %v7168_v29, %v7167_v42  ;;  %11676 = vst [vmem:[#allocation6_spill] sm:$0xff] %v9521_v21 }
 0x1c3   : > { %v9507_v40 = vadd.f32 %v7090_v57, %v9141_v24  ;;  %v7170_v56 = vpop.f32.mrf.mxu0 }
 0x1c4   : > { %v7092_v41 = vpop.f32.mrf.mxu1  ;;  %v9512_v36 = vadd.f32 %v7169_v17, %v9431_v39  ;;  %v8143_v39 = vld [vmem:[%s9324_s12 + $0x50] sm:$0xff]  }
 0x1c5   : > { %v7093_v61 = vadd.f32 %v7092_v41, %v7091_v4  ;;  %v7171_v50 = vpop.f32.mrf.mxu0  ;;  %7370 = vmatprep.subr.bf16.mxu1 %v8143_v39 }
 0x1c6   : > { %v7094_v28 = vpop.f32.mrf.mxu1  ;;  %v7172_v62 = vadd.f32 %v7171_v50, %v7170_v56  ;;  %7371 = vmatpush3.bf16.msra.mxu1 %v8144_v58  ;;  %v9535_v50 = vpop.permute.xlu1 %3149 }
 0x1c7   : > { %v9516_v54 = vadd.f32 %v7093_v61, %v6981_v53  ;;  %v7173_v24 = vpop.f32.mrf.mxu0 }
 0x1c8   : > { %v7095_v18 = vpop.f32.mrf.mxu1  ;;  %v9519_v27 = vadd.f32 %v7172_v62, %v9439_v16  ;;  %v6987_v16 = vadd.f32 %v9225_v45, %v9219_v38 }
 0x1c9   : > { %v7096_v8 = vadd.f32 %v7095_v18, %v7094_v28  ;;  %v7174_v2 = vpop.f32.mrf.mxu0 }
 0x1ca   : > { %v7097_v42 = vpop.f32.mrf.mxu1  ;;  %v7175_v51 = vadd.f32 %v7174_v2, %v7173_v24 }
 0x1cb   : > { %v9526_v59 = vadd.f32 %v7096_v8, %v9188_v31  ;;  %v7176_v60 = vpop.f32.mrf.mxu0 }
 0x1cc   : > { %v7098_v57 = vpop.f32.mrf.mxu1  ;;  %v9529_v29 = vadd.f32 %v7175_v51, %v9445_v37 }
 0x1cd   : > { %v7099_v4 = vadd.f32 %v7098_v57, %v7097_v42  ;;  %v7177_v17 = vpop.f32.mrf.mxu0  ;;  %v9546_v42 = vpop.permute.xlu1 %3229 }
 0x1ce   : > { %v7100_v56 = vpop.f32.mrf.mxu1  ;;  %v7178_v41 = vadd.f32 %v7177_v17, %v7176_v60  ;;  %11677 = vst [vmem:[#allocation18_spill] sm:$0xff] %v9546_v42  ;;  %v8158_v42 = vld [vmem:[%s9324_s12 + $0x98] sm:$0xff]  }
 0x1cf   : > { %v9533_v53 = vadd.f32 %v7099_v4, %v6987_v16  ;;  %v7179_v61 = vpop.f32.mrf.mxu0 }
 0x1d0   : > { %v7101_v31 = vpop.f32.mrf.mxu1  ;;  %v9538_v28 = vadd.f32 %v7178_v41, %v9451_v9 }
 0x1d1   : > { %v7102_v62 = vadd.f32 %v7101_v31, %v7100_v56  ;;  %v7180_v37 = vpop.f32.mrf.mxu0 }
 0x1d2   : > { %v7103_v24 = vpop.f32.mrf.mxu1  ;;  %v7181_v18 = vadd.f32 %v7180_v37, %v7179_v61 }
 0x1d3   : > { %v9541_v8 = vadd.f32 %v7102_v62, %v9234_v1  ;;  %v7182_v38 = vpop.f32.mrf.mxu0  ;;  %v9554_v1 = vpop.permute.xlu0 %3137 }
 0x1d4   : > { %v7104_v45 = vpop.f32.mrf.mxu1  ;;  %v9544_v2 = vadd.f32 %v7181_v18, %v9458_v13  ;;  %v9559_v62 = vpop.permute.xlu1 %3233 }
 0x1d5   : > { %v7105_v39 = vadd.f32 %v7104_v45, %v7103_v24  ;;  %v7183_v58 = vpop.f32.mrf.mxu0  ;;  %11678 = vst [vmem:[#allocation9_spill] sm:$0xff] %v9559_v62 }
 0x1d6   : > { %v7106_v51 = vpop.f32.mrf.mxu1  ;;  %v7184_v60 = vadd.f32 %v7183_v58, %v7182_v38 }
 0x1d7   : > { %v9549_v9 = vadd.f32 %v7105_v39, %v9241_v11  ;;  %v7185_v57 = vpop.f32.mrf.mxu0  ;;  %v9564_v45 = vpop.permute.xlu0 %3217 }
 0x1d8   : > { %v7107_v16 = vpop.f32.mrf.mxu1  ;;  %v9552_v4 = vadd.f32 %v7184_v60, %v9464_v49  ;;  %11679 = vst [vmem:[#allocation10_spill] sm:$0xff] %v9564_v45  ;;  %v8160_v45 = vld [vmem:[%s9324_s12 + $0x90] sm:$0xff]  }
 0x1d9   : > { %v7108_v17 = vadd.f32 %v7107_v16, %v7106_v51  ;;  %v7186_v56 = vpop.f32.mrf.mxu0 }
 0x1da   : > { %v7109_v13 = vpop.f32.mrf.mxu1  ;;  %v7187_v41 = vadd.f32 %v7186_v56, %v7185_v57 }
 0x1db   : > { %v9557_v61 = vadd.f32 %v7108_v17, %v9270_v22  ;;  %v7188_v31 = vpop.f32.mrf.mxu0 }
 0x1dc   : > { %v7110_v37 = vpop.f32.mrf.mxu1  ;;  %v9562_v11 = vadd.f32 %v7187_v41, %v9471_v3  ;;  %v9572_v3 = vpop.permute.xlu1 %3161  ;;  %v8145_v41 = vld [vmem:[%s9324_s12 + $0x48] sm:$0xff]  }
 0x1dd   : > { %v7111_v24 = vadd.f32 %v7110_v37, %v7109_v13  ;;  %v7189_v49 = vpop.f32.mrf.mxu0  ;;  %11680 = vst [vmem:[#allocation14_spill] sm:$0xff] %v9572_v3  ;;  %7372 = vmatprep.subr.bf16.mxu1 %v8145_v41 }
 0x1de   : > { %v7240_v18 = vpop.f32.mrf.mxu1  ;;  %v7190_v38 = vadd.f32 %v7189_v49, %v7188_v31  ;;  %v8146_v31 = vld [vmem:[%s9324_s12 + $0x8] sm:$0xff]  }
 0x1df   : > { %v9567_v39 = vadd.f32 %v7111_v24, %v9282_v6  ;;  %v7191_v22 = vpop.f32.mrf.mxu0  ;;  %v9582_v24 = vpop.permute.xlu0 %3225  ;;  %7373 = vmatpush3.bf16.msra.mxu1 %v8146_v31 }
 0x1e0   : > { %v7241_v58 = vpop.f32.mrf.mxu1  ;;  %v9570_v51 = vadd.f32 %v7190_v38, %v9479_v48  ;;  %11682 = vst [vmem:[#allocation19_spill] sm:$0xff] %v9582_v24  ;;  %v8161_v24 = vld [vmem:[%s9324_s12 + $0xc8] sm:$0xff]  }
 0x1e1   : > { %v7242_v60 = vadd.f32 %v7241_v58, %v7240_v18  ;;  %v7192_v57 = vpop.f32.mrf.mxu0 }
 0x1e2   : > { %v7243_v16 = vpop.f32.mrf.mxu1  ;;  %v7193_v17 = vadd.f32 %v7192_v57, %v7191_v22  ;;  %v9584_v22 = vpop.permute.xlu1 %3241 }
 0x1e3   : > { %v7194_v56 = vpop.f32.mrf.mxu0  ;;  %v9575_v13 = vadd.f32 %v7242_v60, %v9421_v55  ;;  %11683 = vst [vmem:[#allocation20_spill] sm:$0xff] %v9584_v22  ;;  %v9592_v41 = vpop.permute.xlu0 %3153 }
 0x1e4   : > { %v7244_v37 = vpop.f32.mrf.mxu1  ;;  %v9580_v6 = vadd.f32 %v7193_v17, %v9486_v19  ;;  %11684 = vst [vmem:[#allocation11_spill] sm:$0xff] %v9592_v41 }
 0x1e5   : > { %v7245_v48 = vadd.f32 %v7244_v37, %v7243_v16  ;;  %v7195_v49 = vpop.f32.mrf.mxu0 }
 0x1e6   : > { %11681 = vst [vmem:[#allocation15_spill] sm:$0xff] %v9580_v6  ;;  %v7246_v18 = vpop.f32.mrf.mxu1  ;;  %v7196_v38 = vadd.f32 %v7195_v49, %v7194_v56  ;;  %v9600_v52 = vpop.permute.xlu1 %2963 }
 0x1e7   : > { %v7197_v58 = vpop.f32.mrf.mxu0  ;;  %v9587_v55 = vadd.f32 %v7245_v48, %v9427_v35 }
 0x1e8   : > { %v7247_v60 = vpop.f32.mrf.mxu1  ;;  %v9590_v57 = vadd.f32 %v7196_v38, %v9492_v14  ;;  %v8147_v38 = vld [vmem:[%s9324_s12 + $0xf8] sm:$0xff]  }
 0x1e9   : > { %v7248_v19 = vadd.f32 %v7247_v60, %v7246_v18  ;;  %v7198_v17 = vpop.f32.mrf.mxu0  ;;  %7472 = vmatprep.subr.bf16.mxu0 %v8147_v38 }
 0x1ea   : > { %v7249_v16 = vpop.f32.mrf.mxu1  ;;  %v7199_v37 = vadd.f32 %v7198_v17, %v7197_v58  ;;  %v8148_v17 = vld [vmem:[%s9324_s12 + $0xb8] sm:$0xff]   ;;  %v9613_v23 = vpop.permute.xlu1 %3057 }
 0x1eb   : > { %v7200_v56 = vpop.f32.mrf.mxu0  ;;  %v9595_v31 = vadd.f32 %v7248_v19, %v9434_v30  ;;  %7473 = vmatpush3.bf16.msra.mxu0 %v8148_v17 }
 0x1ec   : > { %v7250_v49 = vpop.f32.mrf.mxu1  ;;  %v9598_v35 = vadd.f32 %v7199_v37, %v9501_v47  ;;  %v9610_v47 = vpop.permute.xlu0 %3157 }
 0x1ed   : > { %v7251_v48 = vadd.f32 %v7250_v49, %v7249_v16  ;;  %v7201_v15 = vpop.f32.mrf.mxu0  ;;  %11687 = vst [vmem:[#allocation5_spill] sm:$0xff] %v9610_v47 }
 0x1ee   : > { %11685 = vst [vmem:[#allocation4_spill] sm:$0xff] %v9598_v35  ;;  %v7252_v14 = vpop.f32.mrf.mxu1  ;;  %v7202_v18 = vadd.f32 %v7201_v15, %v7200_v56  ;;  %v8149_v56 = vld [vmem:[%s9324_s12 + $0xf0] sm:$0xff]  }
 0x1ef   : > { %v7203_v60 = vpop.f32.mrf.mxu0  ;;  %v9604_v58 = vadd.f32 %v7251_v48, %v9442_v34  ;;  %v8150_v48 = vld [vmem:[%s9324_s12 + $0xb0] sm:$0xff]   ;;  %7474 = vmatprep.subr.bf16.mxu0 %v8149_v56  ;;  %v9632_v56 = vpop.permute.xlu1 %3061 }
 0x1f0   : > { %v7253_v30 = vpop.f32.mrf.mxu1  ;;  %v9608_v19 = vadd.f32 %v7202_v18, %v9507_v40  ;;  %7475 = vmatpush3.bf16.msra.mxu0 %v8150_v48 }
 0x1f1   : > { %v7254_v16 = vadd.f32 %v7253_v30, %v7252_v14  ;;  %v7204_v37 = vpop.f32.mrf.mxu0  ;;  %v9622_v30 = vpop.permute.xlu0 %3237 }
 0x1f2   : > { %11686 = vst [vmem:[#allocation7_spill] sm:$0xff] %v9608_v19  ;;  %v7255_v49 = vpop.f32.mrf.mxu1  ;;  %v7205_v15 = vadd.f32 %v7204_v37, %v7203_v60  ;;  %11689 = vst [vmem:[#allocation8_spill] sm:$0xff] %v9622_v30  ;;  %v8151_v37 = vld [vmem:[%s9324_s12 + $0xe8] sm:$0xff]  }
 0x1f3   : > { %v7206_v63 = vpop.f32.mrf.mxu0  ;;  %v9616_v34 = vadd.f32 %v7254_v16, %v9448_v10  ;;  %v8152_v16 = vld [vmem:[%s9324_s12 + $0xa8] sm:$0xff]   ;;  %7476 = vmatprep.subr.bf16.mxu0 %v8151_v37  ;;  %v9646_v37 = vpop.permute.xlu1 %2978 }
 0x1f4   : > { %v7256_v40 = vpop.f32.mrf.mxu1  ;;  %v9620_v18 = vadd.f32 %v7205_v15, %v9516_v54  ;;  %7477 = vmatpush3.bf16.msra.mxu0 %v8152_v16 }
 0x1f5   : > { %v7257_v14 = vadd.f32 %v7256_v40, %v7255_v49  ;;  %v7207_v38 = vpop.f32.mrf.mxu0  ;;  %v8155_v40 = vld [vmem:[%s9324_s12 + $0xe0] sm:$0xff]  }
 0x1f6   : > { %11688 = vst [vmem:[#allocation12_spill] sm:$0xff] %v9620_v18  ;;  %v7258_v17 = vpop.f32.mrf.mxu1  ;;  %v7208_v60 = vadd.f32 %v7207_v38, %v7206_v63  ;;  %7478 = vmatprep.subr.bf16.mxu0 %v8155_v40 }
 0x1f7   : > { %v7209_v22 = vpop.f32.mrf.mxu0  ;;  %v9626_v10 = vadd.f32 %v7257_v14, %v9454_v12  ;;  %v8156_v12 = vld [vmem:[%s9324_s12 + $0xa0] sm:$0xff]  }
 0x1f8   : > { %v7259_v62 = vpop.f32.mrf.mxu1  ;;  %v9630_v54 = vadd.f32 %v7208_v60, %v9526_v59  ;;  %v9642_v59 = vpop.permute.xlu0 %2968  ;;  %7479 = vmatpush3.bf16.msra.mxu0 %v8156_v12 }
 0x1f9   : > { %v7260_v49 = vadd.f32 %v7259_v62, %v7258_v17  ;;  %v7210_v15 = vpop.f32.mrf.mxu0 }
 0x1fa   : > { %11690 = vst [vmem:[#allocation16_spill] sm:$0xff] %v9630_v54  ;;  %v7261_v63 = vpop.f32.mrf.mxu1  ;;  %v7211_v48 = vadd.f32 %v7210_v15, %v7209_v22 }
 0x1fb   : > { %v7212_v38 = vpop.f32.mrf.mxu0  ;;  %v9636_v30 = vadd.f32 %v7260_v49, %v9461_v25 }
 0x1fc   : > { %v7262_v14 = vpop.f32.mrf.mxu1  ;;  %v9640_v21 = vadd.f32 %v7211_v48, %v9533_v53  ;;  %v2974_v40 = vpop.permute.xlu0 %2973 }
 0x1fd   : > { %v7263_v62 = vadd.f32 %v7262_v14, %v7261_v63  ;;  %v7213_v17 = vpop.f32.mrf.mxu0 }
 0x1fe   : > { %11691 = vst [vmem:[#allocation13_spill] sm:$0xff] %v9640_v21  ;;  %v9644_v60 = vpop.f32.mrf.mxu1  ;;  %v7214_v22 = vadd.f32 %v7213_v17, %v7212_v38  ;;  %v8157_v38 = vld [vmem:[%s9324_s12 + $0xd8] sm:$0xff]  }
 0x1ff   : > { %v7215_v25 = vpop.f32.mrf.mxu0  ;;  %v9649_v16 = vadd.f32 %v7263_v62, %v9467_v46  ;;  %v8153_v46 = vld [vmem:[%s9324_s12 + $0x40] sm:$0xff]   ;;  %7480 = vmatprep.subr.bf16.mxu0 %v8157_v38 }
 0x200   : > { %v9651_v53 = vpop.f32.mrf.mxu1  ;;  %v9654_v49 = vadd.f32 %v7214_v22, %v9541_v8  ;;  %v8154_v62 = vld [vmem:[%s9324_s12] sm:$0xff]   ;;  %v9667_v8 = vpop.permute.xlu1 %3069  ;;  %7374 = vmatprep.subr.bf16.mxu1 %v8153_v46  ;;  %7481 = vmatpush3.bf16.msra.mxu0 %v8158_v42 }
 0x201   : > { %v7216_v15 = vpop.f32.mrf.mxu0  ;;  %7375 = vmatpush3.bf16.msra.mxu1 %v8154_v62 }
 0x202   : > { %11692 = vst [vmem:[#allocation17_spill] sm:$0xff] %v9654_v49  ;;  %v9656_v63 = vpop.f32.mrf.mxu1  ;;  %v7217_v48 = vadd.f32 %v7216_v15, %v7215_v25  ;;  %v8159_v15 = vld [vmem:[%s9324_s12 + $0xd0] sm:$0xff]  }
 0x203   : > { %v7218_v12 = vpop.f32.mrf.mxu0  ;;  %7482 = vmatprep.subr.bf16.mxu0 %v8159_v15 }
 0x204   : > { %v9659_v14 = vpop.f32.mrf.mxu1  ;;  %v9662_v17 = vadd.f32 %v7217_v48, %v9549_v9  ;;  %7483 = vmatpush3.bf16.msra.mxu0 %v8160_v45  ;;  %v9678_v46 = vpop.permute.xlu1 %2983  ;;  %v9696_v45 = vld [vmem:[%s11562_s4] ss:$0 sm:$0xff] }
 0x205   : > { %v7219_v18 = vpop.f32.mrf.mxu0  ;;  %7484 = vmatprep.subr.bf16.mxu0 %v8161_v24 }
 0x206   : > { %11693 = vst [vmem:[#allocation22_spill] sm:$0xff] %v9662_v17  ;;  %v7270_v22 = vpop.f32.mrf.mxu1  ;;  %v7220_v49 = vadd.f32 %v7219_v18, %v7218_v12  ;;  %v9673_v17 = vpop.permute.xlu0 %3065 }
 0x207   : > { %v7221_v25 = vpop.f32.mrf.mxu0 }
 0x208   : > { %v7271_v9 = vpop.f32.mrf.mxu1  ;;  %v9671_v48 = vadd.f32 %v7220_v49, %v9557_v61  ;;  %v8162_v61 = vld [vmem:[%s9324_s12 + $0x88] sm:$0xff]   ;;  %v8163_v49 = vld [vmem:[%s9324_s12 + $0x178] sm:$0xff]   ;;  %v9705_v24 = vpop.permute.xlu1 %3073 }
 0x209   : > { %v7272_v21 = vadd.f32 %v7271_v9, %v7270_v22  ;;  %v7222_v38 = vpop.f32.mrf.mxu0  ;;  %v8165_v9 = vld [vmem:[%s9324_s12 + $0xc0] sm:$0xff]   ;;  %7584 = vmatprep.subr.bf16.mxu1 %v8163_v49  ;;  %7485 = vmatpush3.bf16.msra.mxu0 %v8162_v61 }
 0x20a   : > { %11694 = vst [vmem:[#allocation23_spill] sm:$0xff] %v9671_v48  ;;  %v9676_v18 = vpop.f32.mrf.mxu1  ;;  %v7223_v42 = vadd.f32 %v7222_v38, %v7221_v25  ;;  %v9699_v19 = vpop.permute.xlu0 %2988  ;;  %7486 = vmatprep.subr.bf16.mxu0 %v8165_v9  ;;  %v7266_v9 = vadd.f32 %v9651_v53, %v9644_v60 }
 0x20b   : > { %v7874_v12 = vpop.f32.mrf.mxu0  ;;  %v9681_v62 = vadd.f32 %v7272_v21, %v9489_v43 }
 0x20c   : > { %v9686_v48 = vpop.f32.mrf.mxu1  ;;  %v9689_v22 = vadd.f32 %v7223_v42, %v9567_v39  ;;  %v2843_v15 = vadd.f32 %v7874_v12, %v9595_v31  ;;  %v8166_v39 = vld [vmem:[%s9324_s12 + $0x80] sm:$0xff]  }
 0x20d   : > { %v2834_v25 = vpop.f32.mrf.mxu0  ;;  %7487 = vmatpush3.bf16.msra.mxu0 %v8166_v39 }
 0x20e   : > { %11695 = vst [vmem:[#allocation24_spill] sm:$0xff] %v9689_v22  ;;  %v7276_v43 = vpop.f32.mrf.mxu1  ;;  %v3003_v21 = vadd.f32 %v2974_v40, %v2843_v15  ;;  %v2835_v38 = vadd.f32 %v2834_v25, %v9575_v13 }
 0x20f   : > { %v7875_v42 = vpop.f32.mrf.mxu0 }
 0x210   : > { %v7277_v31 = vpop.f32.mrf.mxu1  ;;  %v3018_v12 = vadd.f32 %v9696_v45, %v3003_v21  ;;  %v3001_v22 = vadd.f32 %v9600_v52, %v2835_v38  ;;  %v2846_v54 = vadd.f32 %v7875_v42, %v9604_v58 }
 0x211   : > { %v7278_v47 = vadd.f32 %v7277_v31, %v7276_v43  ;;  %v2837_v49 = vpop.f32.mrf.mxu0  ;;  %v2994_v31 = vpop.permute.xlu0 %2993 }
 0x212   : > { %v7279_v40 = vpop.f32.mrf.mxu1  ;;  %vm3026_vm6 = vcmp.ge.f32.partialorder %v3018_v12, 0.0  ;;  %v3034_v13 = vmul.f32 0.2, %v3018_v12  ;;  %v3016_v15 = vadd.f32 %v9696_v45, %v3001_v22  ;;  %v3004_v61 = vadd.f32 %v9646_v37, %v2846_v54 }
 0x213   : > { %v2838_v25 = vadd.f32 %v2837_v49, %v9587_v55  ;;  %v7878_v52 = vpop.f32.mrf.mxu0  ;;  %v9713_v58 = vadd.f32 %v7278_v47, %v9504_v32 }
 0x214   : > { %v7280_v43 = vpop.f32.mrf.mxu1  ;;  %v3042_v21 = vsel %vm3026_vm6, %v3018_v12, %v3034_v13  ;;  %vm3024_vm7 = vcmp.ge.f32.partialorder %v3016_v15, 0.0  ;;  %v3032_v38 = vmul.f32 0.2, %v3016_v15  ;;  %v3019_v42 = vadd.f32 %v9696_v45, %v3004_v61  ;;  %v9720_v13 = vpop.permute.xlu1 %3077 }
 0x215   : > { %v7281_v22 = vadd.f32 %v7280_v43, %v7279_v40  ;;  %v3050_v6 = vmul.f32 1.4142135, %v3042_v21  ;;  %v3002_v54 = vadd.f32 %v9642_v59, %v2838_v25  ;;  %v2859_v37 = vadd.f32 %v7878_v52, %v9636_v30  ;;  %v2850_v60 = vpop.f32.mrf.mxu0 }
 0x216   : > { %v7282_v53 = vpop.f32.mrf.mxu1  ;;  %v3040_v55 = vsel %vm3024_vm7, %v3016_v15, %v3032_v38  ;;  %vm3027_vm8 = vcmp.ge.f32.partialorder %v3019_v42, 0.0  ;;  %v3035_v39 = vmul.f32 0.2, %v3019_v42  ;;  %v2851_v32 = vadd.f32 %v2850_v60, %v9616_v34 }
 0x217   : > { %v3298_v47 = vpack.c.bf16 %v3050_v6, %v3050_v6  ;;  %v3048_v12 = vmul.f32 1.4142135, %v3040_v55  ;;  %v3017_v49 = vadd.f32 %v9696_v45, %v3002_v54  ;;  %v3007_v61 = vadd.f32 %v2994_v31, %v2859_v37  ;;  %v7879_v40 = vpop.f32.mrf.mxu0 }
 0x218   : > { %v7283_v43 = vpop.f32.mrf.mxu1  ;;  %v3043_v21 = vsel %vm3027_vm8, %v3019_v42, %v3035_v39  ;;  %v3005_v59 = vadd.f32 %v9678_v46, %v2851_v32  ;;  %v2862_v30 = vadd.f32 %v7879_v40, %v9649_v16  ;;  %v9725_v15 = vadd.f32 %v7281_v22, %v9512_v36 }
 0x219   : > { %v7269_v34 = vadd.f32 %v9659_v14, %v9656_v63  ;;  %v9729_v6 = vadd.f32 %v7283_v43, %v7282_v53  ;;  %v3343_v25 = vshrl.u32 %v3298_v47, 16  ;;  %v3296_v52 = vpack.c.bf16 %v3048_v12, %v3048_v12  ;;  %v2853_v38 = vpop.f32.mrf.mxu0  ;;  %v2999_v43 = vpop.permute.xlu1 %2998 }
 0x21a   : > { %v7285_v54 = vpop.f32.mrf.mxu1  ;;  %v3051_v31 = vmul.f32 1.4142135, %v3043_v21  ;;  %vm3025_vm9 = vcmp.ge.f32.partialorder %v3017_v49, 0.0  ;;  %v3033_v37 = vmul.f32 0.2, %v3017_v49  ;;  %v3022_v42 = vadd.f32 %v9696_v45, %v3007_v61 }
 0x21b   : > { %v3345_v46 = vrot.slane %v3343_v25, 7  ;;  %v3346_v60 = vshll.u32 %v3298_v47, 16  ;;  %v3329_v16 = vshrl.u32 %v3296_v52, 16  ;;  %v3020_v36 = vadd.f32 %v9696_v45, %v3005_v59  ;;  %v7882_v22 = vpop.f32.mrf.mxu0 }
 0x21c   : > { %v7286_v55 = vpop.f32.mrf.mxu1  ;;  %v3299_v39 = vpack.c.bf16 %v3051_v31, %v3051_v31  ;;  %v3041_v63 = vsel %vm3025_vm9, %v3017_v49, %v3033_v37  ;;  %vm3030_vm10 = vcmp.ge.f32.partialorder %v3022_v42, 0.0  ;;  %v3038_v14 = vmul.f32 0.2, %v3022_v42 }
 0x21d   : > { %v7275_v53 = vadd.f32 %v9686_v48, %v9676_v18  ;;  %v3348_v32 = vor.u32 %v3346_v60, %v3345_v46  ;;  %v3331_v12 = vrot.slane %v3329_v16, 7  ;;  %v3049_v40 = vmul.f32 1.4142135, %v3041_v63  ;;  %v9735_v21 = vpop.f32.mrf.mxu0 }
 0x21e   : > { %v7288_v61 = vpop.f32.mrf.mxu1  ;;  %v3332_v47 = vshll.u32 %v3296_v52, 16  ;;  %v3350_v25 = vshrl.u32 %v3299_v39, 16  ;;  %v3046_v41 = vsel %vm3030_vm10, %v3022_v42, %v3038_v14  ;;  %v2706_v59 = vadd.f32 %v7266_v9, %v9476_v44 }
 0x21f   : > { %v3586_v49 = vsel %vm8298_vm4, 0, %v3348_v32  ;;  %v3297_v31 = vpack.c.bf16 %v3049_v40, %v3049_v40  ;;  %v3054_v37 = vmul.f32 1.4142135, %v3046_v41  ;;  %vm3028_vm11 = vcmp.ge.f32.partialorder %v3020_v36, 0.0  ;;  %v7883_v35 = vpop.f32.mrf.mxu0 }
 0x220   : > { %v7289_v48 = vpop.f32.mrf.mxu1  ;;  %v3352_v18 = vrot.slane %v3350_v25, 7  ;;  %v3353_v46 = vshll.u32 %v3299_v39, 16  ;;  %v3036_v60 = vmul.f32 0.2, %v3020_v36  ;;  %v3008_v16 = vadd.f32 %v2999_v43, %v2862_v30 }
 0x221   : > { %v9740_v63 = vor.u32 %v3332_v47, %v3331_v12  ;;  %v3336_v3 = vshrl.u32 %v3297_v31, 16  ;;  %v2717_v52 = vadd.f32 %v7275_v53, %v9495_v20  ;;  %v9744_v42 = vadd.f32 %v7269_v34, %v9482_v33  ;;  %v9746_v44 = vpop.f32.mrf.mxu0 }
 0x222   : > { %v9750_v41 = vsel %vm8312_vm5, %v3586_v49, 0  ;;  %v7291_v9 = vpop.f32.mrf.mxu1  ;;  %v3355_v14 = vor.u32 %v3353_v46, %v3352_v18  ;;  %v3302_v32 = vpack.c.bf16 %v3054_v37, %v3054_v37  ;;  %v3044_v39 = vsel %vm3028_vm11, %v3020_v36, %v3036_v60 }
 0x223   : > { %v3338_v30 = vrot.slane %v3336_v3, 7  ;;  %v3052_v12 = vmul.f32 1.4142135, %v3044_v39  ;;  %v3023_v40 = vadd.f32 %v9696_v45, %v3008_v16  ;;  %v2854_v20 = vadd.f32 %v2853_v38, %v9626_v10  ;;  %v9761_v3 = vpop.f32.mrf.mxu0 }
 0x224   : > { %v9755_v53 = vadd.f32 %v7286_v55, %v7285_v54  ;;  %v7292_v33 = vpop.f32.mrf.mxu1  ;;  %v3339_v34 = vshll.u32 %v3297_v31, 16  ;;  %v3371_v43 = vshrl.u32 %v3302_v32, 16  ;;  %v2875_v47 = vadd.f32 %v7882_v22, %v9681_v62 }
 0x225   : > { %v3587_v49 = vsel %vm8298_vm4, 0, %v3355_v14  ;;  %v3374_v37 = vshll.u32 %v3302_v32, 16  ;;  %v3300_v36 = vpack.c.bf16 %v3052_v12, %v3052_v12  ;;  %vm3031_vm12 = vcmp.ge.f32.partialorder %v3023_v40, 0.0  ;;  %v9775_v12 = vpop.f32.mrf.mxu0 }
 0x226   : > { %v3341_v18 = vor.u32 %v3339_v34, %v3338_v30  ;;  %v7294_v46 = vpop.f32.mrf.mxu1  ;;  %v3373_v60 = vrot.slane %v3371_v43, 7  ;;  %v3039_v10 = vmul.f32 0.2, %v3023_v40  ;;  %v9763_v38 = vadd.f32 %v7289_v48, %v7288_v61 }
 0x227   : > { %v3357_v54 = vshrl.u32 %v3300_v36, 16  ;;  %v3006_v22 = vadd.f32 %v9699_v19, %v2854_v20  ;;  %v9771_v55 = vsel %vm8312_vm5, %v3587_v49, 0  ;;  %v3090_v32 = vadd.f32 %v9673_v17, %v2875_v47 }
 0x228   : > { %v3376_v31 = vor.u32 %v3374_v37, %v3373_v60  ;;  %v7295_v16 = vpop.f32.mrf.mxu1  ;;  %v3047_v14 = vsel %vm3031_vm12, %v3023_v40, %v3039_v10  ;;  %v3360_v30 = vshll.u32 %v3300_v36, 16  ;;  %v3585_v34 = vsel %vm8298_vm4, 0, %v3341_v18 }
 0x229   : > { %v3359_v39 = vrot.slane %v3357_v54, 7  ;;  %v3055_v61 = vmul.f32 1.4142135, %v3047_v14  ;;  %v3021_v48 = vadd.f32 %v9696_v45, %v3006_v22  ;;  %v3098_v43 = vadd.f32 %v9696_v45, %v3090_v32 }
 0x22a   : > { %v3590_v19 = vsel %vm8298_vm4, 0, %v3376_v31  ;;  %v7297_v20 = vpop.f32.mrf.mxu1  ;;  %v2867_v40 = vadd.f32 %v9735_v21, %v2706_v59  ;;  %v9788_v36 = vadd.f32 %v7292_v33, %v7291_v9  ;;  %v2878_v10 = vadd.f32 %v7883_v35, %v2717_v52  ;;  %v9796_v59 = vpop.f32.mrf.mxu0 }
 0x22b   : > { %v9785_v17 = vsel %vm8312_vm5, %v3590_v19, 0  ;;  %v3362_v47 = vor.u32 %v3360_v30, %v3359_v39  ;;  %v3303_v49 = vpack.c.bf16 %v3055_v61, %v3055_v61  ;;  %vm3029_vm13 = vcmp.ge.f32.partialorder %v3021_v48, 0.0 }
 0x22c   : > { %v7298_v18 = vpop.f32.mrf.mxu1  ;;  %v3037_v60 = vmul.f32 0.2, %v3021_v48  ;;  %v9792_v54 = vsel %vm8312_vm5, %v3585_v34, 0  ;;  %v9794_v22 = vadd.f32 %v7295_v16, %v7294_v46  ;;  %vm3106_vm14 = vcmp.ge.f32.partialorder %v3098_v43, 0.0 }
 0x22d   : > { %v3378_v21 = vshrl.u32 %v3303_v49, 16  ;;  %v3588_v14 = vsel %vm8298_vm4, 0, %v3362_v47  ;;  %v3114_v32 = vmul.f32 0.2, %v3098_v43  ;;  %v3381_v35 = vshll.u32 %v3303_v49, 16 }
 0x22e   : > { %v3045_v9 = vsel %vm3029_vm13, %v3021_v48, %v3037_v60  ;;  %v7300_v33 = vpop.f32.mrf.mxu1  ;;  %v3088_v30 = vadd.f32 %v9613_v23, %v2867_v40  ;;  %v3091_v16 = vadd.f32 %v9667_v8, %v2878_v10  ;;  %v2870_v34 = vadd.f32 %v9746_v44, %v9744_v42 }
 0x22f   : > { %v3380_v39 = vrot.slane %v3378_v21, 7  ;;  %v3053_v52 = vmul.f32 1.4142135, %v3045_v9  ;;  %v3122_v61 = vsel %vm3106_vm14, %v3098_v43, %v3114_v32  ;;  %v2730_v19 = vadd.f32 %v9729_v6, %v9519_v27  ;;  %v2885_v21 = vpop.f32.mrf.mxu0 }
 0x230   : > { %v7301_v46 = vpop.f32.mrf.mxu1  ;;  %v3935_v47 = vshll.u32 %v9785_v17, 16  ;;  %v3130_v31 = vmul.f32 1.4142135, %v3122_v61  ;;  %v9810_v49 = vsel %vm8312_vm5, %v3588_v14, 0  ;;  %v9812_v23 = vadd.f32 %v7298_v18, %v7297_v20 }
 0x231   : > { %v3383_v48 = vor.u32 %v3381_v35, %v3380_v39  ;;  %v3301_v60 = vpack.c.bf16 %v3053_v52, %v3053_v52  ;;  %v3096_v8 = vadd.f32 %v9696_v45, %v3088_v30  ;;  %v3099_v42 = vadd.f32 %v9696_v45, %v3091_v16  ;;  %v3082_v35 = vpop.permute.xlu0 %3081  ;;  %v7890_v52 = vpop.f32.mrf.mxu0 }
 0x232   : > { %v7303_v43 = vpop.f32.mrf.mxu1  ;;  %v9818_v44 = vpack.c.bf16 %v3130_v31, %v3130_v31  ;;  %v3089_v40 = vadd.f32 %v9632_v56, %v2870_v34  ;;  %v2891_v14 = vadd.f32 %v9761_v3, %v2730_v19  ;;  %v9826_v9 = vrot.slane %v3935_v47, 1 }
 0x233   : > { %v3591_v27 = vsel %vm8298_vm4, 0, %v3383_v48  ;;  %v3364_v6 = vshrl.u32 %v3301_v60, 16  ;;  %vm3104_vm15 = vcmp.ge.f32.partialorder %v3096_v8, 0.0  ;;  %v3112_v20 = vmul.f32 0.2, %v3096_v8  ;;  %v2898_v34 = vpop.f32.mrf.mxu0 }
 0x234   : > { %v9823_v10 = vsel %vm8312_vm5, %v3591_v27, 0  ;;  %v7304_v18 = vpop.f32.mrf.mxu1  ;;  %11697 = vst [vmem:[#allocation26_spill] sm:$0xff] %v9826_v9  ;;  %v3367_v39 = vshll.u32 %v3301_v60, 16  ;;  %vm3107_vm0 = vcmp.ge.f32.partialorder %v3099_v42, 0.0  ;;  %v3115_v61 = vmul.f32 0.2, %v3099_v42 }
 0x235   : > { %11696 = vst [vmem:[#allocation25_spill] sm:$0xff] %v9823_v10  ;;  %v3366_v32 = vrot.slane %v3364_v6, 7  ;;  %v3942_v56 = vshll.u32 %v9823_v10, 16  ;;  %v3120_v30 = vsel %vm3104_vm15, %v3096_v8, %v3112_v20  ;;  %v3399_v27 = vshrl.u32 %v9818_v44, 16 }
 0x236   : > { %v7306_v16 = vpop.f32.mrf.mxu1  ;;  %v9832_v3 = vadd.f32 %v7301_v46, %v7300_v33  ;;  %v3123_v19 = vsel %vm3107_vm0, %v3099_v42, %v3115_v61  ;;  %v3097_v47 = vadd.f32 %v9696_v45, %v3089_v40  ;;  %v3094_v60 = vadd.f32 %v3082_v35, %v2891_v14 }
 0x237   : > { %v3369_v48 = vor.u32 %v3367_v39, %v3366_v32  ;;  %v2883_v31 = vadd.f32 %v9775_v12, %v9713_v58  ;;  %v3128_v8 = vmul.f32 1.4142135, %v3120_v30  ;;  %v3131_v20 = vmul.f32 1.4142135, %v3123_v19 }
 0x238   : > { %v7307_v6 = vpop.f32.mrf.mxu1  ;;  %v9838_v25 = vadd.f32 %v7304_v18, %v7303_v43  ;;  %v9840_v32 = vrot.slane %v3942_v56, 1  ;;  %vm3105_vm1 = vcmp.ge.f32.partialorder %v3097_v47, 0.0  ;;  %v3113_v33 = vmul.f32 0.2, %v3097_v47 }
 0x239   : > { %v3102_v46 = vadd.f32 %v9696_v45, %v3094_v60  ;;  %v9843_v40 = vrot.slane %v3399_v27, 7  ;;  %v3092_v14 = vadd.f32 %v9705_v24, %v2883_v31  ;;  %v2733_v58 = vadd.f32 %v9755_v53, %v9529_v29  ;;  %v3086_v31 = vpop.permute.xlu1 %3085  ;;  %v7891_v27 = vpop.f32.mrf.mxu0 }
 0x23a   : > { %11698 = vst [vmem:[#allocation27_spill] sm:$0xff] %v9840_v32  ;;  %v7309_v42 = vpop.f32.mrf.mxu1  ;;  %v2886_v12 = vadd.f32 %v2885_v21, %v9725_v15  ;;  %v3589_v43 = vsel %vm8298_vm4, 0, %v3369_v48  ;;  %v3121_v18 = vsel %vm3105_vm1, %v3097_v47, %v3113_v33  ;;  %v9851_v56 = vpack.c.bf16 %v3128_v8, %v3128_v8  ;;  %v8173_v8 = vld [vmem:[%s9324_s12 + $0x1f8] sm:$0xff]  }
 0x23b   : > { %vm3110_vm2 = vcmp.ge.f32.partialorder %v3102_v46, 0.0  ;;  %v3118_v39 = vmul.f32 0.2, %v3102_v46  ;;  %v9853_v30 = vpack.c.bf16 %v3131_v20, %v3131_v20  ;;  %v3129_v61 = vmul.f32 1.4142135, %v3121_v18  ;;  %7696 = vmatprep.subr.bf16.mxu0 %v8173_v8 }
 0x23c   : > { %v7310_v35 = vpop.f32.mrf.mxu1  ;;  %v3100_v24 = vadd.f32 %v9696_v45, %v3092_v14  ;;  %v2894_v15 = vadd.f32 %v9796_v59, %v2733_v58  ;;  %v3093_v53 = vadd.f32 %v9720_v13, %v2886_v12  ;;  %v2746_v48 = vadd.f32 %v9794_v22, %v9552_v4  ;;  %v2901_v12 = vpop.f32.mrf.mxu0 }
 0x23d   : > { %v3126_v29 = vsel %vm3110_vm2, %v3102_v46, %v3118_v39  ;;  %v9862_v19 = vsel %vm8312_vm5, %v3589_v43, 0  ;;  %v9864_v60 = vadd.f32 %v7307_v6, %v7306_v16  ;;  %v3406_v13 = vshrl.u32 %v9853_v30, 16 }
 0x23e   : > { %v7312_v21 = vpop.f32.mrf.mxu1  ;;  %v3134_v47 = vmul.f32 1.4142135, %v3126_v29  ;;  %vm3108_vm3 = vcmp.ge.f32.partialorder %v3100_v24, 0.0  ;;  %v3116_v20 = vmul.f32 0.2, %v3100_v24  ;;  %v3095_v33 = vadd.f32 %v3086_v31, %v2894_v15  ;;  %v7894_v8 = vpop.f32.mrf.mxu0 }
 0x23f   : > { %v3101_v46 = vadd.f32 %v9696_v45, %v3093_v53  ;;  %v2907_v59 = vadd.f32 %v7890_v52, %v2746_v48  ;;  %v9869_v58 = vpack.c.bf16 %v3129_v61, %v3129_v61  ;;  %v2738_v22 = vadd.f32 %v9763_v38, %v9538_v28 }
 0x240   : > { %v7313_v14 = vpop.f32.mrf.mxu1  ;;  %v9871_v4 = vpack.c.bf16 %v3134_v47, %v3134_v47  ;;  %v3124_v16 = vsel %vm3108_vm3, %v3100_v24, %v3116_v20  ;;  %v3103_v6 = vadd.f32 %v9696_v45, %v3095_v33  ;;  %v7311_v31 = vadd.f32 %v7310_v35, %v7309_v42 }
 0x241   : > { %vm3109_vm6 = vcmp.ge.f32.partialorder %v3101_v46, 0.0  ;;  %v3117_v43 = vmul.f32 0.2, %v3101_v46  ;;  %v3132_v39 = vmul.f32 1.4142135, %v3124_v16  ;;  %v3170_v61 = vadd.f32 %v9509_v26, %v2907_v59 }
 0x242   : > { %v7315_v18 = vpop.f32.mrf.mxu1  ;;  %vm3111_vm7 = vcmp.ge.f32.partialorder %v3103_v6, 0.0  ;;  %v3119_v29 = vmul.f32 0.2, %v3103_v6  ;;  %v2899_v53 = vadd.f32 %v2898_v34, %v2738_v22  ;;  %v9878_v28 = vrot.slane %v3406_v13, 7  ;;  %v11701_v34 = vld [vmem:[#allocation11_spill] sm:$0xff] }
 0x243   : > { %v3125_v15 = vsel %vm3109_vm6, %v3101_v46, %v3117_v43  ;;  %v3427_v38 = vshrl.u32 %v9871_v4, 16  ;;  %v9881_v24 = vpack.c.bf16 %v3132_v39, %v3132_v39  ;;  %v3178_v47 = vadd.f32 %v9696_v45, %v3170_v61  ;;  %v2914_v61 = vpop.f32.mrf.mxu0 }
 0x244   : > { %v7316_v48 = vpop.f32.mrf.mxu1  ;;  %v3392_v20 = vshrl.u32 %v9869_v58, 16  ;;  %v3127_v33 = vsel %vm3111_vm7, %v3103_v6, %v3119_v29  ;;  %v3168_v42 = vadd.f32 %v9554_v1, %v2899_v53  ;;  %v2749_v26 = vadd.f32 %v9812_v23, %v9562_v11 }
 0x245   : > { %v3413_v46 = vshrl.u32 %v9881_v24, 16  ;;  %v3133_v59 = vmul.f32 1.4142135, %v3125_v15  ;;  %v9892_v13 = vadd.f32 %v7313_v14, %v7312_v21  ;;  %vm3186_vm8 = vcmp.ge.f32.partialorder %v3178_v47, 0.0 }
 0x246   : > { %v9888_v35 = vpop.f32.mrf.mxu1  ;;  %v3194_v22 = vmul.f32 0.2, %v3178_v47  ;;  %v3176_v16 = vadd.f32 %v9696_v45, %v3168_v42  ;;  %v2910_v43 = vadd.f32 %v7891_v27, %v2749_v26  ;;  %v9897_v1 = vrot.slane %v3427_v38, 7 }
 0x247   : > { %v3135_v39 = vmul.f32 1.4142135, %v3127_v33  ;;  %v9899_v11 = vadd.f32 %v7316_v48, %v7315_v18  ;;  %v2741_v23 = vadd.f32 %v9788_v36, %v9544_v2  ;;  %v9907_v53 = vpack.c.bf16 %v3133_v59, %v3133_v59  ;;  %v7895_v59 = vpop.f32.mrf.mxu0 }
 0x248   : > { %v9895_v6 = vpop.f32.mrf.mxu1  ;;  %v3202_v29 = vsel %vm3186_vm8, %v3178_v47, %v3194_v22  ;;  %vm3184_vm9 = vcmp.ge.f32.partialorder %v3176_v16, 0.0  ;;  %v3192_v21 = vmul.f32 0.2, %v3176_v16  ;;  %v3171_v14 = vadd.f32 %v9535_v50, %v2910_v43 }
 0x249   : > { %v3210_v38 = vmul.f32 1.4142135, %v3202_v29  ;;  %v2902_v42 = vadd.f32 %v2901_v12, %v2741_v23  ;;  %v9909_v33 = vrot.slane %v3413_v46, 7  ;;  %v2762_v2 = vadd.f32 %v9864_v60, %v9590_v57 }
 0x24a   : > { %v9904_v15 = vpop.f32.mrf.mxu1  ;;  %v3200_v18 = vsel %vm3184_vm9, %v3176_v16, %v3192_v21  ;;  %v3179_v48 = vadd.f32 %v9696_v45, %v3171_v14  ;;  %v9916_v47 = vpack.c.bf16 %v3135_v39, %v3135_v39  ;;  %v2754_v46 = vadd.f32 %v9832_v3, %v9570_v51  ;;  %v11699_v21 = vld [vmem:[#allocation14_spill] sm:$0xff]  ;;  %v2917_v51 = vpop.f32.mrf.mxu0 }
 0x24b   : > { %v3314_v50 = vpack.c.bf16 %v3210_v38, %v3210_v38  ;;  %v3208_v26 = vmul.f32 1.4142135, %v3200_v18  ;;  %v3169_v22 = vadd.f32 %v9499_v7, %v2902_v42  ;;  %v2923_v12 = vadd.f32 %v7894_v8, %v2762_v2  ;;  %v11700_v7 = vld [vmem:[#allocation4_spill] sm:$0xff] }
 0x24c   : > { %v9914_v36 = vpop.f32.mrf.mxu1  ;;  %vm3187_vm10 = vcmp.ge.f32.partialorder %v3179_v48, 0.0  ;;  %v3195_v43 = vmul.f32 0.2, %v3179_v48  ;;  %v2915_v38 = vadd.f32 %v2914_v61, %v2754_v46  ;;  %v2765_v42 = vadd.f32 %v7311_v31, %v11700_v7  ;;  %v9936_v52 = vpop.f32.mrf.mxu0 }
 0x24d   : > { %v3455_v23 = vshrl.u32 %v3314_v50, 16  ;;  %v3312_v29 = vpack.c.bf16 %v3208_v26, %v3208_v26  ;;  %v3177_v57 = vadd.f32 %v9696_v45, %v3169_v22  ;;  %v3174_v14 = vadd.f32 %v11699_v21, %v2923_v12 }
 0x24e   : > { %v9923_v60 = vpop.f32.mrf.mxu1  ;;  %v3203_v39 = vsel %vm3187_vm10, %v3179_v48, %v3195_v43  ;;  %v3434_v18 = vshrl.u32 %v9916_v47, 16  ;;  %v3172_v22 = vadd.f32 %v11701_v34, %v2915_v38  ;;  %v3458_v16 = vshll.u32 %v3314_v50, 16 }
 0x24f   : > { %v3457_v8 = vrot.slane %v3455_v23, 7  ;;  %v3441_v2 = vshrl.u32 %v3312_v29, 16  ;;  %v3211_v62 = vmul.f32 1.4142135, %v3203_v39  ;;  %vm3185_vm11 = vcmp.ge.f32.partialorder %v3177_v57, 0.0  ;;  %v3166_v23 = vpop.permute.xlu0 %3165 }
 0x250   : > { %v3193_v3 = vmul.f32 0.2, %v3177_v57  ;;  %v3182_v26 = vadd.f32 %v9696_v45, %v3174_v14  ;;  %v2926_v43 = vadd.f32 %v7895_v59, %v2765_v42  ;;  %v9930_v12 = vpop.f32.mrf.mxu1  ;;  %v3180_v46 = vadd.f32 %v9696_v45, %v3172_v22 }
 0x251   : > { %v3443_v27 = vrot.slane %v3441_v2, 7  ;;  %v3315_v48 = vpack.c.bf16 %v3211_v62, %v3211_v62  ;;  %v9934_v21 = vor.u32 %v3458_v16, %v3457_v8  ;;  %v3444_v7 = vshll.u32 %v3312_v29, 16  ;;  %v11702_v29 = vld [vmem:[#allocation15_spill] sm:$0xff] }
 0x252   : > { %v3201_v61 = vsel %vm3185_vm11, %v3177_v57, %v3193_v3  ;;  %vm3190_vm12 = vcmp.ge.f32.partialorder %v3182_v26, 0.0  ;;  %v3198_v31 = vmul.f32 0.2, %v3182_v26  ;;  %vm3188_vm13 = vcmp.ge.f32.partialorder %v3180_v46, 0.0  ;;  %v9940_v2 = vpop.f32.mrf.mxu1 }
 0x253   : > { %v3462_v14 = vshrl.u32 %v3315_v48, 16  ;;  %v3209_v34 = vmul.f32 1.4142135, %v3201_v61  ;;  %v3196_v62 = vmul.f32 0.2, %v3180_v46  ;;  %v9938_v59 = vor.u32 %v3444_v7, %v3443_v27  ;;  %v2930_v27 = vpop.f32.mrf.mxu0 }
 0x254   : > { %v3206_v50 = vsel %vm3190_vm12, %v3182_v26, %v3198_v31  ;;  %v3175_v42 = vadd.f32 %v3166_v23, %v2926_v43  ;;  %v3465_v3 = vshll.u32 %v3315_v48, 16  ;;  %v7320_v16 = vadd.f32 %v9895_v6, %v9888_v35  ;;  %v9958_v23 = vpop.f32.mrf.mxu1 }
 0x255   : > { %v3464_v57 = vrot.slane %v3462_v14, 7  ;;  %v3214_v38 = vmul.f32 1.4142135, %v3206_v50  ;;  %v3204_v8 = vsel %vm3188_vm13, %v3180_v46, %v3196_v62  ;;  %v2757_v22 = vadd.f32 %v9838_v25, %v11702_v29 }
 0x256   : > { %v3313_v39 = vpack.c.bf16 %v3209_v34, %v3209_v34  ;;  %v3212_v26 = vmul.f32 1.4142135, %v3204_v8  ;;  %v3183_v31 = vadd.f32 %v9696_v45, %v3175_v42  ;;  %v9947_v7 = vrot.slane %v3434_v18, 7 }
 0x257   : > { %v3318_v61 = vpack.c.bf16 %v3214_v38, %v3214_v38  ;;  %v9949_v14 = vor.u32 %v3465_v3, %v3464_v57  ;;  %v2918_v43 = vadd.f32 %v2917_v51, %v2757_v22  ;;  %v3385_v48 = vshrl.u32 %v9851_v56, 16  ;;  %v11703_v51 = vld [vmem:[#allocation5_spill] sm:$0xff]  ;;  %v7899_v3 = vpop.f32.mrf.mxu0 }
 0x258   : > { %v3316_v46 = vpack.c.bf16 %v3212_v26, %v3212_v26  ;;  %vm3191_vm14 = vcmp.ge.f32.partialorder %v3183_v31, 0.0  ;;  %v3199_v18 = vmul.f32 0.2, %v3183_v31  ;;  %v7323_v34 = vadd.f32 %v9914_v36, %v9904_v15  ;;  %v7330_v36 = vpop.f32.mrf.mxu1 }
 0x259   : > { %v3483_v6 = vshrl.u32 %v3318_v61, 16  ;;  %v3173_v50 = vadd.f32 %v11703_v51, %v2918_v43  ;;  %v3448_v62 = vshrl.u32 %v3313_v39, 16  ;;  %v3451_v57 = vshll.u32 %v3313_v39, 16 }
 0x25a   : > { %v3469_v38 = vshrl.u32 %v3316_v46, 16  ;;  %v3387_v42 = vrot.slane %v3385_v48, 7  ;;  %v3207_v29 = vsel %vm3191_vm14, %v3183_v31, %v3199_v18  ;;  %v3388_v26 = vshll.u32 %v9851_v56, 16  ;;  %v2933_v18 = vpop.f32.mrf.mxu0 }
 0x25b   : > { %v3181_v22 = vadd.f32 %v9696_v45, %v3173_v50  ;;  %v3485_v37 = vrot.slane %v3483_v6, 7  ;;  %v3215_v25 = vmul.f32 1.4142135, %v3207_v29  ;;  %v3394_v15 = vrot.slane %v3392_v20, 7  ;;  %v11704_v6 = vld [vmem:[#allocation16_spill] sm:$0xff] }
 0x25c   : > { %v3471_v35 = vrot.slane %v3469_v38, 7  ;;  %v3390_v43 = vor.u32 %v3388_v26, %v3387_v42  ;;  %v3395_v48 = vshll.u32 %v9869_v58, 16  ;;  %v3450_v51 = vrot.slane %v3448_v62, 7  ;;  %v7331_v26 = vpop.f32.mrf.mxu1 }
 0x25d   : > { %vm3189_vm15 = vcmp.ge.f32.partialorder %v3181_v22, 0.0  ;;  %v3197_v39 = vmul.f32 0.2, %v3181_v22  ;;  %v3486_v32 = vshll.u32 %v3318_v61, 16  ;;  %v3472_v8 = vshll.u32 %v3316_v46, 16  ;;  %v11705_v46 = vld [vmem:[#allocation7_spill] sm:$0xff] }
 0x25e   : > { %v3319_v31 = vpack.c.bf16 %v3215_v25, %v3215_v25  ;;  %v3397_v10 = vor.u32 %v3395_v48, %v3394_v15  ;;  %v3592_v56 = vsel %vm8298_vm4, 0, %v3390_v43  ;;  %v2778_v38 = vadd.f32 %v7320_v16, %v11704_v6  ;;  %v7902_v16 = vpop.f32.mrf.mxu0  ;;  %v11710_v48 = vld [vmem:[#allocation13_spill] sm:$0xff] }
 0x25f   : > { %v3205_v50 = vsel %vm3189_vm15, %v3181_v22, %v3197_v39  ;;  %v9974_v29 = vor.u32 %v3486_v32, %v3485_v37  ;;  %v9976_v20 = vor.u32 %v3472_v8, %v3471_v35  ;;  %v2770_v62 = vadd.f32 %v9892_v13, %v11705_v46  ;;  %v11716_v8 = vld [vmem:[#allocation23_spill] sm:$0xff] }
 0x260   : > { %v3490_v9 = vshrl.u32 %v3319_v31, 16  ;;  %v3213_v42 = vmul.f32 1.4142135, %v3205_v50  ;;  %v3493_v58 = vshll.u32 %v3319_v31, 16  ;;  %v3593_v61 = vsel %vm8298_vm4, 0, %v3397_v10  ;;  %v7333_v50 = vpop.f32.mrf.mxu1 }
 0x261   : > { %v2939_v25 = vadd.f32 %v9936_v52, %v2778_v38  ;;  %v9987_v37 = vsel %vm8312_vm5, %v3592_v56, 0  ;;  %v9991_v32 = vsel %vm8312_vm5, %v3593_v61, 0  ;;  %v9993_v35 = vor.u32 %v3451_v57, %v3450_v51  ;;  %v11709_v52 = vld [vmem:[#allocation19_spill] sm:$0xff]  ;;  %v11711_v56 = vld [vmem:[#allocation10_spill] sm:$0xff] }
 0x262   : > { %v3492_v22 = vrot.slane %v3490_v9, 7  ;;  %v9983_v15 = vpack.c.bf16 %v3213_v42, %v3213_v42  ;;  %11706 = vst [vmem:[#allocation14_spill] sm:$0xff] %v9987_v37  ;;  %11707 = vst [vmem:[#allocation4_spill] sm:$0xff] %v9991_v32  ;;  %v9997_v10 = vcombine.low %v9987_v37, %v9991_v32  ;;  %v2931_v9 = vadd.f32 %v2930_v27, %v2770_v62 }
 0x263   : > { %v3250_v13 = vadd.f32 %v11709_v52, %v2939_v25  ;;  %v7326_v43 = vadd.f32 %v9930_v12, %v9923_v60  ;;  %v2781_v31 = vadd.f32 %v7323_v34, %v11710_v48  ;;  %v11712_v12 = vld [vmem:[#allocation12_spill] sm:$0xff]  ;;  %v7329_v46 = vadd.f32 %v9958_v23, %v9940_v2 }
 0x264   : > { %11708 = vst [vmem:[#allocation11_spill] sm:$0xff] %v9997_v10  ;;  %v3495_v39 = vor.u32 %v3493_v58, %v3492_v22  ;;  %4961 = vmatprep.mubr.bf16.mxu0 %v9997_v10  ;;  %v3248_v6 = vadd.f32 %v11711_v56, %v2931_v9  ;;  %v3476_v38 = vshrl.u32 %v9983_v15, 16  ;;  %v3479_v42 = vshll.u32 %v9983_v15, 16  ;;  %v2946_v58 = vpop.f32.mrf.mxu0  ;;  %v11713_v22 = vld [vmem:[#allocation18_spill] sm:$0xff]  ;;  %v7334_v15 = vpop.f32.mrf.mxu1 }
 0x265   : > { %v3258_v27 = vadd.f32 %v9696_v45, %v3250_v13  ;;  %v2942_v60 = vadd.f32 %v7899_v3, %v2781_v31  ;;  %v2773_v34 = vadd.f32 %v9899_v11, %v11712_v12  ;;  %v7332_v9 = vadd.f32 %v7331_v26, %v7330_v36  ;;  %v11714_v11 = vld [vmem:[#allocation17_spill] sm:$0xff] }
 0x266   : > { %v3256_v25 = vadd.f32 %v9696_v45, %v3248_v6  ;;  %v3607_v62 = vsel %vm8298_vm4, 0, %v3495_v39  ;;  %v2786_v31 = vadd.f32 %v7326_v43, %v11714_v11  ;;  %v11715_v6 = vld [vmem:[#allocation6_spill] sm:$0xff]  ;;  %v7903_v23 = vpop.f32.mrf.mxu0  ;;  %v3478_v57 = vrot.slane %v3476_v38, 7 }
 0x267   : > { %vm3266_vm0 = vcmp.ge.f32.partialorder %v3258_v27, 0.0  ;;  %v3274_v61 = vmul.f32 0.2, %v3258_v27  ;;  %v3251_v52 = vadd.f32 %v11713_v22, %v2942_v60  ;;  %v2934_v13 = vadd.f32 %v2933_v18, %v2773_v34  ;;  %v11718_v38 = vld [vmem:[#allocation22_spill] sm:$0xff] }
 0x268   : > { %vm3264_vm1 = vcmp.ge.f32.partialorder %v3256_v25, 0.0  ;;  %v3272_v48 = vmul.f32 0.2, %v3256_v25  ;;  %v2794_v2 = vadd.f32 %v7332_v9, %v11716_v8  ;;  %v2947_v10 = vadd.f32 %v2946_v58, %v2786_v31  ;;  %v2949_v58 = vpop.f32.mrf.mxu0 }
 0x269   : > { %v3282_v3 = vsel %vm3266_vm0, %v3258_v27, %v3274_v61  ;;  %v3259_v12 = vadd.f32 %v9696_v45, %v3251_v52  ;;  %v3249_v51 = vadd.f32 %v11715_v6, %v2934_v13  ;;  %v7335_v60 = vadd.f32 %v7334_v15, %v7333_v50  ;;  %v11717_v61 = vld [vmem:[#allocation9_spill] sm:$0xff]  ;;  %v11719_v15 = vld [vmem:[#allocation20_spill] sm:$0xff] }
 0x26a   : > { %v3290_v56 = vmul.f32 1.4142135, %v3282_v3  ;;  %v3280_v39 = vsel %vm3264_vm1, %v3256_v25, %v3272_v48  ;;  %v10029_v27 = vsel %vm8312_vm5, %v3607_v62, 0  ;;  %v2955_v34 = vadd.f32 %v7902_v16, %v2794_v2 }
 0x26b   : > { %v3288_v36 = vmul.f32 1.4142135, %v3280_v39  ;;  %vm3267_vm2 = vcmp.ge.f32.partialorder %v3259_v12, 0.0  ;;  %v3275_v26 = vmul.f32 0.2, %v3259_v12  ;;  %v3257_v43 = vadd.f32 %v9696_v45, %v3249_v51  ;;  %v11720_v51 = vld [vmem:[#allocation24_spill] sm:$0xff] }
 0x26c   : > { %v3322_v18 = vpack.c.bf16 %v3290_v56, %v3290_v56  ;;  %v3252_v22 = vadd.f32 %v11717_v61, %v2947_v10  ;;  %v2789_v25 = vadd.f32 %v7329_v46, %v11718_v38  ;;  %v3254_v3 = vadd.f32 %v11719_v15, %v2955_v34  ;;  %v11721_v61 = vld [vmem:[#allocation8_spill] sm:$0xff] }
 0x26d   : > { %v3320_v8 = vpack.c.bf16 %v3288_v36, %v3288_v36  ;;  %v3283_v13 = vsel %vm3267_vm2, %v3259_v12, %v3275_v26  ;;  %vm3265_vm3 = vcmp.ge.f32.partialorder %v3257_v43, 0.0  ;;  %v3273_v9 = vmul.f32 0.2, %v3257_v43 }
 0x26e   : > { %v3511_v52 = vshrl.u32 %v3322_v18, 16  ;;  %v3291_v50 = vmul.f32 1.4142135, %v3283_v13  ;;  %v10035_v48 = vor.u32 %v3479_v42, %v3478_v57  ;;  %v3260_v11 = vadd.f32 %v9696_v45, %v3252_v22 }
 0x26f   : > { %v3497_v62 = vshrl.u32 %v3320_v8, 16  ;;  %v2797_v16 = vadd.f32 %v7335_v60, %v11720_v51  ;;  %v3281_v10 = vsel %vm3265_vm3, %v3257_v43, %v3273_v9  ;;  %v3262_v56 = vadd.f32 %v9696_v45, %v3254_v3  ;;  %v8213_v9 = vld [vmem:[%s11562_s4] ss:$0 sm:$0xff] }
 0x270   : > { %v3323_v31 = vpack.c.bf16 %v3291_v50, %v3291_v50  ;;  %v2950_v12 = vadd.f32 %v2949_v58, %v2789_v25  ;;  %v3513_v6 = vrot.slane %v3511_v52, 7  ;;  %v3500_v2 = vshll.u32 %v3320_v8, 16 }
 0x271   : > { %v3499_v46 = vrot.slane %v3497_v62, 7  ;;  %v3289_v39 = vmul.f32 1.4142135, %v3281_v10  ;;  %vm3270_vm6 = vcmp.ge.f32.partialorder %v3262_v56, 0.0  ;;  %v3278_v26 = vmul.f32 0.2, %v3262_v56 }
 0x272   : > { %v3518_v36 = vshrl.u32 %v3323_v31, 16  ;;  %vm3268_vm7 = vcmp.ge.f32.partialorder %v3260_v11, 0.0  ;;  %v3276_v34 = vmul.f32 0.2, %v3260_v11  ;;  %v3253_v22 = vadd.f32 %v11721_v61, %v2950_v12 }
 0x273   : > { %v3502_v57 = vor.u32 %v3500_v2, %v3499_v46  ;;  %v10040_v42 = vpack.c.bf16 %v3289_v39, %v3289_v39  ;;  %v3514_v60 = vshll.u32 %v3322_v18, 16  ;;  %v3286_v43 = vsel %vm3270_vm6, %v3262_v56, %v3278_v26 }
 0x274   : > { %v3520_v13 = vrot.slane %v3518_v36, 7  ;;  %v2958_v38 = vadd.f32 %v7903_v23, %v2797_v16  ;;  %v3521_v52 = vshll.u32 %v3323_v31, 16  ;;  %v3294_v25 = vmul.f32 1.4142135, %v3286_v43 }
 0x275   : > { %v3608_v45 = vsel %vm8298_vm4, 0, %v3502_v57  ;;  %v3504_v8 = vshrl.u32 %v10040_v42, 16  ;;  %v3284_v50 = vsel %vm3268_vm7, %v3260_v11, %v3276_v34  ;;  %v3261_v18 = vadd.f32 %v8213_v9, %v3253_v22  ;;  %v3246_v11 = vpop.permute.xlu1 %3245 }
 0x276   : > { %v10048_v58 = vsel %vm8312_vm5, %v3608_v45, 0  ;;  %v11722_v23 = vsel %vm8298_vm4, 0, %v9938_v59  ;;  %v10059_v3 = vor.u32 %v3514_v60, %v3513_v6  ;;  %v3507_v51 = vshll.u32 %v10040_v42, 16 }
 0x277   : > { %v3632_v15 = vsel %vm8312_vm5, %v11722_v23, 0  ;;  %v3844_v62 = vshll.u32 %v10048_v58, 16  ;;  %v10063_v16 = vpack.c.bf16 %v3294_v25, %v3294_v25  ;;  %v10065_v31 = vor.u32 %v3521_v52, %v3520_v13 }
 0x278   : > { %v3292_v10 = vmul.f32 1.4142135, %v3284_v50  ;;  %vm3269_vm8 = vcmp.ge.f32.partialorder %v3261_v18, 0.0  ;;  %v3277_v56 = vmul.f32 0.2, %v3261_v18  ;;  %v3842_v12 = vshrl.u32 %v10048_v58, 16 }
 0x279   : > { %v3506_v59 = vrot.slane %v3504_v8, 7  ;;  %v3793_v46 = vshrl.u32 %v3632_v15, 16  ;;  %v3795_v2 = vshll.u32 %v3632_v15, 16  ;;  %v3539_v6 = vshrl.u32 %v10063_v16, 16 }
 0x27a   : > { %v3324_v39 = vpack.c.bf16 %v3292_v10, %v3292_v10  ;;  %v3285_v36 = vsel %vm3269_vm8, %v3261_v18, %v3277_v56  ;;  %v3255_v26 = vadd.f32 %v3246_v11, %v2958_v38  ;;  %v3846_v57 = vrot.slane %v3844_v62, 1  ;;  %v11723_v38 = vld [vmem:[#allocation2_spill] sm:$0xff]  ;;  %v11725_v62 = vld [vmem:[#allocation3_spill] sm:$0xff]  ;;  %v8164_v56 = vld [vmem:[%s9324_s12 + $0x138] sm:$0xff]  }
 0x27b   : > { %v3293_v42 = vmul.f32 1.4142135, %v3285_v36  ;;  %v3797_v34 = vrot.slane %v3795_v2, 1  ;;  %v3601_v61 = vsel %vm8298_vm4, 0, %v9993_v35  ;;  %v6670_v8 = vcombine.low %v11723_v38, %v10048_v58  ;;  %v8182_v38 = vld [vmem:[%s9324_s12 + $0x1a8] sm:$0xff]  }
 0x27c   : > { %v3525_v60 = vshrl.u32 %v3324_v39, 16  ;;  %v3263_v13 = vadd.f32 %v8213_v9, %v3255_v26  ;;  %v3633_v43 = vsel %vm8312_vm5, %v3601_v61, 0  ;;  %v11724_v35 = vsel %vm8298_vm4, 0, %v9934_v21  ;;  %v8167_v26 = vld [vmem:[%s9324_s12 + $0x170] sm:$0xff]  }
 0x27d   : > { %v10075_v45 = vpack.c.bf16 %v3293_v42, %v3293_v42  ;;  %v10077_v52 = vor.u32 %v3797_v34, %v3793_v46  ;;  %v3634_v25 = vsel %vm8312_vm5, %v11724_v35, 0  ;;  %v10087_v50 = vrot.slane %v3539_v6, 7 }
 0x27e   : > { %vm3271_vm9 = vcmp.ge.f32.partialorder %v3263_v13, 0.0  ;;  %v3279_v9 = vmul.f32 0.2, %v3263_v13  ;;  %v3802_v18 = vshll.u32 %v3633_v43, 16  ;;  %v3527_v23 = vrot.slane %v3525_v60, 7 }
 0x27f   : > { %v3528_v15 = vshll.u32 %v3324_v39, 16  ;;  %v10091_v11 = vcombine.low %v11725_v62, %v10077_v52  ;;  %v3800_v10 = vshrl.u32 %v3633_v43, 16  ;;  %v3532_v46 = vshrl.u32 %v10075_v45, 16 }
 0x280   : > { %v3287_v21 = vsel %vm3271_vm9, %v3263_v13, %v3279_v9  ;;  %v3804_v2 = vrot.slane %v3802_v18, 1  ;;  %v3809_v36 = vshll.u32 %v3634_v25, 16  ;;  %v3807_v39 = vshrl.u32 %v3634_v25, 16  ;;  %v8174_v18 = vld [vmem:[%s9324_s12 + $0x1b8] sm:$0xff]  }
 0x281   : > { %4800 = vmatprep.mubr.bf16.mxu1 %v10091_v11  ;;  %v10098_v42 = vor.u32 %v3846_v57, %v3842_v12  ;;  %v11727_v34 = vshll.u32 %v9818_v44, 16  ;;  %v11728_v43 = vshll.u32 %v9853_v30, 16  ;;  %v3509_v9 = vor.u32 %v3507_v51, %v3506_v59  ;;  %v8168_v57 = vld [vmem:[%s9324_s12 + $0x130] sm:$0xff]  }
 0x282   : > { %4801 = vmatmul.mubr.bf16.vlgmr.msra.gmra.mxu1 %v6670_v8  ;;  %v10103_v60 = vor.u32 %v3804_v2, %v3800_v10  ;;  %v3811_v13 = vrot.slane %v3809_v36, 1  ;;  %v3295_v22 = vmul.f32 1.4142135, %v3287_v21  ;;  %v8177_v8 = vld [vmem:[%s9324_s12 + $0x1f0] sm:$0xff]   ;;  %v10120_v30 = vor.u32 %v3528_v15, %v3527_v23  ;;  %v8169_v10 = vld [vmem:[%s9324_s12 + $0x168] sm:$0xff]  }
 0x283   : > { %11726 = vst [vmem:[#allocation15_spill] sm:$0xff] %v10098_v42  ;;  %v3404_v61 = vor.u32 %v11727_v34, %v9843_v40  ;;  %v3411_v35 = vor.u32 %v11728_v43, %v9878_v28  ;;  %7585 = vmatpush3.bf16.msra.mxu1 %v8164_v56  ;;  %v10111_v12 = vcombine.low %v11725_v62, %v10098_v42  ;;  %v3610_v40 = vsel %vm8298_vm4, 0, %v10059_v3 }
 0x284   : > { %v10122_v28 = vor.u32 %v3811_v13, %v3807_v39  ;;  %v3609_v59 = vsel %vm8298_vm4, 0, %v3509_v9  ;;  %7586 = vmatprep.subr.bf16.mxu1 %v8167_v26  ;;  %v10128_v25 = vrot.slane %v3532_v46, 7  ;;  %v10154_v21 = vsel %vm8312_vm5, %v3610_v40, 0  ;;  %v8178_v26 = vld [vmem:[%s9324_s12 + $0x1b0] sm:$0xff]   ;;  %v8171_v40 = vld [vmem:[%s9324_s12 + $0x160] sm:$0xff]  }
 0x285   : > { %v3594_v44 = vsel %vm8298_vm4, 0, %v3404_v61  ;;  %v3595_v51 = vsel %vm8298_vm4, 0, %v3411_v35  ;;  %4962 = vmatmul.mubr.bf16.vlgmr.msra.gmra.mxu0 %v10111_v12  ;;  %v10141_v15 = vsel %vm8312_vm5, %v3609_v59, 0  ;;  %v11731_v2 = vsel %vm8298_vm4, 0, %v9949_v14  ;;  %v8170_v14 = vld [vmem:[%s9324_s12 + $0x128] sm:$0xff]  }
 0x286   : > { %v10133_v3 = vsel %vm8312_vm5, %v3594_v44, 0  ;;  %v10137_v23 = vsel %vm8312_vm5, %v3595_v51, 0  ;;  %v10146_v56 = vcombine.low %v10103_v60, %v10122_v28  ;;  %v3635_v36 = vsel %vm8312_vm5, %v11731_v2, 0  ;;  %7697 = vmatpush3.bf16.msra.mxu0 %v8174_v18  ;;  %v8181_v35 = vld [vmem:[%s9324_s12 + $0x1e8] sm:$0xff]  }
 0x287   : > { %11729 = vst [vmem:[#allocation5_spill] sm:$0xff] %v10133_v3  ;;  %v10150_v46 = vcombine.low %v10133_v3, %v10137_v23  ;;  %v10163_v39 = vpack.c.bf16 %v3295_v22, %v3295_v22  ;;  %v6679_v34 = vcombine.low %v10141_v15, %v10154_v21  ;;  %v11732_v61 = vsel %vm8298_vm4, 0, %v9976_v20  ;;  %7587 = vmatpush3.bf16.msra.mxu1 %v8168_v57 }
 0x288   : > { %v3636_v13 = vsel %vm8312_vm5, %v11732_v61, 0  ;;  %v3814_v43 = vshrl.u32 %v3635_v36, 16  ;;  %7698 = vmatprep.subr.bf16.mxu0 %v8177_v8  ;;  %4808 = vmatprep.mubr.bf16.mxu1 %v10146_v56  ;;  %v3816_v22 = vshll.u32 %v3635_v36, 16  ;;  %v3849_v44 = vshrl.u32 %v10141_v15, 16 }
 0x289   : > { %11730 = vst [vmem:[#allocation16_spill] sm:$0xff] %v10150_v46  ;;  %4969 = vmatprep.mubr.bf16.mxu0 %v10150_v46  ;;  %v3821_v9 = vshrl.u32 %v3636_v13, 16  ;;  %v3823_v18 = vshll.u32 %v3636_v13, 16  ;;  %v3851_v20 = vshll.u32 %v10141_v15, 16  ;;  %v3856_v51 = vshrl.u32 %v10154_v21, 16  ;;  %7588 = vmatprep.subr.bf16.mxu1 %v8169_v10  ;;  %v8185_v10 = vld [vmem:[%s9324_s12 + $0x1e0] sm:$0xff]  }
 0x28a   : > { %v3858_v57 = vshll.u32 %v10154_v21, 16  ;;  %v11733_v8 = vshll.u32 %v9881_v24, 16  ;;  %4809 = vmatmul.mubr.bf16.gmra.mxu1 %v6679_v34  ;;  %v3818_v2 = vrot.slane %v3816_v22, 1  ;;  %v11734_v61 = vshrl.u32 %v9907_v53, 16  ;;  %7699 = vmatpush3.bf16.msra.mxu0 %v8178_v26 }
 0x28b   : > { %v3825_v36 = vrot.slane %v3823_v18, 1  ;;  %v3423_v6 = vshll.u32 %v9907_v53, 16  ;;  %v3853_v62 = vrot.slane %v3851_v20, 1  ;;  %v3611_v24 = vsel %vm8298_vm4, 0, %v10065_v31  ;;  %7589 = vmatpush3.bf16.msra.mxu1 %v8170_v14  ;;  %7700 = vmatprep.subr.bf16.mxu0 %v8181_v35  ;;  %v8175_v18 = vld [vmem:[%s9324_s12 + $0x158] sm:$0xff]  }
 0x28c   : > { %v3418_v59 = vor.u32 %v11733_v8, %v9909_v33  ;;  %v3422_v13 = vrot.slane %v11734_v61, 7  ;;  %v3860_v46 = vrot.slane %v3858_v57, 1  ;;  %v8172_v33 = vld [vmem:[%s9324_s12 + $0x120] sm:$0xff]   ;;  %v10196_v34 = vor.u32 %v3818_v2, %v3814_v43  ;;  %7590 = vmatprep.subr.bf16.mxu1 %v8171_v40  ;;  %v8176_v40 = vld [vmem:[%s9324_s12 + $0x118] sm:$0xff]   ;;  %v8179_v2 = vld [vmem:[%s9324_s12 + $0x150] sm:$0xff]  }
 0x28d   : > { %v10198_v22 = vor.u32 %v3825_v36, %v3821_v9  ;;  %v10205_v20 = vor.u32 %v3853_v62, %v3849_v44  ;;  %v3612_v43 = vsel %vm8298_vm4, 0, %v10120_v30  ;;  %v10214_v14 = vsel %vm8312_vm5, %v3611_v24, 0  ;;  %v8189_v36 = vld [vmem:[%s9324_s12 + $0x1d8] sm:$0xff]  }
 0x28e   : > { %v3596_v37 = vsel %vm8298_vm4, 0, %v3418_v59  ;;  %v3425_v53 = vor.u32 %v3423_v6, %v3422_v13  ;;  %v10207_v31 = vor.u32 %v3860_v46, %v3856_v51  ;;  %v10224_v62 = vsel %vm8312_vm5, %v3612_v43, 0  ;;  %7701 = vmatpush3.bf16.msra.mxu0 %v8182_v38 }
 0x28f   : > { %v10202_v26 = vsel %vm8312_vm5, %v3596_v37, 0  ;;  %v10218_v37 = vcombine.low %v10196_v34, %v10198_v22  ;;  %v3605_v46 = vsel %vm8298_vm4, 0, %v10035_v48  ;;  %v6688_v9 = vcombine.low %v10214_v14, %v10224_v62  ;;  %7591 = vmatpush3.bf16.msra.mxu1 %v8172_v33  ;;  %7702 = vmatprep.subr.bf16.mxu0 %v8185_v10  ;;  %v8186_v48 = vld [vmem:[%s9324_s12 + $0x1a0] sm:$0xff]  }
 0x290   : > { %11735 = vst [vmem:[#allocation7_spill] sm:$0xff] %v10207_v31  ;;  %v3597_v6 = vsel %vm8298_vm4, 0, %v3425_v53  ;;  %v10231_v30 = vcombine.low %v10205_v20, %v10207_v31  ;;  %v3637_v44 = vsel %vm8312_vm5, %v3605_v46, 0  ;;  %v11737_v51 = vsel %vm8298_vm4, 0, %v9974_v29  ;;  %7592 = vmatprep.subr.bf16.mxu1 %v8175_v18 }
 0x291   : > { %v10235_v35 = vsel %vm8312_vm5, %v3597_v6, 0  ;;  %4816 = vmatprep.mubr.bf16.mxu1 %v10218_v37  ;;  %v3638_v57 = vsel %vm8312_vm5, %v11737_v51, 0  ;;  %v3828_v8 = vshrl.u32 %v3637_v44, 16  ;;  %v3830_v59 = vshll.u32 %v3637_v44, 16 }
 0x292   : > { %v10246_v38 = vcombine.low %v10202_v26, %v10235_v35  ;;  %4970 = vmatmul.mubr.bf16.gmra.mxu0 %v10231_v30  ;;  %v3835_v61 = vshrl.u32 %v3638_v57, 16  ;;  %v3837_v13 = vshll.u32 %v3638_v57, 16  ;;  %v3863_v24 = vshrl.u32 %v10214_v14, 16  ;;  %4817 = vmatmul.mubr.bf16.gmra.mxu1 %v6688_v9 }
 0x293   : > { %v3865_v33 = vshll.u32 %v10214_v14, 16  ;;  %v3832_v29 = vrot.slane %v3830_v59, 1  ;;  %v3870_v10 = vshrl.u32 %v10224_v62, 16  ;;  %v3872_v53 = vshll.u32 %v10224_v62, 16  ;;  %7593 = vmatpush3.bf16.msra.mxu1 %v8176_v40  ;;  %v8180_v59 = vld [vmem:[%s9324_s12 + $0x110] sm:$0xff]   ;;  %7703 = vmatpush3.bf16.msra.mxu0 %v8186_v48 }
 0x294   : > { %11736 = vst [vmem:[#allocation19_spill] sm:$0xff] %v10246_v38  ;;  %4977 = vmatprep.mubr.bf16.mxu0 %v10246_v38  ;;  %v11738_v18 = vshll.u32 %v9871_v4, 16  ;;  %v3839_v6 = vrot.slane %v3837_v13, 1  ;;  %v11739_v44 = vshll.u32 %v9916_v47, 16  ;;  %v11740_v9 = vshll.u32 %v10075_v45, 16  ;;  %v8190_v38 = vld [vmem:[%s9324_s12 + $0x198] sm:$0xff]   ;;  %7594 = vmatprep.subr.bf16.mxu1 %v8179_v2 }
 0x295   : > { %v3867_v46 = vrot.slane %v3865_v33, 1  ;;  %v10273_v31 = vor.u32 %v3832_v29, %v3828_v8  ;;  %v3874_v42 = vrot.slane %v3872_v53, 1  ;;  %v8183_v47 = vld [vmem:[%s9324_s12 + $0x148] sm:$0xff]   ;;  %7704 = vmatprep.subr.bf16.mxu0 %v8189_v36 }
 0x296   : > { %v3432_v43 = vor.u32 %v11738_v18, %v9897_v1  ;;  %v3439_v51 = vor.u32 %v11739_v44, %v9947_v7  ;;  %v3537_v57 = vor.u32 %v11740_v9, %v10128_v25  ;;  %v11741_v1 = vshll.u32 %v10063_v16, 16  ;;  %v8191_v7 = vld [vmem:[%s9324_s12 + $0x1d0] sm:$0xff]   ;;  %v8184_v18 = vld [vmem:[%s9324_s12 + $0x108] sm:$0xff]   ;;  %v8187_v9 = vld [vmem:[%s9324_s12 + $0x140] sm:$0xff]  }
 0x297   : > { %v10282_v45 = vor.u32 %v3839_v6, %v3835_v61  ;;  %v10284_v25 = vor.u32 %v3867_v46, %v3863_v24  ;;  %v10292_v8 = vor.u32 %v3874_v42, %v3870_v10  ;;  %7595 = vmatpush3.bf16.msra.mxu1 %v8180_v59  ;;  %7705 = vmatpush3.bf16.msra.mxu0 %v8190_v38  ;;  %v11746_v46 = vsel %vm8298_vm4, 0, %v9740_v63 }
 0x298   : > { %v3598_v4 = vsel %vm8298_vm4, 0, %v3432_v43  ;;  %v3544_v13 = vor.u32 %v11741_v1, %v10087_v50  ;;  %v3599_v40 = vsel %vm8298_vm4, 0, %v3439_v51  ;;  %v3613_v50 = vsel %vm8298_vm4, 0, %v3537_v57  ;;  %7596 = vmatprep.subr.bf16.mxu1 %v8183_v47  ;;  %7706 = vmatprep.subr.bf16.mxu0 %v8191_v7  ;;  %v8192_v43 = vld [vmem:[%s9324_s12 + $0x190] sm:$0xff]   ;;  %v8193_v57 = vld [vmem:[%s9324_s12 + $0x1c8] sm:$0xff]  }
 0x299   : > { %11742 = vst [vmem:[#allocation13_spill] sm:$0xff] %v10284_v25  ;;  %v10290_v48 = vsel %vm8312_vm5, %v3598_v4, 0  ;;  %11743 = vst [vmem:[#allocation10_spill] sm:$0xff] %v10292_v8  ;;  %v10296_v16 = vsel %vm8312_vm5, %v3599_v40, 0  ;;  %v10304_v36 = vcombine.low %v10273_v31, %v10282_v45  ;;  %v10312_v42 = vsel %vm8312_vm5, %v3613_v50, 0 }
 0x29a   : > { %11744 = vst [vmem:[#allocation12_spill] sm:$0xff] %v10296_v16  ;;  %v3614_v2 = vsel %vm8298_vm4, 0, %v3544_v13  ;;  %v10308_v61 = vcombine.low %v10290_v48, %v10296_v16  ;;  %v10320_v33 = vcombine.low %v10284_v25, %v10292_v8  ;;  %v3877_v10 = vshrl.u32 %v10312_v42, 16 }
 0x29b   : > { %v10316_v24 = vsel %vm8312_vm5, %v3614_v2, 0  ;;  %v3879_v53 = vshll.u32 %v10312_v42, 16  ;;  %4824 = vmatprep.mubr.bf16.mxu1 %v10304_v36  ;;  %v3616_v44 = vsel %vm8312_vm5, %v11746_v46, 0  ;;  %v3898_v51 = vshrl.u32 %v9792_v54, 16  ;;  %7597 = vmatpush3.bf16.msra.mxu1 %v8184_v18  ;;  %v8188_v46 = vld [vmem:[%s9324_s12 + $0x100] sm:$0xff]  }
 0x29c   : > { %11745 = vst [vmem:[#allocation18_spill] sm:$0xff] %v10308_v61  ;;  %v6697_v29 = vcombine.low %v10312_v42, %v10316_v24  ;;  %v3884_v6 = vshrl.u32 %v10316_v24, 16  ;;  %v3886_v38 = vshll.u32 %v10316_v24, 16  ;;  %4978 = vmatmul.mubr.bf16.gmra.mxu0 %v10320_v33  ;;  %v3891_v4 = vshrl.u32 %v3616_v44, 16  ;;  %7598 = vmatprep.subr.bf16.mxu1 %v8187_v9 }
 0x29d   : > { %v3881_v59 = vrot.slane %v3879_v53, 1  ;;  %v3893_v1 = vshll.u32 %v3616_v44, 16  ;;  %v3900_v13 = vshll.u32 %v9792_v54, 16  ;;  %4985 = vmatprep.mubr.bf16.mxu0 %v10308_v61  ;;  %v4024_v47 = vshrl.u32 %v10077_v52, 16  ;;  %7707 = vmatpush3.bf16.msra.mxu0 %v8192_v43 }
 0x29e   : > { %4825 = vmatmul.mubr.bf16.gmra.mxu1 %v6697_v29  ;;  %v3888_v63 = vrot.slane %v3886_v38, 1  ;;  %v4026_v7 = vshll.u32 %v10077_v52, 16  ;;  %v3905_v40 = vshrl.u32 %v9750_v41, 16  ;;  %v11747_v53 = vshll.u32 %v9750_v41, 16  ;;  %7708 = vmatprep.subr.bf16.mxu0 %v8193_v57 }
 0x29f   : > { %4832 = vmatprep.mubr.bf16.mxu1 %v10111_v12  ;;  %v10347_v50 = vor.u32 %v3881_v59, %v3877_v10  ;;  %v3895_v2 = vrot.slane %v3893_v1, 1  ;;  %v3902_v29 = vrot.slane %v3900_v13, 1  ;;  %v8194_v12 = vld [vmem:[%s9324_s12 + $0x188] sm:$0xff]   ;;  %v3912_v61 = vshrl.u32 %v9771_v55, 16  ;;  %v10359_v10 = vld [vmem:[%s9324_s12 + $0x238] sm:$0xff]   ;;  %v8196_v59 = vld [vmem:[%s9324_s12 + $0x1c0] sm:$0xff]   ;;  %7599 = vmatpush3.bf16.msra.mxu1 %v8188_v46 }
 0x2a0   : > { %v3909_v54 = vrot.slane %v11747_v53, 1  ;;  %v10353_v38 = vor.u32 %v3888_v63, %v3884_v6  ;;  %v4028_v44 = vrot.slane %v4026_v7, 1  ;;  %v11748_v8 = vshll.u32 %v9771_v55, 16  ;;  %11749 = vst [vmem:[#allocation17_spill] sm:$0xff] %v10359_v10  ;;  %v8197_v63 = vld [vmem:[%s9324_s12 + $0x180] sm:$0xff]   ;;  %7904 = vmatprep.subr.bf16.mxu1 %v10359_v10  ;;  %v11758_v10 = vld [vmem:[#allocation27_spill] sm:$0xff] }
 0x2a1   : > { %v3546_v41 = vshrl.u32 %v10163_v39, 16  ;;  %v10363_v18 = vor.u32 %v3895_v2, %v3891_v4  ;;  %v10365_v43 = vor.u32 %v3902_v29, %v3898_v51  ;;  %v4040_v9 = vshll.u32 %v10103_v60, 16  ;;  %7709 = vmatpush3.bf16.msra.mxu0 %v8194_v12  ;;  %v11752_v2 = vld [vmem:[#allocation21_spill] sm:$0xff] }
 0x2a2   : > { %v3916_v25 = vrot.slane %v11748_v8, 1  ;;  %v10367_v6 = vor.u32 %v3909_v54, %v3905_v40  ;;  %v10371_v1 = vcombine.low %v10347_v50, %v10353_v38  ;;  %v10373_v55 = vor.u32 %v4028_v44, %v4024_v47  ;;  %7710 = vmatprep.subr.bf16.mxu0 %v8196_v59 }
 0x2a3   : > { %v10381_v4 = vcombine.low %v10363_v18, %v10365_v43  ;;  %v4038_v51 = vshrl.u32 %v10103_v60, 16  ;;  %v4054_v13 = vshll.u32 %v10122_v28, 16  ;;  %v11751_v7 = vshll.u32 %v9810_v49, 16 }
 0x2a4   : > { %11750 = vst [vmem:[#allocation6_spill] sm:$0xff] %v10373_v55  ;;  %v10375_v8 = vor.u32 %v3916_v25, %v3912_v61  ;;  %v4042_v25 = vrot.slane %v4040_v9, 1  ;;  %v4052_v61 = vshrl.u32 %v10122_v28, 16  ;;  %4986 = vmatmul.mubr.bf16.gmra.mxu0 %v10371_v1  ;;  %v6706_v29 = vcombine.low %v11752_v2, %v10373_v55 }
 0x2a5   : > { %v3923_v40 = vrot.slane %v11751_v7, 1  ;;  %v4056_v53 = vrot.slane %v4054_v13, 1  ;;  %v3919_v54 = vshrl.u32 %v9810_v49, 16  ;;  %v3928_v46 = vshll.u32 %v9862_v19, 16  ;;  %4993 = vmatprep.mubr.bf16.mxu0 %v10381_v4  ;;  %7711 = vmatpush3.bf16.msra.mxu0 %v8197_v63 }
 0x2a6   : > { %v10388_v47 = vcombine.low %v10367_v6, %v10375_v8  ;;  %4833 = vmatmul.mubr.bf16.gmra.mxu1 %v10091_v11  ;;  %v10402_v12 = vor.u32 %v4042_v25, %v4038_v51  ;;  %v3926_v44 = vshrl.u32 %v9862_v19, 16  ;;  %v4066_v59 = vshrl.u32 %v10196_v34, 16  ;;  %v11756_v25 = vld [vmem:[#allocation25_spill] sm:$0xff] }
 0x2a7   : > { %4840 = vmatprep.mubr.bf16.mxu1 %v10231_v30  ;;  %v4068_v11 = vshll.u32 %v10196_v34, 16  ;;  %v10407_v9 = vor.u32 %v4056_v53, %v4052_v61  ;;  %v10409_v7 = vor.u32 %v3923_v40, %v3919_v54  ;;  %v3930_v13 = vrot.slane %v3928_v46, 1  ;;  %v11755_v30 = vld [vmem:[#allocation26_spill] sm:$0xff] }
 0x2a8   : > { %v4082_v49 = vshll.u32 %v10198_v22, 16  ;;  %v11754_v2 = vshrl.u32 %v9785_v17, 16  ;;  %v11757_v19 = vshrl.u32 %v11756_v25, 16  ;;  %v4096_v61 = vshll.u32 %v10273_v31, 16 }
 0x2a9   : > { %11753 = vst [vmem:[#allocation23_spill] sm:$0xff] %v10407_v9  ;;  %v4070_v57 = vrot.slane %v4068_v11, 1  ;;  %v6709_v40 = vcombine.low %v10402_v12, %v10407_v9  ;;  %v10425_v53 = vor.u32 %v3930_v13, %v3926_v44  ;;  %v4080_v63 = vshrl.u32 %v10198_v22, 16 }
 0x2aa   : > { %v10415_v51 = vor.u32 %v11755_v30, %v11754_v2  ;;  %v10420_v55 = vor.u32 %v11758_v10, %v11757_v19  ;;  %v4084_v54 = vrot.slane %v4082_v49, 1  ;;  %v4094_v2 = vshrl.u32 %v10273_v31, 16 }
 0x2ab   : > { %v4098_v46 = vrot.slane %v4096_v61, 1  ;;  %v4110_v10 = vshll.u32 %v10282_v45, 16  ;;  %v10436_v11 = vcombine.low %v10409_v7, %v10425_v53  ;;  %v10438_v30 = vor.u32 %v4070_v57, %v4066_v59 }
 0x2ac   : > { %v10430_v17 = vcombine.low %v10415_v51, %v10420_v55  ;;  %v10440_v44 = vor.u32 %v4084_v54, %v4080_v63  ;;  %v10444_v13 = vcombine.low %v10048_v58, %v10141_v15  ;;  %v4108_v25 = vshrl.u32 %v10282_v45, 16  ;;  %4994 = vmatmul.mubr.bf16.gmra.mxu0 %v6706_v29 }
 0x2ad   : > { %v10446_v49 = vor.u32 %v4098_v46, %v4094_v2  ;;  %v4112_v19 = vrot.slane %v4110_v10, 1  ;;  %v3956_v61 = vshll.u32 %v9991_v32, 16  ;;  %v3548_v9 = vrot.slane %v3546_v41, 7  ;;  %5001 = vmatprep.mubr.bf16.mxu0 %v10388_v47 }
 0x2ae   : > { %4841 = vmatmul.mubr.bf16.gmra.mxu1 %v10146_v56  ;;  %v10455_v59 = vcombine.low %v10154_v21, %v10214_v14  ;;  %v3963_v58 = vshll.u32 %v10133_v3, 16  ;;  %v3954_v41 = vshrl.u32 %v9991_v32, 16  ;;  %v3970_v56 = vshll.u32 %v10137_v23, 16 }
 0x2af   : > { %4848 = vmatprep.mubr.bf16.mxu1 %v10320_v33  ;;  %v10460_v15 = vor.u32 %v4112_v19, %v4108_v25  ;;  %v3958_v29 = vrot.slane %v3956_v61, 1  ;;  %v3961_v63 = vshrl.u32 %v10133_v3, 16  ;;  %v10467_v21 = vcombine.low %v10224_v62, %v10312_v42 }
 0x2b0   : > { %v3965_v54 = vrot.slane %v3963_v58, 1  ;;  %v3977_v14 = vshll.u32 %v10202_v26, 16  ;;  %v3968_v33 = vshrl.u32 %v10137_v23, 16  ;;  %v3972_v46 = vrot.slane %v3970_v56, 1 }
 0x2b1   : > { %v3975_v10 = vshrl.u32 %v10202_v26, 16  ;;  %v10474_v25 = vor.u32 %v3958_v29, %v3954_v41  ;;  %v3984_v61 = vshll.u32 %v10235_v35, 16  ;;  %v11759_v58 = vshll.u32 %v10163_v39, 16 }
 0x2b2   : > { %v3979_v19 = vrot.slane %v3977_v14, 1  ;;  %v10479_v62 = vor.u32 %v3965_v54, %v3961_v63  ;;  %v10481_v42 = vor.u32 %v3972_v46, %v3968_v33  ;;  %v3982_v32 = vshrl.u32 %v10235_v35, 16 }
 0x2b3   : > { %v3551_v57 = vor.u32 %v11759_v58, %v3548_v9  ;;  %v3991_v2 = vshll.u32 %v10290_v48, 16  ;;  %v3986_v56 = vrot.slane %v3984_v61, 1  ;;  %v3989_v29 = vshrl.u32 %v10290_v48, 16 }
 0x2b4   : > { %v10485_v3 = vor.u32 %v3979_v19, %v3975_v10  ;;  %v10492_v39 = vcombine.low %v10479_v62, %v10481_v42  ;;  %v3998_v54 = vshll.u32 %v10296_v16, 16  ;;  %5002 = vmatmul.mubr.bf16.gmra.mxu0 %v6709_v40  ;;  %v3996_v33 = vshrl.u32 %v10296_v16, 16  ;;  %v11765_v16 = vld [vmem:[#allocation13_spill] sm:$0xff] }
 0x2b5   : > { %v3615_v41 = vsel %vm8298_vm4, 0, %v3551_v57  ;;  %v3993_v63 = vrot.slane %v3991_v2, 1  ;;  %v10500_v14 = vor.u32 %v3986_v56, %v3982_v32  ;;  %5009 = vmatprep.mubr.bf16.mxu0 %v10436_v11  ;;  %v10515_v32 = vcombine.low %v10077_v52, %v10103_v60 }
 0x2b6   : > { %v10496_v9 = vsel %vm8312_vm5, %v3615_v41, 0  ;;  %4849 = vmatmul.mubr.bf16.gmra.mxu1 %v10218_v37  ;;  %v4000_v40 = vrot.slane %v3998_v54, 1  ;;  %v4017_v46 = vshrl.u32 %v10363_v18, 16  ;;  %v4019_v10 = vshll.u32 %v10363_v18, 16 }
 0x2b7   : > { %v4012_v0 = vshll.u32 %v10496_v9, 16  ;;  %v10505_v57 = vcombine.low %v10316_v24, %v10496_v9  ;;  %4856 = vmatprep.mubr.bf16.mxu1 %v10371_v1  ;;  %v4010_v5 = vshrl.u32 %v10496_v9, 16  ;;  %v10511_v2 = vor.u32 %v3993_v63, %v3989_v29 }
 0x2b8   : > { %v10519_v37 = vcombine.low %v10485_v3, %v10500_v14  ;;  %v10523_v19 = vor.u32 %v4000_v40, %v3996_v33  ;;  %v4031_v1 = vshrl.u32 %v10365_v43, 16  ;;  %v4033_v61 = vshll.u32 %v10365_v43, 16 }
 0x2b9   : > { %v4014_v24 = vrot.slane %v4012_v0, 1  ;;  %v10529_v58 = vcombine.low %v10122_v28, %v10196_v34  ;;  %v4021_v52 = vrot.slane %v4019_v10, 1  ;;  %v4045_v60 = vshrl.u32 %v10367_v6, 16 }
 0x2ba   : > { %11760 = vst [vmem:[#allocation9_spill] sm:$0xff] %v10523_v19  ;;  %v4047_v56 = vshll.u32 %v10367_v6, 16  ;;  %v4061_v41 = vshll.u32 %v10375_v8, 16  ;;  %v10536_v18 = vcombine.low %v10511_v2, %v10523_v19  ;;  %v4035_v29 = vrot.slane %v4033_v61, 1 }
 0x2bb   : > { %11761 = vst [vmem:[#allocation22_spill] sm:$0xff] %v10529_v58  ;;  %v4059_v9 = vshrl.u32 %v10375_v8, 16  ;;  %v10541_v63 = vcombine.low %v10198_v22, %v10273_v31  ;;  %v4073_v54 = vshrl.u32 %v10409_v7, 16  ;;  %v4075_v0 = vshll.u32 %v10409_v7, 16 }
 0x2bc   : > { %v4049_v28 = vrot.slane %v4047_v56, 1  ;;  %v4063_v34 = vrot.slane %v4061_v41, 1  ;;  %v4022_v33 = vor.u32 %v4021_v52, %v4017_v46  ;;  %v10545_v40 = vor.u32 %v4035_v29, %v4031_v1 }
 0x2bd   : > { %11762 = vst [vmem:[#allocation20_spill] sm:$0xff] %v10541_v63  ;;  %v4087_v10 = vshrl.u32 %v10425_v53, 16  ;;  %v4089_v19 = vshll.u32 %v10425_v53, 16  ;;  %v11763_v61 = vcombine.low %v10438_v30, %v10440_v44  ;;  %v4077_v56 = vrot.slane %v4075_v0, 1  ;;  %v11766_v63 = vld [vmem:[#allocation7_spill] sm:$0xff] }
 0x2be   : > { %4857 = vmatmul.mubr.bf16.gmra.mxu1 %v10304_v36  ;;  %v10553_v22 = vor.u32 %v4049_v28, %v4045_v60  ;;  %v10555_v31 = vor.u32 %v4063_v34, %v4059_v9  ;;  %v4005_v41 = vshll.u32 %v10029_v27, 16  ;;  %v10561_v46 = vcombine.low %v4022_v33, %v10545_v40 }
 0x2bf   : > { %5010 = vmatmul.mubr.bf16.gmra.mxu0 %v11763_v61  ;;  %4864 = vmatprep.mubr.bf16.mxu1 %v10381_v4  ;;  %v4091_v1 = vrot.slane %v4089_v19, 1  ;;  %v4003_v52 = vshrl.u32 %v10029_v27, 16  ;;  %v4103_v29 = vshll.u32 %v10415_v51, 16  ;;  %v10569_v60 = vor.u32 %v4077_v56, %v4073_v54  ;;  %v11764_v19 = vld [vmem:[#allocation15_spill] sm:$0xff]  ;;  %v11767_v54 = vld [vmem:[#allocation10_spill] sm:$0xff] }
 0x2c0   : > { %5017 = vmatprep.mubr.bf16.mxu0 %v10430_v17  ;;  %v10567_v36 = vcombine.low %v10553_v22, %v10555_v31  ;;  %v4007_v9 = vrot.slane %v4005_v41, 1  ;;  %v4101_v28 = vshrl.u32 %v10415_v51, 16  ;;  %v4117_v33 = vshll.u32 %v10420_v55, 16 }
 0x2c1   : > { %v10572_v34 = vor.u32 %v4091_v1, %v4087_v10  ;;  %v4105_v0 = vrot.slane %v4103_v29, 1  ;;  %v10577_v61 = vcombine.low %v11764_v19, %v10205_v20  ;;  %v10581_v58 = vcombine.low %v11766_v63, %v11765_v16  ;;  %v11773_v19 = vld [vmem:[#allocation23_spill] sm:$0xff] }
 0x2c2   : > { %v4008_v27 = vor.u32 %v4007_v9, %v4003_v52  ;;  %v10585_v56 = vcombine.low %v11767_v54, %v10347_v50  ;;  %v4015_v41 = vor.u32 %v4014_v24, %v4010_v5  ;;  %v4115_v1 = vshrl.u32 %v10420_v55, 16 }
 0x2c3   : > { %v10589_v10 = vcombine.low %v10569_v60, %v10572_v34  ;;  %v4119_v29 = vrot.slane %v4117_v33, 1  ;;  %v10594_v20 = vcombine.low %v10365_v43, %v10367_v6  ;;  %v10599_v16 = vor.u32 %v4105_v0, %v4101_v28  ;;  %v11768_v6 = vld [vmem:[#allocation14_spill] sm:$0xff] }
 0x2c4   : > { %v10597_v52 = vcombine.low %v10282_v45, %v4008_v27  ;;  %v10602_v50 = vcombine.low %v10353_v38, %v4015_v41  ;;  %v10606_v5 = vcombine.low %v10375_v8, %v10409_v7  ;;  %v6721_v63 = vcombine.low %v10137_v23, %v10202_v26  ;;  %v11771_v7 = vld [vmem:[#allocation11_spill] sm:$0xff]  ;;  %v11772_v0 = vld [vmem:[#allocation6_spill] sm:$0xff] }
 0x2c5   : > { %v10608_v24 = vor.u32 %v4119_v29, %v4115_v1  ;;  %v10614_v43 = vcombine.low %v10425_v53, %v10415_v51  ;;  %v6724_v45 = vcombine.low %v10235_v35, %v10290_v48  ;;  %v3947_v9 = vshrl.u32 %v11768_v6, 16 }
 0x2c6   : > { %v11769_v38 = vshll.u32 %v11768_v6, 16  ;;  %v11770_v8 = vcombine.low %v10446_v49, %v10460_v15  ;;  %4865 = vmatmul.mubr.bf16.gmra.mxu1 %v11771_v7  ;;  %v10627_v33 = vcombine.low %v11772_v0, %v10402_v12  ;;  %v10637_v53 = vcombine.low %v10474_v25, %v10479_v62  ;;  %v8199_v7 = vld [vmem:[%s9324_s12 + $0x228] sm:$0xff]   ;;  %v8200_v0 = vld [vmem:[%s9324_s12 + $0x220] sm:$0xff]  }
 0x2c7   : > { %4872 = vmatprep.mubr.bf16.mxu1 %v10388_v47  ;;  %v10633_v51 = vcombine.low %v10599_v16, %v10608_v24  ;;  %v10641_v54 = vcombine.low %v11773_v19, %v10438_v30  ;;  %v4124_v41 = vshll.u32 %v4008_v27, 16  ;;  %v10645_v12 = vcombine.low %v10481_v42, %v10485_v3  ;;  %v8202_v19 = vld [vmem:[%s9324_s12 + $0x210] sm:$0xff]  }
 0x2c8   : > { %v3951_v28 = vrot.slane %v11769_v38, 1  ;;  %5018 = vmatmul.mubr.bf16.gmra.mxu0 %v11770_v8  ;;  %v10649_v1 = vcombine.low %v10440_v44, %v10446_v49  ;;  %v10653_v29 = vcombine.low %v10500_v14, %v10511_v2  ;;  %v4122_v6 = vshrl.u32 %v4008_v27, 16  ;;  %v11774_v14 = vld [vmem:[#allocation16_spill] sm:$0xff]  ;;  %v11775_v2 = vld [vmem:[#allocation19_spill] sm:$0xff] }
 0x2c9   : > { %5025 = vmatprep.mubr.bf16.mxu0 %v10444_v13  ;;  %v4126_v62 = vrot.slane %v4124_v41, 1  ;;  %v6730_v38 = vcombine.low %v10545_v40, %v10553_v22  ;;  %v6731_v30 = vcombine.low %v10555_v31, %v10569_v60  ;;  %v6732_v3 = vcombine.low %v10572_v34, %v10599_v16  ;;  %v11778_v27 = vld [vmem:[#allocation20_spill] sm:$0xff] }
 0x2ca   : > { %v3952_v42 = vor.u32 %v3951_v28, %v3947_v9  ;;  %v8198_v9 = vld [vmem:[%s9324_s12 + $0x230] sm:$0xff]   ;;  %v11779_v28 = vld [vmem:[#allocation17_spill] sm:$0xff] }
 0x2cb   : > { %v4127_v8 = vor.u32 %v4126_v62, %v4122_v6  ;;  %v11781_v6 = vld [vmem:[#allocation5_spill] sm:$0xff]  ;;  %v11782_v62 = vld [vmem:[#allocation4_spill] sm:$0xff] }
 0x2cc   : > { %v10662_v44 = vcombine.low %v3952_v42, %v10474_v25  ;;  %v11777_v25 = vld [vmem:[#allocation22_spill] sm:$0xff]  ;;  %v6718_v42 = vcombine.low %v11782_v62, %v11781_v6 }
 0x2cd   : > { %v10665_v49 = vcombine.low %v10460_v15, %v4127_v8  ;;  %v11776_v15 = vld [vmem:[#allocation18_spill] sm:$0xff] }
 0x2ce   : > { %4873 = vmatmul.mubr.bf16.gmra.mxu1 %v11774_v14 }
 0x2cf   : > { %4880 = vmatprep.mubr.bf16.mxu1 %v10436_v11 }
 0x2d0   : > { %5026 = vmatmul.mubr.bf16.gmra.mxu0 %v10662_v44 }
 0x2d1   : > { %5033 = vmatprep.mubr.bf16.mxu0 %v10455_v59 }
 0x2d6   : > { %4881 = vmatmul.mubr.bf16.gmra.mxu1 %v11775_v2 }
 0x2d7   : > { %4888 = vmatprep.mubr.bf16.mxu1 %v10430_v17 }
 0x2d8   : > { %5034 = vmatmul.mubr.bf16.gmra.mxu0 %v10492_v39 }
 0x2d9   : > { %5041 = vmatprep.mubr.bf16.mxu0 %v10467_v21 }
 0x2de   : > { %4889 = vmatmul.mubr.bf16.gmra.mxu1 %v11776_v15 }
 0x2df   : > { %4896 = vmatprep.mubr.bf16.mxu1 %v10662_v44 }
 0x2e0   : > { %5042 = vmatmul.mubr.bf16.gmra.mxu0 %v10519_v37 }
 0x2e1   : > { %5049 = vmatprep.mubr.bf16.mxu0 %v10505_v57 }
 0x2e6   : > { %4897 = vmatmul.mubr.bf16.gmra.mxu1 %v10381_v4 }
 0x2e7   : > { %4904 = vmatprep.mubr.bf16.mxu1 %v10492_v39 }
 0x2e8   : > { %5050 = vmatmul.mubr.bf16.gmra.mxu0 %v10536_v18 }
 0x2e9   : > { %5057 = vmatprep.mubr.bf16.mxu0 %v10515_v32 }
 0x2ee   : > { %4905 = vmatmul.mubr.bf16.gmra.mxu1 %v10388_v47 }
 0x2ef   : > { %4912 = vmatprep.mubr.bf16.mxu1 %v10519_v37 }
 0x2f0   : > { %5058 = vmatmul.mubr.bf16.gmra.mxu0 %v10561_v46 }
 0x2f1   : > { %5065 = vmatprep.mubr.bf16.mxu0 %v11777_v25 }
 0x2f6   : > { %4913 = vmatmul.mubr.bf16.gmra.mxu1 %v10436_v11 }
 0x2f7   : > { %4920 = vmatprep.mubr.bf16.mxu1 %v10536_v18 }
 0x2f8   : > { %5066 = vmatmul.mubr.bf16.gmra.mxu0 %v10567_v36 }
 0x2f9   : > { %5073 = vmatprep.mubr.bf16.mxu0 %v11778_v27 }
 0x2fe   : > { %4921 = vmatmul.mubr.bf16.gmra.mxu1 %v10430_v17 }
 0x2ff   : > { %5122 = vmatprep.mubr.bf16.mxu1 %v10662_v44 }
 0x300   : > { %5074 = vmatmul.mubr.bf16.gmra.mxu0 %v10589_v10 }
 0x301   : > { %5081 = vmatprep.mubr.bf16.mxu0 %v10597_v52 }
 0x306   : > { %5123 = vmatmul.mubr.bf16.vlgmr.msra.gmra.mxu1 %v10381_v4  ;;  %v8201_v4 = vld [vmem:[%s9324_s12 + $0x218] sm:$0xff]  }
 0x307   : > { %5130 = vmatprep.mubr.bf16.mxu1 %v10492_v39  ;;  %7905 = vmatpush3.bf16.msra.mxu1 %v11779_v28 }
 0x308   : > { %5082 = vmatmul.mubr.bf16.gmra.mxu0 %v10633_v51  ;;  %7906 = vmatprep.subr.bf16.mxu1 %v8198_v9 }
 0x309   : > { %5283 = vmatprep.mubr.bf16.mxu0 %v10515_v32 }
 0x30b   : > { %7907 = vmatpush3.bf16.msra.mxu1 %v8198_v9  ;;  %v10775_v9 = vld [vmem:[%s10731_s21 + $0x10] sm:$0xff] }
 0x30c   : > { %7908 = vmatprep.subr.bf16.mxu1 %v8199_v7  ;;  %5585 = vperm.xlu0 %8054, %v10775_v9  }
 0x30e   : > { %5131 = vmatmul.mubr.bf16.gmra.mxu1 %v10388_v47  ;;  %v8203_v47 = vld [vmem:[%s9324_s12 + $0x208] sm:$0xff]  }
 0x30f   : > { %5138 = vmatprep.mubr.bf16.mxu1 %v10519_v37  ;;  %7909 = vmatpush3.bf16.msra.mxu1 %v8199_v7 }
 0x310   : > { %5284 = vmatmul.mubr.bf16.vlgmr.msra.gmra.mxu0 %v10444_v13  ;;  %7910 = vmatprep.subr.bf16.mxu1 %v8200_v0  ;;  %v8204_v13 = vld [vmem:[%s9324_s12 + $0x200] sm:$0xff]   ;;  %s11489_s12 = scalar_lea.vmem %s11568_s10, %s6870_s24 }
 0x311   : > { %5291 = vmatprep.mubr.bf16.mxu0 %v11777_v25 }
 0x313   : > { %7911 = vmatpush3.bf16.msra.mxu1 %v8200_v0 }
 0x314   : > { %7912 = vmatprep.subr.bf16.mxu1 %v8201_v4 }
 0x316   : > { %5139 = vmatmul.mubr.bf16.gmra.mxu1 %v10436_v11  ;;  %v10742_v11 = vld [vmem:[%s10731_s21 + $0x8] sm:$0xff] }
 0x317   : > { %5146 = vmatprep.mubr.bf16.mxu1 %v10536_v18  ;;  %7913 = vmatpush3.bf16.msra.mxu1 %v8201_v4  ;;  %v10780_v4 = vld [vmem:[%s10731_s21 + $0x28] sm:$0xff] }
 0x318   : > { %5292 = vmatmul.mubr.bf16.gmra.mxu0 %v10455_v59  ;;  %7914 = vmatprep.subr.bf16.mxu1 %v8202_v19  ;;  %v10746_v59 = vld [vmem:[%s10731_s21 + $0x18] sm:$0xff] }
 0x319   : > { %5299 = vmatprep.mubr.bf16.mxu0 %v11778_v27  ;;  %5600 = vperm.xlu0 %8054, %v10780_v4  }
 0x31b   : > { %7915 = vmatpush3.bf16.msra.mxu1 %v8202_v19 }
 0x31c   : > { %7916 = vmatprep.subr.bf16.mxu1 %v8203_v47 }
 0x31e   : > { %5147 = vmatmul.mubr.bf16.gmra.mxu1 %v10430_v17  ;;  %v10734_v17 = vld [vmem:[%s10731_s21] sm:$0xff] }
 0x31f   : > { %5154 = vmatprep.mubr.bf16.mxu1 %v10561_v46  ;;  %7917 = vmatpush3.bf16.msra.mxu1 %v8203_v47 }
 0x320   : > { %5300 = vmatmul.mubr.bf16.gmra.mxu0 %v10467_v21  ;;  %7918 = vmatprep.subr.bf16.mxu1 %v8204_v13  ;;  %v10754_v21 = vld [vmem:[%s10731_s21 + $0x20] sm:$0xff] }
 0x321   : > { %5307 = vmatprep.mubr.bf16.mxu0 %v10597_v52  ;;  %5575 = vperm.xlu1 %8053, %v10734_v17  }
 0x323   : > { %7919 = vmatpush3.bf16.msra.mxu1 %v8204_v13 }
 0x325   : > { %5580 = vperm.xlu1 %8053, %v10742_v11  }
 0x326   : > { %5155 = vmatmul.mubr.bf16.gmra.mxu1 %v10662_v44 }
 0x327   : > { %5162 = vmatprep.mubr.bf16.mxu1 %v10567_v36  ;;  %v11780_v36 = vmov 1  }
 0x328   : > { %5308 = vmatmul.mubr.bf16.gmra.mxu0 %v10505_v57 }
 0x329   : > { %5315 = vmatprep.mubr.bf16.mxu0 %v10577_v61  ;;  %5590 = vperm.xlu1 %8053, %v10746_v59  }
 0x32d   : > { %5595 = vperm.xlu1 %8053, %v10754_v21  }
 0x32e   : > { %5163 = vmatmul.mubr.bf16.gmra.mxu1 %v10492_v39  ;;  %v10758_v39 = vld [vmem:[%s10731_s21 + $0x30] sm:$0xff] }
 0x32f   : > { %5170 = vmatprep.mubr.bf16.mxu1 %v10589_v10 }
 0x330   : > { %5316 = vmatmul.mubr.bf16.gmra.mxu0 %v10515_v32 }
 0x331   : > { %5323 = vmatprep.mubr.bf16.mxu0 %v10581_v58  ;;  %5605 = vperm.xlu1 %8053, %v10758_v39  }
 0x335   : > { %8055 = vset.pattern.permute.xlu1 %v11780_v36 }
 0x336   : > { %5171 = vmatmul.mubr.bf16.gmra.mxu1 %v10519_v37  ;;  %5669 = vperm.xlu1 %8055, %v10734_v17  }
 0x337   : > { %5178 = vmatprep.mubr.bf16.mxu1 %v10633_v51 }
 0x338   : > { %5324 = vmatmul.mubr.bf16.gmra.mxu0 %v11777_v25 }
 0x339   : > { %5331 = vmatprep.mubr.bf16.mxu0 %v10585_v56 }
 0x33a   : > { %5677 = vperm.xlu1 %8055, %v10775_v9  }
 0x33e   : > { %5179 = vmatmul.mubr.bf16.gmra.mxu1 %v10536_v18  ;;  %5681 = vperm.xlu1 %8055, %v10746_v59  }
 0x33f   : > { %5186 = vmatprep.mubr.bf16.mxu1 %v10577_v61 }
 0x340   : > { %5332 = vmatmul.mubr.bf16.gmra.mxu0 %v11778_v27 }
 0x341   : > { %5339 = vmatprep.mubr.bf16.mxu0 %v10602_v50 }
 0x342   : > { %v7376_v57 = vpop.f32.mrf.mxu1  ;;  %5689 = vperm.xlu1 %8055, %v10780_v4  }
 0x344   : > { %v7377_v37 = vpop.f32.mrf.mxu1 }
 0x345   : > { %v7378_v18 = vadd.f32 %v7377_v37, %v7376_v57  ;;  %v7488_v46 = vpop.f32.mrf.mxu0  ;;  %v10787_v37 = vld [vmem:[%s10731_s21 + $0x38] sm:$0xff] }
 0x346   : > { %5187 = vmatmul.mubr.bf16.gmra.mxu1 %v10515_v32  ;;  %v7379_v10 = vpop.f32.mrf.mxu1  ;;  %5610 = vperm.xlu0 %8054, %v10787_v37  }
 0x347   : > { %5194 = vmatprep.mubr.bf16.mxu1 %v10581_v58  ;;  %v7489_v51 = vpop.f32.mrf.mxu0  ;;  %5697 = vperm.xlu1 %8055, %v10787_v37  }
 0x348   : > { %5340 = vmatmul.mubr.bf16.gmra.mxu0 %v10597_v52  ;;  %v7380_v41 = vpop.f32.mrf.mxu1  ;;  %v7490_v8 = vadd.f32 %v7489_v51, %v7488_v46 }
 0x349   : > { %5347 = vmatprep.mubr.bf16.mxu0 %v10594_v20  ;;  %v7381_v32 = vadd.f32 %v7380_v41, %v7379_v10  ;;  %v7491_v44 = vpop.f32.mrf.mxu0 }
 0x34a   : > { %v7382_v14 = vpop.f32.mrf.mxu1  ;;  %v10769_v2 = vadd.f32 %v7490_v8, %v7378_v18  ;;  %8056 = vset.pattern.permute.xlu0 %v11780_v36  ;;  %v11783_v8 = vld [vmem:[#allocation3_spill] sm:$0xff] }
 0x34b   : > { %v7492_v15 = vpop.f32.mrf.mxu0  ;;  %5673 = vperm.xlu0 %8056, %v10742_v11  }
 0x34c   : > { %v7383_v28 = vpop.f32.mrf.mxu1  ;;  %v7493_v7 = vadd.f32 %v7492_v15, %v7491_v44  ;;  %v8205_v44 = vld [vmem:[%s9087_s29 + $0x38] sm:$0xff]  }
 0x34d   : > { %v7384_v0 = vadd.f32 %v7383_v28, %v7382_v14  ;;  %7952 = vmatprep.subr.bf16.mxu0 %v8205_v44 }
 0x34e   : > { %5195 = vmatmul.mubr.bf16.gmra.mxu1 %v11777_v25  ;;  %v7385_v19 = vpop.f32.mrf.mxu1  ;;  %v10782_v47 = vadd.f32 %v7493_v7, %v7381_v32  ;;  %v10803_v32 = vcombine.low %v10420_v55, %v11783_v8  ;;  %v11784_v7 = vmov 2   ;;  %7953 = vmatpush3.bf16.msra.mxu0 %v8205_v44 }
 0x34f   : > { %5202 = vmatprep.mubr.bf16.mxu1 %v10585_v56  ;;  %8058 = vset.pattern.permute.xlu1 %v11784_v7 }
 0x350   : > { %5348 = vmatmul.mubr.bf16.gmra.mxu0 %v6718_v42  ;;  %v7386_v25 = vpop.f32.mrf.mxu1  ;;  %5753 = vperm.xlu1 %8058, %v10742_v11  }
 0x351   : > { %5355 = vmatprep.mubr.bf16.mxu0 %v10606_v5  ;;  %v7387_v13 = vadd.f32 %v7386_v25, %v7385_v19  ;;  %5685 = vperm.xlu0 %8056, %v10754_v21  }
 0x352   : > { %v7494_v57 = vpop.f32.mrf.mxu0  ;;  %v7388_v18 = vpop.f32.mrf.mxu1 }
 0x354   : > { %v7495_v46 = vpop.f32.mrf.mxu0  ;;  %v7389_v51 = vpop.f32.mrf.mxu1  ;;  %5757 = vperm.xlu1 %8058, %v10775_v9  }
 0x355   : > { %v7496_v10 = vadd.f32 %v7495_v46, %v7494_v57  ;;  %v7390_v41 = vadd.f32 %v7389_v51, %v7388_v18  ;;  %v11786_v57 = vld [vmem:[#allocation12_spill] sm:$0xff]  ;;  %5693 = vperm.xlu0 %8056, %v10758_v39  }
 0x356   : > { %5203 = vmatmul.mubr.bf16.gmra.mxu1 %v11778_v27  ;;  %v7497_v6 = vpop.f32.mrf.mxu0  ;;  %v7391_v23 = vpop.f32.mrf.mxu1 }
 0x357   : > { %5210 = vmatprep.mubr.bf16.mxu1 %v10602_v50  ;;  %v10797_v62 = vadd.f32 %v7496_v10, %v7384_v0 }
 0x358   : > { %5356 = vmatmul.mubr.bf16.gmra.mxu0 %v6721_v63  ;;  %v7498_v26 = vpop.f32.mrf.mxu0  ;;  %v7392_v27 = vpop.f32.mrf.mxu1  ;;  %5765 = vperm.xlu1 %8058, %v10754_v21  }
 0x359   : > { %5363 = vmatprep.mubr.bf16.mxu0 %v10614_v43  ;;  %v7499_v63 = vadd.f32 %v7498_v26, %v7497_v6  ;;  %v7393_v42 = vadd.f32 %v7392_v27, %v7391_v23  ;;  %8057 = vset.pattern.permute.xlu0 %v11784_v7 }
 0x35a   : > { %5749 = vperm.xlu0 %8057, %v10734_v17  }
 0x35b   : > { %v10807_v14 = vadd.f32 %v7499_v63, %v7387_v13  ;;  %v11785_v13 = vld [vmem:[#allocation2_spill] sm:$0xff] }
 0x35c   : > { %v7500_v15 = vpop.f32.mrf.mxu0  ;;  %v6727_v18 = vcombine.low %v11786_v57, %v11785_v13  ;;  %5773 = vperm.xlu1 %8058, %v10758_v39  }
 0x35e   : > { %v7394_v28 = vpop.f32.mrf.mxu1  ;;  %5211 = vmatmul.mubr.bf16.gmra.mxu1 %v10597_v52  ;;  %v7501_v36 = vpop.f32.mrf.mxu0  ;;  %5761 = vperm.xlu0 %8057, %v10746_v59  }
 0x35f   : > { %5218 = vmatprep.mubr.bf16.mxu1 %v10627_v33  ;;  %v7502_v0 = vadd.f32 %v7501_v36, %v7500_v15 }
 0x360   : > { %5364 = vmatmul.mubr.bf16.gmra.mxu0 %v6724_v45  ;;  %v7395_v55 = vpop.f32.mrf.mxu1  ;;  %v7503_v35 = vpop.f32.mrf.mxu0 }
 0x361   : > { %5371 = vmatprep.mubr.bf16.mxu0 %v10803_v32  ;;  %v7396_v19 = vadd.f32 %v7395_v55, %v7394_v28  ;;  %v10818_v45 = vadd.f32 %v7502_v0, %v7390_v41 }
 0x362   : > { %v7397_v48 = vpop.f32.mrf.mxu1  ;;  %v7504_v52 = vpop.f32.mrf.mxu0  ;;  %5769 = vperm.xlu0 %8057, %v10780_v4  }
 0x363   : > { %v7505_v46 = vadd.f32 %v7504_v52, %v7503_v35  ;;  %v8206_v35 = vld [vmem:[%s9087_s29 + $0x30] sm:$0xff]  }
 0x364   : > { %v7398_v25 = vpop.f32.mrf.mxu1  ;;  %v7506_v51 = vpop.f32.mrf.mxu0  ;;  %7954 = vmatprep.subr.bf16.mxu0 %v8206_v35 }
 0x365   : > { %v7399_v10 = vadd.f32 %v7398_v25, %v7397_v48  ;;  %v10825_v23 = vadd.f32 %v7505_v46, %v7393_v42  ;;  %7955 = vmatpush3.bf16.msra.mxu0 %v8206_v35 }
 0x366   : > { %v7400_v6 = vpop.f32.mrf.mxu1  ;;  %5219 = vmatmul.mubr.bf16.gmra.mxu1 %v10577_v61  ;;  %v7507_v41 = vpop.f32.mrf.mxu0  ;;  %5777 = vperm.xlu0 %8057, %v10787_v37  }
 0x367   : > { %5226 = vmatprep.mubr.bf16.mxu1 %v10641_v54  ;;  %v7508_v63 = vadd.f32 %v7507_v41, %v7506_v51 }
 0x368   : > { %5372 = vmatmul.mubr.bf16.gmra.mxu0 %v6727_v18  ;;  %v7401_v26 = vpop.f32.mrf.mxu1  ;;  %v7509_v44 = vpop.f32.mrf.mxu0  ;;  %v11787_v18 = vmov 3  }
 0x369   : > { %5379 = vmatprep.mubr.bf16.mxu0 %v10637_v53  ;;  %v7402_v27 = vadd.f32 %v7401_v26, %v7400_v6  ;;  %v10832_v28 = vadd.f32 %v7508_v63, %v7396_v19  ;;  %8059 = vset.pattern.permute.xlu1 %v11787_v18 }
 0x36a   : > { %v7403_v15 = vpop.f32.mrf.mxu1  ;;  %v7510_v42 = vpop.f32.mrf.mxu0  ;;  %5829 = vperm.xlu1 %8059, %v10734_v17   ;;  %8060 = vset.pattern.permute.xlu0 %v11787_v18 }
 0x36b   : > { %v7511_v55 = vadd.f32 %v7510_v42, %v7509_v44  ;;  %5833 = vperm.xlu0 %8060, %v10742_v11  }
 0x36c   : > { %v7404_v36 = vpop.f32.mrf.mxu1  ;;  %v7512_v48 = vpop.f32.mrf.mxu0 }
 0x36d   : > { %v7405_v0 = vadd.f32 %v7404_v36, %v7403_v15  ;;  %v10838_v7 = vadd.f32 %v7511_v55, %v7399_v10 }
 0x36e   : > { %v7406_v52 = vpop.f32.mrf.mxu1  ;;  %5227 = vmatmul.mubr.bf16.gmra.mxu1 %v10581_v58  ;;  %v7513_v19 = vpop.f32.mrf.mxu0  ;;  %5837 = vperm.xlu1 %8059, %v10775_v9   ;;  %v8207_v9 = vld [vmem:[%s9087_s29 + $0x28] sm:$0xff]  }
 0x36f   : > { %5234 = vmatprep.mubr.bf16.mxu1 %v10649_v1  ;;  %v7514_v13 = vadd.f32 %v7513_v19, %v7512_v48  ;;  %7956 = vmatprep.subr.bf16.mxu0 %v8207_v9 }
 0x370   : > { %5380 = vmatmul.mubr.bf16.gmra.mxu0 %v10594_v20  ;;  %v7407_v25 = vpop.f32.mrf.mxu1  ;;  %v7515_v20 = vpop.f32.mrf.mxu0  ;;  %5845 = vperm.xlu0 %8060, %v10754_v21  }
 0x371   : > { %5387 = vmatprep.mubr.bf16.mxu0 %v10645_v12  ;;  %v7408_v57 = vadd.f32 %v7407_v25, %v7406_v52  ;;  %v10845_v10 = vadd.f32 %v7514_v13, %v7402_v27  ;;  %v11788_v25 = vld [vmem:[#allocation9_spill] sm:$0xff]  ;;  %7957 = vmatpush3.bf16.msra.mxu0 %v8207_v9 }
 0x372   : > { %v7409_v46 = vpop.f32.mrf.mxu1  ;;  %v7516_v51 = vpop.f32.mrf.mxu0  ;;  %5841 = vperm.xlu1 %8059, %v10746_v59   ;;  %v10862_v13 = vcombine.low %v11788_v25, %v11783_v8 }
 0x373   : > { %v7517_v41 = vadd.f32 %v7516_v51, %v7515_v20 }
 0x374   : > { %v7410_v6 = vpop.f32.mrf.mxu1  ;;  %v7518_v63 = vpop.f32.mrf.mxu0  ;;  %5853 = vperm.xlu0 %8060, %v10758_v39  }
 0x375   : > { %v7411_v26 = vadd.f32 %v7410_v6, %v7409_v46  ;;  %v10850_v15 = vadd.f32 %v7517_v41, %v7405_v0 }
 0x376   : > { %v7412_v44 = vpop.f32.mrf.mxu1  ;;  %5235 = vmatmul.mubr.bf16.gmra.mxu1 %v10585_v56  ;;  %v7519_v17 = vpop.f32.mrf.mxu0  ;;  %5849 = vperm.xlu1 %8059, %v10780_v4  }
 0x377   : > { %5242 = vmatprep.mubr.bf16.mxu1 %v10665_v49  ;;  %v7520_v42 = vadd.f32 %v7519_v17, %v7518_v63 }
 0x378   : > { %5388 = vmatmul.mubr.bf16.gmra.mxu0 %v10606_v5  ;;  %v7413_v27 = vpop.f32.mrf.mxu1  ;;  %v7521_v55 = vpop.f32.mrf.mxu0 }
 0x379   : > { %5395 = vmatprep.mubr.bf16.mxu0 %v10653_v29  ;;  %v7414_v36 = vadd.f32 %v7413_v27, %v7412_v44  ;;  %v10856_v35 = vadd.f32 %v7520_v42, %v7408_v57 }
 0x37a   : > { %v7415_v5 = vpop.f32.mrf.mxu1  ;;  %v7522_v48 = vpop.f32.mrf.mxu0  ;;  %5857 = vperm.xlu1 %8059, %v10787_v37  }
 0x37b   : > { %v7523_v52 = vadd.f32 %v7522_v48, %v7521_v55 }
 0x37c   : > { %v7416_v0 = vpop.f32.mrf.mxu1 }
 0x37d   : > { %v7417_v19 = vadd.f32 %v7416_v0, %v7415_v5  ;;  %v10868_v46 = vadd.f32 %v7523_v52, %v7411_v26  ;;  %v8208_v52 = vld [vmem:[%s9087_s29 + $0x20] sm:$0xff]  }
 0x37e   : > { %v7418_v57 = vpop.f32.mrf.mxu1  ;;  %5243 = vmatmul.mubr.bf16.gmra.mxu1 %v10602_v50  ;;  %7958 = vmatprep.subr.bf16.mxu0 %v8208_v52 }
 0x37f   : > { %v7524_v20 = vpop.f32.mrf.mxu0  ;;  %7920 = vmatprep.mubr.bf16.mxu1 %v10577_v61  ;;  %7959 = vmatpush3.bf16.msra.mxu0 %v8208_v52 }
 0x380   : > { %5396 = vmatmul.mubr.bf16.gmra.mxu0 %v10614_v43  ;;  %v7419_v18 = vpop.f32.mrf.mxu1 }
 0x381   : > { %5403 = vmatprep.mubr.bf16.mxu0 %v10862_v13  ;;  %v7525_v59 = vpop.f32.mrf.mxu0  ;;  %v7420_v51 = vadd.f32 %v7419_v18, %v7418_v57 }
 0x382   : > { %v7526_v8 = vadd.f32 %v7525_v59, %v7524_v20  ;;  %v7421_v11 = vpop.f32.mrf.mxu1 }
 0x383   : > { %v7527_v43 = vpop.f32.mrf.mxu0 }
 0x384   : > { %v10874_v6 = vadd.f32 %v7526_v8, %v7414_v36  ;;  %v7422_v26 = vpop.f32.mrf.mxu1 }
 0x385   : > { %v7528_v41 = vpop.f32.mrf.mxu0  ;;  %v7423_v61 = vadd.f32 %v7422_v26, %v7421_v11 }
 0x386   : > { %v7529_v63 = vadd.f32 %v7528_v41, %v7527_v43  ;;  %v7424_v4 = vpop.f32.mrf.mxu1  ;;  %7921 = vmatmul.mubr.bf16.vlgmr.msra.gmra.mxu1 %v10581_v58 }
 0x387   : > { %7924 = vmatprep.mubr.bf16.mxu1 %v10585_v56 }
 0x388   : > { %v7530_v44 = vpop.f32.mrf.mxu0  ;;  %5404 = vmatmul.mubr.bf16.gmra.mxu0 %v10803_v32  ;;  %v10880_v21 = vadd.f32 %v7529_v63, %v7417_v19  ;;  %v7425_v27 = vpop.f32.mrf.mxu1 }
 0x389   : > { %v7426_v36 = vadd.f32 %v7425_v27, %v7424_v4 }
 0x38a   : > { %v7531_v17 = vpop.f32.mrf.mxu0  ;;  %v7427_v55 = vpop.f32.mrf.mxu1 }
 0x38b   : > { %v7532_v42 = vadd.f32 %v7531_v17, %v7530_v44 }
 0x38c   : > { %v7533_v37 = vpop.f32.mrf.mxu0  ;;  %v7428_v48 = vpop.f32.mrf.mxu1 }
 0x38d   : > { %v10883_v5 = vadd.f32 %v7532_v42, %v7420_v51  ;;  %v7429_v32 = vadd.f32 %v7428_v48, %v7427_v55  ;;  %v8209_v48 = vld [vmem:[%s9087_s29 + $0x18] sm:$0xff]  }
 0x38e   : > { %v7534_v39 = vpop.f32.mrf.mxu0  ;;  %v7430_v9 = vpop.f32.mrf.mxu1  ;;  %7925 = vmatmul.mubr.bf16.gmra.mxu1 %v10602_v50  ;;  %7960 = vmatprep.subr.bf16.mxu0 %v8209_v48 }
 0x38f   : > { %v7535_v0 = vadd.f32 %v7534_v39, %v7533_v37  ;;  %7928 = vmatprep.mubr.bf16.mxu1 %v10627_v33  ;;  %7961 = vmatpush3.bf16.msra.mxu0 %v8209_v48 }
 0x390   : > { %v7536_v25 = vpop.f32.mrf.mxu0  ;;  %v7431_v19 = vpop.f32.mrf.mxu1 }
 0x391   : > { %v10887_v58 = vadd.f32 %v7535_v0, %v7423_v61  ;;  %v7432_v57 = vadd.f32 %v7431_v19, %v7430_v9 }
 0x392   : > { %v7537_v56 = vpop.f32.mrf.mxu0  ;;  %v7433_v18 = vpop.f32.mrf.mxu1 }
 0x393   : > { %v7538_v20 = vadd.f32 %v7537_v56, %v7536_v25 }
 0x394   : > { %v7539_v59 = vpop.f32.mrf.mxu0  ;;  %v7434_v43 = vpop.f32.mrf.mxu1 }
 0x395   : > { %v10890_v8 = vadd.f32 %v7538_v20, %v7426_v36  ;;  %v7435_v41 = vadd.f32 %v7434_v43, %v7433_v18 }
 0x396   : > { %v7540_v51 = vpop.f32.mrf.mxu0  ;;  %v7436_v50 = vpop.f32.mrf.mxu1  ;;  %7929 = vmatmul.mubr.bf16.gmra.mxu1 %v10641_v54 }
 0x397   : > { %v7541_v11 = vadd.f32 %v7540_v51, %v7539_v59  ;;  %7932 = vmatprep.mubr.bf16.mxu1 %v10649_v1 }
 0x398   : > { %v7542_v26 = vpop.f32.mrf.mxu0  ;;  %v7437_v61 = vpop.f32.mrf.mxu1 }
 0x399   : > { %v10893_v33 = vadd.f32 %v7541_v11, %v7429_v32  ;;  %v7438_v4 = vadd.f32 %v7437_v61, %v7436_v50 }
 0x39a   : > { %v7543_v63 = vpop.f32.mrf.mxu0  ;;  %v7439_v27 = vpop.f32.mrf.mxu1 }
 0x39b   : > { %v7544_v44 = vadd.f32 %v7543_v63, %v7542_v26 }
 0x39c   : > { %v7545_v17 = vpop.f32.mrf.mxu0  ;;  %v7440_v37 = vpop.f32.mrf.mxu1 }
 0x39d   : > { %v10896_v42 = vadd.f32 %v7544_v44, %v7432_v57  ;;  %v7441_v39 = vadd.f32 %v7440_v37, %v7439_v27  ;;  %v8210_v37 = vld [vmem:[%s9087_s29 + $0x10] sm:$0xff]  }
 0x39e   : > { %v7546_v36 = vpop.f32.mrf.mxu0  ;;  %v7442_v52 = vpop.f32.mrf.mxu1  ;;  %7933 = vmatmul.mubr.bf16.gmra.mxu1 %v10665_v49  ;;  %7962 = vmatprep.subr.bf16.mxu0 %v8210_v37 }
 0x39f   : > { %v7547_v55 = vadd.f32 %v7546_v36, %v7545_v17  ;;  %7936 = vmatprep.mubr.bf16.mxu1 %v10637_v53  ;;  %7963 = vmatpush3.bf16.msra.mxu0 %v8210_v37 }
 0x3a0   : > { %v7548_v0 = vpop.f32.mrf.mxu0  ;;  %v7443_v32 = vpop.f32.mrf.mxu1 }
 0x3a1   : > { %v10900_v54 = vadd.f32 %v7547_v55, %v7435_v41  ;;  %v7444_v9 = vadd.f32 %v7443_v32, %v7442_v52 }
 0x3a2   : > { %v7549_v1 = vpop.f32.mrf.mxu0  ;;  %v7445_v19 = vpop.f32.mrf.mxu1 }
 0x3a3   : > { %v7550_v25 = vadd.f32 %v7549_v1, %v7548_v0 }
 0x3a4   : > { %v7551_v56 = vpop.f32.mrf.mxu0  ;;  %v7446_v59 = vpop.f32.mrf.mxu1 }
 0x3a5   : > { %v10903_v20 = vadd.f32 %v7550_v25, %v7438_v4  ;;  %v7447_v51 = vadd.f32 %v7446_v59, %v7445_v19 }
 0x3a6   : > { %v7552_v57 = vpop.f32.mrf.mxu0  ;;  %v7448_v49 = vpop.f32.mrf.mxu1  ;;  %7937 = vmatmul.mubr.bf16.gmra.mxu1 %v10645_v12 }
 0x3a7   : > { %v7553_v18 = vadd.f32 %v7552_v57, %v7551_v56  ;;  %7940 = vmatprep.mubr.bf16.mxu1 %v10653_v29 }
 0x3a8   : > { %v7554_v43 = vpop.f32.mrf.mxu0  ;;  %v7449_v41 = vpop.f32.mrf.mxu1 }
 0x3a9   : > { %v10906_v53 = vadd.f32 %v7553_v18, %v7441_v39  ;;  %v7450_v50 = vadd.f32 %v7449_v41, %v7448_v49 }
 0x3aa   : > { %v7555_v11 = vpop.f32.mrf.mxu0  ;;  %v7451_v61 = vpop.f32.mrf.mxu1 }
 0x3ab   : > { %v7556_v26 = vadd.f32 %v7555_v11, %v7554_v43 }
 0x3ac   : > { %v7557_v63 = vpop.f32.mrf.mxu0  ;;  %v7452_v17 = vpop.f32.mrf.mxu1 }
 0x3ad   : > { %v10909_v44 = vadd.f32 %v7556_v26, %v7444_v9  ;;  %v7453_v36 = vadd.f32 %v7452_v17, %v7451_v61 }
 0x3ae   : > { %v7558_v4 = vpop.f32.mrf.mxu0  ;;  %v7454_v48 = vpop.f32.mrf.mxu1  ;;  %7941 = vmatmul.mubr.bf16.gmra.mxu1 %v10862_v13 }
 0x3af   : > { %v7559_v27 = vadd.f32 %v7558_v4, %v7557_v63  ;;  %7944 = vmatprep.mubr.bf16.mxu1 %v6730_v38  ;;  %v8211_v63 = vld [vmem:[%s9087_s29 + $0x8] sm:$0xff]  }
 0x3b0   : > { %v7560_v55 = vpop.f32.mrf.mxu0  ;;  %v7455_v39 = vpop.f32.mrf.mxu1  ;;  %7964 = vmatprep.subr.bf16.mxu0 %v8211_v63 }
 0x3b1   : > { %v10913_v12 = vadd.f32 %v7559_v27, %v7447_v51  ;;  %v7456_v52 = vadd.f32 %v7455_v39, %v7454_v48  ;;  %7965 = vmatpush3.bf16.msra.mxu0 %v8211_v63 }
 0x3b2   : > { %v7561_v29 = vpop.f32.mrf.mxu0  ;;  %v7457_v32 = vpop.f32.mrf.mxu1 }
 0x3b3   : > { %v7562_v0 = vadd.f32 %v7561_v29, %v7560_v55 }
 0x3b4   : > { %v7563_v1 = vpop.f32.mrf.mxu0  ;;  %v7458_v56 = vpop.f32.mrf.mxu1 }
 0x3b5   : > { %v10918_v25 = vadd.f32 %v7562_v0, %v7450_v50  ;;  %v7459_v13 = vadd.f32 %v7458_v56, %v7457_v32  ;;  %v11789_v50 = vld [vmem:[#allocation21_spill] sm:$0xff] }
 0x3b6   : > { %v7564_v9 = vpop.f32.mrf.mxu0  ;;  %v7460_v59 = vpop.f32.mrf.mxu1  ;;  %7945 = vmatmul.mubr.bf16.gmra.mxu1 %v6731_v30  ;;  %v6733_v31 = vcombine.low %v10608_v24, %v11789_v50 }
 0x3b7   : > { %v7565_v19 = vadd.f32 %v7564_v9, %v7563_v1  ;;  %7948 = vmatprep.mubr.bf16.mxu1 %v6732_v3 }
 0x3b8   : > { %v7566_v57 = vpop.f32.mrf.mxu0  ;;  %v7461_v38 = vpop.f32.mrf.mxu1 }
 0x3b9   : > { %v10923_v40 = vadd.f32 %v7565_v19, %v7453_v36  ;;  %v7462_v51 = vadd.f32 %v7461_v38, %v7460_v59 }
 0x3ba   : > { %v7567_v22 = vpop.f32.mrf.mxu0  ;;  %v7463_v49 = vpop.f32.mrf.mxu1 }
 0x3bb   : > { %v7568_v18 = vadd.f32 %v7567_v22, %v7566_v57 }
 0x3bc   : > { %v7569_v43 = vpop.f32.mrf.mxu0  ;;  %v7464_v26 = vpop.f32.mrf.mxu1 }
 0x3bd   : > { %v10928_v11 = vadd.f32 %v7568_v18, %v7456_v52  ;;  %v7465_v30 = vadd.f32 %v7464_v26, %v7463_v49 }
 0x3be   : > { %v7570_v41 = vpop.f32.mrf.mxu0  ;;  %v7466_v4 = vpop.f32.mrf.mxu1  ;;  %7949 = vmatmul.mubr.bf16.gmra.mxu1 %v6733_v31 }
 0x3bf   : > { %v7571_v60 = vadd.f32 %v7570_v41, %v7569_v43 }
 0x3c0   : > { %v7572_v61 = vpop.f32.mrf.mxu0  ;;  %v7467_v3 = vpop.f32.mrf.mxu1 }
 0x3c1   : > { %v10933_v34 = vadd.f32 %v7571_v60, %v7459_v13  ;;  %v7468_v27 = vadd.f32 %v7467_v3, %v7466_v4 }
 0x3c2   : > { %v7573_v16 = vpop.f32.mrf.mxu0  ;;  %v7469_v37 = vpop.f32.mrf.mxu1 }
 0x3c3   : > { %v7574_v17 = vadd.f32 %v7573_v16, %v7572_v61 }
 0x3c4   : > { %v7575_v36 = vpop.f32.mrf.mxu0  ;;  %v7470_v24 = vpop.f32.mrf.mxu1 }
 0x3c5   : > { %v10935_v55 = vadd.f32 %v7574_v17, %v7462_v51  ;;  %v7471_v39 = vadd.f32 %v7470_v24, %v7469_v37  ;;  %v8212_v24 = vld [vmem:[%s9087_s29] sm:$0xff]  }
 0x3c6   : > { %v7576_v48 = vpop.f32.mrf.mxu0  ;;  %v7600_v52 = vpop.f32.mrf.mxu1  ;;  %7966 = vmatprep.subr.bf16.mxu0 %v8212_v24 }
 0x3c7   : > { %v7577_v29 = vadd.f32 %v7576_v48, %v7575_v36  ;;  %7967 = vmatpush3.bf16.msra.mxu0 %v8212_v24 }
 0x3c8   : > { %v7578_v0 = vpop.f32.mrf.mxu0  ;;  %v7601_v9 = vpop.f32.mrf.mxu1 }
 0x3c9   : > { %v10937_v1 = vadd.f32 %v7577_v29, %v7465_v30  ;;  %v7602_v19 = vadd.f32 %v7601_v9, %v7600_v52 }
 0x3ca   : > { %v7579_v32 = vpop.f32.mrf.mxu0  ;;  %v7603_v57 = vpop.f32.mrf.mxu1 }
 0x3cb   : > { %v7580_v56 = vadd.f32 %v7579_v32, %v7578_v0  ;;  %v5125_v22 = vadd.f32 %v7602_v19, %v10769_v2 }
 0x3cc   : > { %v7581_v13 = vpop.f32.mrf.mxu0  ;;  %v7604_v18 = vpop.f32.mrf.mxu1 }
 0x3cd   : > { %v10939_v59 = vadd.f32 %v7580_v56, %v7468_v27  ;;  %v7605_v43 = vadd.f32 %v7604_v18, %v7603_v57 }
 0x3ce   : > { %v7582_v38 = vpop.f32.mrf.mxu0  ;;  %v7606_v41 = vpop.f32.mrf.mxu1 }
 0x3cf   : > { %11790 = vst [vmem:[#allocation24_spill] sm:$0xff] %v10939_v59  ;;  %v7583_v51 = vadd.f32 %v7582_v38, %v7581_v13  ;;  %v5128_v50 = vadd.f32 %v7605_v43, %v10782_v47 }
 0x3d0   : > { %v7712_v49 = vpop.f32.mrf.mxu0  ;;  %v7607_v60 = vpop.f32.mrf.mxu1 }
 0x3d1   : > { %v10942_v26 = vadd.f32 %v7583_v51, %v7471_v39  ;;  %v7608_v63 = vadd.f32 %v7607_v60, %v7606_v41 }
 0x3d2   : > { %v7713_v31 = vpop.f32.mrf.mxu0  ;;  %v7609_v4 = vpop.f32.mrf.mxu1 }
 0x3d3   : > { %11791 = vst [vmem:[#allocation8_spill] sm:$0xff] %v10942_v26  ;;  %v7714_v30 = vadd.f32 %v7713_v31, %v7712_v49  ;;  %v10946_v16 = vadd.f32 %v7608_v63, %v10797_v62 }
 0x3d4   : > { %v7715_v61 = vpop.f32.mrf.mxu0  ;;  %v7610_v17 = vpop.f32.mrf.mxu1 }
 0x3d5   : > { %v10948_v2 = vadd.f32 %v7714_v30, %v5125_v22  ;;  %v7611_v36 = vadd.f32 %v7610_v17, %v7609_v4 }
 0x3d6   : > { %v7716_v3 = vpop.f32.mrf.mxu0  ;;  %v7612_v48 = vpop.f32.mrf.mxu1 }
 0x3d7   : > { %11792 = vst [vmem:[#allocation26_spill] sm:$0xff] %v10948_v2  ;;  %v7717_v27 = vadd.f32 %v7716_v3, %v7715_v61  ;;  %v10953_v47 = vadd.f32 %v7611_v36, %v10807_v14 }
 0x3d8   : > { %v10950_v37 = vpop.f32.mrf.mxu0  ;;  %v7613_v0 = vpop.f32.mrf.mxu1 }
 0x3d9   : > { %v10956_v29 = vadd.f32 %v7717_v27, %v5128_v50  ;;  %v7614_v62 = vadd.f32 %v7613_v0, %v7612_v48 }
 0x3da   : > { %v10958_v39 = vpop.f32.mrf.mxu0  ;;  %v7615_v32 = vpop.f32.mrf.mxu1 }
 0x3db   : > { %11793 = vst [vmem:[#allocation25_spill] sm:$0xff] %v10956_v29  ;;  %v10963_v9 = vadd.f32 %v7614_v62, %v10818_v45 }
 0x3dc   : > { %v10960_v52 = vpop.f32.mrf.mxu0  ;;  %v7616_v19 = vpop.f32.mrf.mxu1 }
 0x3dd   : > { %v7617_v14 = vadd.f32 %v7616_v19, %v7615_v32 }
 0x3de   : > { %v10965_v56 = vpop.f32.mrf.mxu0  ;;  %v7618_v57 = vpop.f32.mrf.mxu1 }
 0x3df   : > { %v10970_v22 = vadd.f32 %v7617_v14, %v10825_v23 }
 0x3e0   : > { %v10967_v13 = vpop.f32.mrf.mxu0  ;;  %v7619_v18 = vpop.f32.mrf.mxu1 }
 0x3e1   : > { %v7620_v51 = vadd.f32 %v7619_v18, %v7618_v57 }
 0x3e2   : > { %v10972_v38 = vpop.f32.mrf.mxu0  ;;  %v7621_v49 = vpop.f32.mrf.mxu1 }
 0x3e3   : > { %v10977_v45 = vadd.f32 %v7620_v51, %v10832_v28 }
 0x3e4   : > { %v10974_v43 = vpop.f32.mrf.mxu0  ;;  %v7622_v50 = vpop.f32.mrf.mxu1 }
 0x3e5   : > { %v7623_v31 = vadd.f32 %v7622_v50, %v7621_v49 }
 0x3e6   : > { %v10979_v41 = vpop.f32.mrf.mxu0  ;;  %v7624_v30 = vpop.f32.mrf.mxu1 }
 0x3e7   : > { %v10984_v23 = vadd.f32 %v7623_v31, %v10838_v7 }
 0x3e8   : > { %v10981_v60 = vpop.f32.mrf.mxu0  ;;  %v7625_v61 = vpop.f32.mrf.mxu1 }
 0x3e9   : > { %v7626_v4 = vadd.f32 %v7625_v61, %v7624_v30 }
 0x3ea   : > { %v10986_v63 = vpop.f32.mrf.mxu0  ;;  %v7627_v17 = vpop.f32.mrf.mxu1 }
 0x3eb   : > { %v10991_v28 = vadd.f32 %v7626_v4, %v10845_v10 }
 0x3ec   : > { %v10988_v3 = vpop.f32.mrf.mxu0  ;;  %v7628_v36 = vpop.f32.mrf.mxu1 }
 0x3ed   : > { %v7629_v48 = vadd.f32 %v7628_v36, %v7627_v17 }
 0x3ee   : > { %v10993_v27 = vpop.f32.mrf.mxu0  ;;  %v7630_v0 = vpop.f32.mrf.mxu1 }
 0x3ef   : > { %v10998_v7 = vadd.f32 %v7629_v48, %v10850_v15 }
 0x3f0   : > { %v10995_v24 = vpop.f32.mrf.mxu0  ;;  %v7631_v32 = vpop.f32.mrf.mxu1 }
 0x3f1   : > { %v7632_v19 = vadd.f32 %v7631_v32, %v7630_v0 }
 0x3f2   : > { %v11000_v62 = vpop.f32.mrf.mxu0  ;;  %v7633_v57 = vpop.f32.mrf.mxu1 }
 0x3f3   : > { %v11005_v10 = vadd.f32 %v7632_v19, %v10856_v35 }
 0x3f4   : > { %v11002_v14 = vpop.f32.mrf.mxu0  ;;  %v7634_v51 = vpop.f32.mrf.mxu1 }
 0x3f5   : > { %v7635_v49 = vadd.f32 %v7634_v51, %v7633_v57 }
 0x3f6   : > { %v11007_v18 = vpop.f32.mrf.mxu0  ;;  %v7636_v31 = vpop.f32.mrf.mxu1 }
 0x3f7   : > { %v11012_v15 = vadd.f32 %v7635_v49, %v10868_v46 }
 0x3f8   : > { %v11009_v50 = vpop.f32.mrf.mxu0  ;;  %v7637_v61 = vpop.f32.mrf.mxu1 }
 0x3f9   : > { %11794 = vst [vmem:[#allocation27_spill] sm:$0xff] %v11012_v15  ;;  %v7638_v4 = vadd.f32 %v7637_v61, %v7636_v31 }
 0x3fa   : > { %v11014_v30 = vpop.f32.mrf.mxu0  ;;  %v7639_v36 = vpop.f32.mrf.mxu1 }
 0x3fb   : > { %v11019_v35 = vadd.f32 %v7638_v4, %v10874_v6 }
 0x3fc   : > { %v11016_v17 = vpop.f32.mrf.mxu0  ;;  %v7640_v0 = vpop.f32.mrf.mxu1 }
 0x3fd   : > { %11795 = vst [vmem:[#allocation15_spill] sm:$0xff] %v11019_v35  ;;  %v7641_v32 = vadd.f32 %v7640_v0, %v7639_v36 }
 0x3fe   : > { %v11021_v48 = vpop.f32.mrf.mxu0  ;;  %v7642_v57 = vpop.f32.mrf.mxu1 }
 0x3ff   : > { %v11026_v46 = vadd.f32 %v7641_v32, %v10880_v21 }
 0x400   : > { %v11023_v19 = vpop.f32.mrf.mxu0  ;;  %v7643_v49 = vpop.f32.mrf.mxu1 }
 0x401   : > { %11796 = vst [vmem:[#allocation13_spill] sm:$0xff] %v11026_v46  ;;  %v7644_v31 = vadd.f32 %v7643_v49, %v7642_v57 }
 0x402   : > { %v11028_v51 = vpop.f32.mrf.mxu0  ;;  %v7645_v26 = vpop.f32.mrf.mxu1 }
 0x403   : > { %v11033_v6 = vadd.f32 %v7644_v31, %v10883_v5 }
 0x404   : > { %v11030_v61 = vpop.f32.mrf.mxu0  ;;  %v7646_v59 = vpop.f32.mrf.mxu1 }
 0x405   : > { %11797 = vst [vmem:[#allocation7_spill] sm:$0xff] %v11033_v6  ;;  %v7647_v36 = vadd.f32 %v7646_v59, %v7645_v26 }
 0x406   : > { %v11035_v4 = vpop.f32.mrf.mxu0  ;;  %v7648_v29 = vpop.f32.mrf.mxu1 }
 0x407   : > { %v11040_v21 = vadd.f32 %v7647_v36, %v10887_v58 }
 0x408   : > { %v11037_v0 = vpop.f32.mrf.mxu0  ;;  %v7649_v2 = vpop.f32.mrf.mxu1 }
 0x409   : > { %11798 = vst [vmem:[#allocation10_spill] sm:$0xff] %v11040_v21  ;;  %v7650_v57 = vadd.f32 %v7649_v2, %v7648_v29 }
 0x40a   : > { %v11042_v32 = vpop.f32.mrf.mxu0  ;;  %v7651_v46 = vpop.f32.mrf.mxu1 }
 0x40b   : > { %v11047_v5 = vadd.f32 %v7650_v57, %v10890_v8 }
 0x40c   : > { %v11044_v49 = vpop.f32.mrf.mxu0  ;;  %v7652_v6 = vpop.f32.mrf.mxu1 }
 0x40d   : > { %11799 = vst [vmem:[#allocation14_spill] sm:$0xff] %v11047_v5  ;;  %v7653_v59 = vadd.f32 %v7652_v6, %v7651_v46 }
 0x40e   : > { %v11049_v31 = vpop.f32.mrf.mxu0  ;;  %v7654_v35 = vpop.f32.mrf.mxu1 }
 0x40f   : > { %v11054_v58 = vadd.f32 %v7653_v59, %v10893_v33 }
 0x410   : > { %v11051_v26 = vpop.f32.mrf.mxu0  ;;  %v7655_v21 = vpop.f32.mrf.mxu1 }
 0x411   : > { %11800 = vst [vmem:[#allocation11_spill] sm:$0xff] %v11051_v26  ;;  %11801 = vst [vmem:[#allocation6_spill] sm:$0xff] %v11054_v58  ;;  %v7656_v2 = vadd.f32 %v7655_v21, %v7654_v35 }
 0x412   : > { %v11056_v36 = vpop.f32.mrf.mxu0  ;;  %v7657_v15 = vpop.f32.mrf.mxu1 }
 0x413   : > { %v11061_v8 = vadd.f32 %v7656_v2, %v10896_v42  ;;  %v11077_v2 = vpop.permute.xlu1 %5575 }
 0x414   : > { %v11058_v29 = vpop.f32.mrf.mxu0  ;;  %v7658_v5 = vpop.f32.mrf.mxu1  ;;  %11808 = vst [vmem:[#allocation17_spill] sm:$0xff] %v11077_v2 }
 0x415   : > { %11802 = vst [vmem:[#allocation23_spill] sm:$0xff] %v11058_v29  ;;  %11803 = vst [vmem:[#allocation16_spill] sm:$0xff] %v11061_v8  ;;  %v7659_v46 = vadd.f32 %v7658_v5, %v7657_v15 }
 0x416   : > { %v11063_v57 = vpop.f32.mrf.mxu0  ;;  %v7660_v26 = vpop.f32.mrf.mxu1 }
 0x417   : > { %v11068_v33 = vadd.f32 %v7659_v46, %v10900_v54 }
 0x418   : > { %v11065_v6 = vpop.f32.mrf.mxu0  ;;  %v7661_v58 = vpop.f32.mrf.mxu1 }
 0x419   : > { %11804 = vst [vmem:[#allocation19_spill] sm:$0xff] %v11065_v6  ;;  %11805 = vst [vmem:[#allocation18_spill] sm:$0xff] %v11068_v33  ;;  %v7662_v35 = vadd.f32 %v7661_v58, %v7660_v26 }
 0x41a   : > { %v11070_v59 = vpop.f32.mrf.mxu0  ;;  %v7663_v29 = vpop.f32.mrf.mxu1 }
 0x41b   : > { %v11075_v42 = vadd.f32 %v7662_v35, %v10903_v20 }
 0x41c   : > { %v11072_v21 = vpop.f32.mrf.mxu0  ;;  %v7664_v15 = vpop.f32.mrf.mxu1 }
 0x41d   : > { %11806 = vst [vmem:[#allocation22_spill] sm:$0xff] %v11072_v21  ;;  %11807 = vst [vmem:[#allocation20_spill] sm:$0xff] %v11075_v42  ;;  %v7665_v5 = vadd.f32 %v7664_v15, %v7663_v29  ;;  %v11088_v21 = vpop.permute.xlu1 %5580 }
 0x41e   : > { %v11079_v8 = vpop.f32.mrf.mxu0  ;;  %v7666_v54 = vpop.f32.mrf.mxu1  ;;  %11811 = vst [vmem:[#allocation3_spill] sm:$0xff] %v11088_v21 }
 0x41f   : > { %v11084_v46 = vadd.f32 %v7665_v5, %v10906_v53 }
 0x420   : > { %v11081_v6 = vpop.f32.mrf.mxu0  ;;  %v7667_v26 = vpop.f32.mrf.mxu1 }
 0x421   : > { %11809 = vst [vmem:[#allocation5_spill] sm:$0xff] %v11081_v6  ;;  %11810 = vst [vmem:[#allocation4_spill] sm:$0xff] %v11084_v46  ;;  %v7668_v58 = vadd.f32 %v7667_v26, %v7666_v54  ;;  %v11102_v46 = vpop.permute.xlu1 %5590 }
 0x422   : > { %v11086_v33 = vpop.f32.mrf.mxu0  ;;  %v7669_v35 = vpop.f32.mrf.mxu1  ;;  %11816 = vst [vmem:[#allocation28_spill] sm:$0xff] %v11102_v46 }
 0x423   : > { %v11093_v42 = vadd.f32 %v7668_v58, %v10909_v44 }
 0x424   : > { %v11090_v20 = vpop.f32.mrf.mxu0  ;;  %v7670_v29 = vpop.f32.mrf.mxu1 }
 0x425   : > { %11812 = vst [vmem:[#allocation2_spill] sm:$0xff] %v11090_v20  ;;  %11813 = vst [vmem:[#allocation12_spill] sm:$0xff] %v11093_v42  ;;  %v7671_v15 = vadd.f32 %v7670_v29, %v7669_v35 }
 0x426   : > { %v11095_v2 = vpop.f32.mrf.mxu0  ;;  %v7672_v53 = vpop.f32.mrf.mxu1 }
 0x427   : > { %v11100_v5 = vadd.f32 %v7671_v15, %v10913_v12 }
 0x428   : > { %v11097_v6 = vpop.f32.mrf.mxu0  ;;  %v7673_v26 = vpop.f32.mrf.mxu1 }
 0x429   : > { %11814 = vst [vmem:[#allocation9_spill] sm:$0xff] %v11097_v6  ;;  %11815 = vst [vmem:[#allocation21_spill] sm:$0xff] %v11100_v5  ;;  %v7674_v21 = vadd.f32 %v7673_v26, %v7672_v53  ;;  %v11113_v6 = vpop.permute.xlu1 %5595 }
 0x42a   : > { %v11104_v54 = vpop.f32.mrf.mxu0  ;;  %v7675_v44 = vpop.f32.mrf.mxu1  ;;  %11819 = vst [vmem:[#allocation31_spill] sm:$0xff] %v11113_v6 }
 0x42b   : > { %v11109_v58 = vadd.f32 %v7674_v21, %v10918_v25 }
 0x42c   : > { %v11106_v20 = vpop.f32.mrf.mxu0  ;;  %v7676_v35 = vpop.f32.mrf.mxu1 }
 0x42d   : > { %11817 = vst [vmem:[#allocation29_spill] sm:$0xff] %v11106_v20  ;;  %11818 = vst [vmem:[#allocation30_spill] sm:$0xff] %v11109_v58  ;;  %v7677_v29 = vadd.f32 %v7676_v35, %v7675_v44  ;;  %v11125_v21 = vpop.permute.xlu1 %5605 }
 0x42e   : > { %v11111_v42 = vpop.f32.mrf.mxu0  ;;  %v7678_v12 = vpop.f32.mrf.mxu1 }
 0x42f   : > { %v11116_v15 = vadd.f32 %v7677_v29, %v10923_v40 }
 0x430   : > { %v11118_v46 = vpop.f32.mrf.mxu0  ;;  %v7679_v5 = vpop.f32.mrf.mxu1 }
 0x431   : > { %11820 = vst [vmem:[#allocation32_spill] sm:$0xff] %v11116_v15  ;;  %11821 = vst [vmem:[#allocation33_spill] sm:$0xff] %v11118_v46  ;;  %v7680_v53 = vadd.f32 %v7679_v5, %v7678_v12  ;;  %v11132_v46 = vpop.permute.xlu1 %5669  ;;  %v5586_v12 = vpop.permute.xlu0 %5585 }
 0x432   : > { %v7681_v26 = vpop.f32.mrf.mxu1  ;;  %v11120_v20 = vpop.f32.mrf.mxu0 }
 0x433   : > { %11822 = vst [vmem:[#allocation34_spill] sm:$0xff] %v11120_v20  ;;  %v11123_v25 = vadd.f32 %v7680_v53, %v10928_v11 }
 0x434   : > { %v7682_v58 = vpop.f32.mrf.mxu1  ;;  %v11127_v6 = vpop.f32.mrf.mxu0 }
 0x435   : > { %11823 = vst [vmem:[#allocation35_spill] sm:$0xff] %v11123_v25  ;;  %v7683_v44 = vadd.f32 %v7682_v58, %v7681_v26  ;;  %v7720_v58 = vadd.f32 %v10958_v39, %v10950_v37  ;;  %v7732_v37 = vadd.f32 %v10986_v63, %v10981_v60  ;;  %v7735_v39 = vadd.f32 %v10993_v27, %v10988_v3 }
 0x436   : > { %v7684_v35 = vpop.f32.mrf.mxu1  ;;  %v11134_v20 = vpop.f32.mrf.mxu0  ;;  %v7750_v63 = vadd.f32 %v11028_v51, %v11023_v19  ;;  %v7753_v3 = vadd.f32 %v11035_v4, %v11030_v61  ;;  %v11825_v19 = vld [vmem:[#allocation23_spill] sm:$0xff] }
 0x437   : > { %v11130_v40 = vadd.f32 %v7683_v44, %v10933_v34  ;;  %v7723_v34 = vadd.f32 %v10965_v56, %v10960_v52  ;;  %v7726_v44 = vadd.f32 %v10972_v38, %v10967_v13  ;;  %v7738_v52 = vadd.f32 %v11000_v62, %v10995_v24  ;;  %v11164_v13 = vpop.permute.xlu0 %5600  ;;  %v11826_v51 = vld [vmem:[#allocation19_spill] sm:$0xff] }
 0x438   : > { %v7685_v29 = vpop.f32.mrf.mxu1  ;;  %v7744_v38 = vadd.f32 %v11014_v30, %v11009_v50  ;;  %v5294_v60 = vadd.f32 %v7720_v58, %v10946_v16  ;;  %v11187_v50 = vadd.f32 %v7735_v39, %v10984_v23  ;;  %v11824_v23 = vld [vmem:[#allocation11_spill] sm:$0xff]  ;;  %v7768_v61 = vadd.f32 %v11070_v59, %v11826_v51  ;;  %v11834_v39 = vld [vmem:[#allocation29_spill] sm:$0xff]  ;;  %v11840_v51 = vld [vmem:[#allocation16_spill] sm:$0xff] }
 0x439   : > { %v7686_v15 = vadd.f32 %v7685_v29, %v7684_v35  ;;  %v11147_v35 = vpop.f32.mrf.mxu0  ;;  %v5297_v24 = vadd.f32 %v7723_v34, %v10953_v47  ;;  %v11181_v62 = vadd.f32 %v7726_v44, %v10963_v9  ;;  %v11193_v30 = vadd.f32 %v7738_v52, %v10991_v28  ;;  %v11832_v34 = vld [vmem:[#allocation2_spill] sm:$0xff] }
 0x43a   : > { %v7687_v5 = vpop.f32.mrf.mxu1  ;;  %v7759_v47 = vadd.f32 %v11049_v31, %v11044_v49  ;;  %v7765_v28 = vadd.f32 %v11063_v57, %v11825_v19  ;;  %v11831_v57 = vld [vmem:[#allocation5_spill] sm:$0xff]  ;;  %v7777_v44 = vadd.f32 %v11095_v2, %v11832_v34  ;;  %v11237_v52 = vld [vmem:[%s11563_s5] ss:$0 sm:$0xff] }
 0x43b   : > { %v11137_v11 = vadd.f32 %v7686_v15, %v10935_v55  ;;  %v11152_v55 = vpop.permute.xlu1 %5677  ;;  %v7729_v15 = vadd.f32 %v10979_v41, %v10974_v43  ;;  %v7747_v43 = vadd.f32 %v11021_v48, %v11016_v17  ;;  %v7791_v27 = vpop.f32.mrf.mxu0  ;;  %v7756_v17 = vadd.f32 %v11042_v32, %v11037_v0  ;;  %v11827_v32 = vld [vmem:[#allocation27_spill] sm:$0xff]  ;;  %v11837_v2 = vld [vmem:[#allocation10_spill] sm:$0xff] }
 0x43c   : > { %v7688_v53 = vpop.f32.mrf.mxu1  ;;  %v11202_v48 = vadd.f32 %v7744_v38, %v11005_v10  ;;  %v11213_v0 = vpop.permute.xlu0 %5610  ;;  %v11828_v10 = vld [vmem:[#allocation22_spill] sm:$0xff]  ;;  %v7774_v59 = vadd.f32 %v11086_v33, %v11831_v57  ;;  %v11836_v33 = vld [vmem:[#allocation7_spill] sm:$0xff] }
 0x43d   : > { %v7689_v25 = vadd.f32 %v7688_v53, %v7687_v5  ;;  %v11190_v16 = vadd.f32 %v7729_v15, %v10970_v22  ;;  %v7762_v22 = vadd.f32 %v11056_v36, %v11824_v23  ;;  %v11216_v49 = vadd.f32 %v7747_v43, %v11827_v32  ;;  %v11829_v5 = vld [vmem:[#allocation15_spill] sm:$0xff]  ;;  %v11830_v36 = vld [vmem:[#allocation13_spill] sm:$0xff]  ;;  %v11835_v43 = vld [vmem:[#allocation26_spill] sm:$0xff] }
 0x43e   : > { %v11141_v26 = vpop.f32.mrf.mxu1  ;;  %v7771_v31 = vadd.f32 %v11079_v8, %v11828_v10  ;;  %v11221_v53 = vadd.f32 %v7750_v63, %v11829_v5  ;;  %v11224_v58 = vadd.f32 %v7753_v3, %v11830_v36  ;;  %v11833_v15 = vld [vmem:[#allocation9_spill] sm:$0xff]  ;;  %v7783_v8 = vadd.f32 %v11111_v42, %v11834_v39  ;;  %v11839_v23 = vld [vmem:[#allocation34_spill] sm:$0xff] }
 0x43f   : > { %v11150_v29 = vadd.f32 %v7689_v25, %v10937_v1  ;;  %v7741_v1 = vadd.f32 %v11007_v18, %v11002_v14  ;;  %v5310_v18 = vadd.f32 %v7732_v37, %v10977_v45  ;;  %v11199_v9 = vpop.permute.xlu1 %5681  ;;  %v7780_v37 = vadd.f32 %v11104_v54, %v11833_v15  ;;  %v11838_v54 = vld [vmem:[#allocation33_spill] sm:$0xff]  ;;  %v11841_v32 = vld [vmem:[#allocation14_spill] sm:$0xff] }
 0x440   : > { %v11162_v56 = vpop.f32.mrf.mxu1  ;;  %v11241_v63 = vadd.f32 %v7756_v17, %v11836_v33  ;;  %v11244_v3 = vadd.f32 %v7759_v47, %v11837_v2  ;;  %v7786_v19 = vadd.f32 %v11839_v23, %v11838_v54  ;;  %v11252_v10 = vadd.f32 %v7762_v22, %v11841_v32  ;;  %v11842_v5 = vld [vmem:[#allocation6_spill] sm:$0xff]  ;;  %v11843_v36 = vld [vmem:[#allocation17_spill] sm:$0xff]  ;;  %v11845_v22 = vld [vmem:[#allocation12_spill] sm:$0xff] }
 0x441   : > { %v11205_v45 = vadd.f32 %v7741_v1, %v10998_v7  ;;  %v7793_v7 = vpop.f32.mrf.mxu0  ;;  %v11844_v15 = vld [vmem:[#allocation18_spill] sm:$0xff]  ;;  %v11850_v32 = vld [vmem:[#allocation25_spill] sm:$0xff] }
 0x442   : > { %v11172_v41 = vpop.f32.mrf.mxu1  ;;  %v11262_v39 = vadd.f32 %v7771_v31, %v11844_v15  ;;  %v7789_v31 = vadd.f32 %v11134_v20, %v11127_v6 }
 0x443   : > { %v11259_v34 = vpop.permute.xlu1 %5689 }
 0x444   : > { %v11183_v14 = vpop.f32.mrf.mxu1 }
 0x446   : > { %v7922_v4 = vpop.f32.mrf.mxu1 }
 0x447   : > { %v5455_v25 = vadd.f32 %v7922_v4, %v5294_v60  ;;  %v11249_v4 = vadd.f32 %v7768_v61, %v11840_v51 }
 0x448   : > { %v5446_v1 = vpop.f32.mrf.mxu1 }
 0x449   : > { %v5615_v38 = vadd.f32 %v5586_v12, %v5455_v25  ;;  %v5447_v60 = vadd.f32 %v5446_v1, %v11835_v43  ;;  %v11255_v12 = vadd.f32 %v7765_v28, %v11842_v5  ;;  %v7794_v25 = vpop.f32.mrf.mxu0  ;;  %v11265_v1 = vpop.permute.xlu0 %5673  ;;  %v11268_v43 = vadd.f32 %v7780_v37, %v11845_v22  ;;  %v11846_v28 = vld [vmem:[#allocation20_spill] sm:$0xff] }
 0x44a   : > { %v7923_v42 = vpop.f32.mrf.mxu1  ;;  %v11271_v33 = vadd.f32 %v7774_v59, %v11846_v28  ;;  %v11849_v37 = vld [vmem:[#allocation28_spill] sm:$0xff] }
 0x44b   : > { %v5630_v17 = vadd.f32 %v11237_v52, %v5615_v38  ;;  %v5613_v57 = vadd.f32 %v11843_v36, %v5447_v60  ;;  %v5458_v47 = vadd.f32 %v7923_v42, %v5297_v24  ;;  %v11847_v38 = vld [vmem:[#allocation21_spill] sm:$0xff]  ;;  %v11848_v24 = vld [vmem:[#allocation4_spill] sm:$0xff]  ;;  %v7792_v42 = vadd.f32 %v7791_v27, %v11147_v35  ;;  %v11851_v36 = vld [vmem:[#allocation30_spill] sm:$0xff]  ;;  %v7796_v15 = vpop.f32.mrf.mxu0 }
 0x44c   : > { %v5449_v61 = vpop.f32.mrf.mxu1  ;;  %v11274_v2 = vadd.f32 %v7783_v8, %v11847_v38  ;;  %v11277_v60 = vadd.f32 %v7777_v44, %v11848_v24  ;;  %v11286_v8 = vadd.f32 %v7786_v19, %v11851_v36  ;;  %v7795_v35 = vadd.f32 %v7794_v25, %v7793_v7  ;;  %v11301_v38 = vpop.permute.xlu1 %5697 }
 0x44d   : > { %vm5638_vm4 = vcmp.ge.f32.partialorder %v5630_v17, 0.0  ;;  %v5646_v54 = vmul.f32 0.2, %v5630_v17  ;;  %v5628_v23 = vadd.f32 %v11237_v52, %v5613_v57  ;;  %v5616_v51 = vadd.f32 %v11849_v37, %v5458_v47  ;;  %v11852_v47 = vld [vmem:[#allocation3_spill] sm:$0xff]  ;;  %v11853_v37 = vld [vmem:[#allocation32_spill] sm:$0xff] }
 0x44e   : > { %v5450_v59 = vadd.f32 %v5449_v61, %v11850_v32  ;;  %v7926_v5 = vpop.f32.mrf.mxu1  ;;  %v11854_v32 = vld [vmem:[#allocation31_spill] sm:$0xff] }
 0x44f   : > { %v5654_v6 = vsel %vm5638_vm4, %v5630_v17, %v5646_v54  ;;  %v5644_v20 = vmul.f32 0.2, %v5628_v23  ;;  %v5471_v44 = vadd.f32 %v7926_v5, %v5310_v18  ;;  %vm5636_vm5 = vcmp.ge.f32.partialorder %v5628_v23, 0.0  ;;  %v11309_v54 = vpop.permute.xlu0 %5685 }
 0x450   : > { %v11295_v27 = vmul.f32 1.4142135, %v5654_v6  ;;  %v5631_v57 = vadd.f32 %v11237_v52, %v5616_v51  ;;  %v5614_v19 = vadd.f32 %v11852_v47, %v5450_v59  ;;  %v5462_v61 = vpop.f32.mrf.mxu1  ;;  %v11304_v17 = vadd.f32 %v7789_v31, %v11853_v37  ;;  %v11855_v31 = vld [vmem:[#allocation35_spill] sm:$0xff] }
 0x451   : > { %v5619_v22 = vadd.f32 %v11125_v21, %v5471_v44  ;;  %v5463_v28 = vadd.f32 %v5462_v61, %v11181_v62  ;;  %v5652_v24 = vsel %vm5636_vm5, %v5628_v23, %v5644_v20  ;;  %v7797_v21 = vpop.f32.mrf.mxu0  ;;  %v11315_v5 = vadd.f32 %v7792_v42, %v11855_v31 }
 0x452   : > { %5912 = vst [vmem:[%s11293_s27 + $0x40] sm:$0xff] %v11295_v27  ;;  %vm5639_vm10 = vcmp.ge.f32.partialorder %v5631_v57, 0.0  ;;  %v5647_v18 = vmul.f32 0.2, %v5631_v57  ;;  %v5629_v7 = vadd.f32 %v11237_v52, %v5614_v19  ;;  %v7927_v25 = vpop.f32.mrf.mxu1  ;;  %v5660_v51 = vmul.f32 1.4142135, %v5652_v24 }
 0x453   : > { %v5634_v62 = vadd.f32 %v11237_v52, %v5619_v22  ;;  %v5617_v59 = vadd.f32 %v11854_v32, %v5463_v28  ;;  %v5474_v23 = vadd.f32 %v7927_v25, %v11187_v50  ;;  %v11319_v44 = vadd.f32 %v7795_v35, %v11130_v40  ;;  %v11322_v22 = vpop.permute.xlu1 %5753 }
 0x454   : > { %v5655_v36 = vsel %vm5639_vm10, %v5631_v57, %v5647_v18  ;;  %v5645_v6 = vmul.f32 0.2, %v5629_v7  ;;  %v5465_v20 = vpop.f32.mrf.mxu1  ;;  %vm5637_vm11 = vcmp.ge.f32.partialorder %v5629_v7, 0.0  ;;  %5908 = vst [vmem:[%s11293_s27] sm:$0xff] %v5660_v51  ;;  %v11324_v50 = vadd.f32 %v7797_v21, %v7796_v15 }
 0x455   : > { %v5663_v47 = vmul.f32 1.4142135, %v5655_v36  ;;  %vm5642_vm12 = vcmp.ge.f32.partialorder %v5634_v62, 0.0  ;;  %v5650_v19 = vmul.f32 0.2, %v5634_v62  ;;  %v5632_v61 = vadd.f32 %v11237_v52, %v5617_v59 }
 0x456   : > { %v5620_v42 = vadd.f32 %v11213_v0, %v5474_v23  ;;  %v5466_v57 = vadd.f32 %v5465_v20, %v11190_v16  ;;  %v7930_v28 = vpop.f32.mrf.mxu1  ;;  %v5653_v24 = vsel %vm5637_vm11, %v5629_v7, %v5645_v6  ;;  %v5694_v16 = vpop.permute.xlu0 %5693  ;;  %v7692_v7 = vadd.f32 %v11162_v56, %v11141_v26 }
 0x457   : > { %5914 = vst [vmem:[%s11293_s27 + $0x60] sm:$0xff] %v5663_v47  ;;  %v6873_v40 = vpack.c.bf16 %v5663_v47, %v11295_v27  ;;  %v5658_v35 = vsel %vm5642_vm12, %v5634_v62, %v5650_v19  ;;  %v5648_v37 = vmul.f32 0.2, %v5632_v61  ;;  %v5487_v18 = vadd.f32 %v7930_v28, %v11202_v48  ;;  %v11346_v56 = vpop.permute.xlu1 %5757 }
 0x458   : > { %v11331_v25 = vmul.f32 1.4142135, %v5658_v35  ;;  %v5635_v15 = vadd.f32 %v11237_v52, %v5620_v42  ;;  %v5618_v21 = vadd.f32 %v11164_v13, %v5466_v57  ;;  %v5478_v0 = vpop.f32.mrf.mxu1  ;;  %v5661_v32 = vmul.f32 1.4142135, %v5653_v24 }
 0x459   : > { %v5702_v59 = vadd.f32 %v11152_v55, %v5487_v18  ;;  %v5479_v27 = vadd.f32 %v5478_v0, %v11193_v30  ;;  %vm5640_vm13 = vcmp.ge.f32.partialorder %v5632_v61, 0.0 }
 0x45a   : > { %5920 = vst [vmem:[%s11293_s27 + $0xc0] sm:$0xff] %v11331_v25  ;;  %vm5643_vm14 = vcmp.ge.f32.partialorder %v5635_v15, 0.0  ;;  %v5651_v48 = vmul.f32 0.2, %v5635_v15  ;;  %v5633_v62 = vadd.f32 %v11237_v52, %v5618_v21  ;;  %v7931_v23 = vpop.f32.mrf.mxu1  ;;  %5910 = vst [vmem:[%s11293_s27 + $0x20] sm:$0xff] %v5661_v32  ;;  %v6872_v13 = vpack.c.bf16 %v5661_v32, %v5660_v51  ;;  %v11354_v24 = vpop.permute.xlu0 %5749 }
 0x45b   : > { %v5710_v31 = vadd.f32 %v11237_v52, %v5702_v59  ;;  %v5700_v36 = vadd.f32 %v11132_v46, %v5479_v27  ;;  %v5490_v26 = vadd.f32 %v7931_v23, %v11216_v49  ;;  %v5656_v55 = vsel %vm5640_vm13, %v5632_v61, %v5648_v37  ;;  %v11856_v46 = vld [vmem:[#allocation24_spill] sm:$0xff]  ;;  %v11357_v37 = vpop.f32.mrf.mxu0  ;;  %v11366_v27 = vpop.permute.xlu1 %5765 }
 0x45c   : > { %v5659_v30 = vsel %vm5643_vm14, %v5635_v15, %v5651_v48  ;;  %v5649_v6 = vmul.f32 0.2, %v5633_v62  ;;  %7968 = vmatprep.mubr.bf16.mxu0 %v6872_v13  ;;  %v5481_v20 = vpop.f32.mrf.mxu1  ;;  %vm5641_vm15 = vcmp.ge.f32.partialorder %v5633_v62, 0.0  ;;  %v5664_v47 = vmul.f32 1.4142135, %v5656_v55 }
 0x45d   : > { %v5667_v19 = vmul.f32 1.4142135, %v5659_v30  ;;  %vm5718_vm0 = vcmp.ge.f32.partialorder %v5710_v31, 0.0  ;;  %v5726_v51 = vmul.f32 0.2, %v5710_v31  ;;  %v5708_v42 = vadd.f32 %v11237_v52, %v5700_v36  ;;  %7969 = vmatmul.mubr.bf16.vlgmr.msra.gmra.mxu0 %v6873_v40 }
 0x45e   : > { %v11350_v57 = vadd.f32 %v7692_v7, %v11856_v46  ;;  %v5703_v49 = vadd.f32 %v11199_v9, %v5490_v26  ;;  %v5482_v61 = vadd.f32 %v5481_v20, %v11205_v45  ;;  %v7934_v28 = vpop.f32.mrf.mxu1  ;;  %v5657_v35 = vsel %vm5641_vm15, %v5633_v62, %v5649_v6  ;;  %5916 = vst [vmem:[%s11293_s27 + $0x80] sm:$0xff] %v5664_v47  ;;  %v5762_v30 = vpop.permute.xlu0 %5761 }
 0x45f   : > { %5922 = vst [vmem:[%s11293_s27 + $0xe0] sm:$0xff] %v5667_v19  ;;  %v5734_v18 = vsel %vm5718_vm0, %v5710_v31, %v5726_v51  ;;  %v5724_v15 = vmul.f32 0.2, %v5708_v42  ;;  %v5503_v40 = vadd.f32 %v7934_v28, %v11241_v63  ;;  %v5665_v21 = vmul.f32 1.4142135, %v5657_v35  ;;  %v5774_v28 = vpop.permute.xlu1 %5773 }
 0x460   : > { %v11361_v0 = vmul.f32 1.4142135, %v5734_v18  ;;  %v5711_v9 = vadd.f32 %v11237_v52, %v5703_v49  ;;  %v5701_v45 = vadd.f32 %v11265_v1, %v5482_v61  ;;  %v5494_v32 = vpop.f32.mrf.mxu1  ;;  %v6875_v7 = vpack.c.bf16 %v5667_v19, %v11331_v25  ;;  %v7800_v1 = vpop.f32.mrf.mxu0 }
 0x461   : > { %v5706_v59 = vadd.f32 %v5694_v16, %v5503_v40  ;;  %v5495_v48 = vadd.f32 %v5494_v32, %v11221_v53  ;;  %5918 = vst [vmem:[%s11293_s27 + $0xa0] sm:$0xff] %v5665_v21  ;;  %v6874_v62 = vpack.c.bf16 %v5665_v21, %v5664_v47  ;;  %vm5716_vm1 = vcmp.ge.f32.partialorder %v5708_v42, 0.0 }
 0x462   : > { %5913 = vst [vmem:[%s11293_s27 + $0x48] sm:$0xff] %v11361_v0  ;;  %vm5719_vm2 = vcmp.ge.f32.partialorder %v5711_v9, 0.0  ;;  %v5727_v63 = vmul.f32 0.2, %v5711_v9  ;;  %v5709_v23 = vadd.f32 %v11237_v52, %v5701_v45  ;;  %v7935_v13 = vpop.f32.mrf.mxu1  ;;  %v5732_v31 = vsel %vm5716_vm1, %v5708_v42, %v5724_v15  ;;  %v11386_v61 = vpop.f32.mrf.mxu0 }
 0x463   : > { %v5714_v36 = vadd.f32 %v11237_v52, %v5706_v59  ;;  %v5704_v25 = vadd.f32 %v11309_v54, %v5495_v48  ;;  %v5506_v16 = vadd.f32 %v7935_v13, %v11244_v3  ;;  %7972 = vmatprep.mubr.bf16.mxu0 %v6874_v62  ;;  %v5740_v53 = vmul.f32 1.4142135, %v5732_v31  ;;  %v11401_v32 = vpop.permute.xlu0 %5769 }
 0x464   : > { %v5735_v26 = vsel %vm5719_vm2, %v5711_v9, %v5727_v63  ;;  %v5725_v55 = vmul.f32 0.2, %v5709_v23  ;;  %v5497_v6 = vpop.f32.mrf.mxu1  ;;  %vm5717_vm3 = vcmp.ge.f32.partialorder %v5709_v23, 0.0  ;;  %v11378_v20 = vadd.f32 %v11324_v50, %v11137_v11  ;;  %v7803_v59 = vpop.f32.mrf.mxu0 }
 0x465   : > { %v5743_v47 = vmul.f32 1.4142135, %v5735_v26  ;;  %vm5722_vm6 = vcmp.ge.f32.partialorder %v5714_v36, 0.0  ;;  %v5730_v19 = vmul.f32 0.2, %v5714_v36  ;;  %v5712_v51 = vadd.f32 %v11237_v52, %v5704_v25  ;;  %7973 = vmatmul.mubr.bf16.gmra.mxu0 %v6875_v7  ;;  %5909 = vst [vmem:[%s11293_s27 + $0x8] sm:$0xff] %v5740_v53  ;;  %v11409_v25 = vpop.permute.xlu1 %5829 }
 0x466   : > { %v7695_v3 = vadd.f32 %v11183_v14, %v11172_v41  ;;  %v5707_v54 = vadd.f32 %v11301_v38, %v5506_v16  ;;  %v5498_v42 = vadd.f32 %v5497_v6, %v11224_v58  ;;  %v7938_v46 = vpop.f32.mrf.mxu1  ;;  %v5733_v49 = vsel %vm5717_vm3, %v5709_v23, %v5725_v55  ;;  %v7805_v55 = vpop.f32.mrf.mxu0 }
 0x467   : > { %5915 = vst [vmem:[%s11293_s27 + $0x68] sm:$0xff] %v5743_v47  ;;  %v5738_v11 = vsel %vm5722_vm6, %v5714_v36, %v5730_v19  ;;  %v5728_v50 = vmul.f32 0.2, %v5712_v51  ;;  %v5519_v35 = vadd.f32 %v7938_v46, %v11249_v4  ;;  %v5741_v18 = vmul.f32 1.4142135, %v5733_v49 }
 0x468   : > { %v11390_v15 = vmul.f32 1.4142135, %v5738_v11  ;;  %v5715_v41 = vadd.f32 %v11237_v52, %v5707_v54  ;;  %v5705_v14 = vadd.f32 %v11259_v34, %v5498_v42  ;;  %v5510_v58 = vpop.f32.mrf.mxu1  ;;  %v6877_v38 = vpack.c.bf16 %v5743_v47, %v11361_v0 }
 0x469   : > { %v5782_v40 = vadd.f32 %v11346_v56, %v5519_v35  ;;  %v5511_v21 = vadd.f32 %v5510_v58, %v11252_v10  ;;  %5911 = vst [vmem:[%s11293_s27 + $0x28] sm:$0xff] %v5741_v18  ;;  %v6876_v9 = vpack.c.bf16 %v5741_v18, %v5740_v53  ;;  %vm5720_vm7 = vcmp.ge.f32.partialorder %v5712_v51, 0.0  ;;  %v5838_v58 = vpop.permute.xlu1 %5837 }
 0x46a   : > { %5921 = vst [vmem:[%s11293_s27 + $0xc8] sm:$0xff] %v11390_v15  ;;  %vm5723_vm8 = vcmp.ge.f32.partialorder %v5715_v41, 0.0  ;;  %v5731_v4 = vmul.f32 0.2, %v5715_v41  ;;  %v5713_v45 = vadd.f32 %v11237_v52, %v5705_v14  ;;  %v7939_v7 = vpop.f32.mrf.mxu1  ;;  %v5736_v34 = vsel %vm5720_vm7, %v5712_v51, %v5728_v50  ;;  %v7806_v14 = vpop.f32.mrf.mxu0 }
 0x46b   : > { %v5790_v0 = vadd.f32 %v11237_v52, %v5782_v40  ;;  %v5780_v56 = vadd.f32 %v11354_v24, %v5511_v21  ;;  %v5522_v10 = vadd.f32 %v7939_v7, %v11262_v39  ;;  %7976 = vmatprep.mubr.bf16.mxu0 %v6876_v9  ;;  %v5744_v48 = vmul.f32 1.4142135, %v5736_v34  ;;  %v11857_v39 = vld [vmem:[#allocation8_spill] sm:$0xff] }
 0x46c   : > { %v11407_v62 = vadd.f32 %v7800_v1, %v11357_v37  ;;  %v5739_v63 = vsel %vm5723_vm8, %v5715_v41, %v5731_v4  ;;  %v5729_v23 = vmul.f32 0.2, %v5713_v45  ;;  %v5513_v13 = vpop.f32.mrf.mxu1  ;;  %vm5721_vm9 = vcmp.ge.f32.partialorder %v5713_v45, 0.0 }
 0x46d   : > { %v5747_v31 = vmul.f32 1.4142135, %v5739_v63  ;;  %vm5798_vm4 = vcmp.ge.f32.partialorder %v5790_v0, 0.0  ;;  %v5806_v36 = vmul.f32 0.2, %v5790_v0  ;;  %v5788_v16 = vadd.f32 %v11237_v52, %v5780_v56  ;;  %7977 = vmatmul.mubr.bf16.gmra.mxu0 %v6877_v38  ;;  %5917 = vst [vmem:[%s11293_s27 + $0x88] sm:$0xff] %v5744_v48 }
 0x46e   : > { %v11414_v24 = vadd.f32 %v7695_v3, %v11857_v39  ;;  %v5783_v53 = vadd.f32 %v5762_v30, %v5522_v10  ;;  %v5514_v37 = vadd.f32 %v5513_v13, %v11255_v12  ;;  %v7942_v1 = vpop.f32.mrf.mxu1  ;;  %v5737_v26 = vsel %vm5721_vm9, %v5713_v45, %v5729_v23  ;;  %v5778_v3 = vpop.permute.xlu0 %5777 }
 0x46f   : > { %5923 = vst [vmem:[%s11293_s27 + $0xe8] sm:$0xff] %v5747_v31  ;;  %v5814_v6 = vsel %vm5798_vm4, %v5790_v0, %v5806_v36  ;;  %v5804_v47 = vmul.f32 0.2, %v5788_v16  ;;  %v5535_v19 = vadd.f32 %v7942_v1, %v11268_v43  ;;  %v5745_v51 = vmul.f32 1.4142135, %v5737_v26 }
 0x470   : > { %v11419_v54 = vmul.f32 1.4142135, %v5814_v6  ;;  %v5791_v42 = vadd.f32 %v11237_v52, %v5783_v53  ;;  %v5781_v30 = vadd.f32 %v11322_v22, %v5514_v37  ;;  %v5526_v46 = vpop.f32.mrf.mxu1  ;;  %v6879_v12 = vpack.c.bf16 %v5747_v31, %v11390_v15 }
 0x471   : > { %v5786_v49 = vadd.f32 %v5774_v28, %v5535_v19  ;;  %v5527_v11 = vadd.f32 %v5526_v46, %v11271_v33  ;;  %5919 = vst [vmem:[%s11293_s27 + $0xa8] sm:$0xff] %v5745_v51  ;;  %v6878_v50 = vpack.c.bf16 %v5745_v51, %v5744_v48  ;;  %vm5796_vm5 = vcmp.ge.f32.partialorder %v5788_v16, 0.0 }
 0x472   : > { %6811 = vst [vmem:[%s11293_s27 + $0x50] sm:$0xff] %v11419_v54  ;;  %vm5799_vm10 = vcmp.ge.f32.partialorder %v5791_v42, 0.0  ;;  %v5807_v43 = vmul.f32 0.2, %v5791_v42  ;;  %v5789_v35 = vadd.f32 %v11237_v52, %v5781_v30  ;;  %v7943_v18 = vpop.f32.mrf.mxu1  ;;  %v5812_v41 = vsel %vm5796_vm5, %v5788_v16, %v5804_v47  ;;  %v11433_v4 = vpop.permute.xlu0 %5833 }
 0x473   : > { %v5794_v22 = vadd.f32 %v11237_v52, %v5786_v49  ;;  %v5784_v28 = vadd.f32 %v11366_v27, %v5527_v11  ;;  %v5538_v33 = vadd.f32 %v7943_v18, %v11274_v2  ;;  %7980 = vmatprep.mubr.bf16.mxu0 %v6878_v50  ;;  %v5820_v15 = vmul.f32 1.4142135, %v5812_v41 }
 0x474   : > { %v7804_v38 = vadd.f32 %v7803_v59, %v11386_v61  ;;  %v5815_v40 = vsel %vm5799_vm10, %v5791_v42, %v5807_v43  ;;  %v5805_v21 = vmul.f32 0.2, %v5789_v35  ;;  %v5529_v9 = vpop.f32.mrf.mxu1  ;;  %vm5797_vm11 = vcmp.ge.f32.partialorder %v5789_v35, 0.0 }
 0x475   : > { %v5823_v45 = vmul.f32 1.4142135, %v5815_v40  ;;  %vm5802_vm12 = vcmp.ge.f32.partialorder %v5794_v22, 0.0  ;;  %v5810_v7 = vmul.f32 0.2, %v5794_v22  ;;  %v5792_v34 = vadd.f32 %v11237_v52, %v5784_v28  ;;  %7981 = vmatmul.mubr.bf16.gmra.mxu0 %v6879_v12  ;;  %6807 = vst [vmem:[%s11293_s27 + $0x10] sm:$0xff] %v5820_v15 }
 0x476   : > { %v7807_v27 = vadd.f32 %v7806_v14, %v7805_v55  ;;  %v5787_v2 = vadd.f32 %v5778_v3, %v5538_v33  ;;  %v5530_v0 = vadd.f32 %v5529_v9, %v11277_v60  ;;  %v7946_v61 = vpop.f32.mrf.mxu1  ;;  %v5813_v59 = vsel %vm5797_vm11, %v5789_v35, %v5805_v21  ;;  %v5842_v60 = vpop.permute.xlu1 %5841 }
 0x477   : > { %6813 = vst [vmem:[%s11293_s27 + $0x70] sm:$0xff] %v5823_v45  ;;  %v5818_v56 = vsel %vm5802_vm12, %v5794_v22, %v5810_v7  ;;  %v5808_v10 = vmul.f32 0.2, %v5792_v34  ;;  %v5551_v48 = vadd.f32 %v7946_v61, %v11315_v5  ;;  %v5821_v63 = vmul.f32 1.4142135, %v5813_v59  ;;  %v5846_v55 = vpop.permute.xlu0 %5845 }
 0x478   : > { %v11440_v23 = vmul.f32 1.4142135, %v5818_v56  ;;  %v5795_v13 = vadd.f32 %v11237_v52, %v5787_v2  ;;  %v5785_v31 = vadd.f32 %v11401_v32, %v5530_v0  ;;  %v5542_v36 = vpop.f32.mrf.mxu1  ;;  %v6881_v16 = vpack.c.bf16 %v5823_v45, %v11419_v54 }
 0x479   : > { %v5862_v39 = vadd.f32 %v5838_v58, %v5551_v48  ;;  %v5543_v53 = vadd.f32 %v5542_v36, %v11286_v8  ;;  %6809 = vst [vmem:[%s11293_s27 + $0x30] sm:$0xff] %v5821_v63  ;;  %v6880_v37 = vpack.c.bf16 %v5821_v63, %v5820_v15  ;;  %vm5800_vm13 = vcmp.ge.f32.partialorder %v5792_v34, 0.0 }
 0x47a   : > { %6819 = vst [vmem:[%s11293_s27 + $0xd0] sm:$0xff] %v11440_v23  ;;  %vm5803_vm14 = vcmp.ge.f32.partialorder %v5795_v13, 0.0  ;;  %v5811_v5 = vmul.f32 0.2, %v5795_v13  ;;  %v5793_v1 = vadd.f32 %v11237_v52, %v5785_v31  ;;  %v7947_v26 = vpop.f32.mrf.mxu1  ;;  %v5816_v6 = vsel %vm5800_vm13, %v5792_v34, %v5808_v10  ;;  %v5850_v43 = vpop.permute.xlu1 %5849 }
 0x47b   : > { %v5870_v32 = vadd.f32 %v11237_v52, %v5862_v39  ;;  %v5860_v47 = vadd.f32 %v11409_v25, %v5543_v53  ;;  %v5554_v19 = vadd.f32 %v7947_v26, %v11319_v44  ;;  %7984 = vmatprep.mubr.bf16.mxu0 %v6880_v37  ;;  %v5824_v8 = vmul.f32 1.4142135, %v5816_v6  ;;  %v5854_v28 = vpop.permute.xlu0 %5853 }
 0x47c   : > { %v5819_v51 = vsel %vm5803_vm14, %v5795_v13, %v5811_v5  ;;  %v5809_v54 = vmul.f32 0.2, %v5793_v1  ;;  %v5545_v42 = vpop.f32.mrf.mxu1  ;;  %v5406_v3 = vadd.f32 %v7804_v38, %v11350_v57  ;;  %vm5801_vm15 = vcmp.ge.f32.partialorder %v5793_v1, 0.0 }
 0x47d   : > { %v5827_v30 = vmul.f32 1.4142135, %v5819_v51  ;;  %vm5878_vm0 = vcmp.ge.f32.partialorder %v5870_v32, 0.0  ;;  %v5886_v46 = vmul.f32 0.2, %v5870_v32  ;;  %v5868_v12 = vadd.f32 %v11237_v52, %v5860_v47  ;;  %7985 = vmatmul.mubr.bf16.gmra.mxu0 %v6881_v16  ;;  %6815 = vst [vmem:[%s11293_s27 + $0x90] sm:$0xff] %v5824_v8 }
 0x47e   : > { %v5863_v49 = vadd.f32 %v5842_v60, %v5554_v19  ;;  %v5546_v25 = vadd.f32 %v5545_v42, %v11304_v17  ;;  %v7950_v44 = vpop.f32.mrf.mxu1  ;;  %v5409_v11 = vadd.f32 %v7807_v27, %v11414_v24  ;;  %v5817_v50 = vsel %vm5801_vm15, %v5793_v1, %v5809_v54  ;;  %v5858_v59 = vpop.permute.xlu1 %5857 }
 0x47f   : > { %6821 = vst [vmem:[%s11293_s27 + $0xf0] sm:$0xff] %v5827_v30  ;;  %v5894_v57 = vsel %vm5878_vm0, %v5870_v32, %v5886_v46  ;;  %v5884_v35 = vmul.f32 0.2, %v5868_v12  ;;  %v5567_v18 = vadd.f32 %v7950_v44, %v5406_v3  ;;  %v5825_v41 = vmul.f32 1.4142135, %v5817_v50 }
 0x480   : > { %v5902_v14 = vmul.f32 1.4142135, %v5894_v57  ;;  %v5871_v58 = vadd.f32 %v11237_v52, %v5863_v49  ;;  %v5861_v22 = vadd.f32 %v11433_v4, %v5546_v25  ;;  %v5558_v33 = vpop.f32.mrf.mxu1  ;;  %v6883_v17 = vpack.c.bf16 %v5827_v30, %v11440_v23 }
 0x481   : > { %v5866_v15 = vadd.f32 %v5854_v28, %v5567_v18  ;;  %v5559_v24 = vadd.f32 %v5558_v33, %v11378_v20  ;;  %6817 = vst [vmem:[%s11293_s27 + $0xb0] sm:$0xff] %v5825_v41  ;;  %v6882_v38 = vpack.c.bf16 %v5825_v41, %v5824_v8  ;;  %vm5876_vm1 = vcmp.ge.f32.partialorder %v5868_v12, 0.0 }
 0x482   : > { %6812 = vst [vmem:[%s11293_s27 + $0x58] sm:$0xff] %v5902_v14  ;;  %vm5879_vm2 = vcmp.ge.f32.partialorder %v5871_v58, 0.0  ;;  %v5887_v40 = vmul.f32 0.2, %v5871_v58  ;;  %v5869_v21 = vadd.f32 %v11237_v52, %v5861_v22  ;;  %v7951_v9 = vpop.f32.mrf.mxu1  ;;  %v5892_v45 = vsel %vm5876_vm1, %v5868_v12, %v5884_v35 }
 0x483   : > { %v5874_v7 = vadd.f32 %v11237_v52, %v5866_v15  ;;  %v5864_v4 = vadd.f32 %v5846_v55, %v5559_v24  ;;  %v5570_v34 = vadd.f32 %v7951_v9, %v5409_v11  ;;  %7988 = vmatprep.mubr.bf16.mxu0 %v6882_v38  ;;  %v5900_v27 = vmul.f32 1.4142135, %v5892_v45 }
 0x484   : > { %v5895_v2 = vsel %vm5879_vm2, %v5871_v58, %v5887_v40  ;;  %v5885_v20 = vmul.f32 0.2, %v5869_v21  ;;  %v5401_v0 = vadd.f32 %v11407_v62, %v11150_v29  ;;  %v5561_v61 = vpop.f32.mrf.mxu1  ;;  %vm5877_vm3 = vcmp.ge.f32.partialorder %v5869_v21, 0.0 }
 0x485   : > { %v5903_v56 = vmul.f32 1.4142135, %v5895_v2  ;;  %vm5882_vm6 = vcmp.ge.f32.partialorder %v5874_v7, 0.0  ;;  %v5890_v10 = vmul.f32 0.2, %v5874_v7  ;;  %v5872_v48 = vadd.f32 %v11237_v52, %v5864_v4  ;;  %7989 = vmatmul.mubr.bf16.gmra.mxu0 %v6883_v17  ;;  %6808 = vst [vmem:[%s11293_s27 + $0x18] sm:$0xff] %v5900_v27 }
 0x486   : > { %v5867_v63 = vadd.f32 %v5858_v59, %v5570_v34  ;;  %v5562_v23 = vadd.f32 %v5561_v61, %v5401_v0  ;;  %v5893_v13 = vsel %vm5877_vm3, %v5869_v21, %v5885_v20 }
 0x487   : > { %6814 = vst [vmem:[%s11293_s27 + $0x78] sm:$0xff] %v5903_v56  ;;  %v5898_v31 = vsel %vm5882_vm6, %v5874_v7, %v5890_v10  ;;  %v5888_v36 = vmul.f32 0.2, %v5872_v48  ;;  %v5901_v16 = vmul.f32 1.4142135, %v5893_v13  ;;  %v6885_v29 = vpack.c.bf16 %v5903_v56, %v5902_v14 }
 0x488   : > { %v5906_v62 = vmul.f32 1.4142135, %v5898_v31  ;;  %v5875_v60 = vadd.f32 %v11237_v52, %v5867_v63  ;;  %v5865_v39 = vadd.f32 %v5850_v43, %v5562_v23  ;;  %vm5880_vm7 = vcmp.ge.f32.partialorder %v5872_v48, 0.0 }
 0x489   : > { %6810 = vst [vmem:[%s11293_s27 + $0x38] sm:$0xff] %v5901_v16  ;;  %v6884_v53 = vpack.c.bf16 %v5901_v16, %v5900_v27  ;;  %v5896_v37 = vsel %vm5880_vm7, %v5872_v48, %v5888_v36 }
 0x48a   : > { %6820 = vst [vmem:[%s11293_s27 + $0xd8] sm:$0xff] %v5906_v62  ;;  %vm5883_vm8 = vcmp.ge.f32.partialorder %v5875_v60, 0.0  ;;  %v5891_v5 = vmul.f32 0.2, %v5875_v60  ;;  %v5873_v1 = vadd.f32 %v11237_v52, %v5865_v39  ;;  %v5904_v26 = vmul.f32 1.4142135, %v5896_v37 }
 0x48b   : > { %7992 = vmatprep.mubr.bf16.mxu0 %v6884_v53  ;;  %v11482_v52 = vld [vmem:[%s11564_s6] ss:$0 sm:$0xff] }
 0x48c   : > { %v5899_v55 = vsel %vm5883_vm8, %v5875_v60, %v5891_v5  ;;  %v5889_v6 = vmul.f32 0.2, %v5873_v1  ;;  %vm5881_vm9 = vcmp.ge.f32.partialorder %v5873_v1, 0.0  ;;  %6816 = vst [vmem:[%s11293_s27 + $0x98] sm:$0xff] %v5904_v26 }
 0x48d   : > { %v5907_v32 = vmul.f32 1.4142135, %v5899_v55  ;;  %7993 = vmatmul.mubr.bf16.gmra.mxu0 %v6885_v29 }
 0x48e   : > { %v5897_v47 = vsel %vm5881_vm9, %v5873_v1, %v5889_v6 }
 0x48f   : > { %6822 = vst [vmem:[%s11293_s27 + $0xf8] sm:$0xff] %v5907_v32  ;;  %v5905_v19 = vmul.f32 1.4142135, %v5897_v47  ;;  %v6887_v8 = vpack.c.bf16 %v5907_v32, %v5906_v62 }
 0x491   : > { %6818 = vst [vmem:[%s11293_s27 + $0xb8] sm:$0xff] %v5905_v19  ;;  %v6886_v51 = vpack.c.bf16 %v5905_v19, %v5904_v26 }
 0x493   : > { %7996 = vmatprep.mubr.bf16.mxu0 %v6886_v51 }
 0x495   : > { %7997 = vmatmul.mubr.bf16.gmra.mxu0 %v6887_v8 }
 0x51d   : > { %v7970_v54 = vpop.f32.mrf.mxu0 }
 0x51e   : > { %v6303_v42 = vadd.f32 %v7970_v54, %v11482_v52 }
 0x51f   : > { %v6167_v3 = vpop.f32.mrf.mxu0 }
 0x520   : > { %6337 = vst [vmem:[%s11489_s12 + $0x40] sm:$0xff] %v6303_v42  ;;  %v6301_v30 = vadd.f32 %v11482_v52, %v6167_v3 }
 0x521   : > { %v7971_v46 = vpop.f32.mrf.mxu0 }
 0x522   : > { %6333 = vst [vmem:[%s11489_s12] sm:$0xff] %v6301_v30  ;;  %v6304_v12 = vadd.f32 %v7971_v46, %v11482_v52 }
 0x523   : > { %v6170_v49 = vpop.f32.mrf.mxu0 }
 0x524   : > { %6339 = vst [vmem:[%s11489_s12 + $0x60] sm:$0xff] %v6304_v12  ;;  %v6302_v25 = vadd.f32 %v11482_v52, %v6170_v49 }
 0x525   : > { %v7974_v44 = vpop.f32.mrf.mxu0 }
 0x526   : > { %6335 = vst [vmem:[%s11489_s12 + $0x20] sm:$0xff] %v6302_v25  ;;  %v6307_v11 = vadd.f32 %v7974_v44, %v11482_v52 }
 0x527   : > { %v6183_v50 = vpop.f32.mrf.mxu0 }
 0x528   : > { %6345 = vst [vmem:[%s11489_s12 + $0xc0] sm:$0xff] %v6307_v11  ;;  %v6305_v43 = vadd.f32 %v11482_v52, %v6183_v50 }
 0x529   : > { %v7975_v57 = vpop.f32.mrf.mxu0 }
 0x52a   : > { %6341 = vst [vmem:[%s11489_s12 + $0x80] sm:$0xff] %v6305_v43  ;;  %v6308_v35 = vadd.f32 %v7975_v57, %v11482_v52 }
 0x52b   : > { %v6186_v18 = vpop.f32.mrf.mxu0 }
 0x52c   : > { %6347 = vst [vmem:[%s11489_s12 + $0xe0] sm:$0xff] %v6308_v35  ;;  %v6306_v41 = vadd.f32 %v11482_v52, %v6186_v18 }
 0x52d   : > { %v7978_v14 = vpop.f32.mrf.mxu0 }
 0x52e   : > { %6343 = vst [vmem:[%s11489_s12 + $0xa0] sm:$0xff] %v6306_v41  ;;  %v6311_v58 = vadd.f32 %v7978_v14, %v11482_v52 }
 0x52f   : > { %v6199_v22 = vpop.f32.mrf.mxu0 }
 0x530   : > { %6338 = vst [vmem:[%s11489_s12 + $0x48] sm:$0xff] %v6311_v58  ;;  %v6309_v28 = vadd.f32 %v11482_v52, %v6199_v22 }
 0x531   : > { %v7979_v33 = vpop.f32.mrf.mxu0 }
 0x532   : > { %6334 = vst [vmem:[%s11489_s12 + $0x8] sm:$0xff] %v6309_v28  ;;  %v6312_v17 = vadd.f32 %v7979_v33, %v11482_v52 }
 0x533   : > { %v6202_v15 = vpop.f32.mrf.mxu0 }
 0x534   : > { %6340 = vst [vmem:[%s11489_s12 + $0x68] sm:$0xff] %v6312_v17  ;;  %v6310_v24 = vadd.f32 %v11482_v52, %v6202_v15 }
 0x535   : > { %v7982_v38 = vpop.f32.mrf.mxu0 }
 0x536   : > { %6336 = vst [vmem:[%s11489_s12 + $0x28] sm:$0xff] %v6310_v24  ;;  %v6315_v40 = vadd.f32 %v7982_v38, %v11482_v52 }
 0x537   : > { %v6215_v21 = vpop.f32.mrf.mxu0 }
 0x538   : > { %6346 = vst [vmem:[%s11489_s12 + $0xc8] sm:$0xff] %v6315_v40  ;;  %v6313_v9 = vadd.f32 %v11482_v52, %v6215_v21 }
 0x539   : > { %v7983_v45 = vpop.f32.mrf.mxu0 }
 0x53a   : > { %6342 = vst [vmem:[%s11489_s12 + $0x88] sm:$0xff] %v6313_v9  ;;  %v6316_v7 = vadd.f32 %v7983_v45, %v11482_v52 }
 0x53b   : > { %v6218_v4 = vpop.f32.mrf.mxu0 }
 0x53c   : > { %6348 = vst [vmem:[%s11489_s12 + $0xe8] sm:$0xff] %v6316_v7  ;;  %v6314_v34 = vadd.f32 %v11482_v52, %v6218_v4 }
 0x53d   : > { %v7986_v27 = vpop.f32.mrf.mxu0 }
 0x53e   : > { %6344 = vst [vmem:[%s11489_s12 + $0xa8] sm:$0xff] %v6314_v34  ;;  %v6319_v2 = vadd.f32 %v7986_v27, %v11482_v52 }
 0x53f   : > { %v6231_v20 = vpop.f32.mrf.mxu0 }
 0x540   : > { %6852 = vst [vmem:[%s11489_s12 + $0x50] sm:$0xff] %v6319_v2  ;;  %v6317_v0 = vadd.f32 %v11482_v52, %v6231_v20 }
 0x541   : > { %v7987_v61 = vpop.f32.mrf.mxu0 }
 0x542   : > { %6848 = vst [vmem:[%s11489_s12 + $0x10] sm:$0xff] %v6317_v0  ;;  %v6320_v59 = vadd.f32 %v7987_v61, %v11482_v52 }
 0x543   : > { %v6234_v56 = vpop.f32.mrf.mxu0 }
 0x544   : > { %6854 = vst [vmem:[%s11489_s12 + $0x70] sm:$0xff] %v6320_v59  ;;  %v6318_v10 = vadd.f32 %v11482_v52, %v6234_v56 }
 0x545   : > { %v7990_v48 = vpop.f32.mrf.mxu0 }
 0x546   : > { %6850 = vst [vmem:[%s11489_s12 + $0x30] sm:$0xff] %v6318_v10  ;;  %v6323_v63 = vadd.f32 %v7990_v48, %v11482_v52 }
 0x547   : > { %v6247_v23 = vpop.f32.mrf.mxu0 }
 0x548   : > { %6860 = vst [vmem:[%s11489_s12 + $0xd0] sm:$0xff] %v6323_v63  ;;  %v6321_v13 = vadd.f32 %v11482_v52, %v6247_v23 }
 0x549   : > { %v7991_v31 = vpop.f32.mrf.mxu0 }
 0x54a   : > { %6856 = vst [vmem:[%s11489_s12 + $0x90] sm:$0xff] %v6321_v13  ;;  %v6324_v36 = vadd.f32 %v7991_v31, %v11482_v52 }
 0x54b   : > { %v6250_v16 = vpop.f32.mrf.mxu0 }
 0x54c   : > { %6862 = vst [vmem:[%s11489_s12 + $0xf0] sm:$0xff] %v6324_v36  ;;  %v6322_v29 = vadd.f32 %v11482_v52, %v6250_v16 }
 0x54d   : > { %v7994_v62 = vpop.f32.mrf.mxu0 }
 0x54e   : > { %6858 = vst [vmem:[%s11489_s12 + $0xb0] sm:$0xff] %v6322_v29  ;;  %v6327_v60 = vadd.f32 %v7994_v62, %v11482_v52 }
 0x54f   : > { %v6263_v39 = vpop.f32.mrf.mxu0 }
 0x550   : > { %6853 = vst [vmem:[%s11489_s12 + $0x58] sm:$0xff] %v6327_v60  ;;  %v6325_v53 = vadd.f32 %v11482_v52, %v6263_v39 }
 0x551   : > { %v7995_v37 = vpop.f32.mrf.mxu0 }
 0x552   : > { %6849 = vst [vmem:[%s11489_s12 + $0x18] sm:$0xff] %v6325_v53  ;;  %v6328_v5 = vadd.f32 %v7995_v37, %v11482_v52 }
 0x553   : > { %v6266_v1 = vpop.f32.mrf.mxu0 }
 0x554   : > { %6855 = vst [vmem:[%s11489_s12 + $0x78] sm:$0xff] %v6328_v5  ;;  %v6326_v26 = vadd.f32 %v11482_v52, %v6266_v1 }
 0x555   : > { %v7998_v55 = vpop.f32.mrf.mxu0 }
 0x556   : > { %6851 = vst [vmem:[%s11489_s12 + $0x38] sm:$0xff] %v6326_v26  ;;  %v6331_v6 = vadd.f32 %v7998_v55, %v11482_v52 }
 0x557   : > { %v6279_v32 = vpop.f32.mrf.mxu0 }
 0x558   : > { %6861 = vst [vmem:[%s11489_s12 + $0xd8] sm:$0xff] %v6331_v6  ;;  %v6329_v47 = vadd.f32 %v11482_v52, %v6279_v32 }
 0x559   : > { %v7999_v19 = vpop.f32.mrf.mxu0 }
 0x55a   : > { %6857 = vst [vmem:[%s11489_s12 + $0x98] sm:$0xff] %v6329_v47  ;;  %v6332_v8 = vadd.f32 %v7999_v19, %v11482_v52 }
 0x55b   : > { %v6282_v51 = vpop.f32.mrf.mxu0 }
 0x55c   : > { %6863 = vst [vmem:[%s11489_s12 + $0xf8] sm:$0xff] %v6332_v8  ;;  %v6330_v54 = vadd.f32 %v11482_v52, %v6282_v51 }
 0x55e   : > { %6859 = vst [vmem:[%s11489_s12 + $0xb8] sm:$0xff] %v6330_v54 }
 0x55f PF: > { %s21_s13 = sadd.s32 1, %s8220_s13  }
 0x560   : > { %p18_p4 = scmp.ge.s32.totalorder %s21_s13, 4  }
 0x562   :  { %20 = sbr.rel (!%p18_p4) target bundleno = 1 (0x1), region = 115 }

</bundles_post_ra>
